<compile_context>
chip_gen: v5e
topology: v5e:2x2
jax: 0.10.0
libtpu: 0.0.40
codegen_flags: <defaults>
</compile_context>

<pallas_src>
from functools import partial

import jax
import jax.numpy as jnp
from jax.experimental import pallas as pl
from jax.experimental.pallas import tpu as pltpu

LANE = 128  # channel padding multiple (TPU lane width)


def _round_up(v, m):
    return ((v + m - 1) // m) * m


def _pick_vmem_limit():
    """~3/4 of physical VMEM, capped at 96 MiB (safe on v5e/v6e 128 MiB, v7x 64 MiB)."""
    try:
        cap = int(pltpu.get_tpu_info().vmem_capacity_bytes)
        return max(32 * 1024 * 1024, min(96 * 1024 * 1024, (cap * 3) // 4))
    except Exception:
        return 48 * 1024 * 1024


_VMEM_LIMIT = _pick_vmem_limit()


# ----------------------------------------------------------------------------
# Pallas kernels
# ----------------------------------------------------------------------------
def _conv_kernel(x_ref, w_ref, b_ref, o_ref, *, k, s, cin, ho, wo, leaky):
    """Direct NHWC conv: unrolled k*k tap loop, bf16 MXU matmuls, local f32 accumulation,
    fused (folded-BN) bias + LeakyReLU epilogue, lane-dense Cout tile store.

    x_ref : (1, Hs, Ws, P*cin)  bf16 spatially padded (and space-to-depth'd if s>1) input
    w_ref : (k, k, cin, tn)     bf16 weight tile (BN scale already folded in)
    b_ref : (1, tn)             f32 bias
    o_ref : (1, ho*wo, tn)      bf16 output tile
    """
    acc = jnp.zeros((ho * wo, o_ref.shape[-1]), jnp.float32)
    for dh in range(k):
        ah, ph = divmod(dh, s)
        for dw in range(k):
            aw, pw = divmod(dw, s)
            c0 = (ph * s + pw) * cin
            a = x_ref[0, ah:ah + ho, aw:aw + wo, c0:c0 + cin]
            a = a.reshape(ho * wo, cin).astype(jnp.bfloat16)
            acc = acc + jnp.dot(a, w_ref[dh, dw],
                                preferred_element_type=jnp.float32)
    out = acc + b_ref[...]
    if leaky:
        out = jnp.where(out > 0, out, 0.1 * out)
    o_ref[0] = out.astype(o_ref.dtype)


def _add_kernel(a_ref, b_ref, o_ref):
    o_ref[...] = (a_ref[...].astype(jnp.float32) +
                  b_ref[...].astype(jnp.float32)).astype(o_ref.dtype)


def _upsample2_kernel(x_ref, o00, o01, o10, o11):
    """Bilinear x2 (align_corners=False).  x_ref is the edge-padded input block
    (1, H+2, W+2, C); the four outputs are the (row-parity, col-parity) phase planes.
    Compute in f32, I/O in bf16."""
    H, W = o00.shape[1], o00.shape[2]
    x = x_ref[0].astype(jnp.float32)
    xc = x[1:H + 1, :, :]
    xu = x[0:H, :, :]
    xd = x[2:H + 2, :, :]
    h0 = 0.25 * xu + 0.75 * xc          # even output rows (all padded columns)
    h1 = 0.75 * xc + 0.25 * xd          # odd output rows
    o00[0] = (0.25 * h0[:, 0:W, :] + 0.75 * h0[:, 1:W + 1, :]).astype(o00.dtype)
    o01[0] = (0.75 * h0[:, 1:W + 1, :] + 0.25 * h0[:, 2:W + 2, :]).astype(o01.dtype)
    o10[0] = (0.25 * h1[:, 0:W, :] + 0.75 * h1[:, 1:W + 1, :]).astype(o10.dtype)
    o11[0] = (0.75 * h1[:, 1:W + 1, :] + 0.25 * h1[:, 2:W + 2, :]).astype(o11.dtype)


def _yolo_kernel(p_ref, aux_ref, o_ref, *, stride):
    """predict_transform on a lane-dense (attrs, G*G*A) layout.  exp only on the w/h rows,
    sigmoid only on x/y/objectness/class rows (mirrors the PyTorch reference)."""
    p = p_ref[0]                     # (attrs, Nb)
    xy_off = aux_ref[0:2, :]         # grid-cell x/y offsets
    anc = aux_ref[2:4, :]            # anchors / stride
    o_ref[0, 0:2, :] = (jax.nn.sigmoid(p[0:2, :]) + xy_off) * stride
    o_ref[0, 2:4, :] = jnp.exp(p[2:4, :]) * anc * stride
    o_ref[0, 4:, :] = jax.nn.sigmoid(p[4:, :])


# ----------------------------------------------------------------------------
# Wrappers
# ----------------------------------------------------------------------------
def conv_nhwc(x, w_pad, b_pad, k, stride, pad, leaky):
    """x: (N, H, W, Cin_pad) NHWC bf16, w_pad: (k, k, Cin_pad, Cout_pad) bf16,
    b_pad: (1, Cout_pad) f32.  Returns (N, Ho, Wo, Cout_pad) bf16."""
    N, H, W, Cin = x.shape
    Coutp = w_pad.shape[-1]
    Ho = (H + 2 * pad - k) // stride + 1
    Wo = (W + 2 * pad - k) // stride + 1
    Hp, Wp = H + 2 * pad, W + 2 * pad
    eh, ew = (-Hp) % stride, (-Wp) % stride
    if pad or eh or ew:
        x = jnp.pad(x, ((0, 0), (pad, pad + eh), (pad, pad + ew), (0, 0)))
    Hp, Wp = Hp + eh, Wp + ew
    if stride > 1:
        s = stride
        Hs, Ws = Hp // s, Wp // s
        # space-to-depth: a stride-s conv becomes a stride-1 conv whose taps read
        # phase-sliced channel blocks (handled inside the kernel).
        x = (x.reshape(N, Hs, s, Ws, s, Cin)
              .transpose(0, 1, 3, 2, 4, 5)
              .reshape(N, Hs, Ws, s * s * Cin))
    else:
        Hs, Ws = Hp, Wp

    tn = LANE if Coutp % LANE == 0 else Coutp
    # TODO(synk): for very large feature maps (early real-YOLOv3 layers) add spatial/K
    # tiling of the input block; at these sizes the whole padded plane fits VMEM.
    out = pl.pallas_call(
        partial(_conv_kernel, k=k, s=stride, cin=Cin, ho=Ho, wo=Wo, leaky=leaky),
        out_shape=jax.ShapeDtypeStruct((N, Ho * Wo, Coutp), jnp.bfloat16),
        grid=(N, Coutp // tn),
        in_specs=[
            pl.BlockSpec((1, Hs, Ws, x.shape[-1]), lambda n, co: (n, 0, 0, 0)),
            pl.BlockSpec((k, k, Cin, tn), lambda n, co: (0, 0, 0, co)),
            pl.BlockSpec((1, tn), lambda n, co: (0, co)),
        ],
        out_specs=pl.BlockSpec((1, Ho * Wo, tn), lambda n, co: (n, 0, co)),
        compiler_params=pltpu.CompilerParams(
            dimension_semantics=("parallel", "parallel"),
            vmem_limit_bytes=_VMEM_LIMIT),
    )(x, w_pad, b_pad)
    return out.reshape(N, Ho, Wo, Coutp)   # contiguous (free) reshape back to NHWC


def shortcut_add(a, b):
    """Residual add on NHWC bf16 tensors, tiled over lane-dense (rows, C) blocks."""
    N, H, W, C = a.shape
    rows = N * H * W
    a2 = a.reshape(rows, C)
    b2 = b.reshape(rows, C)
    tr = rows
    for cand in (1024, 512, 256, 128, 64, 32, 16, 8):
        if rows % cand == 0:
            tr = cand
            break
    out = pl.pallas_call(
        _add_kernel,
        out_shape=jax.ShapeDtypeStruct((rows, C), a.dtype),
        grid=(rows // tr,),
        in_specs=[pl.BlockSpec((tr, C), lambda r: (r, 0)),
                  pl.BlockSpec((tr, C), lambda r: (r, 0))],
        out_specs=pl.BlockSpec((tr, C), lambda r: (r, 0)),
        compiler_params=pltpu.CompilerParams(
            dimension_semantics=("parallel",),
            vmem_limit_bytes=_VMEM_LIMIT),
    )(a2, b2)
    return out.reshape(N, H, W, C)


def bilinear_upsample2x(x):
    """nn.Upsample(scale_factor=2, mode='bilinear', align_corners=False) on NHWC bf16."""
    N, H, W, C = x.shape
    xpad = jnp.pad(x, ((0, 0), (1, 1), (1, 1), (0, 0)), mode="edge")  # edge clamp
    tc = LANE if C % LANE == 0 else C
    phase = pl.BlockSpec((1, H, W, tc), lambda n, c: (n, 0, 0, c))
    p00, p01, p10, p11 = pl.pallas_call(
        _upsample2_kernel,
        out_shape=tuple(jax.ShapeDtypeStruct((N, H, W, C), x.dtype) for _ in range(4)),
        grid=(N, C // tc),
        in_specs=[pl.BlockSpec((1, H + 2, W + 2, tc), lambda n, c: (n, 0, 0, c))],
        out_specs=[phase, phase, phase, phase],
        compiler_params=pltpu.CompilerParams(
            dimension_semantics=("parallel", "parallel"),
            vmem_limit_bytes=_VMEM_LIMIT),
    )(xpad)
    # TODO(synk): interleaving the four phase planes is left to XLA (one extra copy of
    # the output); writing them interleaved in-kernel would need strided stores.
    row0 = jnp.stack([p00, p01], axis=3)        # (N, H, W, 2, C)
    row1 = jnp.stack([p10, p11], axis=3)
    out = jnp.stack([row0, row1], axis=2)       # (N, H, 2, W, 2, C)
    return out.reshape(N, 2 * H, 2 * W, C)


def predict_transform_pallas(x_nhwc, inp_dim, anchors, num_classes):
    """x_nhwc: (B, G, G, Cpad) bf16 head-conv output (real channels = A*(5+nc) first).
    Returns (B, G*G*A, 5+nc) f32 in the PyTorch predict_transform ordering."""
    B, G, _, _ = x_nhwc.shape
    A = len(anchors)
    attrs = 5 + num_classes
    stride = inp_dim // G
    Nb = G * G * A

    # tiny XLA rearrange: (B, G, G, A*attrs) -> (B, attrs, G*G*A) compute layout
    head = x_nhwc[..., :A * attrs].astype(jnp.float32).reshape(B, G * G, A, attrs)
    p = jnp.transpose(head, (0, 3, 1, 2)).reshape(B, attrs, Nb)

    g = jnp.arange(G, dtype=jnp.float32)
    gy, gx = jnp.meshgrid(g, g, indexing="ij")
    anc = jnp.asarray(anchors, jnp.float32) / float(stride)
    aux = jnp.stack([
        jnp.repeat(gx.reshape(-1), A),     # x offset per box
        jnp.repeat(gy.reshape(-1), A),     # y offset per box
        jnp.tile(anc[:, 0], G * G),        # anchor_w / stride
        jnp.tile(anc[:, 1], G * G),        # anchor_h / stride
    ], axis=0)                             # (4, Nb)

    out = pl.pallas_call(
        partial(_yolo_kernel, stride=float(stride)),
        out_shape=jax.ShapeDtypeStruct((B, attrs, Nb), jnp.float32),
        grid=(B,),
        in_specs=[pl.BlockSpec((1, attrs, Nb), lambda b: (b, 0, 0)),
                  pl.BlockSpec((4, Nb), lambda b: (0, 0))],
        out_specs=pl.BlockSpec((1, attrs, Nb), lambda b: (b, 0, 0)),
        compiler_params=pltpu.CompilerParams(
            dimension_semantics=("parallel",),
            vmem_limit_bytes=_VMEM_LIMIT),
    )(p, aux)
    return jnp.transpose(out, (0, 2, 1))   # (B, G*G*A, attrs)


# ----------------------------------------------------------------------------
# Synthetic cfg (replaces parse_cfg of a .cfg file)
# ----------------------------------------------------------------------------
BLOCKS = [
    {"type": "net", "height": 16, "width": 16, "channels": 3},
    {"type": "convolutional", "batch_normalize": 1, "filters": 8,  "size": 3, "stride": 1, "pad": 1, "activation": "leaky"},   # i=0
    {"type": "convolutional", "batch_normalize": 1, "filters": 16, "size": 3, "stride": 2, "pad": 1, "activation": "leaky"},   # i=1
    {"type": "convolutional", "batch_normalize": 1, "filters": 16, "size": 1, "stride": 1, "pad": 1, "activation": "leaky"},   # i=2
    {"type": "shortcut", "from": -2, "activation": "linear"},                                                                   # i=3
    {"type": "convolutional", "batch_normalize": 0, "filters": 21, "size": 1, "stride": 1, "pad": 1, "activation": "linear"},  # i=4
    {"type": "yolo", "mask": [0, 1, 2],
     "anchors": [(2, 3), (4, 5), (6, 7), (8, 9), (10, 11), (12, 13)], "classes": 2},                                            # i=5
    {"type": "route", "layers": [-3]},                                                                                          # i=6
    {"type": "upsample", "stride": 2},                                                                                          # i=7
    {"type": "route", "layers": [-1, -8]},                                                                                      # i=8
    {"type": "convolutional", "batch_normalize": 0, "filters": 21, "size": 1, "stride": 1, "pad": 1, "activation": "linear"},  # i=9
    {"type": "yolo", "mask": [3, 4, 5],
     "anchors": [(2, 3), (4, 5), (6, 7), (8, 9), (10, 11), (12, 13)], "classes": 2},                                            # i=10
]


class DarknetPallas:
    """JAX/Pallas re-implementation of Darknet.forward (inference / eval semantics)."""

    def __init__(self, blocks, key):
        self.blocks = blocks
        self.net_info = blocks[0]
        self.inp_dim = int(self.net_info["height"])
        self.params = {}
        self.out_layout = []   # per layer: [(real_channels, zero_pad), ...] segments

        in_ch = int(self.net_info.get("channels", 3))
        prev_layout = [(in_ch, 0)]            # network input stays unpadded (Cin=3)
        keys = iter(jax.random.split(key, 128))
        for i, b in enumerate(blocks[1:]):
            t = b["type"]
            if t == "convolutional":
                f, k = int(b["filters"]), int(b["size"])
                cin_real = sum(r for r, _ in prev_layout)
                cin_tot = sum(r + p for r, p in prev_layout)
                fp = _round_up(f, LANE)
                w_real = 0.1 * jax.random.normal(next(keys), (f, cin_real, k, k),
                                                 jnp.float32)
                if int(b.get("batch_normalize", 0)):
                    gamma = 1.0 + 0.1 * jax.random.normal(next(keys), (f,), jnp.float32)
                    beta = 0.1 * jax.random.normal(next(keys), (f,), jnp.float32)
                    rmean = 0.1 * jax.random.normal(next(keys), (f,), jnp.float32)
                    rvar = 1.0 + 0.1 * jax.random.uniform(next(keys), (f,), jnp.float32)
                    scale = gamma / jnp.sqrt(rvar + 1e-5)          # fold eval-mode BN
                    bias = beta - rmean * scale
                    w_real = w_real * scale[:, None, None, None]   # scale into weights
                else:
                    bias = 0.1 * jax.random.normal(next(keys), (f,), jnp.float32)
                # embed into the padded / segmented channel layout: (k, k, cin_tot, fp)
                w_pad = jnp.zeros((k, k, cin_tot, fp), jnp.float32)
                rp, pp = 0, 0
                for (r, pz) in prev_layout:
                    seg = jnp.transpose(w_real[:, rp:rp + r], (2, 3, 1, 0))  # (k,k,r,f)
                    w_pad = w_pad.at[:, :, pp:pp + r, :f].set(seg)
                    rp += r
                    pp += r + pz
                b_pad = jnp.zeros((1, fp), jnp.float32).at[0, :f].set(bias)
                self.params[i] = (w_pad.astype(jnp.bfloat16), b_pad)
                prev_layout = [(f, fp - f)]
            elif t == "route":
                ls = [l if l < 0 else l - i for l in b["layers"]]
                if len(ls) == 1:
                    prev_layout = list(self.out_layout[i + ls[0]])
                else:
                    prev_layout = (list(self.out_layout[i + ls[0]]) +
                                   list(self.out_layout[i + ls[1]]))
            # shortcut / upsample / yolo leave the channel layout unchanged
            self.out_layout.append(list(prev_layout))

    def __call__(self, x_nchw):
        # NCHW -> NHWC once; bf16 activations throughout (halved HBM traffic per layer).
        x = jnp.transpose(x_nchw, (0, 2, 3, 1)).astype(jnp.bfloat16)
        modules = self.blocks[1:]
        outputs = {}
        detections = None
        for i, m in enumerate(modules):
            t = m["type"]
            if t == "convolutional":
                w, b = self.params[i]
                k, s = int(m["size"]), int(m["stride"])
                pad = (k - 1) // 2 if int(m["pad"]) else 0
                x = conv_nhwc(x, w, b, k, s, pad, leaky=(m["activation"] == "leaky"))
            elif t == "upsample":
                if int(m["stride"]) != 2:
                    # TODO(synk): only the scale-2 upsample used by Darknet is implemented.
                    raise NotImplementedError("only scale_factor=2 upsample supported")
                x = bilinear_upsample2x(x)
            elif t == "route":
                layers = [l if l < 0 else l - i for l in m["layers"]]
                if len(layers) == 1:
                    x = outputs[i + layers[0]]
                else:
                    # TODO(synk): the channel concat is an XLA copy; could be avoided by
                    # passing both route inputs as separate refs to the next conv kernel.
                    x = jnp.concatenate([outputs[i + layers[0]],
                                         outputs[i + layers[1]]], axis=-1)
            elif t == "shortcut":
                # TODO(synk): could be fused into the preceding conv epilogue, but the
                # pre-add conv output must stay addressable for generic route layers.
                x = shortcut_add(outputs[i - 1], outputs[i + int(m["from"])])
            elif t == "yolo":
                anchors = [m["anchors"][j] for j in m["mask"]]
                x = predict_transform_pallas(x, self.inp_dim, anchors, int(m["classes"]))
                detections = x if detections is None else jnp.concatenate(
                    [detections, x], axis=1)
            else:
                raise TypeError(f"unsupported module type {t}")
            outputs[i] = x
        # TODO(synk): write_results (confidence filter + per-class NMS) is data-dependent
        # host-side control flow and is not part of forward(); not implemented as a kernel.
        return detections


if __name__ == "__main__":
    key = jax.random.PRNGKey(0)
    k_param, k_in = jax.random.split(key)

    net = DarknetPallas(BLOCKS, k_param)
    x = jax.random.normal(k_in, (2, 3, 16, 16), jnp.float32)   # NCHW input

    fwd = jax.jit(lambda inp: net(inp))
    det = jax.block_until_ready(fwd(x))

    # 8x8 grid * 3 anchors + 16x16 grid * 3 anchors = 192 + 768 boxes, 5+2 attrs
    assert det.shape == (2, 960, 7), det.shape
    assert bool(jnp.all(jnp.isfinite(det)))
    print("KERNEL_OK")
</pallas_src>

<mosaic_0001>
module attributes {stable_mosaic.version = 11 : i64} {
  func.func @_conv_kernel(%arg0: i32, %arg1: i32, %arg2: memref<1x18x18x3xbf16, #tpu.memory_space<vmem>>, %arg3: memref<3x3x3x128xbf16, #tpu.memory_space<vmem>>, %arg4: memref<1x128xf32, #tpu.memory_space<vmem>>, %arg5: memref<1x256x128xbf16, #tpu.memory_space<vmem>>) attributes {dimension_semantics = [#tpu.dimension_semantics<parallel>, #tpu.dimension_semantics<parallel>], iteration_bounds = array<i64: 2, 1>, scalar_prefetch = 0 : i64, scratch_operands = 0 : i64, tpu.core_type = #tpu.core_type<tc>, window_params = [{transform_indices = @transform_0, window_bounds = array<i64: 1, 18, 18, 3>}, {transform_indices = @transform_1, window_bounds = array<i64: 3, 3, 3, 128>}, {transform_indices = @transform_2, window_bounds = array<i64: 1, 128>}, {transform_indices = @transform_3, window_bounds = array<i64: 1, 256, 128>}]} {
    %cst = arith.constant 0.000000e+00 : f32
    %0 = vector.broadcast %cst : f32 to vector<256x128xf32>
    %c0 = arith.constant 0 : index
    %c0_0 = arith.constant 0 : index
    %c0_1 = arith.constant 0 : index
    %c0_2 = arith.constant 0 : index
    %1 = vector.load %arg2[%c0, %c0_0, %c0_1, %c0_2] : memref<1x18x18x3xbf16, #tpu.memory_space<vmem>>, vector<1x16x16x3xbf16>
    %2 = vector.shape_cast %1 : vector<1x16x16x3xbf16> to vector<16x16x3xbf16>
    %3 = vector.shape_cast %2 : vector<16x16x3xbf16> to vector<256x3xbf16>
    %c0_3 = arith.constant 0 : index
    %c0_4 = arith.constant 0 : index
    %c0_5 = arith.constant 0 : index
    %c0_6 = arith.constant 0 : index
    %4 = vector.load %arg3[%c0_3, %c0_4, %c0_5, %c0_6] : memref<3x3x3x128xbf16, #tpu.memory_space<vmem>>, vector<1x1x3x128xbf16>
    %5 = vector.shape_cast %4 : vector<1x1x3x128xbf16> to vector<3x128xbf16>
    %cst_7 = arith.constant dense<0.000000e+00> : vector<256x128xf32>
    %6 = tpu.matmul %3, %5, %cst_7 {dimension_numbers = #tpu.dot_dimension_numbers<[1], [0], [0], [1], [0, 0, 1, 1], [], []>} : vector<256x3xbf16>, vector<3x128xbf16>, vector<256x128xf32> -> vector<256x128xf32>
    %7 = arith.addf %0, %6 : vector<256x128xf32>
    %c0_8 = arith.constant 0 : index
    %c0_9 = arith.constant 0 : index
    %c1 = arith.constant 1 : index
    %c0_10 = arith.constant 0 : index
    %8 = vector.load %arg2[%c0_8, %c0_9, %c1, %c0_10] : memref<1x18x18x3xbf16, #tpu.memory_space<vmem>>, vector<1x16x16x3xbf16>
    %9 = vector.shape_cast %8 : vector<1x16x16x3xbf16> to vector<16x16x3xbf16>
    %10 = vector.shape_cast %9 : vector<16x16x3xbf16> to vector<256x3xbf16>
    %c0_11 = arith.constant 0 : index
    %c1_12 = arith.constant 1 : index
    %c0_13 = arith.constant 0 : index
    %c0_14 = arith.constant 0 : index
    %11 = vector.load %arg3[%c0_11, %c1_12, %c0_13, %c0_14] : memref<3x3x3x128xbf16, #tpu.memory_space<vmem>>, vector<1x1x3x128xbf16>
    %12 = vector.shape_cast %11 : vector<1x1x3x128xbf16> to vector<3x128xbf16>
    %cst_15 = arith.constant dense<0.000000e+00> : vector<256x128xf32>
    %13 = tpu.matmul %10, %12, %cst_15 {dimension_numbers = #tpu.dot_dimension_numbers<[1], [0], [0], [1], [0, 0, 1, 1], [], []>} : vector<256x3xbf16>, vector<3x128xbf16>, vector<256x128xf32> -> vector<256x128xf32>
    %14 = arith.addf %7, %13 : vector<256x128xf32>
    %c0_16 = arith.constant 0 : index
    %c0_17 = arith.constant 0 : index
    %c2 = arith.constant 2 : index
    %c0_18 = arith.constant 0 : index
    %15 = vector.load %arg2[%c0_16, %c0_17, %c2, %c0_18] : memref<1x18x18x3xbf16, #tpu.memory_space<vmem>>, vector<1x16x16x3xbf16>
    %16 = vector.shape_cast %15 : vector<1x16x16x3xbf16> to vector<16x16x3xbf16>
    %17 = vector.shape_cast %16 : vector<16x16x3xbf16> to vector<256x3xbf16>
    %c0_19 = arith.constant 0 : index
    %c2_20 = arith.constant 2 : index
    %c0_21 = arith.constant 0 : index
    %c0_22 = arith.constant 0 : index
    %18 = vector.load %arg3[%c0_19, %c2_20, %c0_21, %c0_22] : memref<3x3x3x128xbf16, #tpu.memory_space<vmem>>, vector<1x1x3x128xbf16>
    %19 = vector.shape_cast %18 : vector<1x1x3x128xbf16> to vector<3x128xbf16>
    %cst_23 = arith.constant dense<0.000000e+00> : vector<256x128xf32>
    %20 = tpu.matmul %17, %19, %cst_23 {dimension_numbers = #tpu.dot_dimension_numbers<[1], [0], [0], [1], [0, 0, 1, 1], [], []>} : vector<256x3xbf16>, vector<3x128xbf16>, vector<256x128xf32> -> vector<256x128xf32>
    %21 = arith.addf %14, %20 : vector<256x128xf32>
    %c0_24 = arith.constant 0 : index
    %c1_25 = arith.constant 1 : index
    %c0_26 = arith.constant 0 : index
    %c0_27 = arith.constant 0 : index
    %22 = vector.load %arg2[%c0_24, %c1_25, %c0_26, %c0_27] : memref<1x18x18x3xbf16, #tpu.memory_space<vmem>>, vector<1x16x16x3xbf16>
    %23 = vector.shape_cast %22 : vector<1x16x16x3xbf16> to vector<16x16x3xbf16>
    %24 = vector.shape_cast %23 : vector<16x16x3xbf16> to vector<256x3xbf16>
    %c1_28 = arith.constant 1 : index
    %c0_29 = arith.constant 0 : index
    %c0_30 = arith.constant 0 : index
    %c0_31 = arith.constant 0 : index
    %25 = vector.load %arg3[%c1_28, %c0_29, %c0_30, %c0_31] : memref<3x3x3x128xbf16, #tpu.memory_space<vmem>>, vector<1x1x3x128xbf16>
    %26 = vector.shape_cast %25 : vector<1x1x3x128xbf16> to vector<3x128xbf16>
    %cst_32 = arith.constant dense<0.000000e+00> : vector<256x128xf32>
    %27 = tpu.matmul %24, %26, %cst_32 {dimension_numbers = #tpu.dot_dimension_numbers<[1], [0], [0], [1], [0, 0, 1, 1], [], []>} : vector<256x3xbf16>, vector<3x128xbf16>, vector<256x128xf32> -> vector<256x128xf32>
    %28 = arith.addf %21, %27 : vector<256x128xf32>
    %c0_33 = arith.constant 0 : index
    %c1_34 = arith.constant 1 : index
    %c1_35 = arith.constant 1 : index
    %c0_36 = arith.constant 0 : index
    %29 = vector.load %arg2[%c0_33, %c1_34, %c1_35, %c0_36] : memref<1x18x18x3xbf16, #tpu.memory_space<vmem>>, vector<1x16x16x3xbf16>
    %30 = vector.shape_cast %29 : vector<1x16x16x3xbf16> to vector<16x16x3xbf16>
    %31 = vector.shape_cast %30 : vector<16x16x3xbf16> to vector<256x3xbf16>
    %c1_37 = arith.constant 1 : index
    %c1_38 = arith.constant 1 : index
    %c0_39 = arith.constant 0 : index
    %c0_40 = arith.constant 0 : index
    %32 = vector.load %arg3[%c1_37, %c1_38, %c0_39, %c0_40] : memref<3x3x3x128xbf16, #tpu.memory_space<vmem>>, vector<1x1x3x128xbf16>
    %33 = vector.shape_cast %32 : vector<1x1x3x128xbf16> to vector<3x128xbf16>
    %cst_41 = arith.constant dense<0.000000e+00> : vector<256x128xf32>
    %34 = tpu.matmul %31, %33, %cst_41 {dimension_numbers = #tpu.dot_dimension_numbers<[1], [0], [0], [1], [0, 0, 1, 1], [], []>} : vector<256x3xbf16>, vector<3x128xbf16>, vector<256x128xf32> -> vector<256x128xf32>
    %35 = arith.addf %28, %34 : vector<256x128xf32>
    %c0_42 = arith.constant 0 : index
    %c1_43 = arith.constant 1 : index
    %c2_44 = arith.constant 2 : index
    %c0_45 = arith.constant 0 : index
    %36 = vector.load %arg2[%c0_42, %c1_43, %c2_44, %c0_45] : memref<1x18x18x3xbf16, #tpu.memory_space<vmem>>, vector<1x16x16x3xbf16>
    %37 = vector.shape_cast %36 : vector<1x16x16x3xbf16> to vector<16x16x3xbf16>
    %38 = vector.shape_cast %37 : vector<16x16x3xbf16> to vector<256x3xbf16>
    %c1_46 = arith.constant 1 : index
    %c2_47 = arith.constant 2 : index
    %c0_48 = arith.constant 0 : index
    %c0_49 = arith.constant 0 : index
    %39 = vector.load %arg3[%c1_46, %c2_47, %c0_48, %c0_49] : memref<3x3x3x128xbf16, #tpu.memory_space<vmem>>, vector<1x1x3x128xbf16>
    %40 = vector.shape_cast %39 : vector<1x1x3x128xbf16> to vector<3x128xbf16>
    %cst_50 = arith.constant dense<0.000000e+00> : vector<256x128xf32>
    %41 = tpu.matmul %38, %40, %cst_50 {dimension_numbers = #tpu.dot_dimension_numbers<[1], [0], [0], [1], [0, 0, 1, 1], [], []>} : vector<256x3xbf16>, vector<3x128xbf16>, vector<256x128xf32> -> vector<256x128xf32>
    %42 = arith.addf %35, %41 : vector<256x128xf32>
    %c0_51 = arith.constant 0 : index
    %c2_52 = arith.constant 2 : index
    %c0_53 = arith.constant 0 : index
    %c0_54 = arith.constant 0 : index
    %43 = vector.load %arg2[%c0_51, %c2_52, %c0_53, %c0_54] : memref<1x18x18x3xbf16, #tpu.memory_space<vmem>>, vector<1x16x16x3xbf16>
    %44 = vector.shape_cast %43 : vector<1x16x16x3xbf16> to vector<16x16x3xbf16>
    %45 = vector.shape_cast %44 : vector<16x16x3xbf16> to vector<256x3xbf16>
    %c2_55 = arith.constant 2 : index
    %c0_56 = arith.constant 0 : index
    %c0_57 = arith.constant 0 : index
    %c0_58 = arith.constant 0 : index
    %46 = vector.load %arg3[%c2_55, %c0_56, %c0_57, %c0_58] : memref<3x3x3x128xbf16, #tpu.memory_space<vmem>>, vector<1x1x3x128xbf16>
    %47 = vector.shape_cast %46 : vector<1x1x3x128xbf16> to vector<3x128xbf16>
    %cst_59 = arith.constant dense<0.000000e+00> : vector<256x128xf32>
    %48 = tpu.matmul %45, %47, %cst_59 {dimension_numbers = #tpu.dot_dimension_numbers<[1], [0], [0], [1], [0, 0, 1, 1], [], []>} : vector<256x3xbf16>, vector<3x128xbf16>, vector<256x128xf32> -> vector<256x128xf32>
    %49 = arith.addf %42, %48 : vector<256x128xf32>
    %c0_60 = arith.constant 0 : index
    %c2_61 = arith.constant 2 : index
    %c1_62 = arith.constant 1 : index
    %c0_63 = arith.constant 0 : index
    %50 = vector.load %arg2[%c0_60, %c2_61, %c1_62, %c0_63] : memref<1x18x18x3xbf16, #tpu.memory_space<vmem>>, vector<1x16x16x3xbf16>
    %51 = vector.shape_cast %50 : vector<1x16x16x3xbf16> to vector<16x16x3xbf16>
    %52 = vector.shape_cast %51 : vector<16x16x3xbf16> to vector<256x3xbf16>
    %c2_64 = arith.constant 2 : index
    %c1_65 = arith.constant 1 : index
    %c0_66 = arith.constant 0 : index
    %c0_67 = arith.constant 0 : index
    %53 = vector.load %arg3[%c2_64, %c1_65, %c0_66, %c0_67] : memref<3x3x3x128xbf16, #tpu.memory_space<vmem>>, vector<1x1x3x128xbf16>
    %54 = vector.shape_cast %53 : vector<1x1x3x128xbf16> to vector<3x128xbf16>
    %cst_68 = arith.constant dense<0.000000e+00> : vector<256x128xf32>
    %55 = tpu.matmul %52, %54, %cst_68 {dimension_numbers = #tpu.dot_dimension_numbers<[1], [0], [0], [1], [0, 0, 1, 1], [], []>} : vector<256x3xbf16>, vector<3x128xbf16>, vector<256x128xf32> -> vector<256x128xf32>
    %56 = arith.addf %49, %55 : vector<256x128xf32>
    %c0_69 = arith.constant 0 : index
    %c2_70 = arith.constant 2 : index
    %c2_71 = arith.constant 2 : index
    %c0_72 = arith.constant 0 : index
    %57 = vector.load %arg2[%c0_69, %c2_70, %c2_71, %c0_72] : memref<1x18x18x3xbf16, #tpu.memory_space<vmem>>, vector<1x16x16x3xbf16>
    %58 = vector.shape_cast %57 : vector<1x16x16x3xbf16> to vector<16x16x3xbf16>
    %59 = vector.shape_cast %58 : vector<16x16x3xbf16> to vector<256x3xbf16>
    %c2_73 = arith.constant 2 : index
    %c2_74 = arith.constant 2 : index
    %c0_75 = arith.constant 0 : index
    %c0_76 = arith.constant 0 : index
    %60 = vector.load %arg3[%c2_73, %c2_74, %c0_75, %c0_76] : memref<3x3x3x128xbf16, #tpu.memory_space<vmem>>, vector<1x1x3x128xbf16>
    %61 = vector.shape_cast %60 : vector<1x1x3x128xbf16> to vector<3x128xbf16>
    %cst_77 = arith.constant dense<0.000000e+00> : vector<256x128xf32>
    %62 = tpu.matmul %59, %61, %cst_77 {dimension_numbers = #tpu.dot_dimension_numbers<[1], [0], [0], [1], [0, 0, 1, 1], [], []>} : vector<256x3xbf16>, vector<3x128xbf16>, vector<256x128xf32> -> vector<256x128xf32>
    %63 = arith.addf %56, %62 : vector<256x128xf32>
    %c0_78 = arith.constant 0 : index
    %c0_79 = arith.constant 0 : index
    %64 = vector.load %arg4[%c0_78, %c0_79] : memref<1x128xf32, #tpu.memory_space<vmem>>, vector<1x128xf32>
    %65 = vector.broadcast %64 : vector<1x128xf32> to vector<256x128xf32>
    %66 = arith.addf %63, %65 : vector<256x128xf32>
    %cst_80 = arith.constant 0.000000e+00 : f32
    %67 = vector.broadcast %cst_80 : f32 to vector<256x128xf32>
    %68 = arith.cmpf ogt, %66, %67 : vector<256x128xf32>
    %cst_81 = arith.constant 1.000000e-01 : f32
    %69 = vector.broadcast %cst_81 : f32 to vector<256x128xf32>
    %70 = arith.mulf %69, %66 : vector<256x128xf32>
    %71 = arith.select %68, %66, %70 : vector<256x128xi1>, vector<256x128xf32>
    %72 = arith.truncf %71 : vector<256x128xf32> to vector<256x128xbf16>
    %c0_82 = arith.constant 0 : index
    %c0_83 = arith.constant 0 : index
    %c0_84 = arith.constant 0 : index
    %73 = vector.load %arg5[%c0_82, %c0_83, %c0_84] : memref<1x256x128xbf16, #tpu.memory_space<vmem>>, vector<1x256x128xbf16>
    %74 = vector.shape_cast %73 : vector<1x256x128xbf16> to vector<256x128xbf16>
    %75 = vector.shape_cast %72 : vector<256x128xbf16> to vector<1x256x128xbf16>
    tpu.vector_store %arg5[%c0_82, %c0_83, %c0_84], %75 {strides = array<i32>} : memref<1x256x128xbf16, #tpu.memory_space<vmem>>, vector<1x256x128xbf16>,
    return
  }
  func.func @transform_0(%arg0: i32, %arg1: i32) -> (i32, i32, i32, i32) {
    %c0_i32 = arith.constant 0 : i32
    %c0_i32_0 = arith.constant 0 : i32
    %c0_i32_1 = arith.constant 0 : i32
    %c0_i32_2 = arith.constant 0 : i32
    return %arg0, %c0_i32, %c0_i32_0, %c0_i32_1 : i32, i32, i32, i32
  }
  func.func @transform_1(%arg0: i32, %arg1: i32) -> (i32, i32, i32, i32) {
    %c0_i32 = arith.constant 0 : i32
    %c0_i32_0 = arith.constant 0 : i32
    %c0_i32_1 = arith.constant 0 : i32
    %c0_i32_2 = arith.constant 0 : i32
    return %c0_i32, %c0_i32_0, %c0_i32_1, %arg1 : i32, i32, i32, i32
  }
  func.func @transform_2(%arg0: i32, %arg1: i32) -> (i32, i32) {
    %c0_i32 = arith.constant 0 : i32
    %c0_i32_0 = arith.constant 0 : i32
    return %c0_i32, %arg1 : i32, i32
  }
  func.func @transform_3(%arg0: i32, %arg1: i32) -> (i32, i32, i32) {
    %c0_i32 = arith.constant 0 : i32
    %c0_i32_0 = arith.constant 0 : i32
    return %arg0, %c0_i32, %arg1 : i32, i32, i32
  }
}

module attributes {stable_mosaic.version = 11 : i64} {
  func.func @_conv_kernel(%arg0: i32, %arg1: i32, %arg2: memref<1x8x8x128xbf16, #tpu.memory_space<vmem>>, %arg3: memref<1x1x128x128xbf16, #tpu.memory_space<vmem>>, %arg4: memref<1x128xf32, #tpu.memory_space<vmem>>, %arg5: memref<1x64x128xbf16, #tpu.memory_space<vmem>>) attributes {dimension_semantics = [#tpu.dimension_semantics<parallel>, #tpu.dimension_semantics<parallel>], iteration_bounds = array<i64: 2, 1>, scalar_prefetch = 0 : i64, scratch_operands = 0 : i64, tpu.core_type = #tpu.core_type<tc>, window_params = [{transform_indices = @transform_0, window_bounds = array<i64: 1, 8, 8, 128>}, {transform_indices = @transform_1, window_bounds = array<i64: 1, 1, 128, 128>}, {transform_indices = @transform_2, window_bounds = array<i64: 1, 128>}, {transform_indices = @transform_3, window_bounds = array<i64: 1, 64, 128>}]} {
    %cst = arith.constant 0.000000e+00 : f32
    %0 = vector.broadcast %cst : f32 to vector<64x128xf32>
    %c0 = arith.constant 0 : index
    %c0_0 = arith.constant 0 : index
    %c0_1 = arith.constant 0 : index
    %c0_2 = arith.constant 0 : index
    %1 = vector.load %arg2[%c0, %c0_0, %c0_1, %c0_2] : memref<1x8x8x128xbf16, #tpu.memory_space<vmem>>, vector<1x8x8x128xbf16>
    %2 = vector.shape_cast %1 : vector<1x8x8x128xbf16> to vector<8x8x128xbf16>
    %3 = vector.shape_cast %2 : vector<8x8x128xbf16> to vector<64x128xbf16>
    %c0_3 = arith.constant 0 : index
    %c0_4 = arith.constant 0 : index
    %c0_5 = arith.constant 0 : index
    %c0_6 = arith.constant 0 : index
    %4 = vector.load %arg3[%c0_3, %c0_4, %c0_5, %c0_6] : memref<1x1x128x128xbf16, #tpu.memory_space<vmem>>, vector<1x1x128x128xbf16>
    %5 = vector.shape_cast %4 : vector<1x1x128x128xbf16> to vector<128x128xbf16>
    %cst_7 = arith.constant dense<0.000000e+00> : vector<64x128xf32>
    %6 = tpu.matmul %3, %5, %cst_7 {dimension_numbers = #tpu.dot_dimension_numbers<[1], [0], [0], [1], [0, 0, 1, 1], [], []>} : vector<64x128xbf16>, vector<128x128xbf16>, vector<64x128xf32> -> vector<64x128xf32>
    %7 = arith.addf %0, %6 : vector<64x128xf32>
    %c0_8 = arith.constant 0 : index
    %c0_9 = arith.constant 0 : index
    %8 = vector.load %arg4[%c0_8, %c0_9] : memref<1x128xf32, #tpu.memory_space<vmem>>, vector<1x128xf32>
    %9 = vector.broadcast %8 : vector<1x128xf32> to vector<64x128xf32>
    %10 = arith.addf %7, %9 : vector<64x128xf32>
    %cst_10 = arith.constant 0.000000e+00 : f32
    %11 = vector.broadcast %cst_10 : f32 to vector<64x128xf32>
    %12 = arith.cmpf ogt, %10, %11 : vector<64x128xf32>
    %cst_11 = arith.constant 1.000000e-01 : f32
    %13 = vector.broadcast %cst_11 : f32 to vector<64x128xf32>
    %14 = arith.mulf %13, %10 : vector<64x128xf32>
    %15 = arith.select %12, %10, %14 : vector<64x128xi1>, vector<64x128xf32>
    %16 = arith.truncf %15 : vector<64x128xf32> to vector<64x128xbf16>
    %c0_12 = arith.constant 0 : index
    %c0_13 = arith.constant 0 : index
    %c0_14 = arith.constant 0 : index
    %17 = vector.load %arg5[%c0_12, %c0_13, %c0_14] : memref<1x64x128xbf16, #tpu.memory_space<vmem>>, vector<1x64x128xbf16>
    %18 = vector.shape_cast %17 : vector<1x64x128xbf16> to vector<64x128xbf16>
    %19 = vector.shape_cast %16 : vector<64x128xbf16> to vector<1x64x128xbf16>
    tpu.vector_store %arg5[%c0_12, %c0_13, %c0_14], %19 {strides = array<i32>} : memref<1x64x128xbf16, #tpu.memory_space<vmem>>, vector<1x64x128xbf16>,
    return
  }
  func.func @transform_0(%arg0: i32, %arg1: i32) -> (i32, i32, i32, i32) {
    %c0_i32 = arith.constant 0 : i32
    %c0_i32_0 = arith.constant 0 : i32
    %c0_i32_1 = arith.constant 0 : i32
    %c0_i32_2 = arith.constant 0 : i32
    return %arg0, %c0_i32, %c0_i32_0, %c0_i32_1 : i32, i32, i32, i32
  }
  func.func @transform_1(%arg0: i32, %arg1: i32) -> (i32, i32, i32, i32) {
    %c0_i32 = arith.constant 0 : i32
    %c0_i32_0 = arith.constant 0 : i32
    %c0_i32_1 = arith.constant 0 : i32
    %c0_i32_2 = arith.constant 0 : i32
    return %c0_i32, %c0_i32_0, %c0_i32_1, %arg1 : i32, i32, i32, i32
  }
  func.func @transform_2(%arg0: i32, %arg1: i32) -> (i32, i32) {
    %c0_i32 = arith.constant 0 : i32
    %c0_i32_0 = arith.constant 0 : i32
    return %c0_i32, %arg1 : i32, i32
  }
  func.func @transform_3(%arg0: i32, %arg1: i32) -> (i32, i32, i32) {
    %c0_i32 = arith.constant 0 : i32
    %c0_i32_0 = arith.constant 0 : i32
    return %arg0, %c0_i32, %arg1 : i32, i32, i32
  }
}

module attributes {stable_mosaic.version = 11 : i64} {
  func.func @_conv_kernel(%arg0: i32, %arg1: i32, %arg2: memref<1x9x9x512xbf16, #tpu.memory_space<vmem>>, %arg3: memref<3x3x128x128xbf16, #tpu.memory_space<vmem>>, %arg4: memref<1x128xf32, #tpu.memory_space<vmem>>, %arg5: memref<1x64x128xbf16, #tpu.memory_space<vmem>>) attributes {dimension_semantics = [#tpu.dimension_semantics<parallel>, #tpu.dimension_semantics<parallel>], iteration_bounds = array<i64: 2, 1>, scalar_prefetch = 0 : i64, scratch_operands = 0 : i64, tpu.core_type = #tpu.core_type<tc>, window_params = [{transform_indices = @transform_0, window_bounds = array<i64: 1, 9, 9, 512>}, {transform_indices = @transform_1, window_bounds = array<i64: 3, 3, 128, 128>}, {transform_indices = @transform_2, window_bounds = array<i64: 1, 128>}, {transform_indices = @transform_3, window_bounds = array<i64: 1, 64, 128>}]} {
    %cst = arith.constant 0.000000e+00 : f32
    %0 = vector.broadcast %cst : f32 to vector<64x128xf32>
    %c0 = arith.constant 0 : index
    %c0_0 = arith.constant 0 : index
    %c0_1 = arith.constant 0 : index
    %c0_2 = arith.constant 0 : index
    %1 = vector.load %arg2[%c0, %c0_0, %c0_1, %c0_2] : memref<1x9x9x512xbf16, #tpu.memory_space<vmem>>, vector<1x8x8x128xbf16>
    %2 = vector.shape_cast %1 : vector<1x8x8x128xbf16> to vector<8x8x128xbf16>
    %3 = vector.shape_cast %2 : vector<8x8x128xbf16> to vector<64x128xbf16>
    %c0_3 = arith.constant 0 : index
    %c0_4 = arith.constant 0 : index
    %c0_5 = arith.constant 0 : index
    %c0_6 = arith.constant 0 : index
    %4 = vector.load %arg3[%c0_3, %c0_4, %c0_5, %c0_6] : memref<3x3x128x128xbf16, #tpu.memory_space<vmem>>, vector<1x1x128x128xbf16>
    %5 = vector.shape_cast %4 : vector<1x1x128x128xbf16> to vector<128x128xbf16>
    %cst_7 = arith.constant dense<0.000000e+00> : vector<64x128xf32>
    %6 = tpu.matmul %3, %5, %cst_7 {dimension_numbers = #tpu.dot_dimension_numbers<[1], [0], [0], [1], [0, 0, 1, 1], [], []>} : vector<64x128xbf16>, vector<128x128xbf16>, vector<64x128xf32> -> vector<64x128xf32>
    %7 = arith.addf %0, %6 : vector<64x128xf32>
    %c0_8 = arith.constant 0 : index
    %c0_9 = arith.constant 0 : index
    %c0_10 = arith.constant 0 : index
    %c128 = arith.constant 128 : index
    %8 = vector.load %arg2[%c0_8, %c0_9, %c0_10, %c128] : memref<1x9x9x512xbf16, #tpu.memory_space<vmem>>, vector<1x8x8x128xbf16>
    %9 = vector.shape_cast %8 : vector<1x8x8x128xbf16> to vector<8x8x128xbf16>
    %10 = vector.shape_cast %9 : vector<8x8x128xbf16> to vector<64x128xbf16>
    %c0_11 = arith.constant 0 : index
    %c1 = arith.constant 1 : index
    %c0_12 = arith.constant 0 : index
    %c0_13 = arith.constant 0 : index
    %11 = vector.load %arg3[%c0_11, %c1, %c0_12, %c0_13] : memref<3x3x128x128xbf16, #tpu.memory_space<vmem>>, vector<1x1x128x128xbf16>
    %12 = vector.shape_cast %11 : vector<1x1x128x128xbf16> to vector<128x128xbf16>
    %cst_14 = arith.constant dense<0.000000e+00> : vector<64x128xf32>
    %13 = tpu.matmul %10, %12, %cst_14 {dimension_numbers = #tpu.dot_dimension_numbers<[1], [0], [0], [1], [0, 0, 1, 1], [], []>} : vector<64x128xbf16>, vector<128x128xbf16>, vector<64x128xf32> -> vector<64x128xf32>
    %14 = arith.addf %7, %13 : vector<64x128xf32>
    %c0_15 = arith.constant 0 : index
    %c0_16 = arith.constant 0 : index
    %c1_17 = arith.constant 1 : index
    %c0_18 = arith.constant 0 : index
    %15 = vector.load %arg2[%c0_15, %c0_16, %c1_17, %c0_18] : memref<1x9x9x512xbf16, #tpu.memory_space<vmem>>, vector<1x8x8x128xbf16>
    %16 = vector.shape_cast %15 : vector<1x8x8x128xbf16> to vector<8x8x128xbf16>
    %17 = vector.shape_cast %16 : vector<8x8x128xbf16> to vector<64x128xbf16>
    %c0_19 = arith.constant 0 : index
    %c2 = arith.constant 2 : index
    %c0_20 = arith.constant 0 : index
    %c0_21 = arith.constant 0 : index
    %18 = vector.load %arg3[%c0_19, %c2, %c0_20, %c0_21] : memref<3x3x128x128xbf16, #tpu.memory_space<vmem>>, vector<1x1x128x128xbf16>
    %19 = vector.shape_cast %18 : vector<1x1x128x128xbf16> to vector<128x128xbf16>
    %cst_22 = arith.constant dense<0.000000e+00> : vector<64x128xf32>
    %20 = tpu.matmul %17, %19, %cst_22 {dimension_numbers = #tpu.dot_dimension_numbers<[1], [0], [0], [1], [0, 0, 1, 1], [], []>} : vector<64x128xbf16>, vector<128x128xbf16>, vector<64x128xf32> -> vector<64x128xf32>
    %21 = arith.addf %14, %20 : vector<64x128xf32>
    %c0_23 = arith.constant 0 : index
    %c0_24 = arith.constant 0 : index
    %c0_25 = arith.constant 0 : index
    %c256 = arith.constant 256 : index
    %22 = vector.load %arg2[%c0_23, %c0_24, %c0_25, %c256] : memref<1x9x9x512xbf16, #tpu.memory_space<vmem>>, vector<1x8x8x128xbf16>
    %23 = vector.shape_cast %22 : vector<1x8x8x128xbf16> to vector<8x8x128xbf16>
    %24 = vector.shape_cast %23 : vector<8x8x128xbf16> to vector<64x128xbf16>
    %c1_26 = arith.constant 1 : index
    %c0_27 = arith.constant 0 : index
    %c0_28 = arith.constant 0 : index
    %c0_29 = arith.constant 0 : index
    %25 = vector.load %arg3[%c1_26, %c0_27, %c0_28, %c0_29] : memref<3x3x128x128xbf16, #tpu.memory_space<vmem>>, vector<1x1x128x128xbf16>
    %26 = vector.shape_cast %25 : vector<1x1x128x128xbf16> to vector<128x128xbf16>
    %cst_30 = arith.constant dense<0.000000e+00> : vector<64x128xf32>
    %27 = tpu.matmul %24, %26, %cst_30 {dimension_numbers = #tpu.dot_dimension_numbers<[1], [0], [0], [1], [0, 0, 1, 1], [], []>} : vector<64x128xbf16>, vector<128x128xbf16>, vector<64x128xf32> -> vector<64x128xf32>
    %28 = arith.addf %21, %27 : vector<64x128xf32>
    %c0_31 = arith.constant 0 : index
    %c0_32 = arith.constant 0 : index
    %c0_33 = arith.constant 0 : index
    %c384 = arith.constant 384 : index
    %29 = vector.load %arg2[%c0_31, %c0_32, %c0_33, %c384] : memref<1x9x9x512xbf16, #tpu.memory_space<vmem>>, vector<1x8x8x128xbf16>
    %30 = vector.shape_cast %29 : vector<1x8x8x128xbf16> to vector<8x8x128xbf16>
    %31 = vector.shape_cast %30 : vector<8x8x128xbf16> to vector<64x128xbf16>
    %c1_34 = arith.constant 1 : index
    %c1_35 = arith.constant 1 : index
    %c0_36 = arith.constant 0 : index
    %c0_37 = arith.constant 0 : index
    %32 = vector.load %arg3[%c1_34, %c1_35, %c0_36, %c0_37] : memref<3x3x128x128xbf16, #tpu.memory_space<vmem>>, vector<1x1x128x128xbf16>
    %33 = vector.shape_cast %32 : vector<1x1x128x128xbf16> to vector<128x128xbf16>
    %cst_38 = arith.constant dense<0.000000e+00> : vector<64x128xf32>
    %34 = tpu.matmul %31, %33, %cst_38 {dimension_numbers = #tpu.dot_dimension_numbers<[1], [0], [0], [1], [0, 0, 1, 1], [], []>} : vector<64x128xbf16>, vector<128x128xbf16>, vector<64x128xf32> -> vector<64x128xf32>
    %35 = arith.addf %28, %34 : vector<64x128xf32>
    %c0_39 = arith.constant 0 : index
    %c0_40 = arith.constant 0 : index
    %c1_41 = arith.constant 1 : index
    %c256_42 = arith.constant 256 : index
    %36 = vector.load %arg2[%c0_39, %c0_40, %c1_41, %c256_42] : memref<1x9x9x512xbf16, #tpu.memory_space<vmem>>, vector<1x8x8x128xbf16>
    %37 = vector.shape_cast %36 : vector<1x8x8x128xbf16> to vector<8x8x128xbf16>
    %38 = vector.shape_cast %37 : vector<8x8x128xbf16> to vector<64x128xbf16>
    %c1_43 = arith.constant 1 : index
    %c2_44 = arith.constant 2 : index
    %c0_45 = arith.constant 0 : index
    %c0_46 = arith.constant 0 : index
    %39 = vector.load %arg3[%c1_43, %c2_44, %c0_45, %c0_46] : memref<3x3x128x128xbf16, #tpu.memory_space<vmem>>, vector<1x1x128x128xbf16>
    %40 = vector.shape_cast %39 : vector<1x1x128x128xbf16> to vector<128x128xbf16>
    %cst_47 = arith.constant dense<0.000000e+00> : vector<64x128xf32>
    %41 = tpu.matmul %38, %40, %cst_47 {dimension_numbers = #tpu.dot_dimension_numbers<[1], [0], [0], [1], [0, 0, 1, 1], [], []>} : vector<64x128xbf16>, vector<128x128xbf16>, vector<64x128xf32> -> vector<64x128xf32>
    %42 = arith.addf %35, %41 : vector<64x128xf32>
    %c0_48 = arith.constant 0 : index
    %c1_49 = arith.constant 1 : index
    %c0_50 = arith.constant 0 : index
    %c0_51 = arith.constant 0 : index
    %43 = vector.load %arg2[%c0_48, %c1_49, %c0_50, %c0_51] : memref<1x9x9x512xbf16, #tpu.memory_space<vmem>>, vector<1x8x8x128xbf16>
    %44 = vector.shape_cast %43 : vector<1x8x8x128xbf16> to vector<8x8x128xbf16>
    %45 = vector.shape_cast %44 : vector<8x8x128xbf16> to vector<64x128xbf16>
    %c2_52 = arith.constant 2 : index
    %c0_53 = arith.constant 0 : index
    %c0_54 = arith.constant 0 : index
    %c0_55 = arith.constant 0 : index
    %46 = vector.load %arg3[%c2_52, %c0_53, %c0_54, %c0_55] : memref<3x3x128x128xbf16, #tpu.memory_space<vmem>>, vector<1x1x128x128xbf16>
    %47 = vector.shape_cast %46 : vector<1x1x128x128xbf16> to vector<128x128xbf16>
    %cst_56 = arith.constant dense<0.000000e+00> : vector<64x128xf32>
    %48 = tpu.matmul %45, %47, %cst_56 {dimension_numbers = #tpu.dot_dimension_numbers<[1], [0], [0], [1], [0, 0, 1, 1], [], []>} : vector<64x128xbf16>, vector<128x128xbf16>, vector<64x128xf32> -> vector<64x128xf32>
    %49 = arith.addf %42, %48 : vector<64x128xf32>
    %c0_57 = arith.constant 0 : index
    %c1_58 = arith.constant 1 : index
    %c0_59 = arith.constant 0 : index
    %c128_60 = arith.constant 128 : index
    %50 = vector.load %arg2[%c0_57, %c1_58, %c0_59, %c128_60] : memref<1x9x9x512xbf16, #tpu.memory_space<vmem>>, vector<1x8x8x128xbf16>
    %51 = vector.shape_cast %50 : vector<1x8x8x128xbf16> to vector<8x8x128xbf16>
    %52 = vector.shape_cast %51 : vector<8x8x128xbf16> to vector<64x128xbf16>
    %c2_61 = arith.constant 2 : index
    %c1_62 = arith.constant 1 : index
    %c0_63 = arith.constant 0 : index
    %c0_64 = arith.constant 0 : index
    %53 = vector.load %arg3[%c2_61, %c1_62, %c0_63, %c0_64] : memref<3x3x128x128xbf16, #tpu.memory_space<vmem>>, vector<1x1x128x128xbf16>
    %54 = vector.shape_cast %53 : vector<1x1x128x128xbf16> to vector<128x128xbf16>
    %cst_65 = arith.constant dense<0.000000e+00> : vector<64x128xf32>
    %55 = tpu.matmul %52, %54, %cst_65 {dimension_numbers = #tpu.dot_dimension_numbers<[1], [0], [0], [1], [0, 0, 1, 1], [], []>} : vector<64x128xbf16>, vector<128x128xbf16>, vector<64x128xf32> -> vector<64x128xf32>
    %56 = arith.addf %49, %55 : vector<64x128xf32>
    %c0_66 = arith.constant 0 : index
    %c1_67 = arith.constant 1 : index
    %c1_68 = arith.constant 1 : index
    %c0_69 = arith.constant 0 : index
    %57 = vector.load %arg2[%c0_66, %c1_67, %c1_68, %c0_69] : memref<1x9x9x512xbf16, #tpu.memory_space<vmem>>, vector<1x8x8x128xbf16>
    %58 = vector.shape_cast %57 : vector<1x8x8x128xbf16> to vector<8x8x128xbf16>
    %59 = vector.shape_cast %58 : vector<8x8x128xbf16> to vector<64x128xbf16>
    %c2_70 = arith.constant 2 : index
    %c2_71 = arith.constant 2 : index
    %c0_72 = arith.constant 0 : index
    %c0_73 = arith.constant 0 : index
    %60 = vector.load %arg3[%c2_70, %c2_71, %c0_72, %c0_73] : memref<3x3x128x128xbf16, #tpu.memory_space<vmem>>, vector<1x1x128x128xbf16>
    %61 = vector.shape_cast %60 : vector<1x1x128x128xbf16> to vector<128x128xbf16>
    %cst_74 = arith.constant dense<0.000000e+00> : vector<64x128xf32>
    %62 = tpu.matmul %59, %61, %cst_74 {dimension_numbers = #tpu.dot_dimension_numbers<[1], [0], [0], [1], [0, 0, 1, 1], [], []>} : vector<64x128xbf16>, vector<128x128xbf16>, vector<64x128xf32> -> vector<64x128xf32>
    %63 = arith.addf %56, %62 : vector<64x128xf32>
    %c0_75 = arith.constant 0 : index
    %c0_76 = arith.constant 0 : index
    %64 = vector.load %arg4[%c0_75, %c0_76] : memref<1x128xf32, #tpu.memory_space<vmem>>, vector<1x128xf32>
    %65 = vector.broadcast %64 : vector<1x128xf32> to vector<64x128xf32>
    %66 = arith.addf %63, %65 : vector<64x128xf32>
    %cst_77 = arith.constant 0.000000e+00 : f32
    %67 = vector.broadcast %cst_77 : f32 to vector<64x128xf32>
    %68 = arith.cmpf ogt, %66, %67 : vector<64x128xf32>
    %cst_78 = arith.constant 1.000000e-01 : f32
    %69 = vector.broadcast %cst_78 : f32 to vector<64x128xf32>
    %70 = arith.mulf %69, %66 : vector<64x128xf32>
    %71 = arith.select %68, %66, %70 : vector<64x128xi1>, vector<64x128xf32>
    %72 = arith.truncf %71 : vector<64x128xf32> to vector<64x128xbf16>
    %c0_79 = arith.constant 0 : index
    %c0_80 = arith.constant 0 : index
    %c0_81 = arith.constant 0 : index
    %73 = vector.load %arg5[%c0_79, %c0_80, %c0_81] : memref<1x64x128xbf16, #tpu.memory_space<vmem>>, vector<1x64x128xbf16>
    %74 = vector.shape_cast %73 : vector<1x64x128xbf16> to vector<64x128xbf16>
    %75 = vector.shape_cast %72 : vector<64x128xbf16> to vector<1x64x128xbf16>
    tpu.vector_store %arg5[%c0_79, %c0_80, %c0_81], %75 {strides = array<i32>} : memref<1x64x128xbf16, #tpu.memory_space<vmem>>, vector<1x64x128xbf16>,
    return
  }
  func.func @transform_0(%arg0: i32, %arg1: i32) -> (i32, i32, i32, i32) {
    %c0_i32 = arith.constant 0 : i32
    %c0_i32_0 = arith.constant 0 : i32
    %c0_i32_1 = arith.constant 0 : i32
    %c0_i32_2 = arith.constant 0 : i32
    return %arg0, %c0_i32, %c0_i32_0, %c0_i32_1 : i32, i32, i32, i32
  }
  func.func @transform_1(%arg0: i32, %arg1: i32) -> (i32, i32, i32, i32) {
    %c0_i32 = arith.constant 0 : i32
    %c0_i32_0 = arith.constant 0 : i32
    %c0_i32_1 = arith.constant 0 : i32
    %c0_i32_2 = arith.constant 0 : i32
    return %c0_i32, %c0_i32_0, %c0_i32_1, %arg1 : i32, i32, i32, i32
  }
  func.func @transform_2(%arg0: i32, %arg1: i32) -> (i32, i32) {
    %c0_i32 = arith.constant 0 : i32
    %c0_i32_0 = arith.constant 0 : i32
    return %c0_i32, %arg1 : i32, i32
  }
  func.func @transform_3(%arg0: i32, %arg1: i32) -> (i32, i32, i32) {
    %c0_i32 = arith.constant 0 : i32
    %c0_i32_0 = arith.constant 0 : i32
    return %arg0, %c0_i32, %arg1 : i32, i32, i32
  }
}

module attributes {stable_mosaic.version = 11 : i64} {
  func.func @_add_kernel(%arg0: i32, %arg1: memref<128x128xbf16, #tpu.memory_space<vmem>>, %arg2: memref<128x128xbf16, #tpu.memory_space<vmem>>, %arg3: memref<128x128xbf16, #tpu.memory_space<vmem>>) attributes {dimension_semantics = [#tpu.dimension_semantics<parallel>], iteration_bounds = array<i64: 1>, scalar_prefetch = 0 : i64, scratch_operands = 0 : i64, tpu.core_type = #tpu.core_type<tc>, window_params = [{transform_indices = @transform_0, window_bounds = array<i64: 128, 128>}, {transform_indices = @transform_1, window_bounds = array<i64: 128, 128>}, {transform_indices = @transform_2, window_bounds = array<i64: 128, 128>}]} {
    %c0 = arith.constant 0 : index
    %c0_0 = arith.constant 0 : index
    %0 = vector.load %arg1[%c0, %c0_0] : memref<128x128xbf16, #tpu.memory_space<vmem>>, vector<128x128xbf16>
    %1 = arith.extf %0 : vector<128x128xbf16> to vector<128x128xf32>
    %c0_1 = arith.constant 0 : index
    %c0_2 = arith.constant 0 : index
    %2 = vector.load %arg2[%c0_1, %c0_2] : memref<128x128xbf16, #tpu.memory_space<vmem>>, vector<128x128xbf16>
    %3 = arith.extf %2 : vector<128x128xbf16> to vector<128x128xf32>
    %4 = arith.addf %1, %3 : vector<128x128xf32>
    %5 = arith.truncf %4 : vector<128x128xf32> to vector<128x128xbf16>
    %c0_3 = arith.constant 0 : index
    %c0_4 = arith.constant 0 : index
    %6 = vector.load %arg3[%c0_3, %c0_4] : memref<128x128xbf16, #tpu.memory_space<vmem>>, vector<128x128xbf16>
    tpu.vector_store %arg3[%c0_3, %c0_4], %5 {strides = array<i32>} : memref<128x128xbf16, #tpu.memory_space<vmem>>, vector<128x128xbf16>,
    return
  }
  func.func @transform_0(%arg0: i32) -> (i32, i32) {
    %c0_i32 = arith.constant 0 : i32
    %c0_i32_0 = arith.constant 0 : i32
    return %arg0, %c0_i32 : i32, i32
  }
  func.func @transform_1(%arg0: i32) -> (i32, i32) {
    %c0_i32 = arith.constant 0 : i32
    %c0_i32_0 = arith.constant 0 : i32
    return %arg0, %c0_i32 : i32, i32
  }
  func.func @transform_2(%arg0: i32) -> (i32, i32) {
    %c0_i32 = arith.constant 0 : i32
    %c0_i32_0 = arith.constant 0 : i32
    return %arg0, %c0_i32 : i32, i32
  }
}

module attributes {stable_mosaic.version = 11 : i64} {
  func.func @_conv_kernel(%arg0: i32, %arg1: i32, %arg2: memref<1x8x8x128xbf16, #tpu.memory_space<vmem>>, %arg3: memref<1x1x128x128xbf16, #tpu.memory_space<vmem>>, %arg4: memref<1x128xf32, #tpu.memory_space<vmem>>, %arg5: memref<1x64x128xbf16, #tpu.memory_space<vmem>>) attributes {dimension_semantics = [#tpu.dimension_semantics<parallel>, #tpu.dimension_semantics<parallel>], iteration_bounds = array<i64: 2, 1>, scalar_prefetch = 0 : i64, scratch_operands = 0 : i64, tpu.core_type = #tpu.core_type<tc>, window_params = [{transform_indices = @transform_0, window_bounds = array<i64: 1, 8, 8, 128>}, {transform_indices = @transform_1, window_bounds = array<i64: 1, 1, 128, 128>}, {transform_indices = @transform_2, window_bounds = array<i64: 1, 128>}, {transform_indices = @transform_3, window_bounds = array<i64: 1, 64, 128>}]} {
    %cst = arith.constant 0.000000e+00 : f32
    %0 = vector.broadcast %cst : f32 to vector<64x128xf32>
    %c0 = arith.constant 0 : index
    %c0_0 = arith.constant 0 : index
    %c0_1 = arith.constant 0 : index
    %c0_2 = arith.constant 0 : index
    %1 = vector.load %arg2[%c0, %c0_0, %c0_1, %c0_2] : memref<1x8x8x128xbf16, #tpu.memory_space<vmem>>, vector<1x8x8x128xbf16>
    %2 = vector.shape_cast %1 : vector<1x8x8x128xbf16> to vector<8x8x128xbf16>
    %3 = vector.shape_cast %2 : vector<8x8x128xbf16> to vector<64x128xbf16>
    %c0_3 = arith.constant 0 : index
    %c0_4 = arith.constant 0 : index
    %c0_5 = arith.constant 0 : index
    %c0_6 = arith.constant 0 : index
    %4 = vector.load %arg3[%c0_3, %c0_4, %c0_5, %c0_6] : memref<1x1x128x128xbf16, #tpu.memory_space<vmem>>, vector<1x1x128x128xbf16>
    %5 = vector.shape_cast %4 : vector<1x1x128x128xbf16> to vector<128x128xbf16>
    %cst_7 = arith.constant dense<0.000000e+00> : vector<64x128xf32>
    %6 = tpu.matmul %3, %5, %cst_7 {dimension_numbers = #tpu.dot_dimension_numbers<[1], [0], [0], [1], [0, 0, 1, 1], [], []>} : vector<64x128xbf16>, vector<128x128xbf16>, vector<64x128xf32> -> vector<64x128xf32>
    %7 = arith.addf %0, %6 : vector<64x128xf32>
    %c0_8 = arith.constant 0 : index
    %c0_9 = arith.constant 0 : index
    %8 = vector.load %arg4[%c0_8, %c0_9] : memref<1x128xf32, #tpu.memory_space<vmem>>, vector<1x128xf32>
    %9 = vector.broadcast %8 : vector<1x128xf32> to vector<64x128xf32>
    %10 = arith.addf %7, %9 : vector<64x128xf32>
    %11 = arith.truncf %10 : vector<64x128xf32> to vector<64x128xbf16>
    %c0_10 = arith.constant 0 : index
    %c0_11 = arith.constant 0 : index
    %c0_12 = arith.constant 0 : index
    %12 = vector.load %arg5[%c0_10, %c0_11, %c0_12] : memref<1x64x128xbf16, #tpu.memory_space<vmem>>, vector<1x64x128xbf16>
    %13 = vector.shape_cast %12 : vector<1x64x128xbf16> to vector<64x128xbf16>
    %14 = vector.shape_cast %11 : vector<64x128xbf16> to vector<1x64x128xbf16>
    tpu.vector_store %arg5[%c0_10, %c0_11, %c0_12], %14 {strides = array<i32>} : memref<1x64x128xbf16, #tpu.memory_space<vmem>>, vector<1x64x128xbf16>,
    return
  }
  func.func @transform_0(%arg0: i32, %arg1: i32) -> (i32, i32, i32, i32) {
    %c0_i32 = arith.constant 0 : i32
    %c0_i32_0 = arith.constant 0 : i32
    %c0_i32_1 = arith.constant 0 : i32
    %c0_i32_2 = arith.constant 0 : i32
    return %arg0, %c0_i32, %c0_i32_0, %c0_i32_1 : i32, i32, i32, i32
  }
  func.func @transform_1(%arg0: i32, %arg1: i32) -> (i32, i32, i32, i32) {
    %c0_i32 = arith.constant 0 : i32
    %c0_i32_0 = arith.constant 0 : i32
    %c0_i32_1 = arith.constant 0 : i32
    %c0_i32_2 = arith.constant 0 : i32
    return %c0_i32, %c0_i32_0, %c0_i32_1, %arg1 : i32, i32, i32, i32
  }
  func.func @transform_2(%arg0: i32, %arg1: i32) -> (i32, i32) {
    %c0_i32 = arith.constant 0 : i32
    %c0_i32_0 = arith.constant 0 : i32
    return %c0_i32, %arg1 : i32, i32
  }
  func.func @transform_3(%arg0: i32, %arg1: i32) -> (i32, i32, i32) {
    %c0_i32 = arith.constant 0 : i32
    %c0_i32_0 = arith.constant 0 : i32
    return %arg0, %c0_i32, %arg1 : i32, i32, i32
  }
}

module attributes {stable_mosaic.version = 11 : i64} {
  func.func @_upsample2_kernel(%arg0: i32, %arg1: i32, %arg2: memref<1x10x10x128xbf16, #tpu.memory_space<vmem>>, %arg3: memref<1x8x8x128xbf16, #tpu.memory_space<vmem>>, %arg4: memref<1x8x8x128xbf16, #tpu.memory_space<vmem>>, %arg5: memref<1x8x8x128xbf16, #tpu.memory_space<vmem>>, %arg6: memref<1x8x8x128xbf16, #tpu.memory_space<vmem>>) attributes {dimension_semantics = [#tpu.dimension_semantics<parallel>, #tpu.dimension_semantics<parallel>], iteration_bounds = array<i64: 2, 1>, scalar_prefetch = 0 : i64, scratch_operands = 0 : i64, tpu.core_type = #tpu.core_type<tc>, window_params = [{transform_indices = @transform_0, window_bounds = array<i64: 1, 10, 10, 128>}, {transform_indices = @transform_1, window_bounds = array<i64: 1, 8, 8, 128>}, {transform_indices = @transform_2, window_bounds = array<i64: 1, 8, 8, 128>}, {transform_indices = @transform_3, window_bounds = array<i64: 1, 8, 8, 128>}, {transform_indices = @transform_4, window_bounds = array<i64: 1, 8, 8, 128>}]} {
    %c0 = arith.constant 0 : index
    %c0_0 = arith.constant 0 : index
    %c0_1 = arith.constant 0 : index
    %c0_2 = arith.constant 0 : index
    %0 = vector.load %arg2[%c0, %c0_0, %c0_1, %c0_2] : memref<1x10x10x128xbf16, #tpu.memory_space<vmem>>, vector<1x10x10x128xbf16>
    %1 = vector.shape_cast %0 : vector<1x10x10x128xbf16> to vector<10x10x128xbf16>
    %2 = arith.extf %1 : vector<10x10x128xbf16> to vector<10x10x128xf32>
    %3 = vector.extract_strided_slice %2 {offsets = [1, 0, 0], sizes = [8, 10, 128], strides = [1, 1, 1]} : vector<10x10x128xf32> to vector<8x10x128xf32>
    %4 = vector.extract_strided_slice %2 {offsets = [0, 0, 0], sizes = [8, 10, 128], strides = [1, 1, 1]} : vector<10x10x128xf32> to vector<8x10x128xf32>
    %5 = vector.extract_strided_slice %2 {offsets = [2, 0, 0], sizes = [8, 10, 128], strides = [1, 1, 1]} : vector<10x10x128xf32> to vector<8x10x128xf32>
    %cst = arith.constant 2.500000e-01 : f32
    %6 = vector.broadcast %cst : f32 to vector<8x10x128xf32>
    %7 = arith.mulf %6, %4 : vector<8x10x128xf32>
    %cst_3 = arith.constant 7.500000e-01 : f32
    %8 = vector.broadcast %cst_3 : f32 to vector<8x10x128xf32>
    %9 = arith.mulf %8, %3 : vector<8x10x128xf32>
    %10 = arith.addf %7, %9 : vector<8x10x128xf32>
    %cst_4 = arith.constant 7.500000e-01 : f32
    %11 = vector.broadcast %cst_4 : f32 to vector<8x10x128xf32>
    %12 = arith.mulf %11, %3 : vector<8x10x128xf32>
    %cst_5 = arith.constant 2.500000e-01 : f32
    %13 = vector.broadcast %cst_5 : f32 to vector<8x10x128xf32>
    %14 = arith.mulf %13, %5 : vector<8x10x128xf32>
    %15 = arith.addf %12, %14 : vector<8x10x128xf32>
    %16 = vector.extract_strided_slice %10 {offsets = [0, 0, 0], sizes = [8, 8, 128], strides = [1, 1, 1]} : vector<8x10x128xf32> to vector<8x8x128xf32>
    %cst_6 = arith.constant 2.500000e-01 : f32
    %17 = vector.broadcast %cst_6 : f32 to vector<8x8x128xf32>
    %18 = arith.mulf %17, %16 : vector<8x8x128xf32>
    %19 = vector.extract_strided_slice %10 {offsets = [0, 1, 0], sizes = [8, 8, 128], strides = [1, 1, 1]} : vector<8x10x128xf32> to vector<8x8x128xf32>
    %cst_7 = arith.constant 7.500000e-01 : f32
    %20 = vector.broadcast %cst_7 : f32 to vector<8x8x128xf32>
    %21 = arith.mulf %20, %19 : vector<8x8x128xf32>
    %22 = arith.addf %18, %21 : vector<8x8x128xf32>
    %23 = arith.truncf %22 : vector<8x8x128xf32> to vector<8x8x128xbf16>
    %c0_8 = arith.constant 0 : index
    %c0_9 = arith.constant 0 : index
    %c0_10 = arith.constant 0 : index
    %c0_11 = arith.constant 0 : index
    %24 = vector.load %arg3[%c0_8, %c0_9, %c0_10, %c0_11] : memref<1x8x8x128xbf16, #tpu.memory_space<vmem>>, vector<1x8x8x128xbf16>
    %25 = vector.shape_cast %24 : vector<1x8x8x128xbf16> to vector<8x8x128xbf16>
    %26 = vector.shape_cast %23 : vector<8x8x128xbf16> to vector<1x8x8x128xbf16>
    tpu.vector_store %arg3[%c0_8, %c0_9, %c0_10, %c0_11], %26 {strides = array<i32>} : memref<1x8x8x128xbf16, #tpu.memory_space<vmem>>, vector<1x8x8x128xbf16>,
    %27 = vector.extract_strided_slice %10 {offsets = [0, 1, 0], sizes = [8, 8, 128], strides = [1, 1, 1]} : vector<8x10x128xf32> to vector<8x8x128xf32>
    %cst_12 = arith.constant 7.500000e-01 : f32
    %28 = vector.broadcast %cst_12 : f32 to vector<8x8x128xf32>
    %29 = arith.mulf %28, %27 : vector<8x8x128xf32>
    %30 = vector.extract_strided_slice %10 {offsets = [0, 2, 0], sizes = [8, 8, 128], strides = [1, 1, 1]} : vector<8x10x128xf32> to vector<8x8x128xf32>
    %cst_13 = arith.constant 2.500000e-01 : f32
    %31 = vector.broadcast %cst_13 : f32 to vector<8x8x128xf32>
    %32 = arith.mulf %31, %30 : vector<8x8x128xf32>
    %33 = arith.addf %29, %32 : vector<8x8x128xf32>
    %34 = arith.truncf %33 : vector<8x8x128xf32> to vector<8x8x128xbf16>
    %c0_14 = arith.constant 0 : index
    %c0_15 = arith.constant 0 : index
    %c0_16 = arith.constant 0 : index
    %c0_17 = arith.constant 0 : index
    %35 = vector.load %arg4[%c0_14, %c0_15, %c0_16, %c0_17] : memref<1x8x8x128xbf16, #tpu.memory_space<vmem>>, vector<1x8x8x128xbf16>
    %36 = vector.shape_cast %35 : vector<1x8x8x128xbf16> to vector<8x8x128xbf16>
    %37 = vector.shape_cast %34 : vector<8x8x128xbf16> to vector<1x8x8x128xbf16>
    tpu.vector_store %arg4[%c0_14, %c0_15, %c0_16, %c0_17], %37 {strides = array<i32>} : memref<1x8x8x128xbf16, #tpu.memory_space<vmem>>, vector<1x8x8x128xbf16>,
    %38 = vector.extract_strided_slice %15 {offsets = [0, 0, 0], sizes = [8, 8, 128], strides = [1, 1, 1]} : vector<8x10x128xf32> to vector<8x8x128xf32>
    %cst_18 = arith.constant 2.500000e-01 : f32
    %39 = vector.broadcast %cst_18 : f32 to vector<8x8x128xf32>
    %40 = arith.mulf %39, %38 : vector<8x8x128xf32>
    %41 = vector.extract_strided_slice %15 {offsets = [0, 1, 0], sizes = [8, 8, 128], strides = [1, 1, 1]} : vector<8x10x128xf32> to vector<8x8x128xf32>
    %cst_19 = arith.constant 7.500000e-01 : f32
    %42 = vector.broadcast %cst_19 : f32 to vector<8x8x128xf32>
    %43 = arith.mulf %42, %41 : vector<8x8x128xf32>
    %44 = arith.addf %40, %43 : vector<8x8x128xf32>
    %45 = arith.truncf %44 : vector<8x8x128xf32> to vector<8x8x128xbf16>
    %c0_20 = arith.constant 0 : index
    %c0_21 = arith.constant 0 : index
    %c0_22 = arith.constant 0 : index
    %c0_23 = arith.constant 0 : index
    %46 = vector.load %arg5[%c0_20, %c0_21, %c0_22, %c0_23] : memref<1x8x8x128xbf16, #tpu.memory_space<vmem>>, vector<1x8x8x128xbf16>
    %47 = vector.shape_cast %46 : vector<1x8x8x128xbf16> to vector<8x8x128xbf16>
    %48 = vector.shape_cast %45 : vector<8x8x128xbf16> to vector<1x8x8x128xbf16>
    tpu.vector_store %arg5[%c0_20, %c0_21, %c0_22, %c0_23], %48 {strides = array<i32>} : memref<1x8x8x128xbf16, #tpu.memory_space<vmem>>, vector<1x8x8x128xbf16>,
    %49 = vector.extract_strided_slice %15 {offsets = [0, 1, 0], sizes = [8, 8, 128], strides = [1, 1, 1]} : vector<8x10x128xf32> to vector<8x8x128xf32>
    %cst_24 = arith.constant 7.500000e-01 : f32
    %50 = vector.broadcast %cst_24 : f32 to vector<8x8x128xf32>
    %51 = arith.mulf %50, %49 : vector<8x8x128xf32>
    %52 = vector.extract_strided_slice %15 {offsets = [0, 2, 0], sizes = [8, 8, 128], strides = [1, 1, 1]} : vector<8x10x128xf32> to vector<8x8x128xf32>
    %cst_25 = arith.constant 2.500000e-01 : f32
    %53 = vector.broadcast %cst_25 : f32 to vector<8x8x128xf32>
    %54 = arith.mulf %53, %52 : vector<8x8x128xf32>
    %55 = arith.addf %51, %54 : vector<8x8x128xf32>
    %56 = arith.truncf %55 : vector<8x8x128xf32> to vector<8x8x128xbf16>
    %c0_26 = arith.constant 0 : index
    %c0_27 = arith.constant 0 : index
    %c0_28 = arith.constant 0 : index
    %c0_29 = arith.constant 0 : index
    %57 = vector.load %arg6[%c0_26, %c0_27, %c0_28, %c0_29] : memref<1x8x8x128xbf16, #tpu.memory_space<vmem>>, vector<1x8x8x128xbf16>
    %58 = vector.shape_cast %57 : vector<1x8x8x128xbf16> to vector<8x8x128xbf16>
    %59 = vector.shape_cast %56 : vector<8x8x128xbf16> to vector<1x8x8x128xbf16>
    tpu.vector_store %arg6[%c0_26, %c0_27, %c0_28, %c0_29], %59 {strides = array<i32>} : memref<1x8x8x128xbf16, #tpu.memory_space<vmem>>, vector<1x8x8x128xbf16>,
    return
  }
  func.func @transform_0(%arg0: i32, %arg1: i32) -> (i32, i32, i32, i32) {
    %c0_i32 = arith.constant 0 : i32
    %c0_i32_0 = arith.constant 0 : i32
    %c0_i32_1 = arith.constant 0 : i32
    return %arg0, %c0_i32, %c0_i32_0, %arg1 : i32, i32, i32, i32
  }
  func.func @transform_1(%arg0: i32, %arg1: i32) -> (i32, i32, i32, i32) {
    %c0_i32 = arith.constant 0 : i32
    %c0_i32_0 = arith.constant 0 : i32
    %c0_i32_1 = arith.constant 0 : i32
    return %arg0, %c0_i32, %c0_i32_0, %arg1 : i32, i32, i32, i32
  }
  func.func @transform_2(%arg0: i32, %arg1: i32) -> (i32, i32, i32, i32) {
    %c0_i32 = arith.constant 0 : i32
    %c0_i32_0 = arith.constant 0 : i32
    %c0_i32_1 = arith.constant 0 : i32
    return %arg0, %c0_i32, %c0_i32_0, %arg1 : i32, i32, i32, i32
  }
  func.func @transform_3(%arg0: i32, %arg1: i32) -> (i32, i32, i32, i32) {
    %c0_i32 = arith.constant 0 : i32
    %c0_i32_0 = arith.constant 0 : i32
    %c0_i32_1 = arith.constant 0 : i32
    return %arg0, %c0_i32, %c0_i32_0, %arg1 : i32, i32, i32, i32
  }
  func.func @transform_4(%arg0: i32, %arg1: i32) -> (i32, i32, i32, i32) {
    %c0_i32 = arith.constant 0 : i32
    %c0_i32_0 = arith.constant 0 : i32
    %c0_i32_1 = arith.constant 0 : i32
    return %arg0, %c0_i32, %c0_i32_0, %arg1 : i32, i32, i32, i32
  }
}

module attributes {stable_mosaic.version = 11 : i64} {
  func.func @_conv_kernel(%arg0: i32, %arg1: i32, %arg2: memref<1x16x16x256xbf16, #tpu.memory_space<vmem>>, %arg3: memref<1x1x256x128xbf16, #tpu.memory_space<vmem>>, %arg4: memref<1x128xf32, #tpu.memory_space<vmem>>, %arg5: memref<1x256x128xbf16, #tpu.memory_space<vmem>>) attributes {dimension_semantics = [#tpu.dimension_semantics<parallel>, #tpu.dimension_semantics<parallel>], iteration_bounds = array<i64: 2, 1>, scalar_prefetch = 0 : i64, scratch_operands = 0 : i64, tpu.core_type = #tpu.core_type<tc>, window_params = [{transform_indices = @transform_0, window_bounds = array<i64: 1, 16, 16, 256>}, {transform_indices = @transform_1, window_bounds = array<i64: 1, 1, 256, 128>}, {transform_indices = @transform_2, window_bounds = array<i64: 1, 128>}, {transform_indices = @transform_3, window_bounds = array<i64: 1, 256, 128>}]} {
    %cst = arith.constant 0.000000e+00 : f32
    %0 = vector.broadcast %cst : f32 to vector<256x128xf32>
    %c0 = arith.constant 0 : index
    %c0_0 = arith.constant 0 : index
    %c0_1 = arith.constant 0 : index
    %c0_2 = arith.constant 0 : index
    %1 = vector.load %arg2[%c0, %c0_0, %c0_1, %c0_2] : memref<1x16x16x256xbf16, #tpu.memory_space<vmem>>, vector<1x16x16x256xbf16>
    %2 = vector.shape_cast %1 : vector<1x16x16x256xbf16> to vector<16x16x256xbf16>
    %3 = vector.shape_cast %2 : vector<16x16x256xbf16> to vector<256x256xbf16>
    %c0_3 = arith.constant 0 : index
    %c0_4 = arith.constant 0 : index
    %c0_5 = arith.constant 0 : index
    %c0_6 = arith.constant 0 : index
    %4 = vector.load %arg3[%c0_3, %c0_4, %c0_5, %c0_6] : memref<1x1x256x128xbf16, #tpu.memory_space<vmem>>, vector<1x1x256x128xbf16>
    %5 = vector.shape_cast %4 : vector<1x1x256x128xbf16> to vector<256x128xbf16>
    %cst_7 = arith.constant dense<0.000000e+00> : vector<256x128xf32>
    %6 = tpu.matmul %3, %5, %cst_7 {dimension_numbers = #tpu.dot_dimension_numbers<[1], [0], [0], [1], [0, 0, 1, 1], [], []>} : vector<256x256xbf16>, vector<256x128xbf16>, vector<256x128xf32> -> vector<256x128xf32>
    %7 = arith.addf %0, %6 : vector<256x128xf32>
    %c0_8 = arith.constant 0 : index
    %c0_9 = arith.constant 0 : index
    %8 = vector.load %arg4[%c0_8, %c0_9] : memref<1x128xf32, #tpu.memory_space<vmem>>, vector<1x128xf32>
    %9 = vector.broadcast %8 : vector<1x128xf32> to vector<256x128xf32>
    %10 = arith.addf %7, %9 : vector<256x128xf32>
    %11 = arith.truncf %10 : vector<256x128xf32> to vector<256x128xbf16>
    %c0_10 = arith.constant 0 : index
    %c0_11 = arith.constant 0 : index
    %c0_12 = arith.constant 0 : index
    %12 = vector.load %arg5[%c0_10, %c0_11, %c0_12] : memref<1x256x128xbf16, #tpu.memory_space<vmem>>, vector<1x256x128xbf16>
    %13 = vector.shape_cast %12 : vector<1x256x128xbf16> to vector<256x128xbf16>
    %14 = vector.shape_cast %11 : vector<256x128xbf16> to vector<1x256x128xbf16>
    tpu.vector_store %arg5[%c0_10, %c0_11, %c0_12], %14 {strides = array<i32>} : memref<1x256x128xbf16, #tpu.memory_space<vmem>>, vector<1x256x128xbf16>,
    return
  }
  func.func @transform_0(%arg0: i32, %arg1: i32) -> (i32, i32, i32, i32) {
    %c0_i32 = arith.constant 0 : i32
    %c0_i32_0 = arith.constant 0 : i32
    %c0_i32_1 = arith.constant 0 : i32
    %c0_i32_2 = arith.constant 0 : i32
    return %arg0, %c0_i32, %c0_i32_0, %c0_i32_1 : i32, i32, i32, i32
  }
  func.func @transform_1(%arg0: i32, %arg1: i32) -> (i32, i32, i32, i32) {
    %c0_i32 = arith.constant 0 : i32
    %c0_i32_0 = arith.constant 0 : i32
    %c0_i32_1 = arith.constant 0 : i32
    %c0_i32_2 = arith.constant 0 : i32
    return %c0_i32, %c0_i32_0, %c0_i32_1, %arg1 : i32, i32, i32, i32
  }
  func.func @transform_2(%arg0: i32, %arg1: i32) -> (i32, i32) {
    %c0_i32 = arith.constant 0 : i32
    %c0_i32_0 = arith.constant 0 : i32
    return %c0_i32, %arg1 : i32, i32
  }
  func.func @transform_3(%arg0: i32, %arg1: i32) -> (i32, i32, i32) {
    %c0_i32 = arith.constant 0 : i32
    %c0_i32_0 = arith.constant 0 : i32
    return %arg0, %c0_i32, %arg1 : i32, i32, i32
  }
}

module attributes {stable_mosaic.version = 11 : i64} {
  func.func @_yolo_kernel(%arg0: i32, %arg1: memref<1x7x192xf32, #tpu.memory_space<vmem>>, %arg2: memref<4x192xf32, #tpu.memory_space<vmem>>, %arg3: memref<1x7x192xf32, #tpu.memory_space<vmem>>) attributes {dimension_semantics = [#tpu.dimension_semantics<parallel>], iteration_bounds = array<i64: 2>, scalar_prefetch = 0 : i64, scratch_operands = 0 : i64, tpu.core_type = #tpu.core_type<tc>, window_params = [{transform_indices = @transform_0, window_bounds = array<i64: 1, 7, 192>}, {pipeline_mode = #tpu.pipeline_mode<synchronous>, transform_indices = @transform_1, window_bounds = array<i64: 4, 192>}, {transform_indices = @transform_2, window_bounds = array<i64: 1, 7, 192>}]} {
    %c0 = arith.constant 0 : index
    %c0_0 = arith.constant 0 : index
    %c0_1 = arith.constant 0 : index
    %0 = vector.load %arg1[%c0, %c0_0, %c0_1] : memref<1x7x192xf32, #tpu.memory_space<vmem>>, vector<1x7x192xf32>
    %1 = vector.shape_cast %0 : vector<1x7x192xf32> to vector<7x192xf32>
    %c0_2 = arith.constant 0 : index
    %c0_3 = arith.constant 0 : index
    %2 = vector.load %arg2[%c0_2, %c0_3] : memref<4x192xf32, #tpu.memory_space<vmem>>, vector<2x192xf32>
    %c2 = arith.constant 2 : index
    %c0_4 = arith.constant 0 : index
    %3 = vector.load %arg2[%c2, %c0_4] : memref<4x192xf32, #tpu.memory_space<vmem>>, vector<2x192xf32>
    %4 = vector.extract_strided_slice %1 {offsets = [0, 0], sizes = [2, 192], strides = [1, 1]} : vector<7x192xf32> to vector<2x192xf32>
    %5 = arith.negf %4 : vector<2x192xf32>
    %6 = math.exp %5 : vector<2x192xf32>
    %cst = arith.constant 1.000000e+00 : f32
    %7 = vector.broadcast %cst : f32 to vector<2x192xf32>
    %8 = arith.addf %7, %6 : vector<2x192xf32>
    %9 = arith.divf %7, %8 : vector<2x192xf32>
    %10 = arith.addf %9, %2 : vector<2x192xf32>
    %cst_5 = arith.constant 2.000000e+00 : f32
    %11 = vector.broadcast %cst_5 : f32 to vector<2x192xf32>
    %12 = arith.mulf %10, %11 : vector<2x192xf32>
    %c0_6 = arith.constant 0 : index
    %c0_7 = arith.constant 0 : index
    %c0_8 = arith.constant 0 : index
    %13 = vector.load %arg3[%c0_6, %c0_7, %c0_8] : memref<1x7x192xf32, #tpu.memory_space<vmem>>, vector<1x2x192xf32>
    %14 = vector.shape_cast %13 : vector<1x2x192xf32> to vector<2x192xf32>
    %15 = vector.shape_cast %12 : vector<2x192xf32> to vector<1x2x192xf32>
    tpu.vector_store %arg3[%c0_6, %c0_7, %c0_8], %15 {strides = array<i32>} : memref<1x7x192xf32, #tpu.memory_space<vmem>>, vector<1x2x192xf32>,
    %16 = vector.extract_strided_slice %1 {offsets = [2, 0], sizes = [2, 192], strides = [1, 1]} : vector<7x192xf32> to vector<2x192xf32>
    %17 = math.exp %16 : vector<2x192xf32>
    %18 = arith.mulf %17, %3 : vector<2x192xf32>
    %cst_9 = arith.constant 2.000000e+00 : f32
    %19 = vector.broadcast %cst_9 : f32 to vector<2x192xf32>
    %20 = arith.mulf %18, %19 : vector<2x192xf32>
    %c0_10 = arith.constant 0 : index
    %c2_11 = arith.constant 2 : index
    %c0_12 = arith.constant 0 : index
    %21 = vector.load %arg3[%c0_10, %c2_11, %c0_12] : memref<1x7x192xf32, #tpu.memory_space<vmem>>, vector<1x2x192xf32>
    %22 = vector.shape_cast %21 : vector<1x2x192xf32> to vector<2x192xf32>
    %23 = vector.shape_cast %20 : vector<2x192xf32> to vector<1x2x192xf32>
    tpu.vector_store %arg3[%c0_10, %c2_11, %c0_12], %23 {strides = array<i32>} : memref<1x7x192xf32, #tpu.memory_space<vmem>>, vector<1x2x192xf32>,
    %24 = vector.extract_strided_slice %1 {offsets = [4, 0], sizes = [3, 192], strides = [1, 1]} : vector<7x192xf32> to vector<3x192xf32>
    %25 = arith.negf %24 : vector<3x192xf32>
    %26 = math.exp %25 : vector<3x192xf32>
    %cst_13 = arith.constant 1.000000e+00 : f32
    %27 = vector.broadcast %cst_13 : f32 to vector<3x192xf32>
    %28 = arith.addf %27, %26 : vector<3x192xf32>
    %29 = arith.divf %27, %28 : vector<3x192xf32>
    %c0_14 = arith.constant 0 : index
    %c4 = arith.constant 4 : index
    %c0_15 = arith.constant 0 : index
    %30 = vector.load %arg3[%c0_14, %c4, %c0_15] : memref<1x7x192xf32, #tpu.memory_space<vmem>>, vector<1x3x192xf32>
    %31 = vector.shape_cast %30 : vector<1x3x192xf32> to vector<3x192xf32>
    %32 = vector.shape_cast %29 : vector<3x192xf32> to vector<1x3x192xf32>
    tpu.vector_store %arg3[%c0_14, %c4, %c0_15], %32 {strides = array<i32>} : memref<1x7x192xf32, #tpu.memory_space<vmem>>, vector<1x3x192xf32>,
    return
  }
  func.func @transform_0(%arg0: i32) -> (i32, i32, i32) {
    %c0_i32 = arith.constant 0 : i32
    %c0_i32_0 = arith.constant 0 : i32
    %c0_i32_1 = arith.constant 0 : i32
    return %arg0, %c0_i32, %c0_i32_0 : i32, i32, i32
  }
  func.func @transform_1(%arg0: i32) -> (i32, i32) {
    %c0_i32 = arith.constant 0 : i32
    %c0_i32_0 = arith.constant 0 : i32
    %c0_i32_1 = arith.constant 0 : i32
    return %c0_i32, %c0_i32_0 : i32, i32
  }
  func.func @transform_2(%arg0: i32) -> (i32, i32, i32) {
    %c0_i32 = arith.constant 0 : i32
    %c0_i32_0 = arith.constant 0 : i32
    %c0_i32_1 = arith.constant 0 : i32
    return %arg0, %c0_i32, %c0_i32_0 : i32, i32, i32
  }
}

module attributes {stable_mosaic.version = 11 : i64} {
  func.func @_yolo_kernel(%arg0: i32, %arg1: memref<1x7x768xf32, #tpu.memory_space<vmem>>, %arg2: memref<4x768xf32, #tpu.memory_space<vmem>>, %arg3: memref<1x7x768xf32, #tpu.memory_space<vmem>>) attributes {dimension_semantics = [#tpu.dimension_semantics<parallel>], iteration_bounds = array<i64: 2>, scalar_prefetch = 0 : i64, scratch_operands = 0 : i64, tpu.core_type = #tpu.core_type<tc>, window_params = [{transform_indices = @transform_0, window_bounds = array<i64: 1, 7, 768>}, {pipeline_mode = #tpu.pipeline_mode<synchronous>, transform_indices = @transform_1, window_bounds = array<i64: 4, 768>}, {transform_indices = @transform_2, window_bounds = array<i64: 1, 7, 768>}]} {
    %c0 = arith.constant 0 : index
    %c0_0 = arith.constant 0 : index
    %c0_1 = arith.constant 0 : index
    %0 = vector.load %arg1[%c0, %c0_0, %c0_1] : memref<1x7x768xf32, #tpu.memory_space<vmem>>, vector<1x7x768xf32>
    %1 = vector.shape_cast %0 : vector<1x7x768xf32> to vector<7x768xf32>
    %c0_2 = arith.constant 0 : index
    %c0_3 = arith.constant 0 : index
    %2 = vector.load %arg2[%c0_2, %c0_3] : memref<4x768xf32, #tpu.memory_space<vmem>>, vector<2x768xf32>
    %c2 = arith.constant 2 : index
    %c0_4 = arith.constant 0 : index
    %3 = vector.load %arg2[%c2, %c0_4] : memref<4x768xf32, #tpu.memory_space<vmem>>, vector<2x768xf32>
    %4 = vector.extract_strided_slice %1 {offsets = [0, 0], sizes = [2, 768], strides = [1, 1]} : vector<7x768xf32> to vector<2x768xf32>
    %5 = arith.negf %4 : vector<2x768xf32>
    %6 = math.exp %5 : vector<2x768xf32>
    %cst = arith.constant 1.000000e+00 : f32
    %7 = vector.broadcast %cst : f32 to vector<2x768xf32>
    %8 = arith.addf %7, %6 : vector<2x768xf32>
    %9 = arith.divf %7, %8 : vector<2x768xf32>
    %10 = arith.addf %9, %2 : vector<2x768xf32>
    %cst_5 = arith.constant 1.000000e+00 : f32
    %11 = vector.broadcast %cst_5 : f32 to vector<2x768xf32>
    %12 = arith.mulf %10, %11 : vector<2x768xf32>
    %c0_6 = arith.constant 0 : index
    %c0_7 = arith.constant 0 : index
    %c0_8 = arith.constant 0 : index
    %13 = vector.load %arg3[%c0_6, %c0_7, %c0_8] : memref<1x7x768xf32, #tpu.memory_space<vmem>>, vector<1x2x768xf32>
    %14 = vector.shape_cast %13 : vector<1x2x768xf32> to vector<2x768xf32>
    %15 = vector.shape_cast %12 : vector<2x768xf32> to vector<1x2x768xf32>
    tpu.vector_store %arg3[%c0_6, %c0_7, %c0_8], %15 {strides = array<i32>} : memref<1x7x768xf32, #tpu.memory_space<vmem>>, vector<1x2x768xf32>,
    %16 = vector.extract_strided_slice %1 {offsets = [2, 0], sizes = [2, 768], strides = [1, 1]} : vector<7x768xf32> to vector<2x768xf32>
    %17 = math.exp %16 : vector<2x768xf32>
    %18 = arith.mulf %17, %3 : vector<2x768xf32>
    %cst_9 = arith.constant 1.000000e+00 : f32
    %19 = vector.broadcast %cst_9 : f32 to vector<2x768xf32>
    %20 = arith.mulf %18, %19 : vector<2x768xf32>
    %c0_10 = arith.constant 0 : index
    %c2_11 = arith.constant 2 : index
    %c0_12 = arith.constant 0 : index
    %21 = vector.load %arg3[%c0_10, %c2_11, %c0_12] : memref<1x7x768xf32, #tpu.memory_space<vmem>>, vector<1x2x768xf32>
    %22 = vector.shape_cast %21 : vector<1x2x768xf32> to vector<2x768xf32>
    %23 = vector.shape_cast %20 : vector<2x768xf32> to vector<1x2x768xf32>
    tpu.vector_store %arg3[%c0_10, %c2_11, %c0_12], %23 {strides = array<i32>} : memref<1x7x768xf32, #tpu.memory_space<vmem>>, vector<1x2x768xf32>,
    %24 = vector.extract_strided_slice %1 {offsets = [4, 0], sizes = [3, 768], strides = [1, 1]} : vector<7x768xf32> to vector<3x768xf32>
    %25 = arith.negf %24 : vector<3x768xf32>
    %26 = math.exp %25 : vector<3x768xf32>
    %cst_13 = arith.constant 1.000000e+00 : f32
    %27 = vector.broadcast %cst_13 : f32 to vector<3x768xf32>
    %28 = arith.addf %27, %26 : vector<3x768xf32>
    %29 = arith.divf %27, %28 : vector<3x768xf32>
    %c0_14 = arith.constant 0 : index
    %c4 = arith.constant 4 : index
    %c0_15 = arith.constant 0 : index
    %30 = vector.load %arg3[%c0_14, %c4, %c0_15] : memref<1x7x768xf32, #tpu.memory_space<vmem>>, vector<1x3x768xf32>
    %31 = vector.shape_cast %30 : vector<1x3x768xf32> to vector<3x768xf32>
    %32 = vector.shape_cast %29 : vector<3x768xf32> to vector<1x3x768xf32>
    tpu.vector_store %arg3[%c0_14, %c4, %c0_15], %32 {strides = array<i32>} : memref<1x7x768xf32, #tpu.memory_space<vmem>>, vector<1x3x768xf32>,
    return
  }
  func.func @transform_0(%arg0: i32) -> (i32, i32, i32) {
    %c0_i32 = arith.constant 0 : i32
    %c0_i32_0 = arith.constant 0 : i32
    %c0_i32_1 = arith.constant 0 : i32
    return %arg0, %c0_i32, %c0_i32_0 : i32, i32, i32
  }
  func.func @transform_1(%arg0: i32) -> (i32, i32) {
    %c0_i32 = arith.constant 0 : i32
    %c0_i32_0 = arith.constant 0 : i32
    %c0_i32_1 = arith.constant 0 : i32
    return %c0_i32, %c0_i32_0 : i32, i32
  }
  func.func @transform_2(%arg0: i32) -> (i32, i32, i32) {
    %c0_i32 = arith.constant 0 : i32
    %c0_i32_0 = arith.constant 0 : i32
    %c0_i32_1 = arith.constant 0 : i32
    return %arg0, %c0_i32, %c0_i32_0 : i32, i32, i32
  }
}

</mosaic_0001>

<bundles_post_ra>
// kernel: tile.18
= control target key start
LH: loop header
LB: loop body
LE: loop exit
PB: predicated region body
PF: predicated region fallthrough
CT: control target
= control target key end

     0   :  { %s64_s0 = inlined_call_operand.vmem [shape: f32[3], index: 0, kind: input, shape index: {}]   ;;  %s65_s1 = inlined_call_operand.vmem [shape: f32[64,3], index: 1, kind: output, shape index: {}]  }
   0x1   :  { %v4_v0 = vld [vmem:[%s64_s0] ss:$0 sm:$0xff] }
   0x2   :  { %5 = vst [vmem:[%s65_s1] sm:$0xff] %v4_v0 }
   0x3   :  { %20 = vst [vmem:[%s65_s1 + $0x8] sm:$0xff] %v4_v0 }
   0x4   :  { %21 = vst [vmem:[%s65_s1 + $0x10] sm:$0xff] %v4_v0 }
   0x5   :  { %22 = vst [vmem:[%s65_s1 + $0x18] sm:$0xff] %v4_v0 }
   0x6   :  { %23 = vst [vmem:[%s65_s1 + $0x20] sm:$0xff] %v4_v0 }
   0x7   :  { %24 = vst [vmem:[%s65_s1 + $0x28] sm:$0xff] %v4_v0 }
   0x8   :  { %25 = vst [vmem:[%s65_s1 + $0x30] sm:$0xff] %v4_v0 }
   0x9   :  { %26 = vst [vmem:[%s65_s1 + $0x38] sm:$0xff] %v4_v0 }

// kernel: _lambda_.11
= control target key start
LH: loop header
LB: loop body
LE: loop exit
PB: predicated region body
PF: predicated region fallthrough
CT: control target
= control target key end

     0   :  { %s687_s12 = smov 0   ;;  %s689_s13 = smov 0   ;;  %s758_s0 = inlined_call_operand.vmem [shape: bf16[2,8,8,128], index: 0, kind: input, shape index: {}]   ;;  %s759_s1 = inlined_call_operand.vmem [shape: bf16[1,1,128,128], index: 1, kind: input, shape index: {}]   ;;  %s760_s2 = inlined_call_operand.vmem [shape: f32[1,128], index: 2, kind: input, shape index: {}]   ;;  %s761_s3 = inlined_call_operand.vmem [shape: bf16[2,64,128], index: 3, kind: output, shape index: {}]  }
   0x1   :  { %s691_s14 = smov 0  }
   0x2 LB: > { %s25_s15 = sadd.s32 1, %s661_s13  ;;  %p502_p0 = scmp.ge.s32.totalorder %s665_s14, 1  ;;  %s665_s14 = sphi %s691_s14, %s13_s14   ;;  %s661_s13 = sphi %s689_s13, %s763_s13   ;;  %s657_s12 = sphi %s687_s12, %s762_s12  }
   0x3   : > { %p27_p1 = scmp.ge.s32.totalorder %s25_s15, 2  ;;  %p168_p2 = scmp.lt.s32.totalorder %s665_s14, 3 }
   0x5   : > { %s765_s15 = smov (%p27_p1, %s25_s15), 0  ;;  %p169_p3 = pnand %p502_p0, %p168_p2 }
   0x6   : > { %p202_p4 = scmp.lt.s32.totalorder (!%p169_p3), %s657_s12, 1 }
   0x7   : > { %172 = sbr.rel (%p169_p3) target bundleno = 194 (0xc2), region = 32 }
   0xc   : > { %v570_v0 = vld [vmem:[%s759_s1 + $0x38] sm:$0xff]  ;;  %v569_v1 = vld [vmem:[%s759_s1 + $0x30] sm:$0xff]  ;;  %v568_v2 = vld [vmem:[%s759_s1 + $0x28] sm:$0xff]  ;;  %s767_s12 = smov (!%p202_p4, %s657_s12), 1 }
   0xd   : > { %322 = vmatpush.bf16.msra.mxu0 %v570_v0  ;;  %594 = vmatpush.bf16.msra.mxu1 %v570_v0  ;;  %v567_v3 = vld [vmem:[%s759_s1 + $0x20] sm:$0xff]  ;;  %v566_v4 = vld [vmem:[%s759_s1 + $0x18] sm:$0xff]  ;;  %v565_v5 = vld [vmem:[%s759_s1 + $0x10] sm:$0xff]  ;;  %s557_s30 = sshll.u32 %s767_s12, 5 }
   0xe   : > { %595 = vmatpush.bf16.msra.mxu2 %v570_v0  ;;  %596 = vmatpush.bf16.msra.mxu3 %v570_v0  ;;  %v564_v6 = vld [vmem:[%s759_s1 + $0x8] sm:$0xff]  ;;  %v563_v7 = vld [vmem:[%s759_s1] sm:$0xff]  ;;  %s206_s8 = scalar_lea.vmem %s758_s0, %s557_s30  ;;  %s221_s17 = scalar_lea.vmem %s761_s3, %s557_s30 }
   0xf   : > { %v559_v8 = vld [vmem:[%s206_s8] sm:$0xff]  ;;  %v560_v9 = vld [vmem:[%s206_s8 + $0x8] sm:$0xff]  ;;  %v561_v10 = vld [vmem:[%s206_s8 + $0x10] sm:$0xff] }
  0x10   : > { %v562_v11 = vld [vmem:[%s206_s8 + $0x18] sm:$0xff]  ;;  %v642_v14 = vld [vmem:[%s760_s2] ss:$0 sm:$0xff] }
  0x11   : > { %323 = vmatpush.bf16.msra.mxu0 %v569_v1  ;;  %597 = vmatpush.bf16.msra.mxu1 %v569_v1 }
  0x12   : > { %598 = vmatpush.bf16.msra.mxu2 %v569_v1  ;;  %599 = vmatpush.bf16.msra.mxu3 %v569_v1 }
  0x15   : > { %324 = vmatpush.bf16.msra.mxu0 %v568_v2  ;;  %600 = vmatpush.bf16.msra.mxu1 %v568_v2 }
  0x16   : > { %601 = vmatpush.bf16.msra.mxu2 %v568_v2  ;;  %602 = vmatpush.bf16.msra.mxu3 %v568_v2 }
  0x19   : > { %325 = vmatpush.bf16.msra.mxu0 %v567_v3  ;;  %603 = vmatpush.bf16.msra.mxu1 %v567_v3 }
  0x1a   : > { %604 = vmatpush.bf16.msra.mxu2 %v567_v3  ;;  %605 = vmatpush.bf16.msra.mxu3 %v567_v3 }
  0x1d   : > { %326 = vmatpush.bf16.msra.mxu0 %v566_v4  ;;  %606 = vmatpush.bf16.msra.mxu1 %v566_v4 }
  0x1e   : > { %607 = vmatpush.bf16.msra.mxu2 %v566_v4  ;;  %608 = vmatpush.bf16.msra.mxu3 %v566_v4 }
  0x21   : > { %327 = vmatpush.bf16.msra.mxu0 %v565_v5  ;;  %609 = vmatpush.bf16.msra.mxu1 %v565_v5 }
  0x22   : > { %610 = vmatpush.bf16.msra.mxu2 %v565_v5  ;;  %611 = vmatpush.bf16.msra.mxu3 %v565_v5 }
  0x25   : > { %328 = vmatpush.bf16.msra.mxu0 %v564_v6  ;;  %612 = vmatpush.bf16.msra.mxu1 %v564_v6 }
  0x26   : > { %613 = vmatpush.bf16.msra.mxu2 %v564_v6  ;;  %614 = vmatpush.bf16.msra.mxu3 %v564_v6 }
  0x29   : > { %329 = vmatpush.bf16.msra.mxu0 %v563_v7  ;;  %615 = vmatpush.bf16.msra.mxu1 %v563_v7 }
  0x2a   : > { %616 = vmatpush.bf16.msra.mxu2 %v563_v7  ;;  %617 = vmatpush.bf16.msra.mxu3 %v563_v7 }
  0x2c   : > { %330 = vmatmul.bf16.vlgmr.msra.gmra.mxu0 %v559_v8  ;;  %335 = vmatmul.bf16.vlgmr.msra.gmra.mxu1 %v560_v9 }
  0x2d   : > { %340 = vmatmul.bf16.vlgmr.msra.gmra.mxu2 %v561_v10  ;;  %345 = vmatmul.bf16.vlgmr.msra.gmra.mxu3 %v562_v11 }
  0xa9   : > { %v331_v12 = vpop.f32.mrf.mxu0  ;;  %v336_v13 = vpop.f32.mrf.mxu1 }
  0xaa   : > { %v332_v15 = vadd.f32 %v642_v14, %v331_v12  ;;  %v337_v16 = vadd.f32 %v642_v14, %v336_v13 }
  0xac   : > { %v359_v21 = vmul.f32 0.1, %v332_v15  ;;  %v361_v22 = vmul.f32 0.1, %v337_v16  ;;  %vm351_vm0 = vcmp.gt.f32.partialorder %v332_v15, 0.0  ;;  %vm353_vm1 = vcmp.gt.f32.partialorder %v337_v16, 0.0 }
  0xae   : > { %v367_v29 = vsel %vm351_vm0, %v332_v15, %v359_v21  ;;  %v369_v30 = vsel %vm353_vm1, %v337_v16, %v361_v22 }
  0xb0   : > { %v341_v17 = vpop.f32.mrf.mxu2  ;;  %v346_v18 = vpop.f32.mrf.mxu3 }
  0xb1   : > { %v333_v19 = vpop.f32.mrf.mxu0  ;;  %v338_v20 = vpop.f32.mrf.mxu1  ;;  %v342_v27 = vadd.f32 %v642_v14, %v341_v17  ;;  %v347_v28 = vadd.f32 %v642_v14, %v346_v18 }
  0xb2   : > { %v334_v23 = vadd.f32 %v642_v14, %v333_v19  ;;  %v339_v24 = vadd.f32 %v642_v14, %v338_v20 }
  0xb3   : > { %v363_v37 = vmul.f32 0.1, %v342_v27  ;;  %v365_v38 = vmul.f32 0.1, %v347_v28  ;;  %vm355_vm4 = vcmp.gt.f32.partialorder %v342_v27, 0.0  ;;  %vm357_vm5 = vcmp.gt.f32.partialorder %v347_v28, 0.0 }
  0xb4   : > { %vm352_vm2 = vcmp.gt.f32.partialorder %v334_v23, 0.0  ;;  %v360_v25 = vmul.f32 0.1, %v334_v23  ;;  %vm354_vm3 = vcmp.gt.f32.partialorder %v339_v24, 0.0  ;;  %v362_v26 = vmul.f32 0.1, %v339_v24 }
  0xb5   : > { %v371_v43 = vsel %vm355_vm4, %v342_v27, %v363_v37  ;;  %v373_v44 = vsel %vm357_vm5, %v347_v28, %v365_v38 }
  0xb6   : > { %v368_v31 = vsel %vm352_vm2, %v334_v23, %v360_v25  ;;  %v370_v32 = vsel %vm354_vm3, %v339_v24, %v362_v26 }
  0xb7   : > { %v574_v33 = vpack.c.bf16 %v368_v31, %v367_v29  ;;  %v579_v34 = vpack.c.bf16 %v370_v32, %v369_v30 }
  0xb8   : > { %v343_v35 = vpop.f32.mrf.mxu2  ;;  %v348_v36 = vpop.f32.mrf.mxu3 }
  0xb9   : > { %575 = vst [vmem:[%s221_s17] sm:$0xff] %v574_v33   ;;  %v344_v39 = vadd.f32 %v642_v14, %v343_v35  ;;  %v349_v40 = vadd.f32 %v642_v14, %v348_v36 }
  0xba   : > { %591 = vst [vmem:[%s221_s17 + $0x8] sm:$0xff] %v579_v34  }
  0xbb   : > { %vm356_vm6 = vcmp.gt.f32.partialorder %v344_v39, 0.0  ;;  %v364_v41 = vmul.f32 0.1, %v344_v39  ;;  %vm358_vm7 = vcmp.gt.f32.partialorder %v349_v40, 0.0  ;;  %v366_v42 = vmul.f32 0.1, %v349_v40 }
  0xbd   : > { %v372_v45 = vsel %vm356_vm6, %v344_v39, %v364_v41  ;;  %v374_v46 = vsel %vm358_vm7, %v349_v40, %v366_v42 }
  0xbe   : > { %v584_v47 = vpack.c.bf16 %v372_v45, %v371_v43  ;;  %v589_v48 = vpack.c.bf16 %v374_v46, %v373_v44 }
  0xc0   : > { %592 = vst [vmem:[%s221_s17 + $0x10] sm:$0xff] %v584_v47  }
  0xc1   : > { %593 = vst [vmem:[%s221_s17 + $0x18] sm:$0xff] %v589_v48  }
  0xc2 PF: > { %s13_s14 = sadd.s32 1, %s665_s14   ;;  %s762_s12 = smov %s661_s13 }
  0xc3   : > { %p10_p5 = scmp.ge.s32.totalorder %s13_s14, 4   ;;  %s763_s13 = smov %s765_s15 }
  0xc5   :  { %12 = sbr.rel (!%p10_p5) target bundleno = 2 (0x2), region = 68 }

// kernel: _lambda_.12
= control target key start
LH: loop header
LB: loop body
LE: loop exit
PB: predicated region body
PF: predicated region fallthrough
CT: control target
= control target key end

     0   :  { %s339_s0 = inlined_call_operand.vmem [shape: bf16[128,128], index: 0, kind: input, shape index: {}]   ;;  %s340_s1 = inlined_call_operand.vmem [shape: bf16[128,128], index: 1, kind: input, shape index: {}]   ;;  %s341_s2 = inlined_call_operand.vmem [shape: bf16[128,128], index: 2, kind: output, shape index: {}]  }
   0x1   :  { %v128_v0 = vld [vmem:[%s339_s0] sm:$0xff]   ;;  %v231_v2 = vld [vmem:[%s339_s0 + $0x8] sm:$0xff]   ;;  %v232_v8 = vld [vmem:[%s339_s0 + $0x10] sm:$0xff]  }
   0x2   :  { %v160_v1 = vld [vmem:[%s340_s1] sm:$0xff]   ;;  %v129_v3 = vunpack.c.l.bf16 %v128_v0  ;;  %v130_v4 = vunpack.c.h.bf16 %v128_v0  ;;  %v238_v7 = vld [vmem:[%s340_s1 + $0x8] sm:$0xff]   ;;  %v239_v9 = vld [vmem:[%s340_s1 + $0x10] sm:$0xff]   ;;  %v133_v10 = vunpack.c.l.bf16 %v231_v2  ;;  %v134_v11 = vunpack.c.h.bf16 %v231_v2 }
   0x3   :  { %v161_v5 = vunpack.c.l.bf16 %v160_v1  ;;  %v162_v6 = vunpack.c.h.bf16 %v160_v1  ;;  %v165_v12 = vunpack.c.l.bf16 %v238_v7  ;;  %v166_v13 = vunpack.c.h.bf16 %v238_v7  ;;  %v233_v14 = vld [vmem:[%s339_s0 + $0x18] sm:$0xff]   ;;  %v234_v24 = vld [vmem:[%s339_s0 + $0x20] sm:$0xff]   ;;  %v235_v30 = vld [vmem:[%s339_s0 + $0x28] sm:$0xff]  }
   0x4   :  { %v240_v15 = vld [vmem:[%s340_s1 + $0x18] sm:$0xff]   ;;  %v137_v18 = vunpack.c.l.bf16 %v232_v8  ;;  %v138_v19 = vunpack.c.h.bf16 %v232_v8  ;;  %v169_v22 = vunpack.c.l.bf16 %v239_v9  ;;  %v170_v23 = vunpack.c.h.bf16 %v239_v9  ;;  %v241_v25 = vld [vmem:[%s340_s1 + $0x20] sm:$0xff]   ;;  %v242_v35 = vld [vmem:[%s340_s1 + $0x28] sm:$0xff]  }
   0x5   :  { %v75_v16 = vadd.f32 %v161_v5, %v129_v3  ;;  %v76_v17 = vadd.f32 %v162_v6, %v130_v4  ;;  %v77_v20 = vadd.f32 %v165_v12, %v133_v10  ;;  %v78_v21 = vadd.f32 %v166_v13, %v134_v11  ;;  %v236_v40 = vld [vmem:[%s339_s0 + $0x30] sm:$0xff]   ;;  %v237_v50 = vld [vmem:[%s339_s0 + $0x38] sm:$0xff]  }
   0x6   :  { %v141_v27 = vunpack.c.l.bf16 %v233_v14  ;;  %v142_v28 = vunpack.c.h.bf16 %v233_v14  ;;  %v173_v29 = vunpack.c.l.bf16 %v240_v15  ;;  %v79_v32 = vadd.f32 %v169_v22, %v137_v18  ;;  %v243_v45 = vld [vmem:[%s340_s1 + $0x30] sm:$0xff]   ;;  %v244_v51 = vld [vmem:[%s340_s1 + $0x38] sm:$0xff]  }
   0x7   :  { %v194_v26 = vpack.c.bf16 %v76_v17, %v75_v16  ;;  %v199_v31 = vpack.c.bf16 %v78_v21, %v77_v20  ;;  %v80_v33 = vadd.f32 %v170_v23, %v138_v19  ;;  %v174_v34 = vunpack.c.h.bf16 %v240_v15 }
   0x8   :  { %v81_v36 = vadd.f32 %v173_v29, %v141_v27  ;;  %v145_v37 = vunpack.c.l.bf16 %v234_v24  ;;  %v146_v38 = vunpack.c.h.bf16 %v234_v24  ;;  %v177_v39 = vunpack.c.l.bf16 %v241_v25 }
   0x9   :  { %195 = vst [vmem:[%s341_s2] sm:$0xff] %v194_v26   ;;  %v204_v41 = vpack.c.bf16 %v80_v33, %v79_v32  ;;  %v82_v42 = vadd.f32 %v174_v34, %v142_v28  ;;  %v178_v43 = vunpack.c.h.bf16 %v241_v25  ;;  %v149_v44 = vunpack.c.l.bf16 %v235_v30 }
   0xa   :  { %245 = vst [vmem:[%s341_s2 + $0x8] sm:$0xff] %v199_v31   ;;  %v83_v46 = vadd.f32 %v177_v39, %v145_v37  ;;  %v150_v47 = vunpack.c.h.bf16 %v235_v30  ;;  %v181_v48 = vunpack.c.l.bf16 %v242_v35  ;;  %v182_v49 = vunpack.c.h.bf16 %v242_v35 }
   0xb   :  { %246 = vst [vmem:[%s341_s2 + $0x10] sm:$0xff] %v204_v41   ;;  %v209_v52 = vpack.c.bf16 %v82_v42, %v81_v36  ;;  %v84_v53 = vadd.f32 %v178_v43, %v146_v38  ;;  %v153_v54 = vunpack.c.l.bf16 %v236_v40  ;;  %v154_v55 = vunpack.c.h.bf16 %v236_v40 }
   0xc   :  { %v85_v56 = vadd.f32 %v181_v48, %v149_v44  ;;  %v86_v57 = vadd.f32 %v182_v49, %v150_v47  ;;  %v185_v58 = vunpack.c.l.bf16 %v243_v45  ;;  %v186_v59 = vunpack.c.h.bf16 %v243_v45 }
   0xd   :  { %247 = vst [vmem:[%s341_s2 + $0x18] sm:$0xff] %v209_v52   ;;  %v214_v60 = vpack.c.bf16 %v84_v53, %v83_v46  ;;  %v157_v61 = vunpack.c.l.bf16 %v237_v50  ;;  %v158_v62 = vunpack.c.h.bf16 %v237_v50  ;;  %v189_v63 = vunpack.c.l.bf16 %v244_v51 }
   0xe   :  { %v219_v0 = vpack.c.bf16 %v86_v57, %v85_v56  ;;  %v87_v1 = vadd.f32 %v185_v58, %v153_v54  ;;  %v88_v2 = vadd.f32 %v186_v59, %v154_v55  ;;  %v190_v3 = vunpack.c.h.bf16 %v244_v51 }
   0xf   :  { %248 = vst [vmem:[%s341_s2 + $0x20] sm:$0xff] %v214_v60   ;;  %v89_v4 = vadd.f32 %v189_v63, %v157_v61 }
  0x10   :  { %249 = vst [vmem:[%s341_s2 + $0x28] sm:$0xff] %v219_v0   ;;  %v224_v5 = vpack.c.bf16 %v88_v2, %v87_v1  ;;  %v90_v6 = vadd.f32 %v190_v3, %v158_v62 }
  0x12   :  { %250 = vst [vmem:[%s341_s2 + $0x30] sm:$0xff] %v224_v5   ;;  %v229_v7 = vpack.c.bf16 %v90_v6, %v89_v4 }
  0x14   :  { %251 = vst [vmem:[%s341_s2 + $0x38] sm:$0xff] %v229_v7  }

// kernel: _lambda_.9
= control target key start
LH: loop header
LB: loop body
LE: loop exit
PB: predicated region body
PF: predicated region fallthrough
CT: control target
= control target key end

     0   :  { %s5304_s12 = smov 0   ;;  %s5306_s13 = smov 0   ;;  %s6714_s0 = inlined_call_operand.vmem [shape: bf16[2,18,18,3], index: 0, kind: input, shape index: {}]   ;;  %s6715_s1 = inlined_call_operand.vmem [shape: bf16[3,3,3,128], index: 1, kind: input, shape index: {}]   ;;  %s6716_s2 = inlined_call_operand.vmem [shape: f32[1,128], index: 2, kind: input, shape index: {}]   ;;  %s6717_s3 = inlined_call_operand.vmem [shape: bf16[2,256,128], index: 3, kind: output, shape index: {}]  }
   0x1   :  { %s5308_s14 = smov 0  }
   0x2 LB: > { %s25_s15 = sadd.s32 1, %s5277_s13  ;;  %p4444_p0 = scmp.ge.s32.totalorder %s5281_s14, 1  ;;  %s5281_s14 = sphi %s5308_s14, %s13_s14   ;;  %s5277_s13 = sphi %s5306_s13, %s6729_s13   ;;  %s5273_s12 = sphi %s5304_s12, %s6728_s12  }
   0x3   : > { %p27_p1 = scmp.ge.s32.totalorder %s25_s15, 2  ;;  %p168_p2 = scmp.lt.s32.totalorder %s5281_s14, 3 }
   0x5   : > { %s6731_s15 = smov (%p27_p1, %s25_s15), 0  ;;  %p169_p3 = pnand %p4444_p0, %p168_p2 }
   0x7   : > { %172 = sbr.rel (%p169_p3) target bundleno = 762 (0x2fa), region = 32 }
   0xc   : > { %v4448_v0 = vld [vmem:[%s6715_s1 + $0x2] sm:$0x3]  ;;  %vm758_vm0 = vcmask 1040384   ;;  %vm759_vm1 = vcmask 1041408   ;;  %p202_p4 = scmp.lt.s32.totalorder %s5273_s12, 1  ;;  %v5283_v1 = vmov 65535  }
   0xd   : > { %v760_v2 = vsel %vm758_vm0, 4294967295, %v5283_v1  ;;  %v4561_v4 = vld [vmem:[%s6715_s1 + $0x4] sm:$0x3]  ;;  %v4610_v7 = vld [vmem:[%s6715_s1 + $0x6] sm:$0x3]  ;;  %vm709_vm5 = vcmask 23552  }
   0xe   : > { %v5325_v3 = vsel %vm759_vm1, %v760_v2, 0  ;;  %s6733_s12 = smov (!%p202_p4, %s5273_s12), 1  ;;  %v255_v8 = vld [vmem:[%s6715_s1] sm:$0x3]  ;;  %v4739_v9 = vld [vmem:[%s6715_s1 + $0x8] sm:$0x3] }
   0xf   : > { %v763_v5 = vand.u32 %v4448_v0, %v5325_v3  ;;  %v1336_v6 = vand.u32 %v4561_v4, %v5325_v3  ;;  %s5181_s26 = smul.u32 216, %s6733_s12  ;;  %v1623_v10 = vand.u32 %v4610_v7, %v5325_v3  ;;  %v983_v11 = vand.u32 %v5325_v3, %v255_v8  ;;  %s5034_s17 = sshll.u32 %s6733_s12, 7 }
  0x10   : > { %v2277_v12 = vand.u32 %v4739_v9, %v5325_v3  ;;  %vm272_vm2 = vsmask.f32 3328  ;;  %vm273_vm3 = vsmask.f32 7440  ;;  %vm1122_vm6 = vcmask 1042432   ;;  %s6444_s19 = scalar_lea.vmem %s6717_s3, %s5034_s17 }
  0x11   : > { %5178 = vmatpush.bf16.msra.mxu1 %v763_v5  ;;  %5179 = vmatpush.bf16.msra.mxu2 %v763_v5  ;;  %s5350_s29 = scalar_lea.vmem %s6714_s0, %s5181_s26  ;;  %vm5362_vm4 = vmor %vm272_vm2, %vm273_vm3  ;;  %vm1123_vm7 = vcmask 1046532  }
  0x12   : > { %5180 = vmatpush.bf16.msra.mxu3 %v763_v5  ;;  %772 = vmatpush.bf16.msra.mxu0 %v763_v5  ;;  %v231_v13 = vld [vmem:[%s5350_s29 + $0x30] sm:$0xf]  ;;  %v232_v14 = vld [vmem:[%s5350_s29 + $0x34] sm:$0xf]  ;;  %v260_v15 = vld [vmem:[%s5350_s29 + $0x38] sm:$0x1] }
  0x13   : > { %v372_v16 = vshrl.u32 %v231_v13, 16  ;;  %v375_v17 = vshll.u32 %v231_v13, 16  ;;  %v381_v18 = vshll.u32 %v232_v14, 16  ;;  %v385_v19 = vshrl.u32 %v232_v14, 16  ;;  %v239_v20 = vld [vmem:[%s5350_s29 + $0x60] sm:$0xf]  ;;  %vm5536_vm8 = vmor %vm1122_vm6, %vm1123_vm7 }
  0x14   : > { %v391_v21 = vshll.u32 %v260_v15, 16  ;;  %v240_v22 = vld [vmem:[%s5350_s29 + $0x64] sm:$0xf]  ;;  %v264_v23 = vld [vmem:[%s5350_s29 + $0x68] sm:$0x1]  ;;  %v468_v24 = vshrl.u32 %v239_v20, 16 }
  0x15   : > { %1345 = vmatpush.bf16.msrb.mxu2 %v1336_v6  ;;  %992 = vmatpush.bf16.msrb.mxu1 %v983_v11  ;;  %v374_v25 = vrot.slane %v372_v16, 4  ;;  %v377_v26 = vrot.slane %v375_v17, 5  ;;  %v383_v27 = vrot.slane %v381_v18, 5  ;;  %v387_v28 = vrot.slane %v385_v19, 4  ;;  %v247_v29 = vld [vmem:[%s5350_s29 + $0x90] sm:$0xf] }
  0x16   : > { %1632 = vmatpush.bf16.msrb.mxu3 %v1623_v10  ;;  %2286 = vmatpush.bf16.msrb.mxu0 %v2277_v12  ;;  %v393_v30 = vrot.slane %v391_v21, 5  ;;  %v470_v31 = vrot.slane %v468_v24, 4  ;;  %v471_v32 = vshll.u32 %v239_v20, 16  ;;  %v477_v33 = vshll.u32 %v240_v22, 16  ;;  %v248_v38 = vld [vmem:[%s5350_s29 + $0x94] sm:$0xf] }
  0x17   : > { %v378_v34 = vor.u32 %v377_v26, %v374_v25  ;;  %v388_v35 = vor.u32 %v387_v28, %v383_v27  ;;  %v481_v36 = vshrl.u32 %v240_v22, 16  ;;  %v487_v37 = vshll.u32 %v264_v23, 16  ;;  %v268_v48 = vld [vmem:[%s5350_s29 + $0x98] sm:$0x1]  ;;  %v223_v0 = vld [vmem:[%s5350_s29] sm:$0xf] }
  0x18   : > { %v473_v40 = vrot.slane %v471_v32, 5  ;;  %v479_v41 = vrot.slane %v477_v33, 5  ;;  %v564_v42 = vshrl.u32 %v247_v29, 16  ;;  %v567_v50 = vshll.u32 %v247_v29, 16  ;;  %v5375_v5 = vld [vmem:[%s5350_s29 + $0x4] sm:$0xf] }
  0x19   : > { %v379_v43 = vrot.slane %v378_v34, 4  ;;  %v389_v44 = vrot.slane %v388_v35, 4  ;;  %v483_v45 = vrot.slane %v481_v36, 4  ;;  %v489_v46 = vrot.slane %v487_v37, 5  ;;  %v5378_v6 = vld [vmem:[%s5350_s29 + $0x8] sm:$0x1] }
  0x1a   : > { %v474_v47 = vor.u32 %v473_v40, %v470_v31  ;;  %v566_v49 = vrot.slane %v564_v42, 4  ;;  %v573_v51 = vshll.u32 %v248_v38, 16  ;;  %v577_v55 = vshrl.u32 %v248_v38, 16  ;;  %v233_v23 = vld [vmem:[%s5350_s29 + $0x3c] sm:$0xf] }
  0x1b   : > { %v384_v52 = vsel %vm5362_vm4, %v379_v43, %v383_v27  ;;  %v394_v53 = vsel %vm5362_vm4, %v389_v44, %v393_v30  ;;  %v484_v54 = vor.u32 %v483_v45, %v479_v41  ;;  %v569_v59 = vrot.slane %v567_v50, 5  ;;  %v5390_v24 = vld [vmem:[%s5350_s29 + $0x40] sm:$0xf]  ;;  %v5395_v29 = vld [vmem:[%s5350_s29 + $0x44] sm:$0x1] }
  0x1c   : > { %v669_v56 = vunpack.c.l.b16 %v384_v52  ;;  %v670_v57 = vunpack.c.l.b16 %v394_v53  ;;  %v475_v58 = vrot.slane %v474_v47, 4  ;;  %v575_v61 = vrot.slane %v573_v51, 5  ;;  %v241_v37 = vld [vmem:[%s5350_s29 + $0x6c] sm:$0xf]  ;;  %v242_v47 = vld [vmem:[%s5350_s29 + $0x70] sm:$0xf] }
  0x1d   : > { %v485_v60 = vrot.slane %v484_v54, 4  ;;  %v579_v62 = vrot.slane %v577_v55, 4  ;;  %v583_v63 = vshll.u32 %v268_v48, 16  ;;  %v570_v4 = vor.u32 %v569_v59, %v566_v49  ;;  %v265_v51 = vld [vmem:[%s5350_s29 + $0x74] sm:$0x1] }
  0x1e   : > { %v697_v1 = vpack.c.b16 %v670_v57, %v669_v56  ;;  %v480_v2 = vsel %vm5362_vm4, %v475_v58, %v479_v41  ;;  %v276_v13 = vshrl.u32 %v223_v0, 16  ;;  %v279_v14 = vshll.u32 %v223_v0, 16 }
  0x1f   : > { %v490_v7 = vsel %vm5362_vm4, %v485_v60, %v489_v46  ;;  %v677_v8 = vunpack.c.l.b16 %v480_v2  ;;  %v580_v9 = vor.u32 %v579_v62, %v575_v61  ;;  %v585_v10 = vrot.slane %v583_v63, 5 }
  0x20   : > { %4453 = vmatmul.msk.bf16.vlgmr.msra.gmra.mxu1 %vm709_vm5, %v697_v1  ;;  %v678_v11 = vunpack.c.l.b16 %v490_v7  ;;  %v571_v12 = vrot.slane %v570_v4, 4  ;;  %v285_v16 = vshll.u32 %v5375_v5, 16  ;;  %v289_v17 = vshrl.u32 %v5375_v5, 16  ;;  %v249_v1 = vld [vmem:[%s5350_s29 + $0x9c] sm:$0xf] }
  0x21   : > { %v581_v15 = vrot.slane %v580_v9, 4  ;;  %v295_v18 = vshll.u32 %v5378_v6, 16  ;;  %v278_v21 = vrot.slane %v276_v13, 4  ;;  %v281_v22 = vrot.slane %v279_v14, 5  ;;  %v269_v13 = vld [vmem:[%s5350_s29 + $0xa4] sm:$0x1] }
  0x22   : > { %v701_v19 = vpack.c.b16 %v678_v11, %v677_v8  ;;  %v576_v20 = vsel %vm5362_vm4, %v571_v12, %v575_v61  ;;  %v287_v27 = vrot.slane %v285_v16, 5  ;;  %v291_v28 = vrot.slane %v289_v17, 4  ;;  %v250_v8 = vld [vmem:[%s5350_s29 + $0xa0] sm:$0xf] }
  0x23   : > { %v586_v25 = vsel %vm5362_vm4, %v581_v15, %v585_v10  ;;  %v685_v26 = vunpack.c.l.b16 %v576_v20  ;;  %v282_v31 = vor.u32 %v281_v22, %v278_v21  ;;  %v297_v32 = vrot.slane %v295_v18, 5 }
  0x24   : > { %4457 = vmatmul.msk.bf16.vlgmr.msra.gmra.mxu2 %vm709_vm5, %v701_v19  ;;  %v686_v30 = vunpack.c.l.b16 %v586_v25  ;;  %v292_v33 = vor.u32 %v291_v28, %v287_v27  ;;  %v396_v34 = vshrl.u32 %v233_v23, 16  ;;  %v399_v35 = vshll.u32 %v233_v23, 16 }
  0x25   : > { %v405_v36 = vshll.u32 %v5390_v24, 16  ;;  %v283_v40 = vrot.slane %v282_v31, 4  ;;  %v409_v41 = vshrl.u32 %v5390_v24, 16  ;;  %v415_v42 = vshll.u32 %v5395_v29, 16 }
  0x26   : > { %v705_v38 = vpack.c.b16 %v686_v30, %v685_v26  ;;  %v293_v43 = vrot.slane %v292_v33, 4  ;;  %v398_v44 = vrot.slane %v396_v34, 4  ;;  %v401_v45 = vrot.slane %v399_v35, 5  ;;  %v5421_v33 = vld [vmem:[%s5350_s29 + $0x10] sm:$0xf] }
  0x27   : > { %v407_v46 = vrot.slane %v405_v36, 5  ;;  %v288_v48 = vsel %vm5362_vm4, %v283_v40, %v287_v27  ;;  %v411_v49 = vrot.slane %v409_v41, 4  ;;  %v417_v50 = vrot.slane %v415_v42, 5  ;;  %v225_v27 = vld [vmem:[%s5350_s29 + $0xc] sm:$0xf] }
  0x28   : > { %4461 = vmatmul.msk.bf16.vlgmr.msra.gmra.mxu3 %vm709_vm5, %v705_v38  ;;  %v492_v52 = vshrl.u32 %v241_v37, 16  ;;  %v298_v53 = vsel %vm5362_vm4, %v293_v43, %v297_v32  ;;  %v661_v54 = vunpack.c.l.b16 %v288_v48  ;;  %v402_v55 = vor.u32 %v401_v45, %v398_v44 }
  0x29   : > { %v495_v56 = vshll.u32 %v241_v37, 16  ;;  %v662_v57 = vunpack.c.l.b16 %v298_v53  ;;  %v412_v58 = vor.u32 %v411_v49, %v407_v46  ;;  %v501_v60 = vshll.u32 %v242_v47, 16  ;;  %v5424_v37 = vld [vmem:[%s5350_s29 + $0x14] sm:$0x1] }
  0x2a   : > { %v494_v59 = vrot.slane %v492_v52, 4  ;;  %v403_v61 = vrot.slane %v402_v55, 4  ;;  %v505_v63 = vshrl.u32 %v242_v47, 16  ;;  %v511_v0 = vshll.u32 %v265_v51, 16  ;;  %v235_v47 = vld [vmem:[%s5350_s29 + $0x48] sm:$0xf] }
  0x2b   : > { %v497_v62 = vrot.slane %v495_v56, 5  ;;  %v693_v2 = vpack.c.b16 %v662_v57, %v661_v54  ;;  %v413_v4 = vrot.slane %v412_v58, 4  ;;  %v503_v7 = vrot.slane %v501_v60, 5  ;;  %v5434_v52 = vld [vmem:[%s5350_s29 + $0x4c] sm:$0xf] }
  0x2c   : > { %v408_v9 = vsel %vm5362_vm4, %v403_v61, %v407_v46  ;;  %v507_v11 = vrot.slane %v505_v63, 4  ;;  %v513_v12 = vrot.slane %v511_v0, 5  ;;  %v588_v16 = vshrl.u32 %v249_v1, 16  ;;  %v5439_v61 = vld [vmem:[%s5350_s29 + $0x50] sm:$0x1] }
  0x2d   : > { %v498_v10 = vor.u32 %v497_v62, %v494_v59  ;;  %4449 = vmatmul.msk.bf16.vlgmr.msra.gmra.mxu0 %vm709_vm5, %v693_v2  ;;  %v418_v14 = vsel %vm5362_vm4, %v413_v4, %v417_v50  ;;  %v671_v15 = vunpack.c.l.b16 %v408_v9  ;;  %v591_v17 = vshll.u32 %v249_v1, 16  ;;  %v243_v9 = vld [vmem:[%s5350_s29 + $0x78] sm:$0xf] }
  0x2e   : > { %v672_v18 = vunpack.c.l.b16 %v418_v14  ;;  %v508_v20 = vor.u32 %v507_v11, %v503_v7  ;;  %v597_v21 = vshll.u32 %v250_v8, 16  ;;  %v590_v22 = vrot.slane %v588_v16, 4  ;;  %v244_v14 = vld [vmem:[%s5350_s29 + $0x7c] sm:$0xf] }
  0x2f   : > { %v499_v19 = vrot.slane %v498_v10, 4  ;;  %v593_v23 = vrot.slane %v591_v17, 5  ;;  %v601_v25 = vshrl.u32 %v250_v8, 16  ;;  %v607_v26 = vshll.u32 %v269_v13, 16 }
  0x30   : > { %v698_v28 = vpack.c.b16 %v672_v18, %v671_v15  ;;  %v509_v31 = vrot.slane %v508_v20, 4  ;;  %v599_v32 = vrot.slane %v597_v21, 5  ;;  %v300_v41 = vshrl.u32 %v225_v27, 16 }
  0x31   : > { %v504_v30 = vsel %vm5362_vm4, %v499_v19, %v503_v7  ;;  %v594_v35 = vor.u32 %v593_v23, %v590_v22  ;;  %v603_v36 = vrot.slane %v601_v25, 4  ;;  %v609_v40 = vrot.slane %v607_v26, 5  ;;  %v266_v22 = vld [vmem:[%s5350_s29 + $0x80] sm:$0x1] }
  0x32   : > { %v679_v34 = vunpack.c.l.b16 %v504_v30  ;;  %4454 = vmatmul.msk.bf16.gmra.mxu1 %vm709_vm5, %v698_v28  ;;  %v514_v38 = vsel %vm5362_vm4, %v509_v31, %v513_v12  ;;  %v303_v42 = vshll.u32 %v225_v27, 16  ;;  %v309_v46 = vshll.u32 %v5421_v33, 16 }
  0x33   : > { %v680_v43 = vunpack.c.l.b16 %v514_v38  ;;  %v595_v44 = vrot.slane %v594_v35, 4  ;;  %v604_v45 = vor.u32 %v603_v36, %v599_v32  ;;  %v302_v48 = vrot.slane %v300_v41, 4  ;;  %v251_v41 = vld [vmem:[%s5350_s29 + $0xa8] sm:$0xf] }
  0x34   : > { %v305_v49 = vrot.slane %v303_v42, 5  ;;  %v313_v50 = vshrl.u32 %v5421_v33, 16  ;;  %v319_v51 = vshll.u32 %v5424_v37, 16  ;;  %v311_v56 = vrot.slane %v309_v46, 5  ;;  %v270_v46 = vld [vmem:[%s5350_s29 + $0xb0] sm:$0x1] }
  0x35   : > { %v702_v53 = vpack.c.b16 %v680_v43, %v679_v34  ;;  %v600_v54 = vsel %vm5362_vm4, %v595_v44, %v599_v32  ;;  %v605_v55 = vrot.slane %v604_v45, 4  ;;  %v420_v63 = vshrl.u32 %v235_v47, 16  ;;  %v252_v45 = vld [vmem:[%s5350_s29 + $0xac] sm:$0xf] }
  0x36   : > { %v687_v57 = vunpack.c.l.b16 %v600_v54  ;;  %v306_v58 = vor.u32 %v305_v49, %v302_v48  ;;  %v315_v59 = vrot.slane %v313_v50, 4  ;;  %v321_v60 = vrot.slane %v319_v51, 5 }
  0x37   : > { %4458 = vmatmul.msk.bf16.gmra.mxu2 %vm709_vm5, %v702_v53  ;;  %v610_v62 = vsel %vm5362_vm4, %v605_v55, %v609_v40  ;;  %v423_v0 = vshll.u32 %v235_v47, 16  ;;  %v429_v1 = vshll.u32 %v5434_v52, 16  ;;  %v433_v8 = vshrl.u32 %v5434_v52, 16 }
  0x38   : > { %v688_v2 = vunpack.c.l.b16 %v610_v62  ;;  %v307_v4 = vrot.slane %v306_v58, 4  ;;  %v316_v7 = vor.u32 %v315_v59, %v311_v56  ;;  %v422_v10 = vrot.slane %v420_v63, 4 }
  0x39   : > { %v425_v11 = vrot.slane %v423_v0, 5  ;;  %v431_v12 = vrot.slane %v429_v1, 5  ;;  %v439_v13 = vshll.u32 %v5439_v61, 16  ;;  %v435_v18 = vrot.slane %v433_v8, 4  ;;  %v227_v1 = vld [vmem:[%s5350_s29 + $0x18] sm:$0xf] }
  0x3a   : > { %v706_v15 = vpack.c.b16 %v688_v2, %v687_v57  ;;  %v312_v16 = vsel %vm5362_vm4, %v307_v4, %v311_v56  ;;  %v317_v17 = vrot.slane %v316_v7, 4  ;;  %v516_v23 = vshrl.u32 %v243_v9, 16  ;;  %v5467_v8 = vld [vmem:[%s5350_s29 + $0x1c] sm:$0xf] }
  0x3b   : > { %v663_v19 = vunpack.c.l.b16 %v312_v16  ;;  %v426_v20 = vor.u32 %v425_v11, %v422_v10  ;;  %v441_v21 = vrot.slane %v439_v13, 5  ;;  %v436_v26 = vor.u32 %v435_v18, %v431_v12 }
  0x3c   : > { %4462 = vmatmul.msk.bf16.gmra.mxu3 %vm709_vm5, %v706_v15  ;;  %v322_v25 = vsel %vm5362_vm4, %v317_v17, %v321_v60  ;;  %v519_v27 = vshll.u32 %v243_v9, 16  ;;  %v525_v28 = vshll.u32 %v244_v14, 16  ;;  %v518_v32 = vrot.slane %v516_v23, 4  ;;  %v5470_v9 = vld [vmem:[%s5350_s29 + $0x20] sm:$0x1] }
  0x3d   : > { %v664_v30 = vunpack.c.l.b16 %v322_v25  ;;  %v427_v31 = vrot.slane %v426_v20, 4  ;;  %v529_v34 = vshrl.u32 %v244_v14, 16  ;;  %v437_v35 = vrot.slane %v436_v26, 4 }
  0x3e   : > { %v521_v36 = vrot.slane %v519_v27, 5  ;;  %v527_v38 = vrot.slane %v525_v28, 5  ;;  %v535_v40 = vshll.u32 %v266_v22, 16  ;;  %v612_v54 = vshrl.u32 %v251_v41, 16  ;;  %v237_v22 = vld [vmem:[%s5350_s29 + $0x54] sm:$0xf] }
  0x3f   : > { %v694_v42 = vpack.c.b16 %v664_v30, %v663_v19  ;;  %v432_v43 = vsel %vm5362_vm4, %v427_v31, %v431_v12  ;;  %v531_v44 = vrot.slane %v529_v34, 4  ;;  %v442_v47 = vsel %vm5362_vm4, %v437_v35, %v441_v21  ;;  %v5480_v28 = vld [vmem:[%s5350_s29 + $0x58] sm:$0xf]  ;;  %v5485_v35 = vld [vmem:[%s5350_s29 + $0x5c] sm:$0x1] }
  0x40   : > { %v673_v48 = vunpack.c.l.b16 %v432_v43  ;;  %v522_v49 = vor.u32 %v521_v36, %v518_v32  ;;  %v537_v50 = vrot.slane %v535_v40, 5  ;;  %v674_v51 = vunpack.c.l.b16 %v442_v47 }
  0x41   : > { %4450 = vmatmul.msk.bf16.gmra.mxu0 %vm709_vm5, %v694_v42  ;;  %v532_v53 = vor.u32 %v531_v44, %v527_v38  ;;  %v615_v55 = vshll.u32 %v251_v41, 16  ;;  %v621_v57 = vshll.u32 %v252_v45, 16  ;;  %v625_v58 = vshrl.u32 %v252_v45, 16 }
  0x42   : > { %v523_v56 = vrot.slane %v522_v49, 4  ;;  %v631_v59 = vshll.u32 %v270_v46, 16  ;;  %v699_v60 = vpack.c.b16 %v674_v51, %v673_v48  ;;  %v614_v63 = vrot.slane %v612_v54, 4  ;;  %v245_v46 = vld [vmem:[%s5350_s29 + $0x84] sm:$0xf] }
  0x43   : > { %v533_v62 = vrot.slane %v532_v53, 4  ;;  %v617_v0 = vrot.slane %v615_v55, 5  ;;  %v623_v4 = vrot.slane %v621_v57, 5  ;;  %v627_v7 = vrot.slane %v625_v58, 4 }
  0x44   : > { %v528_v2 = vsel %vm5362_vm4, %v523_v56, %v527_v38  ;;  %4455 = vmatmul.msk.bf16.gmra.mxu1 %vm709_vm5, %v699_v60  ;;  %v633_v13 = vrot.slane %v631_v59, 5  ;;  %v324_v16 = vshrl.u32 %v227_v1, 16  ;;  %v327_v17 = vshll.u32 %v227_v1, 16  ;;  %v246_v56 = vld [vmem:[%s5350_s29 + $0x88] sm:$0xf] }
  0x45   : > { %v538_v10 = vsel %vm5362_vm4, %v533_v62, %v537_v50  ;;  %v681_v11 = vunpack.c.l.b16 %v528_v2  ;;  %v618_v12 = vor.u32 %v617_v0, %v614_v63  ;;  %v628_v15 = vor.u32 %v627_v7, %v623_v4  ;;  %v267_v60 = vld [vmem:[%s5350_s29 + $0x8c] sm:$0x1] }
  0x46   : > { %v682_v14 = vunpack.c.l.b16 %v538_v10  ;;  %v333_v19 = vshll.u32 %v5467_v8, 16  ;;  %v337_v20 = vshrl.u32 %v5467_v8, 16  ;;  %v343_v21 = vshll.u32 %v5470_v9, 16 }
  0x47   : > { %v619_v18 = vrot.slane %v618_v12, 4  ;;  %v629_v25 = vrot.slane %v628_v15, 4  ;;  %v326_v26 = vrot.slane %v324_v16, 4  ;;  %v329_v27 = vrot.slane %v327_v17, 5  ;;  %v253_v16 = vld [vmem:[%s5350_s29 + $0xb4] sm:$0xf] }
  0x48   : > { %v703_v23 = vpack.c.b16 %v682_v14, %v681_v11  ;;  %v335_v31 = vrot.slane %v333_v19, 5  ;;  %v339_v32 = vrot.slane %v337_v20, 4  ;;  %v345_v34 = vrot.slane %v343_v21, 5  ;;  %v254_v20 = vld [vmem:[%s5350_s29 + $0xb8] sm:$0xf] }
  0x49   : > { %v624_v30 = vsel %vm5362_vm4, %v619_v18, %v623_v4  ;;  %v634_v36 = vsel %vm5362_vm4, %v629_v25, %v633_v13  ;;  %v330_v40 = vor.u32 %v329_v27, %v326_v26  ;;  %v444_v41 = vshrl.u32 %v237_v22, 16  ;;  %v271_v26 = vld [vmem:[%s5350_s29 + $0xbc] sm:$0x1] }
  0x4a   : > { %4459 = vmatmul.msk.bf16.gmra.mxu2 %vm709_vm5, %v703_v23  ;;  %v689_v38 = vunpack.c.l.b16 %v624_v30  ;;  %v690_v42 = vunpack.c.l.b16 %v634_v36  ;;  %v340_v43 = vor.u32 %v339_v32, %v335_v31  ;;  %v447_v44 = vshll.u32 %v237_v22, 16 }
  0x4b   : > { %v453_v45 = vshll.u32 %v5480_v28, 16  ;;  %v331_v47 = vrot.slane %v330_v40, 4  ;;  %v446_v48 = vrot.slane %v444_v41, 4  ;;  %v457_v49 = vshrl.u32 %v5480_v28, 16 }
  0x4c   : > { %v463_v50 = vshll.u32 %v5485_v35, 16  ;;  %v707_v51 = vpack.c.b16 %v690_v42, %v689_v38  ;;  %v341_v53 = vrot.slane %v340_v43, 4  ;;  %v449_v54 = vrot.slane %v447_v44, 5 }
  0x4d   : > { %v455_v55 = vrot.slane %v453_v45, 5  ;;  %v336_v57 = vsel %vm5362_vm4, %v331_v47, %v335_v31  ;;  %v459_v58 = vrot.slane %v457_v49, 4  ;;  %v540_v62 = vshrl.u32 %v245_v46, 16  ;;  %v229_v45 = vld [vmem:[%s5350_s29 + $0x24] sm:$0xf] }
  0x4e   : > { %v465_v59 = vrot.slane %v463_v50, 5  ;;  %4463 = vmatmul.msk.bf16.gmra.mxu3 %vm709_vm5, %v707_v51  ;;  %v346_v63 = vsel %vm5362_vm4, %v341_v53, %v345_v34  ;;  %v665_v0 = vunpack.c.l.b16 %v336_v57  ;;  %v450_v1 = vor.u32 %v449_v54, %v446_v48  ;;  %v5513_v50 = vld [vmem:[%s5350_s29 + $0x28] sm:$0xf] }
  0x4f   : > { %v543_v2 = vshll.u32 %v245_v46, 16  ;;  %v666_v4 = vunpack.c.l.b16 %v346_v63  ;;  %v460_v7 = vor.u32 %v459_v58, %v455_v55  ;;  %v542_v10 = vrot.slane %v540_v62, 4 }
  0x50   : > { %v549_v11 = vshll.u32 %v246_v56, 16  ;;  %v451_v12 = vrot.slane %v450_v1, 4  ;;  %v553_v14 = vshrl.u32 %v246_v56, 16  ;;  %v559_v15 = vshll.u32 %v267_v60, 16  ;;  %v5517_v56 = vld [vmem:[%s5350_s29 + $0x2c] sm:$0x1] }
  0x51   : > { %v545_v13 = vrot.slane %v543_v2, 5  ;;  %v695_v17 = vpack.c.b16 %v666_v4, %v665_v0  ;;  %v461_v18 = vrot.slane %v460_v7, 4  ;;  %v636_v31 = vshrl.u32 %v253_v16, 16 }
  0x52   : > { %v551_v19 = vrot.slane %v549_v11, 5  ;;  %v456_v21 = vsel %vm5362_vm4, %v451_v12, %v455_v55  ;;  %v555_v23 = vrot.slane %v553_v14, 4  ;;  %v561_v25 = vrot.slane %v559_v15, 5  ;;  %v4691_v15 = vld [vmem:[%s5350_s29 + $0xc] sm:$0xf] }
  0x53   : > { %v546_v22 = vor.u32 %v545_v13, %v542_v10  ;;  %4451 = vmatmul.msk.bf16.gmra.mxu0 %vm709_vm5, %v695_v17  ;;  %v466_v27 = vsel %vm5362_vm4, %v461_v18, %v465_v59  ;;  %v675_v30 = vunpack.c.l.b16 %v456_v21  ;;  %v639_v32 = vshll.u32 %v253_v16, 16  ;;  %v1074_v10 = vld [vmem:[%s5350_s29] sm:$0xe]  ;;  %v4692_v21 = vld [vmem:[%s5350_s29 + $0x10] sm:$0xf] }
  0x54   : > { %v676_v34 = vunpack.c.l.b16 %v466_v27  ;;  %v556_v38 = vor.u32 %v555_v23, %v551_v19  ;;  %v645_v40 = vshll.u32 %v254_v20, 16  ;;  %v638_v41 = vrot.slane %v636_v31, 4 }
  0x55   : > { %v547_v36 = vrot.slane %v546_v22, 4  ;;  %v641_v42 = vrot.slane %v639_v32, 5  ;;  %v649_v43 = vshrl.u32 %v254_v20, 16  ;;  %v655_v44 = vshll.u32 %v271_v26, 16  ;;  %v4837_v20 = vld [vmem:[%s6715_s1 + $0xc] sm:$0x3] }
  0x56   : > { %v700_v46 = vpack.c.b16 %v676_v34, %v675_v30  ;;  %v557_v48 = vrot.slane %v556_v38, 4  ;;  %v647_v49 = vrot.slane %v645_v40, 5  ;;  %v1130_v51 = vrot.slane %v5378_v6, 5 }
  0x57   : > { %v552_v47 = vsel %vm5362_vm4, %v547_v36, %v551_v19  ;;  %v642_v54 = vor.u32 %v641_v42, %v638_v41  ;;  %v651_v55 = vrot.slane %v649_v43, 4  ;;  %v657_v58 = vrot.slane %v655_v44, 5 }
  0x58   : > { %v683_v53 = vunpack.c.l.b16 %v552_v47  ;;  %4456 = vmatmul.msk.bf16.gmra.mxu1 %vm709_vm5, %v700_v46  ;;  %v562_v57 = vsel %vm5362_vm4, %v557_v48, %v561_v25  ;;  %v348_v59 = vshrl.u32 %v229_v45, 16  ;;  %v351_v60 = vshll.u32 %v229_v45, 16  ;;  %v4693_v47 = vld [vmem:[%s5350_s29 + $0x14] sm:$0x1] }
  0x59   : > { %v684_v62 = vunpack.c.l.b16 %v562_v57  ;;  %v643_v63 = vrot.slane %v642_v54, 4  ;;  %v652_v0 = vor.u32 %v651_v55, %v647_v49  ;;  %v357_v6 = vshll.u32 %v5513_v50, 16  ;;  %v4966_v55 = vld [vmem:[%s6715_s1 + $0xe] sm:$0x3] }
  0x5a   : > { %v350_v1 = vrot.slane %v348_v59, 4  ;;  %v353_v2 = vrot.slane %v351_v60, 5  ;;  %v361_v4 = vshrl.u32 %v5513_v50, 16  ;;  %v367_v7 = vshll.u32 %v5517_v56, 16  ;;  %v4788_v59 = vld [vmem:[%s6715_s1 + $0xa] sm:$0x3] }
  0x5b   : > { %v704_v11 = vpack.c.b16 %v684_v62, %v683_v53  ;;  %v648_v12 = vsel %vm5362_vm4, %v643_v63, %v647_v49  ;;  %v653_v13 = vrot.slane %v652_v0, 4  ;;  %v359_v14 = vrot.slane %v357_v6, 5  ;;  %v5035_v60 = vld [vmem:[%s5350_s29] sm:$0xff] }
  0x5c   : > { %v691_v16 = vunpack.c.l.b16 %v648_v12  ;;  %v354_v17 = vor.u32 %v353_v2, %v350_v1  ;;  %v363_v18 = vrot.slane %v361_v4, 4  ;;  %v369_v19 = vrot.slane %v367_v7, 5  ;;  %v5015_v1 = vld [vmem:[%s6715_s1 + $0x10] sm:$0x3] }
  0x5d   : > { %4460 = vmatmul.msk.bf16.gmra.mxu2 %vm709_vm5, %v704_v11  ;;  %v658_v22 = vsel %vm5362_vm4, %v653_v13, %v657_v58  ;;  %v4545_v23 = vrot.slane %v1074_v10, 9  ;;  %v1127_v31 = vrot.slane %v5375_v5, 5  ;;  %v2962_v32 = vand.u32 %v4837_v20, %v5325_v3 }
  0x5e   : > { %v692_v25 = vunpack.c.l.b16 %v658_v22  ;;  %v355_v26 = vrot.slane %v354_v17, 4  ;;  %v364_v27 = vor.u32 %v363_v18, %v359_v14  ;;  %v1795_v34 = vshrl.u32 %v4691_v15, 16  ;;  %v1075_v18 = vld [vmem:[%s5350_s29 + $0xc] sm:$0xe] }
  0x5f   : > { %v1798_v36 = vshll.u32 %v4691_v15, 16  ;;  %v1804_v38 = vshll.u32 %v4692_v21, 16  ;;  %v1128_v43 = vsel %vm5536_vm8, %v4545_v23, %v1127_v31  ;;  %v1129_v45 = vrot.slane %v1127_v31, 4  ;;  %2971 = vmatpush.bf16.msra.mxu2 %v2962_v32  ;;  %v4694_v15 = vld [vmem:[%s5350_s29 + $0x18] sm:$0xf] }
  0x60   : > { %v708_v40 = vpack.c.b16 %v692_v25, %v691_v16  ;;  %v360_v41 = vsel %vm5362_vm4, %v355_v26, %v359_v14  ;;  %v365_v42 = vrot.slane %v364_v27, 4  ;;  %v1239_v46 = vunpack.c.l.b16 %v1128_v43  ;;  %v4695_v16 = vld [vmem:[%s5350_s29 + $0x1c] sm:$0xf]  ;;  %v5051_v25 = vld [vmem:[%s5350_s29 + $0xc] sm:$0xff] }
  0x61   : > { %v667_v44 = vunpack.c.l.b16 %v360_v41  ;;  %v1797_v5 = vrot.slane %v1795_v34, 4  ;;  %v1800_v49 = vrot.slane %v1798_v36, 5  ;;  %v1806_v53 = vrot.slane %v1804_v38, 5  ;;  %v4696_v41 = vld [vmem:[%s5350_s29 + $0x20] sm:$0x1] }
  0x62   : > { %4464 = vmatmul.msk.bf16.gmra.mxu3 %vm709_vm5, %v708_v40  ;;  %v370_v48 = vsel %vm5362_vm4, %v365_v42, %v369_v19  ;;  %v1808_v54 = vshrl.u32 %v4692_v21, 16  ;;  %v1131_v58 = vsel %vm5536_vm8, %v1129_v45, %v1130_v51  ;;  %v1814_v6 = vshll.u32 %v4693_v47, 16  ;;  %v5036_v45 = vld [vmem:[%s5350_s29 + $0xc] sm:$0xff] }
  0x63   : > { %v668_v57 = vunpack.c.l.b16 %v370_v48  ;;  %v1240_v62 = vunpack.c.l.b16 %v1131_v58  ;;  %v1801_v63 = vor.u32 %v1800_v49, %v1797_v5  ;;  %v3616_v4 = vand.u32 %v4966_v55, %v5325_v3 }
  0x64   : > { %v1810_v0 = vrot.slane %v1808_v54, 4  ;;  %v2675_v10 = vand.u32 %v4788_v59, %v5325_v3  ;;  %v4014_v11 = vand.u32 %v5015_v1, %v5325_v3  ;;  %v1816_v14 = vrot.slane %v1814_v6, 5  ;;  %v1076_v59 = vld [vmem:[%s5350_s29 + $0x18] sm:$0xe] }
  0x65   : > { %v696_v2 = vpack.c.b16 %v668_v57, %v667_v44  ;;  %v1271_v51 = vpack.c.b16 %v1240_v62, %v1239_v46  ;;  %3625 = vmatpush.bf16.msra.mxu3 %v3616_v4  ;;  %v1802_v12 = vrot.slane %v1801_v63, 4  ;;  %v1134_v17 = vrot.slane %v5421_v33, 5  ;;  %v4698_v57 = vld [vmem:[%s5350_s29 + $0x28] sm:$0xf] }
  0x66   : > { %v1811_v7 = vor.u32 %v1810_v0, %v1806_v53  ;;  %2684 = vmatpush.bf16.msra.mxu1 %v2675_v10  ;;  %4023 = vmatpush.bf16.msra.mxu0 %v4014_v11  ;;  %v1819_v19 = vshrl.u32 %v4694_v15, 16  ;;  %v1822_v20 = vshll.u32 %v4694_v15, 16  ;;  %v1828_v22 = vshll.u32 %v4695_v16, 16 }
  0x67   : > { %4452 = vmatmul.msk.bf16.gmra.mxu0 %vm709_vm5, %v696_v2  ;;  %v1807_v21 = vsel %vm5362_vm4, %v1802_v12, %v1806_v53  ;;  %v1832_v23 = vshrl.u32 %v4695_v16, 16  ;;  %v4546_v26 = vrot.slane %v1075_v18, 9  ;;  %v1136_v27 = vrot.slane %v1134_v17, 4  ;;  %v4697_v53 = vld [vmem:[%s5350_s29 + $0x24] sm:$0xf] }
  0x68   : > { %4529 = vmatmul.msk.bf16.vlgmr.msrb.gmra.mxu1 %vm709_vm5, %v5035_v60  ;;  %v1812_v13 = vrot.slane %v1811_v7, 4  ;;  %v1137_v33 = vrot.slane %v5424_v37, 5  ;;  %v2180_v31 = vunpack.c.l.b16 %v1807_v21  ;;  %v1821_v34 = vrot.slane %v1819_v19, 4  ;;  %v4699_v16 = vld [vmem:[%s5350_s29 + $0x2c] sm:$0x1] }
  0x69   : > { %v1824_v36 = vrot.slane %v1822_v20, 5  ;;  %v1830_v38 = vrot.slane %v1828_v22, 5  ;;  %v1834_v40 = vrot.slane %v1832_v23, 4  ;;  %v1135_v42 = vsel %vm5536_vm8, %v4546_v26, %v1134_v17 }
  0x6a   : > { %v1817_v3 = vsel %vm5362_vm4, %v1812_v13, %v1816_v14  ;;  %v1138_v43 = vsel %vm5536_vm8, %v1136_v27, %v1137_v33  ;;  %v1838_v47 = vshll.u32 %v4696_v41, 16  ;;  %v1241_v5 = vunpack.c.l.b16 %v1135_v42 }
  0x6b   : > { %v2181_v32 = vunpack.c.l.b16 %v1817_v3  ;;  %v1825_v37 = vor.u32 %v1824_v36, %v1821_v34  ;;  %v1835_v46 = vor.u32 %v1834_v40, %v1830_v38  ;;  %v1242_v48 = vunpack.c.l.b16 %v1138_v43  ;;  %v5037_v3 = vld [vmem:[%s5350_s29 + $0x18] sm:$0xff]  ;;  %v1077_v40 = vld [vmem:[%s5350_s29 + $0x24] sm:$0xe] }
  0x6c   : > { %v1840_v55 = vrot.slane %v1838_v47, 5  ;;  %v1141_v60 = vrot.slane %v5467_v8, 5  ;;  %v1843_v62 = vshrl.u32 %v4697_v53, 16  ;;  %v1846_v0 = vshll.u32 %v4697_v53, 16 }
  0x6d   : > { %4562 = vmatmul.msk.bf16.vlgmr.msrb.gmra.mxu2 %vm709_vm5, %v1271_v51  ;;  %v2212_v44 = vpack.c.b16 %v2181_v32, %v2180_v31  ;;  %v1826_v49 = vrot.slane %v1825_v37, 4  ;;  %v1836_v54 = vrot.slane %v1835_v46, 4  ;;  %v1272_v58 = vpack.c.b16 %v1242_v48, %v1241_v5  ;;  %v5052_v51 = vld [vmem:[%s5350_s29 + $0x18] sm:$0xff]  ;;  %v4700_v31 = vld [vmem:[%s5350_s29 + $0x30] sm:$0xf]  ;;  %v5053_v37 = vld [vmem:[%s5350_s29 + $0x24] sm:$0xff] }
  0x6e   : > { %v1852_v6 = vshll.u32 %v4698_v57, 16  ;;  %v1856_v1 = vshrl.u32 %v4698_v57, 16  ;;  %v4547_v4 = vrot.slane %v1076_v59, 9  ;;  %v1143_v10 = vrot.slane %v1141_v60, 4  ;;  %v4701_v32 = vld [vmem:[%s5350_s29 + $0x34] sm:$0xf] }
  0x6f   : > { %v1831_v63 = vsel %vm5362_vm4, %v1826_v49, %v1830_v38  ;;  %v1841_v2 = vsel %vm5362_vm4, %v1836_v54, %v1840_v55  ;;  %v1144_v8 = vrot.slane %v5470_v9, 5  ;;  %v1845_v11 = vrot.slane %v1843_v62, 4  ;;  %v4702_v55 = vld [vmem:[%s5350_s29 + $0x38] sm:$0x1] }
  0x70   : > { %v2182_v7 = vunpack.c.l.b16 %v1831_v63  ;;  %v2183_v12 = vunpack.c.l.b16 %v1841_v2  ;;  %v1848_v13 = vrot.slane %v1846_v0, 5  ;;  %v1854_v14 = vrot.slane %v1852_v6, 5  ;;  %v4704_v2 = vld [vmem:[%s5350_s29 + $0x40] sm:$0xf] }
  0x71   : > { %v1858_v15 = vrot.slane %v1856_v1, 4  ;;  %v1142_v17 = vsel %vm5536_vm8, %v4547_v4, %v1141_v60  ;;  %v1145_v18 = vsel %vm5536_vm8, %v1143_v10, %v1144_v8  ;;  %v1862_v9 = vshll.u32 %v4699_v16, 16  ;;  %v4703_v1 = vld [vmem:[%s5350_s29 + $0x3c] sm:$0xf]  ;;  %v5208_v8 = vld [vmem:[%s5350_s29 + $0x34] sm:$0xf] }
  0x72   : > { %4675 = vmatmul.msk.bf16.vlgmr.msrb.gmra.mxu3 %vm709_vm5, %v5051_v25  ;;  %v2213_v19 = vpack.c.b16 %v2183_v12, %v2182_v7  ;;  %v1849_v20 = vor.u32 %v1848_v13, %v1845_v11  ;;  %v1243_v22 = vunpack.c.l.b16 %v1142_v17  ;;  %v1244_v23 = vunpack.c.l.b16 %v1145_v18  ;;  %v1078_v12 = vld [vmem:[%s5350_s29 + $0x30] sm:$0xe] }
  0x73   : > { %v1859_v21 = vor.u32 %v1858_v15, %v1854_v14  ;;  %v1864_v27 = vrot.slane %v1862_v9, 5  ;;  %v1148_v34 = vrot.slane %v5513_v50, 5  ;;  %v1867_v41 = vshrl.u32 %v4700_v31, 16  ;;  %v5209_v9 = vld [vmem:[%s5350_s29 + $0x38] sm:$0x1] }
  0x74   : > { %v1850_v25 = vrot.slane %v1849_v20, 4  ;;  %v1273_v33 = vpack.c.b16 %v1244_v23, %v1243_v22  ;;  %v1870_v42 = vshll.u32 %v4700_v31, 16  ;;  %v1876_v43 = vshll.u32 %v4701_v32, 16  ;;  %v5054_v22 = vld [vmem:[%s5350_s29 + $0x30] sm:$0xff] }
  0x75   : > { %v1860_v26 = vrot.slane %v1859_v21, 4  ;;  %v1150_v46 = vrot.slane %v1148_v34, 4  ;;  %v1151_v50 = vrot.slane %v5517_v56, 5  ;;  %v1869_v48 = vrot.slane %v1867_v41, 4  ;;  %v5038_v56 = vld [vmem:[%s5350_s29 + $0x24] sm:$0xff] }
  0x76   : > { %v1855_v36 = vsel %vm5362_vm4, %v1850_v25, %v1854_v14  ;;  %v1872_v49 = vrot.slane %v1870_v42, 5  ;;  %v1878_v53 = vrot.slane %v1876_v43, 5  ;;  %v1886_v63 = vshll.u32 %v4702_v55, 16  ;;  %v5039_v43 = vld [vmem:[%s5350_s29 + $0x30] sm:$0xff] }
  0x77   : > { %4740 = vmatmul.msk.bf16.vlgmr.msrb.gmra.mxu0 %vm709_vm5, %v2212_v44  ;;  %v1865_v38 = vsel %vm5362_vm4, %v1860_v26, %v1864_v27  ;;  %v1880_v44 = vshrl.u32 %v4701_v32, 16  ;;  %v2184_v47 = vunpack.c.l.b16 %v1855_v36  ;;  %v1155_v11 = vrot.slane %v5208_v8, 5  ;;  %v4705_v32 = vld [vmem:[%s5350_s29 + $0x44] sm:$0x1] }
  0x78   : > { %4530 = vmatmul.msk.bf16.gmra.mxu1 %vm709_vm5, %v5036_v45  ;;  %v4548_v45 = vrot.slane %v1077_v40, 9  ;;  %v2185_v5 = vunpack.c.l.b16 %v1865_v38  ;;  %v1873_v60 = vor.u32 %v1872_v49, %v1869_v48  ;;  %v1888_v7 = vrot.slane %v1886_v63, 5  ;;  %v4706_v48 = vld [vmem:[%s5350_s29 + $0x48] sm:$0xf]  ;;  %v4707_v49 = vld [vmem:[%s5350_s29 + $0x4c] sm:$0xf] }
  0x79   : > { %v1882_v54 = vrot.slane %v1880_v44, 4  ;;  %v1891_v13 = vshrl.u32 %v4703_v1, 16  ;;  %v1894_v14 = vshll.u32 %v4703_v1, 16  ;;  %v1900_v15 = vshll.u32 %v4704_v2, 16  ;;  %v5055_v1 = vld [vmem:[%s5350_s29 + $0x3c] sm:$0xff] }
  0x7a   : > { %v1149_v57 = vsel %vm5536_vm8, %v4548_v45, %v1148_v34  ;;  %v2214_v59 = vpack.c.b16 %v2185_v5, %v2184_v47  ;;  %v1874_v4 = vrot.slane %v1873_v60, 4  ;;  %v1904_v16 = vshrl.u32 %v4704_v2, 16 }
  0x7b   : > { %v1883_v62 = vor.u32 %v1882_v54, %v1878_v53  ;;  %v1245_v0 = vunpack.c.l.b16 %v1149_v57  ;;  %v4549_v20 = vrot.slane %v1078_v12, 9  ;;  %v1157_v21 = vrot.slane %v1155_v11, 4 }
  0x7c   : > { %v1879_v18 = vsel %vm5362_vm4, %v1874_v4, %v1878_v53  ;;  %v1893_v23 = vrot.slane %v1891_v13, 4  ;;  %v1896_v25 = vrot.slane %v1894_v14, 5  ;;  %v1902_v26 = vrot.slane %v1900_v15, 5  ;;  %v4708_v14 = vld [vmem:[%s5350_s29 + $0x50] sm:$0x1] }
  0x7d   : > { %4563 = vmatmul.msk.bf16.gmra.mxu2 %vm709_vm5, %v1272_v58  ;;  %v1152_v58 = vsel %vm5536_vm8, %v1150_v46, %v1151_v50  ;;  %v1906_v27 = vrot.slane %v1904_v16, 4  ;;  %v1156_v34 = vsel %vm5536_vm8, %v4549_v20, %v1155_v11  ;;  %v1910_v41 = vshll.u32 %v4705_v32, 16 }
  0x7e   : > { %v1246_v6 = vunpack.c.l.b16 %v1152_v58  ;;  %v1897_v38 = vor.u32 %v1896_v25, %v1893_v23  ;;  %v1915_v60 = vshrl.u32 %v4706_v48, 16  ;;  %v1924_v63 = vshll.u32 %v4707_v49, 16 }
  0x7f   : > { %v1907_v40 = vor.u32 %v1906_v27, %v1902_v26  ;;  %v1912_v5 = vrot.slane %v1910_v41, 5 }
  0x80   : > { %v1274_v10 = vpack.c.b16 %v1246_v6, %v1245_v0  ;;  %v1898_v50 = vrot.slane %v1897_v38, 4  ;;  %v1928_v0 = vshrl.u32 %v4707_v49, 16  ;;  %v1926_v12 = vrot.slane %v1924_v63, 5 }
  0x81   : > { %v1908_v47 = vrot.slane %v1907_v40, 4  ;;  %v1169_v38 = vrot.slane %v5434_v52, 5 }
  0x82   : > { %4676 = vmatmul.msk.bf16.gmra.mxu3 %vm709_vm5, %v5052_v51  ;;  %v1884_v51 = vrot.slane %v1883_v62, 4  ;;  %v1903_v55 = vsel %vm5362_vm4, %v1898_v50, %v1902_v26  ;;  %v1918_v62 = vshll.u32 %v4706_v48, 16  ;;  %v1930_v13 = vrot.slane %v1928_v0, 4  ;;  %v4711_v0 = vld [vmem:[%s5350_s29 + $0x5c] sm:$0x1] }
  0x83   : > { %v1913_v57 = vsel %vm5362_vm4, %v1908_v47, %v1912_v5  ;;  %v2188_v6 = vunpack.c.l.b16 %v1903_v55  ;;  %v5056_v5 = vld [vmem:[%s5350_s29 + $0x48] sm:$0xff]  ;;  %v1171_v49 = vrot.slane %v1169_v38, 4 }
  0x84   : > { %v2189_v2 = vunpack.c.l.b16 %v1913_v57  ;;  %v1920_v11 = vrot.slane %v1918_v62, 5  ;;  %v1931_v20 = vor.u32 %v1930_v13, %v1926_v12 }
  0x86   : > { %v1932_v26 = vrot.slane %v1931_v20, 4 }
  0x87   : > { %4741 = vmatmul.msk.bf16.gmra.mxu0 %vm709_vm5, %v2213_v19  ;;  %v1889_v19 = vsel %vm5362_vm4, %v1884_v51, %v1888_v7 }
  0x88   : > { %4531 = vmatmul.msk.bf16.gmra.mxu1 %vm709_vm5, %v5037_v3  ;;  %v1158_v3 = vrot.slane %v5209_v9, 5  ;;  %v2187_v31 = vunpack.c.l.b16 %v1889_v19 }
  0x8a   : > { %v1159_v36 = vsel %vm5536_vm8, %v1157_v21, %v1158_v3  ;;  %v1934_v21 = vshll.u32 %v4708_v14, 16  ;;  %v5040_v3 = vld [vmem:[%s5350_s29 + $0x3c] sm:$0xff] }
  0x8b   : > { %v1248_v45 = vunpack.c.l.b16 %v1159_v36  ;;  %v4710_v36 = vld [vmem:[%s5350_s29 + $0x58] sm:$0xf]  ;;  %v4712_v14 = vld [vmem:[%s5350_s29 + $0x60] sm:$0xf] }
  0x8c   : > { %v1936_v27 = vrot.slane %v1934_v21, 5  ;;  %v1952_v50 = vshrl.u32 %v4710_v36, 16 }
  0x8d   : > { %4564 = vmatmul.msk.bf16.gmra.mxu2 %vm709_vm5, %v1273_v33  ;;  %v2186_v33 = vunpack.c.l.b16 %v1879_v18  ;;  %v2216_v18 = vpack.c.b16 %v2189_v2, %v2188_v6 }
  0x8e   : > { %v1937_v41 = vsel %vm5362_vm4, %v1932_v26, %v1936_v27  ;;  %v1954_v62 = vrot.slane %v1952_v50, 4 }
  0x8f   : > { %v2215_v42 = vpack.c.b16 %v2187_v31, %v2186_v33  ;;  %v2191_v57 = vunpack.c.l.b16 %v1937_v41 }
  0x92   : > { %4677 = vmatmul.msk.bf16.gmra.mxu3 %vm709_vm5, %v5053_v37  ;;  %v1247_v37 = vunpack.c.l.b16 %v1156_v34  ;;  %v4709_v34 = vld [vmem:[%s5350_s29 + $0x54] sm:$0xf] }
  0x94   : > { %v1275_v54 = vpack.c.b16 %v1248_v45, %v1247_v37  ;;  %v1942_v37 = vshll.u32 %v4709_v34, 16  ;;  %v1948_v45 = vshll.u32 %v4710_v36, 16 }
  0x97   : > { %4742 = vmatmul.msk.bf16.gmra.mxu0 %vm709_vm5, %v2214_v59  ;;  %v1162_v59 = vrot.slane %v5390_v24, 5  ;;  %v1917_v24 = vrot.slane %v1915_v60, 4  ;;  %v1950_v60 = vrot.slane %v1948_v45, 5  ;;  %v1179_v45 = vrot.slane %v5485_v35, 5 }
  0x98   : > { %4532 = vmatmul.msk.bf16.gmra.mxu1 %vm709_vm5, %v5038_v56  ;;  %v1079_v56 = vld [vmem:[%s5350_s29 + $0x3c] sm:$0xe] }
  0x99   : > { %v4550_v51 = vrot.slane %v1079_v56, 9  ;;  %v1164_v7 = vrot.slane %v1162_v59, 4  ;;  %v1944_v56 = vrot.slane %v1942_v37, 5 }
  0x9b   : > { %v1163_v15 = vsel %vm5536_vm8, %v4550_v51, %v1162_v59  ;;  %v5041_v51 = vld [vmem:[%s5350_s29 + $0x48] sm:$0xff] }
  0x9d   : > { %v5631_v17 = vpop.f32.mrf.mxu1  ;;  %4565 = vmatmul.msk.bf16.gmra.mxu2 %vm709_vm5, %v1274_v10  ;;  %v1165_v10 = vrot.slane %v5395_v29, 5  ;;  %v1921_v29 = vor.u32 %v1920_v11, %v1917_v24  ;;  %v1958_v24 = vshll.u32 %v4711_v0, 16  ;;  %v5042_v0 = vld [vmem:[%s5350_s29 + $0x54] sm:$0xff] }
  0x9f   : > { %v1166_v16 = vsel %vm5536_vm8, %v1164_v7, %v1165_v10  ;;  %v1922_v25 = vrot.slane %v1921_v29, 4  ;;  %v1955_v10 = vor.u32 %v1954_v62, %v1950_v60  ;;  %v1960_v20 = vrot.slane %v1958_v24, 5 }
  0xa0   : > { %v1250_v23 = vunpack.c.l.b16 %v1166_v16 }
  0xa1   : > { %v1927_v40 = vsel %vm5362_vm4, %v1922_v25, %v1926_v12  ;;  %v1956_v29 = vrot.slane %v1955_v10, 4  ;;  %v1176_v25 = vrot.slane %v5480_v28, 5 }
  0xa2   : > { %4678 = vmatmul.msk.bf16.gmra.mxu3 %vm709_vm5, %v5054_v22  ;;  %v1249_v22 = vunpack.c.l.b16 %v1163_v15  ;;  %v2190_v55 = vunpack.c.l.b16 %v1927_v40  ;;  %v4713_v15 = vld [vmem:[%s5350_s29 + $0x64] sm:$0xf] }
  0xa3   : > { %v1976_v26 = vshrl.u32 %v4713_v15, 16  ;;  %v1961_v36 = vsel %vm5362_vm4, %v1956_v29, %v1960_v20  ;;  %v1178_v37 = vrot.slane %v1176_v25, 4  ;;  %v5210_v20 = vld [vmem:[%s5350_s29 + $0x64] sm:$0xf] }
  0xa4   : > { %v1276_v31 = vpack.c.b16 %v1250_v23, %v1249_v22  ;;  %v2217_v2 = vpack.c.b16 %v2191_v57, %v2190_v55  ;;  %v1966_v22 = vshll.u32 %v4712_v14, 16  ;;  %v1972_v23 = vshll.u32 %v4713_v15, 16 }
  0xa5   : > { %v5647_v44 = vpop.f32.mrf.mxu1  ;;  %v1978_v50 = vrot.slane %v1976_v26, 4 }
  0xa6   : > { %v1968_v41 = vrot.slane %v1966_v22, 5  ;;  %v1082_v22 = vld [vmem:[%s5350_s29 + $0x60] sm:$0xe] }
  0xa7   : > { %v5649_v46 = vpop.f32.mrf.mxu2  ;;  %4743 = vmatmul.msk.bf16.gmra.mxu0 %vm709_vm5, %v2215_v42  ;;  %v1080_v42 = vld [vmem:[%s5350_s29 + $0x48] sm:$0xe] }
  0xa8   : > { %4533 = vmatmul.msk.bf16.gmra.mxu1 %vm709_vm5, %v5039_v43  ;;  %v1939_v43 = vshrl.u32 %v4709_v34, 16  ;;  %v4551_v52 = vrot.slane %v1080_v42, 9  ;;  %v1974_v42 = vrot.slane %v1972_v23, 5 }
  0xaa   : > { %v5655_v53 = vpop.f32.mrf.mxu0  ;;  %v1941_v59 = vrot.slane %v1939_v43, 4  ;;  %v5057_v43 = vld [vmem:[%s5350_s29 + $0x54] sm:$0xff]  ;;  %v1979_v35 = vor.u32 %v1978_v50, %v1974_v42 }
  0xab   : > { %v5661_v58 = vpop.f32.mrf.mxu3 }
  0xac   : > { %v1945_v7 = vor.u32 %v1944_v56, %v1941_v59  ;;  %v1180_v56 = vsel %vm5536_vm8, %v1178_v37, %v1179_v45  ;;  %v1980_v10 = vrot.slane %v1979_v35, 4 }
  0xad   : > { %4566 = vmatmul.msk.bf16.gmra.mxu2 %vm709_vm5, %v1275_v54  ;;  %v1172_v54 = vrot.slane %v5439_v61, 5 }
  0xaf   : > { %v5667_v4 = vpop.f32.mrf.mxu1  ;;  %v5670_v8 = vpop.f32.mrf.mxu2  ;;  %v1173_v61 = vsel %vm5536_vm8, %v1171_v49, %v1172_v54  ;;  %v4714_v49 = vld [vmem:[%s5350_s29 + $0x68] sm:$0x1] }
  0xb0   : > { %v1252_v12 = vunpack.c.l.b16 %v1173_v61 }
  0xb2   : > { %4679 = vmatmul.msk.bf16.gmra.mxu3 %vm709_vm5, %v5055_v1  ;;  %v5678_v19 = vpop.f32.mrf.mxu0  ;;  %v1170_v1 = vsel %vm5536_vm8, %v4551_v52, %v1169_v38  ;;  %v2193_v52 = vunpack.c.l.b16 %v1961_v36 }
  0xb3   : > { %v5680_v9 = vpop.f32.mrf.mxu3  ;;  %v1251_v11 = vunpack.c.l.b16 %v1170_v1 }
  0xb5   : > { %v1277_v21 = vpack.c.b16 %v1252_v12, %v1251_v11  ;;  %v4715_v11 = vld [vmem:[%s5350_s29 + $0x6c] sm:$0xf]  ;;  %v4716_v12 = vld [vmem:[%s5350_s29 + $0x70] sm:$0xf] }
  0xb6   : > { %v1987_v23 = vshrl.u32 %v4715_v11, 16  ;;  %v1996_v26 = vshll.u32 %v4716_v12, 16 }
  0xb7   : > { %4744 = vmatmul.msk.bf16.gmra.mxu0 %vm709_vm5, %v2216_v18  ;;  %v5684_v33 = vpop.f32.mrf.mxu1  ;;  %v1946_v18 = vrot.slane %v1945_v7, 4 }
  0xb8   : > { %4534 = vmatmul.msk.bf16.gmra.mxu1 %vm709_vm5, %v5040_v3  ;;  %v1963_v3 = vshrl.u32 %v4712_v14, 16  ;;  %v1989_v45 = vrot.slane %v1987_v23, 4  ;;  %v4719_v23 = vld [vmem:[%s5350_s29 + $0x7c] sm:$0xf] }
  0xb9   : > { %v1951_v34 = vsel %vm5362_vm4, %v1946_v18, %v1950_v60  ;;  %v1982_v60 = vshll.u32 %v4714_v49, 16 }
  0xba   : > { %v5687_v32 = vpop.f32.mrf.mxu2  ;;  %v1965_v40 = vrot.slane %v1963_v3, 4 }
  0xbb   : > { %v1984_v24 = vrot.slane %v1982_v60, 5 }
  0xbc   : > { %v1969_v57 = vor.u32 %v1968_v41, %v1965_v40  ;;  %v5058_v41 = vld [vmem:[%s5350_s29 + $0x60] sm:$0xff] }
  0xbd   : > { %4567 = vmatmul.msk.bf16.gmra.mxu2 %vm709_vm5, %v1276_v31  ;;  %v1081_v31 = vld [vmem:[%s5350_s29 + $0x54] sm:$0xe]  ;;  %v1985_v29 = vsel %vm5362_vm4, %v1980_v10, %v1984_v24 }
  0xbe   : > { %v5697_v47 = vpop.f32.mrf.mxu0  ;;  %v4552_v28 = vrot.slane %v1081_v31, 9  ;;  %v1970_v7 = vrot.slane %v1969_v57, 4  ;;  %v2000_v31 = vshrl.u32 %v4716_v12, 16  ;;  %v4717_v57 = vld [vmem:[%s5350_s29 + $0x74] sm:$0x1] }
  0xbf   : > { %v5701_v48 = vpop.f32.mrf.mxu3 }
  0xc0   : > { %v1177_v59 = vsel %vm5536_vm8, %v4552_v28, %v1176_v25  ;;  %v1975_v18 = vsel %vm5362_vm4, %v1970_v7, %v1974_v42  ;;  %v1990_v25 = vshll.u32 %v4715_v11, 16  ;;  %v4553_v28 = vrot.slane %v1082_v22, 9  ;;  %v4718_v22 = vld [vmem:[%s5350_s29 + $0x78] sm:$0xf] }
  0xc1   : > { %v5704_v63 = vpop.f32.mrf.mxu1  ;;  %v1253_v61 = vunpack.c.l.b16 %v1177_v59  ;;  %v2194_v42 = vunpack.c.l.b16 %v1975_v18 }
  0xc2   : > { %4680 = vmatmul.msk.bf16.gmra.mxu3 %vm709_vm5, %v5056_v5  ;;  %v5708_v6 = vpop.f32.mrf.mxu2  ;;  %v2192_v5 = vunpack.c.l.b16 %v1951_v34  ;;  %v5211_v34 = vld [vmem:[%s5350_s29 + $0x68] sm:$0x1]  ;;  %v1992_v50 = vrot.slane %v1990_v25, 5  ;;  %v5212_v25 = vld [vmem:[%s5350_s29 + $0x70] sm:$0xf] }
  0xc3   : > { %v1186_v36 = vrot.slane %v5211_v34, 5  ;;  %v1083_v34 = vld [vmem:[%s5350_s29 + $0x6c] sm:$0xe] }
  0xc4   : > { %v2218_v62 = vpack.c.b16 %v2193_v52, %v2192_v5  ;;  %v1998_v5 = vrot.slane %v1996_v26, 5  ;;  %v2002_v52 = vrot.slane %v2000_v31, 4  ;;  %v1993_v60 = vor.u32 %v1992_v50, %v1989_v45  ;;  %v5213_v50 = vld [vmem:[%s5350_s29 + $0x74] sm:$0x1] }
  0xc5   : > { %v1190_v26 = vrot.slane %v5212_v25, 5 }
  0xc6   : > { %v5715_v13 = vpop.f32.mrf.mxu0 }
  0xc7   : > { %4745 = vmatmul.msk.bf16.gmra.mxu0 %vm709_vm5, %v2217_v2  ;;  %v5720_v16 = vpop.f32.mrf.mxu3  ;;  %v1254_v2 = vunpack.c.l.b16 %v1180_v56 }
  0xc8   : > { %4535 = vmatmul.msk.bf16.gmra.mxu1 %vm709_vm5, %v5041_v51 }
  0xc9   : > { %v5724_v27 = vpop.f32.mrf.mxu1  ;;  %v1278_v14 = vpack.c.b16 %v1254_v2, %v1253_v61  ;;  %v5043_v2 = vld [vmem:[%s5350_s29 + $0x60] sm:$0xff] }
  0xcd   : > { %v5731_v38 = vpop.f32.mrf.mxu2  ;;  %4568 = vmatmul.msk.bf16.gmra.mxu2 %vm709_vm5, %v1277_v21  ;;  %v1183_v21 = vrot.slane %v5210_v20, 5 }
  0xcf   : > { %v1185_v37 = vrot.slane %v1183_v21, 4  ;;  %v1184_v59 = vsel %vm5536_vm8, %v4553_v28, %v1183_v21  ;;  %v2024_v28 = vshrl.u32 %v4719_v23, 16 }
  0xd0   : > { %v5737_v54 = vpop.f32.mrf.mxu0  ;;  %v1255_v24 = vunpack.c.l.b16 %v1184_v59  ;;  %v4554_v59 = vrot.slane %v1083_v34, 9 }
  0xd1   : > { %v5739_v55 = vpop.f32.mrf.mxu3  ;;  %v1187_v56 = vsel %vm5536_vm8, %v1185_v37, %v1186_v36 }
  0xd2   : > { %4681 = vmatmul.msk.bf16.gmra.mxu3 %vm709_vm5, %v5057_v43  ;;  %v2195_v43 = vunpack.c.l.b16 %v1985_v29  ;;  %v1256_v11 = vunpack.c.l.b16 %v1187_v56  ;;  %v1192_v56 = vrot.slane %v1190_v26, 4 }
  0xd4   : > { %v2219_v35 = vpack.c.b16 %v2195_v43, %v2194_v42  ;;  %v1279_v21 = vpack.c.b16 %v1256_v11, %v1255_v24  ;;  %v2014_v42 = vshll.u32 %v4718_v22, 16  ;;  %v2020_v43 = vshll.u32 %v4719_v23, 16 }
  0xd5   : > { %v5747_v1 = vpop.f32.mrf.mxu1  ;;  %v5749_v51 = vpop.f32.mrf.mxu2  ;;  %v2026_v24 = vrot.slane %v2024_v28, 4 }
  0xd7   : > { %4746 = vmatmul.msk.bf16.gmra.mxu0 %vm709_vm5, %v2218_v62  ;;  %v2003_v62 = vor.u32 %v2002_v52, %v1998_v5  ;;  %v1193_v52 = vrot.slane %v5213_v50, 5 }
  0xd8   : > { %4536 = vmatmul.msk.bf16.gmra.mxu1 %vm709_vm5, %v5042_v0  ;;  %v5755_v15 = vpop.f32.mrf.mxu0  ;;  %v2006_v0 = vshll.u32 %v4717_v57, 16  ;;  %v5059_v57 = vld [vmem:[%s5350_s29 + $0x6c] sm:$0xff] }
  0xd9   : > { %v5762_v3 = vpop.f32.mrf.mxu3  ;;  %v2004_v18 = vrot.slane %v2003_v62, 4 }
  0xda   : > { %v2008_v29 = vrot.slane %v2006_v0, 5 }
  0xdd   : > { %4569 = vmatmul.msk.bf16.gmra.mxu2 %vm709_vm5, %v1278_v14  ;;  %v5767_v40 = vpop.f32.mrf.mxu1  ;;  %v1994_v14 = vrot.slane %v1993_v60, 4 }
  0xdf   : > { %v1999_v31 = vsel %vm5362_vm4, %v1994_v14, %v1998_v5  ;;  %v4720_v14 = vld [vmem:[%s5350_s29 + $0x80] sm:$0x1] }
  0xe0   : > { %v5770_v49 = vpop.f32.mrf.mxu2 }
  0xe2   : > { %4682 = vmatmul.msk.bf16.gmra.mxu3 %vm709_vm5, %v5058_v41  ;;  %v2011_v41 = vshrl.u32 %v4718_v22, 16  ;;  %v5044_v22 = vld [vmem:[%s5350_s29 + $0x6c] sm:$0xff] }
  0xe4   : > { %v5778_v61 = vpop.f32.mrf.mxu0  ;;  %v2013_v0 = vrot.slane %v2011_v41, 4 }
  0xe5   : > { %v5781_v7 = vpop.f32.mrf.mxu3  ;;  %v994_v10 = vpop.f32.mrf.mxu1 }
  0xe6   : > { %v995_v12 = vadd.f32 %v994_v10, %v5655_v53  ;;  %v2009_v53 = vsel %vm5362_vm4, %v2004_v18, %v2008_v29  ;;  %v2022_v10 = vrot.slane %v2020_v43, 5  ;;  %v1191_v18 = vsel %vm5536_vm8, %v4554_v59, %v1190_v26 }
  0xe7   : > { %4747 = vmatmul.msk.bf16.gmra.mxu0 %vm709_vm5, %v2219_v35  ;;  %v2196_v35 = vunpack.c.l.b16 %v1999_v31  ;;  %v2197_v60 = vunpack.c.l.b16 %v2009_v53  ;;  %v2030_v31 = vshll.u32 %v4720_v14, 16 }
  0xe8   : > { %v5785_v20 = vpop.f32.mrf.mxu2  ;;  %4537 = vmatmul.msk.bf16.gmra.mxu1 %vm709_vm5, %v5043_v2  ;;  %v2016_v2 = vrot.slane %v2014_v42, 5  ;;  %v2027_v25 = vor.u32 %v2026_v24, %v2022_v10 }
  0xe9   : > { %v2220_v29 = vpack.c.b16 %v2197_v60, %v2196_v35  ;;  %v2032_v50 = vrot.slane %v2030_v31, 5  ;;  %v4722_v35 = vld [vmem:[%s5350_s29 + $0x88] sm:$0xf]  ;;  %v5214_v60 = vld [vmem:[%s5350_s29 + $0x7c] sm:$0xf] }
  0xea   : > { %v2017_v23 = vor.u32 %v2016_v2, %v2013_v0  ;;  %v1084_v0 = vld [vmem:[%s5350_s29 + $0x78] sm:$0xe] }
  0xec   : > { %v5796_v36 = vpop.f32.mrf.mxu0  ;;  %v2018_v28 = vrot.slane %v2017_v23, 4 }
  0xed   : > { %v5798_v37 = vpop.f32.mrf.mxu3  ;;  %4570 = vmatmul.msk.bf16.gmra.mxu2 %vm709_vm5, %v1279_v21  ;;  %v996_v45 = vpop.f32.mrf.mxu1 }
  0xee   : > { %v997_v5 = vadd.f32 %v996_v45, %v5678_v19  ;;  %v1194_v19 = vsel %vm5536_vm8, %v1192_v56, %v1193_v52  ;;  %v2028_v45 = vrot.slane %v2027_v25, 4  ;;  %v4721_v52 = vld [vmem:[%s5350_s29 + $0x84] sm:$0xf]  ;;  %v5060_v25 = vld [vmem:[%s5350_s29 + $0x78] sm:$0xff] }
  0xef   : > { %v1258_v41 = vunpack.c.l.b16 %v1194_v19  ;;  %v2038_v2 = vshll.u32 %v4721_v52, 16  ;;  %v2048_v19 = vshrl.u32 %v4722_v35, 16 }
  0xf0   : > { %v1347_v62 = vpop.f32.mrf.mxu2  ;;  %v2033_v14 = vsel %vm5362_vm4, %v2028_v45, %v2032_v50 }
  0xf1   : > { %v1427_v11 = vadd.f32 %v1347_v62, %v995_v12  ;;  %v1257_v12 = vunpack.c.l.b16 %v1191_v18  ;;  %v1197_v62 = vrot.slane %v5214_v60, 5  ;;  %v2044_v18 = vshll.u32 %v4722_v35, 16 }
  0xf2   : > { %4683 = vmatmul.msk.bf16.gmra.mxu3 %vm709_vm5, %v5059_v57  ;;  %v2050_v45 = vrot.slane %v2048_v19, 4 }
  0xf3   : > { %v1280_v56 = vpack.c.b16 %v1258_v41, %v1257_v12 }
  0xf4   : > { %v2288_v21 = vpop.f32.mrf.mxu0 }
  0xf5   : > { %v1634_v53 = vpop.f32.mrf.mxu3  ;;  %v999_v34 = vpop.f32.mrf.mxu1 }
  0xf6   : > { %v1714_v42 = vadd.f32 %v1634_v53, %v1427_v11  ;;  %v1000_v26 = vadd.f32 %v999_v34, %v5697_v47  ;;  %v2035_v47 = vshrl.u32 %v4721_v52, 16  ;;  %v2023_v11 = vsel %vm5362_vm4, %v2018_v28, %v2022_v10 }
  0xf7   : > { %4748 = vmatmul.msk.bf16.gmra.mxu0 %vm709_vm5, %v2220_v29  ;;  %v5215_v29 = vld [vmem:[%s5350_s29 + $0x80] sm:$0x1]  ;;  %v4555_v53 = vrot.slane %v1084_v0, 9  ;;  %v1199_v34 = vrot.slane %v1197_v62, 4  ;;  %v2198_v12 = vunpack.c.l.b16 %v2023_v11  ;;  %v2199_v10 = vunpack.c.l.b16 %v2033_v14 }
  0xf8   : > { %v1349_v43 = vpop.f32.mrf.mxu2  ;;  %4538 = vmatmul.msk.bf16.gmra.mxu1 %vm709_vm5, %v5044_v22  ;;  %v5815_v57 = vadd.f32 %v2288_v21, %v1714_v42  ;;  %v1200_v21 = vrot.slane %v5215_v29, 5  ;;  %v2037_v41 = vrot.slane %v2035_v47, 4  ;;  %v2040_v42 = vrot.slane %v2038_v2, 5  ;;  %v5045_v47 = vld [vmem:[%s5350_s29 + $0x78] sm:$0xff] }
  0xf9   : > { %v1428_v59 = vadd.f32 %v1349_v43, %v997_v5  ;;  %v2046_v28 = vrot.slane %v2044_v18, 5  ;;  %v2221_v35 = vpack.c.b16 %v2199_v10, %v2198_v12  ;;  %v4725_v12 = vld [vmem:[%s5350_s29 + $0x94] sm:$0xf]  ;;  %v5216_v10 = vld [vmem:[%s5350_s29 + $0x88] sm:$0xf] }
  0xfa   : > { %v2041_v60 = vor.u32 %v2040_v42, %v2037_v41  ;;  %v1204_v41 = vrot.slane %v5216_v10, 5  ;;  %v1085_v42 = vld [vmem:[%s5350_s29 + $0x84] sm:$0xe] }
  0xfb   : > { %v2051_v2 = vor.u32 %v2050_v45, %v2046_v28 }
  0xfc   : > { %v2290_v24 = vpop.f32.mrf.mxu0  ;;  %v2042_v29 = vrot.slane %v2041_v60, 4 }
  0xfd   : > { %v1636_v5 = vpop.f32.mrf.mxu3  ;;  %4571 = vmatmul.msk.bf16.gmra.mxu2 %vm709_vm5, %v1280_v56  ;;  %v1001_v22 = vpop.f32.mrf.mxu1  ;;  %v4723_v56 = vld [vmem:[%s5350_s29 + $0x8c] sm:$0x1] }
  0xfe   : > { %v1715_v23 = vadd.f32 %v1636_v5, %v1428_v59  ;;  %v1002_v31 = vadd.f32 %v1001_v22, %v5715_v13  ;;  %v1198_v59 = vsel %vm5536_vm8, %v4555_v53, %v1197_v62  ;;  %v1201_v13 = vsel %vm5536_vm8, %v1199_v34, %v1200_v21 }
  0xff   : > { %v2054_v11 = vshll.u32 %v4723_v56, 16  ;;  %v1260_v18 = vunpack.c.l.b16 %v1201_v13  ;;  %v2052_v5 = vrot.slane %v2051_v2, 4  ;;  %v2072_v13 = vshrl.u32 %v4725_v12, 16  ;;  %v5061_v2 = vld [vmem:[%s5350_s29 + $0x84] sm:$0xff] }
 0x100   : > { %v1352_v43 = vpop.f32.mrf.mxu2  ;;  %v5828_v50 = vadd.f32 %v2290_v24, %v1715_v23  ;;  %v4724_v23 = vld [vmem:[%s5350_s29 + $0x90] sm:$0xf] }
 0x101   : > { %v1429_v52 = vadd.f32 %v1352_v43, %v1000_v26  ;;  %v1259_v26 = vunpack.c.l.b16 %v1198_v59  ;;  %v2056_v22 = vrot.slane %v2054_v11, 5  ;;  %v2059_v43 = vshrl.u32 %v4724_v23, 16 }
 0x102   : > { %4684 = vmatmul.msk.bf16.gmra.mxu3 %vm709_vm5, %v5060_v25  ;;  %v2062_v56 = vshll.u32 %v4724_v23, 16  ;;  %v2068_v59 = vshll.u32 %v4725_v12, 16  ;;  %v4556_v11 = vrot.slane %v1085_v42, 9 }
 0x103   : > { %v1281_v34 = vpack.c.b16 %v1260_v18, %v1259_v26  ;;  %v2061_v18 = vrot.slane %v2059_v43, 4 }
 0x104   : > { %v2293_v0 = vpop.f32.mrf.mxu0 }
 0x105   : > { %v1639_v14 = vpop.f32.mrf.mxu3  ;;  %v1004_v24 = vpop.f32.mrf.mxu1 }
 0x106   : > { %v1716_v19 = vadd.f32 %v1639_v14, %v1429_v52  ;;  %v1005_v62 = vadd.f32 %v1004_v24, %v5737_v54  ;;  %v2047_v54 = vsel %vm5362_vm4, %v2042_v29, %v2046_v28  ;;  %v2057_v52 = vsel %vm5362_vm4, %v2052_v5, %v2056_v22 }
 0x107   : > { %4749 = vmatmul.msk.bf16.gmra.mxu0 %vm709_vm5, %v2221_v35  ;;  %v5217_v35 = vld [vmem:[%s5350_s29 + $0x8c] sm:$0x1]  ;;  %v1206_v14 = vrot.slane %v1204_v41, 4  ;;  %v2200_v24 = vunpack.c.l.b16 %v2047_v54  ;;  %v2201_v26 = vunpack.c.l.b16 %v2057_v52  ;;  %v2064_v29 = vrot.slane %v2062_v56, 5  ;;  %v5046_v54 = vld [vmem:[%s5350_s29 + $0x84] sm:$0xff] }
 0x108   : > { %v1354_v21 = vpop.f32.mrf.mxu2  ;;  %4539 = vmatmul.msk.bf16.gmra.mxu1 %vm709_vm5, %v5045_v47  ;;  %v5841_v25 = vadd.f32 %v2293_v0, %v1716_v19  ;;  %v1207_v60 = vrot.slane %v5217_v35, 5  ;;  %v2074_v5 = vrot.slane %v2072_v13, 4 }
 0x109   : > { %v1430_v53 = vadd.f32 %v1354_v21, %v1002_v31  ;;  %v2070_v21 = vrot.slane %v2068_v59, 5  ;;  %v2222_v12 = vpack.c.b16 %v2201_v26, %v2200_v24  ;;  %v2065_v42 = vor.u32 %v2064_v29, %v2061_v18  ;;  %v4728_v24 = vld [vmem:[%s5350_s29 + $0xa0] sm:$0xf]  ;;  %v1086_v29 = vld [vmem:[%s5350_s29 + $0x90] sm:$0xe] }
 0x10b   : > { %v2075_v43 = vor.u32 %v2074_v5, %v2070_v21 }
 0x10c   : > { %v2295_v45 = vpop.f32.mrf.mxu0 }
 0x10d   : > { %v1641_v31 = vpop.f32.mrf.mxu3  ;;  %4572 = vmatmul.msk.bf16.gmra.mxu2 %vm709_vm5, %v1281_v34  ;;  %v1006_v0 = vpop.f32.mrf.mxu1  ;;  %v4726_v34 = vld [vmem:[%s5350_s29 + $0x98] sm:$0x1] }
 0x10e   : > { %v1717_v47 = vadd.f32 %v1641_v31, %v1430_v53  ;;  %v1007_v28 = vadd.f32 %v1006_v0, %v5755_v15  ;;  %v1205_v15 = vsel %vm5536_vm8, %v4556_v11, %v1204_v41  ;;  %v1208_v53 = vsel %vm5536_vm8, %v1206_v14, %v1207_v60  ;;  %v4727_v41 = vld [vmem:[%s5350_s29 + $0x9c] sm:$0xf] }
 0x10f   : > { %v2078_v52 = vshll.u32 %v4726_v34, 16  ;;  %v1262_v59 = vunpack.c.l.b16 %v1208_v53  ;;  %v2066_v31 = vrot.slane %v2065_v42, 4  ;;  %v2076_v0 = vrot.slane %v2075_v43, 4 }
 0x110   : > { %v1357_v19 = vpop.f32.mrf.mxu2  ;;  %v5854_v22 = vadd.f32 %v2295_v45, %v1717_v47  ;;  %v2083_v26 = vshrl.u32 %v4727_v41, 16  ;;  %v2086_v18 = vshll.u32 %v4727_v41, 16  ;;  %v2096_v53 = vshrl.u32 %v4728_v24, 16 }
 0x111   : > { %v1431_v23 = vadd.f32 %v1357_v19, %v1005_v62  ;;  %v1261_v62 = vunpack.c.l.b16 %v1205_v15  ;;  %v2080_v47 = vrot.slane %v2078_v52, 5  ;;  %v5218_v19 = vld [vmem:[%s5350_s29 + $0x94] sm:$0xf]  ;;  %v2092_v15 = vshll.u32 %v4728_v24, 16 }
 0x112   : > { %4685 = vmatmul.msk.bf16.gmra.mxu3 %vm709_vm5, %v5061_v2  ;;  %v2085_v42 = vrot.slane %v2083_v26, 4  ;;  %v2088_v43 = vrot.slane %v2086_v18, 5 }
 0x113   : > { %v1282_v14 = vpack.c.b16 %v1262_v59, %v1261_v62  ;;  %v2081_v34 = vsel %vm5362_vm4, %v2076_v0, %v2080_v47  ;;  %v4557_v62 = vrot.slane %v1086_v29, 9 }
 0x114   : > { %v2298_v10 = vpop.f32.mrf.mxu0  ;;  %v2089_v24 = vor.u32 %v2088_v43, %v2085_v42  ;;  %v4731_v42 = vld [vmem:[%s5350_s29 + $0xac] sm:$0xf] }
 0x115   : > { %v1644_v56 = vpop.f32.mrf.mxu3  ;;  %v1009_v45 = vpop.f32.mrf.mxu1 }
 0x116   : > { %v1718_v13 = vadd.f32 %v1644_v56, %v1431_v23  ;;  %v1010_v35 = vadd.f32 %v1009_v45, %v5778_v61  ;;  %v1211_v61 = vrot.slane %v5218_v19, 5  ;;  %v2071_v23 = vsel %vm5362_vm4, %v2066_v31, %v2070_v21  ;;  %v5062_v56 = vld [vmem:[%s5350_s29 + $0x90] sm:$0xff] }
 0x117   : > { %4750 = vmatmul.msk.bf16.gmra.mxu0 %vm709_vm5, %v2222_v12  ;;  %v5219_v12 = vld [vmem:[%s5350_s29 + $0x98] sm:$0x1]  ;;  %v2202_v59 = vunpack.c.l.b16 %v2071_v23  ;;  %v2098_v31 = vrot.slane %v2096_v53, 4  ;;  %v5047_v19 = vld [vmem:[%s5350_s29 + $0x90] sm:$0xff] }
 0x118   : > { %v1359_v60 = vpop.f32.mrf.mxu2  ;;  %4540 = vmatmul.msk.bf16.gmra.mxu1 %vm709_vm5, %v5046_v54  ;;  %v5867_v2 = vadd.f32 %v2298_v10, %v1718_v13  ;;  %v1214_v10 = vrot.slane %v5219_v12, 5  ;;  %v1213_v21 = vrot.slane %v1211_v61, 4  ;;  %v2203_v13 = vunpack.c.l.b16 %v2081_v34 }
 0x119   : > { %v1432_v11 = vadd.f32 %v1359_v60, %v1007_v28  ;;  %v2094_v60 = vrot.slane %v2092_v15, 5  ;;  %v2090_v12 = vrot.slane %v2089_v24, 4  ;;  %v5221_v24 = vld [vmem:[%s5350_s29 + $0xa4] sm:$0x1] }
 0x11a   : > { %v2223_v26 = vpack.c.b16 %v2203_v13, %v2202_v59  ;;  %v5220_v59 = vld [vmem:[%s5350_s29 + $0xa0] sm:$0xf] }
 0x11b   : > { %v2099_v29 = vor.u32 %v2098_v31, %v2094_v60  ;;  %v1218_v13 = vrot.slane %v5220_v59, 5  ;;  %v1087_v31 = vld [vmem:[%s5350_s29 + $0x9c] sm:$0xe] }
 0x11c   : > { %v2300_v5 = vpop.f32.mrf.mxu0 }
 0x11d   : > { %v1646_v28 = vpop.f32.mrf.mxu3  ;;  %4573 = vmatmul.msk.bf16.gmra.mxu2 %vm709_vm5, %v1282_v14  ;;  %v1011_v54 = vpop.f32.mrf.mxu1  ;;  %v4729_v14 = vld [vmem:[%s5350_s29 + $0xa4] sm:$0x1] }
 0x11e   : > { %v1719_v52 = vadd.f32 %v1646_v28, %v1432_v11  ;;  %v1012_v45 = vadd.f32 %v1011_v54, %v5796_v36  ;;  %v1212_v11 = vsel %vm5536_vm8, %v4557_v62, %v1211_v61  ;;  %v1215_v36 = vsel %vm5536_vm8, %v1213_v21, %v1214_v10  ;;  %v4730_v28 = vld [vmem:[%s5350_s29 + $0xa8] sm:$0xf] }
 0x11f   : > { %v2102_v23 = vshll.u32 %v4729_v14, 16  ;;  %v1264_v15 = vunpack.c.l.b16 %v1215_v36  ;;  %v2100_v10 = vrot.slane %v2099_v29, 4  ;;  %v2107_v62 = vshrl.u32 %v4730_v28, 16 }
 0x120   : > { %v1362_v41 = vpop.f32.mrf.mxu2  ;;  %v5880_v0 = vadd.f32 %v2300_v5, %v1719_v52  ;;  %v2095_v21 = vsel %vm5362_vm4, %v2090_v12, %v2094_v60  ;;  %v2120_v14 = vshrl.u32 %v4731_v42, 16 }
 0x121   : > { %v1433_v47 = vadd.f32 %v1362_v41, %v1010_v35  ;;  %v1263_v35 = vunpack.c.l.b16 %v1212_v11  ;;  %v2104_v54 = vrot.slane %v2102_v23, 5  ;;  %v2110_v41 = vshll.u32 %v4730_v28, 16  ;;  %v5063_v23 = vld [vmem:[%s5350_s29 + $0x9c] sm:$0xff] }
 0x122   : > { %4686 = vmatmul.msk.bf16.gmra.mxu3 %vm709_vm5, %v5062_v56  ;;  %v2109_v60 = vrot.slane %v2107_v62, 4 }
 0x123   : > { %v1283_v56 = vpack.c.b16 %v1264_v15, %v1263_v35  ;;  %v2105_v36 = vsel %vm5362_vm4, %v2100_v10, %v2104_v54  ;;  %v1220_v35 = vrot.slane %v1218_v13, 4  ;;  %v2112_v15 = vrot.slane %v2110_v41, 5  ;;  %v4732_v54 = vld [vmem:[%s5350_s29 + $0xb0] sm:$0x1] }
 0x124   : > { %v2303_v18 = vpop.f32.mrf.mxu0  ;;  %v2205_v12 = vunpack.c.l.b16 %v2105_v36 }
 0x125   : > { %v1649_v5 = vpop.f32.mrf.mxu3  ;;  %v1014_v34 = vpop.f32.mrf.mxu1  ;;  %v2113_v62 = vor.u32 %v2112_v15, %v2109_v60 }
 0x126   : > { %v1720_v53 = vadd.f32 %v1649_v5, %v1433_v47  ;;  %v2116_v47 = vshll.u32 %v4731_v42, 16  ;;  %v4558_v5 = vrot.slane %v1087_v31, 9  ;;  %v5048_v31 = vld [vmem:[%s5350_s29 + $0x9c] sm:$0xff] }
 0x127   : > { %4751 = vmatmul.msk.bf16.gmra.mxu0 %vm709_vm5, %v2223_v26  ;;  %v1221_v26 = vrot.slane %v5221_v24, 5 }
 0x128   : > { %v1364_v61 = vpop.f32.mrf.mxu2  ;;  %4541 = vmatmul.msk.bf16.gmra.mxu1 %vm709_vm5, %v5047_v19  ;;  %v5893_v43 = vadd.f32 %v2303_v18, %v1720_v53  ;;  %v2204_v18 = vunpack.c.l.b16 %v2095_v21  ;;  %v1015_v53 = vadd.f32 %v1014_v34, %v5631_v17  ;;  %v2118_v28 = vrot.slane %v2116_v47, 5 }
 0x129   : > { %v1434_v52 = vadd.f32 %v1364_v61, %v1012_v45  ;;  %v2122_v61 = vrot.slane %v2120_v14, 4  ;;  %v2126_v21 = vshll.u32 %v4732_v54, 16 }
 0x12a   : > { %v2224_v17 = vpack.c.b16 %v2205_v12, %v2204_v18  ;;  %v4733_v18 = vld [vmem:[%s5350_s29 + $0xb4] sm:$0xf] }
 0x12b   : > { %v2123_v34 = vor.u32 %v2122_v61, %v2118_v28  ;;  %v2128_v60 = vrot.slane %v2126_v21, 5  ;;  %v2134_v54 = vshll.u32 %v4733_v18, 16 }
 0x12c   : > { %v2305_v11 = vpop.f32.mrf.mxu0 }
 0x12d   : > { %v1651_v45 = vpop.f32.mrf.mxu3  ;;  %4574 = vmatmul.msk.bf16.gmra.mxu2 %vm709_vm5, %v1283_v56  ;;  %v1016_v19 = vpop.f32.mrf.mxu1  ;;  %v1222_v56 = vsel %vm5536_vm8, %v1220_v35, %v1221_v26  ;;  %v2124_v26 = vrot.slane %v2123_v34, 4 }
 0x12e   : > { %v1721_v29 = vadd.f32 %v1651_v45, %v1434_v52  ;;  %v1219_v52 = vsel %vm5536_vm8, %v4558_v5, %v1218_v13  ;;  %v1266_v36 = vunpack.c.l.b16 %v1222_v56  ;;  %v2114_v45 = vrot.slane %v2113_v62, 4  ;;  %v5223_v62 = vld [vmem:[%s5350_s29 + $0xb0] sm:$0x1] }
 0x12f   : > { %v1017_v13 = vadd.f32 %v1016_v19, %v5647_v44  ;;  %v2131_v44 = vshrl.u32 %v4733_v18, 16  ;;  %v2129_v19 = vsel %vm5362_vm4, %v2124_v26, %v2128_v60 }
 0x130   : > { %v1367_v10 = vpop.f32.mrf.mxu2  ;;  %v5906_v42 = vadd.f32 %v2305_v11, %v1721_v29  ;;  %v1265_v11 = vunpack.c.l.b16 %v1219_v52  ;;  %v2119_v61 = vsel %vm5362_vm4, %v2114_v45, %v2118_v28 }
 0x131   : > { %v1435_v59 = vadd.f32 %v1367_v10, %v1015_v53  ;;  %v5222_v53 = vld [vmem:[%s5350_s29 + $0xac] sm:$0xf]  ;;  %v1088_v10 = vld [vmem:[%s5350_s29 + $0xa8] sm:$0xe] }
 0x132   : > { %4687 = vmatmul.msk.bf16.gmra.mxu3 %vm709_vm5, %v5063_v23  ;;  %v4734_v23 = vld [vmem:[%s5350_s29 + $0xb8] sm:$0xf]  ;;  %v1284_v15 = vpack.c.b16 %v1266_v36, %v1265_v11  ;;  %v1225_v12 = vrot.slane %v5222_v53, 5  ;;  %v2206_v11 = vunpack.c.l.b16 %v2119_v61  ;;  %v2207_v36 = vunpack.c.l.b16 %v2129_v19  ;;  %v4735_v53 = vld [vmem:[%s5350_s29 + $0xbc] sm:$0x1] }
 0x133   : > { %v2144_v52 = vshrl.u32 %v4734_v23, 16 }
 0x134   : > { %v2308_v41 = vpop.f32.mrf.mxu0 }
 0x135   : > { %v1654_v47 = vpop.f32.mrf.mxu3  ;;  %v1019_v14 = vpop.f32.mrf.mxu1  ;;  %v2146_v60 = vrot.slane %v2144_v52, 4 }
 0x136   : > { %v1722_v24 = vadd.f32 %v1654_v47, %v1435_v59  ;;  %v2140_v59 = vshll.u32 %v4734_v23, 16  ;;  %v5064_v47 = vld [vmem:[%s5350_s29 + $0xa8] sm:$0xff]  ;;  %v1020_v45 = vadd.f32 %v1019_v14, %v5667_v4  ;;  %v2225_v4 = vpack.c.b16 %v2207_v36, %v2206_v11 }
 0x137   : > { %4752 = vmatmul.msk.bf16.gmra.mxu0 %vm709_vm5, %v2224_v17  ;;  %v1228_v17 = vrot.slane %v5223_v62, 5 }
 0x138   : > { %v1369_v29 = vpop.f32.mrf.mxu2  ;;  %4542 = vmatmul.msk.bf16.gmra.mxu1 %vm709_vm5, %v5048_v31  ;;  %v5919_v5 = vadd.f32 %v2308_v41, %v1722_v24  ;;  %v4559_v41 = vrot.slane %v1088_v10, 9  ;;  %v1227_v31 = vrot.slane %v1225_v12, 4  ;;  %v2133_v24 = vrot.slane %v2131_v44, 4  ;;  %v5049_v44 = vld [vmem:[%s5350_s29 + $0xa8] sm:$0xff] }
 0x139   : > { %v1436_v35 = vadd.f32 %v1369_v29, %v1017_v13  ;;  %v2136_v13 = vrot.slane %v2134_v54, 5  ;;  %v5931_v26 = vrot.slane %v2140_v59, 5  ;;  %v2150_v59 = vshll.u32 %v4735_v53, 16 }
 0x13b   : > { %v2137_v14 = vor.u32 %v2136_v13, %v2133_v24  ;;  %v2147_v61 = vor.u32 %v2146_v60, %v5931_v26  ;;  %v2152_v24 = vrot.slane %v2150_v59, 5 }
 0x13c   : > { %v2310_v56 = vpop.f32.mrf.mxu0 }
 0x13d   : > { %v1656_v34 = vpop.f32.mrf.mxu3  ;;  %4575 = vmatmul.msk.bf16.gmra.mxu2 %vm709_vm5, %v1284_v15  ;;  %v1021_v21 = vpop.f32.mrf.mxu1  ;;  %v1226_v15 = vsel %vm5536_vm8, %v4559_v41, %v1225_v12  ;;  %v4736_v12 = vld [vmem:[%s5350_s29 + $0xc0] sm:$0xf]  ;;  %v5224_v41 = vld [vmem:[%s5350_s29 + $0x10] sm:$0xf] }
 0x13e   : > { %v1723_v28 = vadd.f32 %v1656_v34, %v1436_v35  ;;  %v1229_v35 = vsel %vm5536_vm8, %v1227_v31, %v1228_v17  ;;  %v1267_v19 = vunpack.c.l.b16 %v1226_v15  ;;  %v4737_v34 = vld [vmem:[%s5350_s29 + $0xc4] sm:$0xf]  ;;  %v2466_v17 = vrot.slane %v5224_v41, 5 }
 0x13f   : > { %v1268_v54 = vunpack.c.l.b16 %v1229_v35  ;;  %v1022_v31 = vadd.f32 %v1021_v21, %v5684_v33  ;;  %v2158_v13 = vshll.u32 %v4736_v12, 16  ;;  %v5225_v35 = vld [vmem:[%s5350_s29 + $0xb8] sm:$0xf]  ;;  %v1089_v21 = vld [vmem:[%s5350_s29 + $0xb4] sm:$0xe] }
 0x140   : > { %v1372_v18 = vpop.f32.mrf.mxu2  ;;  %v5933_v29 = vadd.f32 %v2310_v56, %v1723_v28  ;;  %v2138_v28 = vrot.slane %v2137_v14, 4  ;;  %v1232_v53 = vrot.slane %v5225_v35, 5  ;;  %v2468_v14 = vrot.slane %v2466_v17, 4  ;;  %v5065_v35 = vld [vmem:[%s5350_s29 + $0xb4] sm:$0xff] }
 0x141   : > { %v1437_v23 = vadd.f32 %v1372_v18, %v1020_v45  ;;  %v1285_v36 = vpack.c.b16 %v1268_v54, %v1267_v19  ;;  %v2155_v45 = vshrl.u32 %v4736_v12, 16  ;;  %v2164_v18 = vshll.u32 %v4737_v34, 16 }
 0x142   : > { %4688 = vmatmul.msk.bf16.gmra.mxu3 %vm709_vm5, %v5064_v47  ;;  %v2148_v47 = vrot.slane %v2147_v61, 4  ;;  %v5227_v61 = vld [vmem:[%s5350_s29 + $0x14] sm:$0x1]  ;;  %v2143_v19 = vsel %vm5362_vm4, %v2138_v28, %v5931_v26 }
 0x143   : > { %v2157_v12 = vrot.slane %v2155_v45, 4  ;;  %v2208_v28 = vunpack.c.l.b16 %v2143_v19 }
 0x144   : > { %v2313_v10 = vpop.f32.mrf.mxu0  ;;  %v2153_v54 = vsel %vm5362_vm4, %v2148_v47, %v2152_v24 }
 0x145   : > { %v1659_v52 = vpop.f32.mrf.mxu3  ;;  %v1024_v56 = vpop.f32.mrf.mxu1  ;;  %v2209_v47 = vunpack.c.l.b16 %v2153_v54 }
 0x146   : > { %v1724_v62 = vadd.f32 %v1659_v52, %v1437_v23  ;;  %v2168_v23 = vshrl.u32 %v4737_v34, 16  ;;  %v2469_v52 = vrot.slane %v5227_v61, 5  ;;  %v5961_v34 = vrot.slane %v2164_v18, 5 }
 0x147   : > { %4753 = vmatmul.msk.bf16.gmra.mxu0 %vm709_vm5, %v2225_v4  ;;  %v5226_v4 = vld [vmem:[%s5350_s29 + $0xbc] sm:$0x1]  ;;  %v1234_v61 = vrot.slane %v1232_v53, 4  ;;  %v1025_v26 = vadd.f32 %v1024_v56, %v5704_v63 }
 0x148   : > { %v1374_v11 = vpop.f32.mrf.mxu2  ;;  %4543 = vmatmul.msk.bf16.gmra.mxu1 %vm709_vm5, %v5049_v44  ;;  %v5949_v15 = vadd.f32 %v2313_v10, %v1724_v62  ;;  %v1235_v33 = vrot.slane %v5226_v4, 5  ;;  %v2160_v62 = vrot.slane %v2158_v13, 5  ;;  %v2170_v41 = vrot.slane %v2168_v23, 4 }
 0x149   : > { %v1438_v60 = vadd.f32 %v1374_v11, %v1022_v31  ;;  %v4756_v31 = vld [vmem:[%s5350_s29 + $0xc] sm:$0xe]  ;;  %v4560_v4 = vrot.slane %v1089_v21, 9  ;;  %v2470_v13 = vsel %vm5536_vm8, %v2468_v14, %v2469_v52  ;;  %v4918_v14 = vld [vmem:[%s5350_s29 + $0x18] sm:$0xf] }
 0x14a   : > { %6722 = vst [vmem:[#allocation2_spill] sm:$0xff] %v5949_v15  ;;  %v4772_v15 = vrot.slane %v4756_v31, 9  ;;  %v2161_v18 = vor.u32 %v2160_v62, %v2157_v12  ;;  %v2579_v21 = vunpack.c.l.b16 %v2470_v13  ;;  %v1236_v56 = vsel %vm5536_vm8, %v1234_v61, %v1235_v33  ;;  %v5050_v12 = vld [vmem:[%s5350_s29 + $0xb4] sm:$0xff]  ;;  %v5984_v62 = vld [vmem:[%s5350_s29 + $0x1c] sm:$0xf] }
 0x14b   : > { %v1233_v63 = vsel %vm5536_vm8, %v4560_v4, %v1232_v53  ;;  %v2171_v19 = vor.u32 %v2170_v41, %v5961_v34  ;;  %v1270_v53 = vunpack.c.l.b16 %v1236_v56  ;;  %v3134_v61 = vshrl.u32 %v4918_v14, 16 }
 0x14c   : > { %v2315_v44 = vpop.f32.mrf.mxu0  ;;  %v2467_v45 = vsel %vm5536_vm8, %v4772_v15, %v2466_v17  ;;  %v2226_v17 = vpack.c.b16 %v2209_v47, %v2208_v28  ;;  %v2162_v4 = vrot.slane %v2161_v18, 4  ;;  %v3137_v41 = vshll.u32 %v4918_v14, 16 }
 0x14d   : > { %v1661_v10 = vpop.f32.mrf.mxu3  ;;  %4576 = vmatmul.msk.bf16.gmra.mxu2 %vm709_vm5, %v1285_v36  ;;  %v1026_v59 = vpop.f32.mrf.mxu1  ;;  %v4738_v36 = vld [vmem:[%s5350_s29 + $0xc8] sm:$0x1]  ;;  %v2578_v23 = vunpack.c.l.b16 %v2467_v45  ;;  %v2172_v33 = vrot.slane %v2171_v19, 4  ;;  %v3147_v47 = vshrl.u32 %v5984_v62, 16  ;;  %v3136_v18 = vrot.slane %v3134_v61, 4 }
 0x14e   : > { %v1725_v11 = vadd.f32 %v1661_v10, %v1438_v60  ;;  %v2174_v15 = vshll.u32 %v4738_v36, 16  ;;  %v1027_v28 = vadd.f32 %v1026_v59, %v5724_v27  ;;  %v2167_v27 = vsel %vm5362_vm4, %v2162_v4, %v5961_v34  ;;  %v4920_v19 = vld [vmem:[%s5350_s29 + $0x20] sm:$0x1]  ;;  %v4921_v61 = vld [vmem:[%s5350_s29 + $0x24] sm:$0xf] }
 0x14f   : > { %v5977_v54 = vpack.c.b16 %v2579_v21, %v2578_v23  ;;  %v3139_v23 = vrot.slane %v3137_v41, 5  ;;  %v3153_v4 = vshll.u32 %v4920_v19, 16  ;;  %v6004_v41 = vld [vmem:[%s5350_s29 + $0x28] sm:$0xf] }
 0x150   : > { %v1377_v24 = vpop.f32.mrf.mxu2  ;;  %v5980_v52 = vadd.f32 %v2315_v44, %v1725_v11  ;;  %v2176_v44 = vrot.slane %v2174_v15, 5  ;;  %v3143_v11 = vshll.u32 %v5984_v62, 16 }
 0x151   : > { %v1439_v60 = vadd.f32 %v1377_v24, %v1025_v26  ;;  %v1269_v26 = vunpack.c.l.b16 %v1233_v63  ;;  %v3149_v63 = vrot.slane %v3147_v47, 4  ;;  %v3155_v47 = vrot.slane %v3153_v4, 5 }
 0x152   : > { %4689 = vmatmul.msk.bf16.gmra.mxu3 %vm709_vm5, %v5065_v35  ;;  %v2177_v59 = vsel %vm5362_vm4, %v2172_v33, %v2176_v44  ;;  %v3145_v21 = vrot.slane %v3143_v11, 5 }
 0x153   : > { %v1286_v13 = vpack.c.b16 %v1270_v53, %v1269_v26  ;;  %v3140_v26 = vor.u32 %v3139_v23, %v3136_v18  ;;  %v3161_v18 = vshll.u32 %v4921_v61, 16  ;;  %v3167_v23 = vshll.u32 %v6004_v41, 16 }
 0x154   : > { %v2318_v10 = vpop.f32.mrf.mxu0  ;;  %v3150_v53 = vor.u32 %v3149_v63, %v3145_v21 }
 0x155   : > { %v1664_v31 = vpop.f32.mrf.mxu3  ;;  %v1029_v35 = vpop.f32.mrf.mxu1  ;;  %v3141_v44 = vrot.slane %v3140_v26, 4 }
 0x156   : > { %v1726_v24 = vadd.f32 %v1664_v31, %v1439_v60  ;;  %v2211_v31 = vunpack.c.l.b16 %v2177_v59  ;;  %v1030_v34 = vadd.f32 %v1029_v35, %v5747_v1  ;;  %v3151_v11 = vrot.slane %v3150_v53, 4 }
 0x157   : > { %4754 = vmatmul.msk.bf16.gmra.mxu0 %vm709_vm5, %v2226_v17 }
 0x158   : > { %v1379_v36 = vpop.f32.mrf.mxu2  ;;  %4544 = vmatmul.msk.bf16.gmra.mxu1 %vm709_vm5, %v5050_v12  ;;  %v5991_v60 = vadd.f32 %v2318_v10, %v1726_v24  ;;  %v5066_v10 = vld [vmem:[%s5350_s29 + $0xc0] sm:$0xff]  ;;  %v2210_v12 = vunpack.c.l.b16 %v2167_v27  ;;  %v3171_v27 = vshrl.u32 %v6004_v41, 16  ;;  %v3156_v53 = vsel %vm5362_vm4, %v3151_v11, %v3155_v47  ;;  %v6030_v47 = vld [vmem:[%s5350_s29 + $0x2c] sm:$0x1] }
 0x159   : > { %v1440_v45 = vadd.f32 %v1379_v36, %v1027_v28  ;;  %v4983_v36 = vld [vmem:[%s5350_s29 + $0x18] sm:$0xe]  ;;  %v3520_v11 = vunpack.c.l.b16 %v3156_v53 }
 0x15a   : > { %v2227_v28 = vpack.c.b16 %v2211_v31, %v2210_v12  ;;  %v5229_v12 = vld [vmem:[%s5350_s29 + $0x20] sm:$0x1] }
 0x15b   : > { %v2476_v31 = vrot.slane %v5229_v12, 5 }
 0x15c   : > { %v2320_v56 = vpop.f32.mrf.mxu0 }
 0x15d   : > { %v1666_v17 = vpop.f32.mrf.mxu3  ;;  %4577 = vmatmul.msk.bf16.gmra.mxu2 %vm709_vm5, %v1286_v13  ;;  %v1031_v15 = vpop.f32.mrf.mxu1  ;;  %v3158_v13 = vshrl.u32 %v4921_v61, 16 }
 0x15e   : > { %v1727_v14 = vadd.f32 %v1666_v17, %v1440_v45  ;;  %v3805_v45 = vrot.slane %v5984_v62, 5  ;;  %v5228_v17 = vld [vmem:[%s5350_s29 + $0x1c] sm:$0xf]  ;;  %v3146_v62 = vsel %vm5362_vm4, %v3141_v44, %v3145_v21  ;;  %v3173_v21 = vrot.slane %v3171_v27, 4 }
 0x160   : > { %v1382_v24 = vpop.f32.mrf.mxu2  ;;  %v6009_v1 = vadd.f32 %v2320_v56, %v1727_v14  ;;  %v4999_v56 = vrot.slane %v4983_v36, 9  ;;  %v4757_v14 = vld [vmem:[%s5350_s29 + $0x18] sm:$0xe]  ;;  %v3807_v4 = vrot.slane %v3805_v45, 4 }
 0x161   : > { %v1441_v33 = vadd.f32 %v1382_v24, %v1030_v34  ;;  %v1032_v34 = vadd.f32 %v1031_v15, %v5767_v40  ;;  %v3808_v24 = vrot.slane %v4920_v19, 5  ;;  %v5067_v36 = vld [vmem:[%s5350_s29 + $0x18] sm:$0xff]  ;;  %v3519_v15 = vunpack.c.l.b16 %v3146_v62 }
 0x162   : > { %4690 = vmatmul.msk.bf16.gmra.mxu3 %vm709_vm5, %v5066_v10  ;;  %6723 = vst [vmem:[#allocation3_spill] sm:$0xff] %v6009_v1  ;;  %v2473_v10 = vrot.slane %v5228_v17, 5  ;;  %v6024_v17 = vrot.slane %v3167_v23, 5  ;;  %v3806_v1 = vsel %vm5536_vm8, %v4999_v56, %v3805_v45  ;;  %v3177_v45 = vshll.u32 %v6030_v47, 16 }
 0x163   : > { %v3551_v56 = vpack.c.b16 %v3520_v11, %v3519_v15  ;;  %v5230_v15 = vld [vmem:[%s5350_s29 + $0x28] sm:$0xf] }
 0x164   : > { %v2323_v35 = vpop.f32.mrf.mxu0  ;;  %v2475_v12 = vrot.slane %v2473_v10, 4  ;;  %v2480_v11 = vrot.slane %v5230_v15, 5 }
 0x165   : > { %v1669_v59 = vpop.f32.mrf.mxu3  ;;  %v1034_v63 = vpop.f32.mrf.mxu1 }
 0x166   : > { %v1728_v26 = vadd.f32 %v1669_v59, %v1441_v33  ;;  %v3160_v33 = vrot.slane %v3158_v13, 4  ;;  %v3163_v59 = vrot.slane %v3161_v18, 5  ;;  %v2477_v27 = vsel %vm5536_vm8, %v2475_v12, %v2476_v31  ;;  %v6049_v12 = vld [vmem:[%s5350_s29 + $0x34] sm:$0xf] }
 0x167   : > { %4755 = vmatmul.msk.bf16.gmra.mxu0 %vm709_vm5, %v2227_v28  ;;  %v4773_v28 = vrot.slane %v4757_v14, 9  ;;  %v1035_v14 = vadd.f32 %v1034_v63, %v5649_v46 }
 0x168   : > { %v1384_v61 = vpop.f32.mrf.mxu2  ;;  %4789 = vmatmul.msk.bf16.vlgmr.msra.gmra.mxu1 %vm709_vm5, %v5977_v54  ;;  %v6027_v40 = vadd.f32 %v2323_v35, %v1728_v26  ;;  %v3809_v54 = vsel %vm5536_vm8, %v3807_v4, %v3808_v24  ;;  %v3164_v13 = vor.u32 %v3163_v59, %v3160_v33  ;;  %v3174_v26 = vor.u32 %v3173_v21, %v6024_v17  ;;  %v4984_v21 = vld [vmem:[%s5350_s29 + $0x24] sm:$0xe] }
 0x169   : > { %v1442_v44 = vadd.f32 %v1384_v61, %v1032_v34  ;;  %v2474_v35 = vsel %vm5536_vm8, %v4773_v28, %v2473_v10  ;;  %v3917_v34 = vunpack.c.l.b16 %v3806_v1  ;;  %v3918_v53 = vunpack.c.l.b16 %v3809_v54 }
 0x16a   : > { %v2580_v24 = vunpack.c.l.b16 %v2474_v35  ;;  %v2581_v10 = vunpack.c.l.b16 %v2477_v27  ;;  %v3165_v33 = vrot.slane %v3164_v13, 4  ;;  %v3175_v31 = vrot.slane %v3174_v26, 4 }
 0x16b   : > { %v3179_v59 = vrot.slane %v3177_v45, 5  ;;  %v3812_v28 = vrot.slane %v6004_v41, 5  ;;  %v5000_v27 = vrot.slane %v4984_v21, 9  ;;  %v4758_v41 = vld [vmem:[%s5350_s29 + $0x24] sm:$0xe] }
 0x16c   : > { %v2325_v19 = vpop.f32.mrf.mxu0  ;;  %v2611_v63 = vpack.c.b16 %v2581_v10, %v2580_v24 }
 0x16d   : > { %v1671_v18 = vpop.f32.mrf.mxu3  ;;  %4902 = vmatmul.msk.bf16.vlgmr.msra.gmra.mxu2 %vm709_vm5, %v5067_v36  ;;  %v1036_v23 = vpop.f32.mrf.mxu1  ;;  %v4924_v36 = vld [vmem:[%s5350_s29 + $0x30] sm:$0xf]  ;;  %v3180_v35 = vsel %vm5362_vm4, %v3175_v31, %v3179_v59  ;;  %v5068_v59 = vld [vmem:[%s5350_s29 + $0x24] sm:$0xff] }
 0x16e   : > { %v1729_v62 = vadd.f32 %v1671_v18, %v1442_v44  ;;  %v3949_v44 = vpack.c.b16 %v3918_v53, %v3917_v34  ;;  %v3170_v18 = vsel %vm5362_vm4, %v3165_v33, %v6024_v17  ;;  %v3182_v26 = vshrl.u32 %v4924_v36, 16  ;;  %v5231_v53 = vld [vmem:[%s5350_s29 + $0x2c] sm:$0x1] }
 0x16f   : > { %v3814_v34 = vrot.slane %v3812_v28, 4  ;;  %v3815_v17 = vrot.slane %v6030_v47, 5  ;;  %v3521_v10 = vunpack.c.l.b16 %v3170_v18  ;;  %v2482_v33 = vrot.slane %v2480_v11, 4 }
 0x170   : > { %v1387_v4 = vpop.f32.mrf.mxu2  ;;  %v6051_v46 = vadd.f32 %v2325_v19, %v1729_v62  ;;  %v3185_v19 = vshll.u32 %v4924_v36, 16  ;;  %v3191_v62 = vshll.u32 %v6049_v12, 16  ;;  %v3522_v21 = vunpack.c.l.b16 %v3180_v35 }
 0x171   : > { %v1443_v61 = vadd.f32 %v1387_v4, %v1035_v14  ;;  %v1037_v14 = vadd.f32 %v1036_v23, %v5670_v8  ;;  %v2483_v4 = vrot.slane %v5231_v53, 5  ;;  %v3813_v36 = vsel %vm5536_vm8, %v5000_v27, %v3812_v28 }
 0x172   : > { %4967 = vmatmul.msk.bf16.vlgmr.msra.gmra.mxu3 %vm709_vm5, %v3551_v56  ;;  %v3195_v56 = vshrl.u32 %v6049_v12, 16  ;;  %v3184_v8 = vrot.slane %v3182_v26, 4  ;;  %v3187_v23 = vrot.slane %v3185_v19, 5  ;;  %v6072_v47 = vrot.slane %v3191_v62, 5 }
 0x173   : > { %v2484_v35 = vsel %vm5536_vm8, %v2482_v33, %v2483_v4  ;;  %v3919_v27 = vunpack.c.l.b16 %v3813_v36  ;;  %v4985_v36 = vld [vmem:[%s5350_s29 + $0x30] sm:$0xe] }
 0x174   : > { %v2328_v1 = vpop.f32.mrf.mxu0  ;;  %v3197_v15 = vrot.slane %v3195_v56, 4  ;;  %v3188_v62 = vor.u32 %v3187_v23, %v3184_v8 }
 0x175   : > { %v1674_v54 = vpop.f32.mrf.mxu3  ;;  %v1039_v13 = vpop.f32.mrf.mxu1 }
 0x176   : > { %v1730_v45 = vadd.f32 %v1674_v54, %v1443_v61  ;;  %v4774_v61 = vrot.slane %v4758_v41, 9  ;;  %v6081_v41 = vld [vmem:[%s5350_s29 + $0x38] sm:$0x1]  ;;  %v3198_v56 = vor.u32 %v3197_v15, %v6072_v47  ;;  %v3189_v33 = vrot.slane %v3188_v62, 4 }
 0x177   : > { %5016 = vmatmul.msk.bf16.vlgmr.msra.gmra.mxu0 %vm709_vm5, %v3949_v44 }
 0x178   : > { %v1389_v24 = vpop.f32.mrf.mxu2  ;;  %4790 = vmatmul.msk.bf16.gmra.mxu1 %vm709_vm5, %v2611_v63  ;;  %v6070_v44 = vadd.f32 %v2328_v1, %v1730_v45  ;;  %v3816_v63 = vsel %vm5536_vm8, %v3814_v34, %v3815_v17  ;;  %v2481_v18 = vsel %vm5536_vm8, %v4774_v61, %v2480_v11  ;;  %v3552_v1 = vpack.c.b16 %v3522_v21, %v3521_v10  ;;  %v6089_v61 = vld [vmem:[%s5350_s29 + $0x40] sm:$0xf] }
 0x179   : > { %v1444_v31 = vadd.f32 %v1389_v24, %v1037_v14  ;;  %v3920_v19 = vunpack.c.l.b16 %v3816_v63  ;;  %v1040_v11 = vadd.f32 %v1039_v13, %v5687_v32  ;;  %v2582_v14 = vunpack.c.l.b16 %v2481_v18  ;;  %v4927_v24 = vld [vmem:[%s5350_s29 + $0x3c] sm:$0xf] }
 0x17a   : > { %v2583_v34 = vunpack.c.l.b16 %v2484_v35  ;;  %v3201_v17 = vshll.u32 %v6081_v41, 16  ;;  %v3819_v32 = vrot.slane %v6049_v12, 5  ;;  %v3206_v23 = vshrl.u32 %v4927_v24, 16 }
 0x17b   : > { %v3950_v10 = vpack.c.b16 %v3920_v19, %v3919_v27  ;;  %v3209_v15 = vshll.u32 %v4927_v24, 16  ;;  %v3215_v63 = vshll.u32 %v6089_v61, 16  ;;  %v3219_v18 = vshrl.u32 %v6089_v61, 16  ;;  %v5233_v19 = vld [vmem:[%s5350_s29 + $0x38] sm:$0x1] }
 0x17c   : > { %v2330_v54 = vpop.f32.mrf.mxu0  ;;  %v3203_v21 = vrot.slane %v3201_v17, 5  ;;  %v2490_v62 = vrot.slane %v5233_v19, 5  ;;  %v3822_v12 = vrot.slane %v6081_v41, 5  ;;  %v3821_v17 = vrot.slane %v3819_v32, 4  ;;  %v6116_v19 = vld [vmem:[%s5350_s29 + $0x44] sm:$0x1] }
 0x17d   : > { %v1676_v28 = vpop.f32.mrf.mxu3  ;;  %4903 = vmatmul.msk.bf16.gmra.mxu2 %vm709_vm5, %v5068_v59  ;;  %v1041_v26 = vpop.f32.mrf.mxu1  ;;  %v2612_v59 = vpack.c.b16 %v2583_v34, %v2582_v14  ;;  %v3194_v14 = vsel %vm5362_vm4, %v3189_v33, %v6072_v47  ;;  %v3211_v24 = vrot.slane %v3209_v15, 5  ;;  %v6110_v41 = vrot.slane %v3215_v63, 5 }
 0x17e   : > { %v1731_v45 = vadd.f32 %v1676_v28, %v1444_v31  ;;  %v3199_v31 = vrot.slane %v3198_v56, 4  ;;  %v3523_v47 = vunpack.c.l.b16 %v3194_v14 }
 0x180   : > { %v1392_v53 = vpop.f32.mrf.mxu2  ;;  %v6094_v13 = vadd.f32 %v2330_v54, %v1731_v45  ;;  %v4759_v54 = vld [vmem:[%s5350_s29 + $0x30] sm:$0xe]  ;;  %v1042_v45 = vadd.f32 %v1041_v26, %v5708_v6  ;;  %v3204_v34 = vsel %vm5362_vm4, %v3199_v31, %v3203_v21 }
 0x181   : > { %v1445_v4 = vadd.f32 %v1392_v53, %v1040_v11  ;;  %v5001_v11 = vrot.slane %v4985_v36, 9  ;;  %v3221_v36 = vrot.slane %v3219_v18, 4  ;;  %v4775_v6 = vrot.slane %v4759_v54, 9 }
 0x182   : > { %4968 = vmatmul.msk.bf16.gmra.mxu3 %vm709_vm5, %v3552_v1  ;;  %v5232_v1 = vld [vmem:[%s5350_s29 + $0x34] sm:$0xf]  ;;  %v3524_v33 = vunpack.c.l.b16 %v3204_v34 }
 0x183   : > { %v2487_v27 = vrot.slane %v5232_v1, 5  ;;  %v3820_v21 = vsel %vm5536_vm8, %v5001_v11, %v3819_v32  ;;  %v3225_v32 = vshll.u32 %v6116_v19, 16 }
 0x184   : > { %v2333_v8 = vpop.f32.mrf.mxu0  ;;  %v3553_v54 = vpack.c.b16 %v3524_v33, %v3523_v47  ;;  %v5234_v33 = vld [vmem:[%s5350_s29 + $0x40] sm:$0xf] }
 0x185   : > { %v1679_v35 = vpop.f32.mrf.mxu3  ;;  %v1044_v28 = vpop.f32.mrf.mxu1  ;;  %v2489_v26 = vrot.slane %v2487_v27, 4 }
 0x186   : > { %v1732_v56 = vadd.f32 %v1679_v35, %v1445_v4  ;;  %v3208_v4 = vrot.slane %v3206_v23, 4  ;;  %v5069_v35 = vld [vmem:[%s5350_s29 + $0x30] sm:$0xff] }
 0x187   : > { %5017 = vmatmul.msk.bf16.gmra.mxu0 %vm709_vm5, %v3950_v10  ;;  %v2491_v18 = vsel %vm5536_vm8, %v2489_v26, %v2490_v62  ;;  %v6135_v26 = vld [vmem:[%s5350_s29 + $0x4c] sm:$0xf] }
 0x188   : > { %v1394_v53 = vpop.f32.mrf.mxu2  ;;  %4791 = vmatmul.msk.bf16.gmra.mxu1 %vm709_vm5, %v2612_v59  ;;  %v6113_v1 = vadd.f32 %v2333_v8, %v1732_v56  ;;  %v3823_v59 = vsel %vm5536_vm8, %v3821_v17, %v3822_v12  ;;  %v3212_v23 = vor.u32 %v3211_v24, %v3208_v4  ;;  %v2488_v8 = vsel %vm5536_vm8, %v4775_v6, %v2487_v27 }
 0x189   : > { %v1446_v10 = vadd.f32 %v1394_v53, %v1042_v45  ;;  %v3222_v56 = vor.u32 %v3221_v36, %v6110_v41  ;;  %v1045_v12 = vadd.f32 %v1044_v28, %v5731_v38  ;;  %v3921_v45 = vunpack.c.l.b16 %v3820_v21  ;;  %v4986_v36 = vld [vmem:[%s5350_s29 + $0x3c] sm:$0xe] }
 0x18a   : > { %v3922_v14 = vunpack.c.l.b16 %v3823_v59  ;;  %v2584_v17 = vunpack.c.l.b16 %v2488_v8  ;;  %v2585_v27 = vunpack.c.l.b16 %v2491_v18  ;;  %v3213_v4 = vrot.slane %v3212_v23, 4 }
 0x18b   : > { %v3223_v62 = vrot.slane %v3222_v56, 4  ;;  %v3227_v24 = vrot.slane %v3225_v32, 5  ;;  %v3826_v6 = vrot.slane %v6089_v61, 5  ;;  %v2494_v21 = vrot.slane %v5234_v33, 5  ;;  %v4760_v61 = vld [vmem:[%s5350_s29 + $0x3c] sm:$0xe] }
 0x18c   : > { %v2335_v31 = vpop.f32.mrf.mxu0  ;;  %v2613_v47 = vpack.c.b16 %v2585_v27, %v2584_v17  ;;  %v5002_v18 = vrot.slane %v4986_v36, 9 }
 0x18d   : > { %v1681_v15 = vpop.f32.mrf.mxu3  ;;  %4904 = vmatmul.msk.bf16.gmra.mxu2 %vm709_vm5, %v5069_v35  ;;  %v1046_v63 = vpop.f32.mrf.mxu1  ;;  %v4930_v35 = vld [vmem:[%s5350_s29 + $0x48] sm:$0xf]  ;;  %v3228_v8 = vsel %vm5362_vm4, %v3223_v62, %v3227_v24  ;;  %v5070_v24 = vld [vmem:[%s5350_s29 + $0x3c] sm:$0xff] }
 0x18e   : > { %v1733_v11 = vadd.f32 %v1681_v15, %v1446_v10  ;;  %v3951_v10 = vpack.c.b16 %v3922_v14, %v3921_v45  ;;  %v3218_v15 = vsel %vm5362_vm4, %v3213_v4, %v6110_v41  ;;  %v3230_v56 = vshrl.u32 %v4930_v35, 16  ;;  %v5235_v14 = vld [vmem:[%s5350_s29 + $0x44] sm:$0x1] }
 0x18f   : > { %v3828_v45 = vrot.slane %v3826_v6, 4  ;;  %v3829_v41 = vrot.slane %v6116_v19, 5  ;;  %v3525_v27 = vunpack.c.l.b16 %v3218_v15  ;;  %v2496_v4 = vrot.slane %v2494_v21, 4 }
 0x190   : > { %v1397_v34 = vpop.f32.mrf.mxu2  ;;  %v6137_v38 = vadd.f32 %v2335_v31, %v1733_v11  ;;  %v3233_v31 = vshll.u32 %v4930_v35, 16  ;;  %v3239_v11 = vshll.u32 %v6135_v26, 16  ;;  %v3526_v36 = vunpack.c.l.b16 %v3228_v8 }
 0x191   : > { %v1447_v53 = vadd.f32 %v1397_v34, %v1045_v12  ;;  %v1047_v12 = vadd.f32 %v1046_v63, %v5749_v51  ;;  %v2497_v34 = vrot.slane %v5235_v14, 5  ;;  %v3827_v35 = vsel %vm5536_vm8, %v5002_v18, %v3826_v6 }
 0x192   : > { %4969 = vmatmul.msk.bf16.gmra.mxu3 %vm709_vm5, %v3553_v54  ;;  %v3243_v54 = vshrl.u32 %v6135_v26, 16  ;;  %v3232_v51 = vrot.slane %v3230_v56, 4  ;;  %v3235_v63 = vrot.slane %v3233_v31, 5  ;;  %v6158_v19 = vrot.slane %v3239_v11, 5 }
 0x193   : > { %v2498_v8 = vsel %vm5536_vm8, %v2496_v4, %v2497_v34  ;;  %v3923_v18 = vunpack.c.l.b16 %v3827_v35  ;;  %v4987_v35 = vld [vmem:[%s5350_s29 + $0x48] sm:$0xe] }
 0x194   : > { %v2338_v28 = vpop.f32.mrf.mxu0  ;;  %v3245_v33 = vrot.slane %v3243_v54, 4  ;;  %v3236_v11 = vor.u32 %v3235_v63, %v3232_v51 }
 0x195   : > { %v1684_v59 = vpop.f32.mrf.mxu3  ;;  %v1049_v23 = vpop.f32.mrf.mxu1 }
 0x196   : > { %v1734_v32 = vadd.f32 %v1684_v59, %v1447_v53  ;;  %v4776_v53 = vrot.slane %v4760_v61, 9  ;;  %v6167_v61 = vld [vmem:[%s5350_s29 + $0x50] sm:$0x1]  ;;  %v3246_v54 = vor.u32 %v3245_v33, %v6158_v19  ;;  %v3237_v4 = vrot.slane %v3236_v11, 4 }
 0x197   : > { %5018 = vmatmul.msk.bf16.gmra.mxu0 %vm709_vm5, %v3951_v10 }
 0x198   : > { %v1399_v17 = vpop.f32.mrf.mxu2  ;;  %4792 = vmatmul.msk.bf16.gmra.mxu1 %vm709_vm5, %v2613_v47  ;;  %v6156_v10 = vadd.f32 %v2338_v28, %v1734_v32  ;;  %v3830_v47 = vsel %vm5536_vm8, %v3828_v45, %v3829_v41  ;;  %v2495_v15 = vsel %vm5536_vm8, %v4776_v53, %v2494_v21  ;;  %v3554_v28 = vpack.c.b16 %v3526_v36, %v3525_v27  ;;  %v6175_v53 = vld [vmem:[%s5350_s29 + $0x58] sm:$0xf] }
 0x199   : > { %v1448_v62 = vadd.f32 %v1399_v17, %v1047_v12  ;;  %v3924_v31 = vunpack.c.l.b16 %v3830_v47  ;;  %v1050_v21 = vadd.f32 %v1049_v23, %v5770_v49  ;;  %v2586_v12 = vunpack.c.l.b16 %v2495_v15  ;;  %v4933_v17 = vld [vmem:[%s5350_s29 + $0x54] sm:$0xf] }
 0x19a   : > { %v2587_v45 = vunpack.c.l.b16 %v2498_v8  ;;  %v3249_v41 = vshll.u32 %v6167_v61, 16  ;;  %v3833_v49 = vrot.slane %v6135_v26, 5  ;;  %v3254_v63 = vshrl.u32 %v4933_v17, 16 }
 0x19b   : > { %v3952_v27 = vpack.c.b16 %v3924_v31, %v3923_v18  ;;  %v3257_v33 = vshll.u32 %v4933_v17, 16  ;;  %v3263_v47 = vshll.u32 %v6175_v53, 16  ;;  %v3267_v15 = vshrl.u32 %v6175_v53, 16  ;;  %v5237_v31 = vld [vmem:[%s5350_s29 + $0x50] sm:$0x1] }
 0x19c   : > { %v2340_v59 = vpop.f32.mrf.mxu0  ;;  %v3251_v36 = vrot.slane %v3249_v41, 5  ;;  %v2504_v11 = vrot.slane %v5237_v31, 5  ;;  %v3836_v26 = vrot.slane %v6167_v61, 5  ;;  %v3835_v41 = vrot.slane %v3833_v49, 4  ;;  %v6202_v31 = vld [vmem:[%s5350_s29 + $0x5c] sm:$0x1] }
 0x19d   : > { %v1686_v6 = vpop.f32.mrf.mxu3  ;;  %4905 = vmatmul.msk.bf16.gmra.mxu2 %vm709_vm5, %v5070_v24  ;;  %v1051_v56 = vpop.f32.mrf.mxu1  ;;  %v2614_v24 = vpack.c.b16 %v2587_v45, %v2586_v12  ;;  %v3242_v12 = vsel %vm5362_vm4, %v3237_v4, %v6158_v19  ;;  %v3259_v17 = vrot.slane %v3257_v33, 5  ;;  %v6196_v61 = vrot.slane %v3263_v47, 5 }
 0x19e   : > { %v1735_v32 = vadd.f32 %v1686_v6, %v1448_v62  ;;  %v3247_v62 = vrot.slane %v3246_v54, 4  ;;  %v3527_v19 = vunpack.c.l.b16 %v3242_v12 }
 0x1a0   : > { %v1402_v14 = vpop.f32.mrf.mxu2  ;;  %v6180_v23 = vadd.f32 %v2340_v59, %v1735_v32  ;;  %v4761_v59 = vld [vmem:[%s5350_s29 + $0x48] sm:$0xe]  ;;  %v1052_v32 = vadd.f32 %v1051_v56, %v5785_v20  ;;  %v3252_v45 = vsel %vm5362_vm4, %v3247_v62, %v3251_v36 }
 0x1a1   : > { %v1449_v34 = vadd.f32 %v1402_v14, %v1050_v21  ;;  %v5003_v21 = vrot.slane %v4987_v35, 9  ;;  %v3269_v35 = vrot.slane %v3267_v15, 4  ;;  %v4777_v20 = vrot.slane %v4761_v59, 9 }
 0x1a2   : > { %4970 = vmatmul.msk.bf16.gmra.mxu3 %vm709_vm5, %v3554_v28  ;;  %v5236_v28 = vld [vmem:[%s5350_s29 + $0x4c] sm:$0xf]  ;;  %v3528_v4 = vunpack.c.l.b16 %v3252_v45 }
 0x1a3   : > { %v2501_v18 = vrot.slane %v5236_v28, 5  ;;  %v3834_v36 = vsel %vm5536_vm8, %v5003_v21, %v3833_v49  ;;  %v3273_v49 = vshll.u32 %v6202_v31, 16 }
 0x1a4   : > { %v2343_v51 = vpop.f32.mrf.mxu0  ;;  %v3555_v59 = vpack.c.b16 %v3528_v4, %v3527_v19  ;;  %v5238_v4 = vld [vmem:[%s5350_s29 + $0x58] sm:$0xf] }
 0x1a5   : > { %v1689_v8 = vpop.f32.mrf.mxu3  ;;  %v1054_v6 = vpop.f32.mrf.mxu1  ;;  %v2503_v56 = vrot.slane %v2501_v18, 4 }
 0x1a6   : > { %v1736_v54 = vadd.f32 %v1689_v8, %v1449_v34  ;;  %v3256_v34 = vrot.slane %v3254_v63, 4  ;;  %v5071_v8 = vld [vmem:[%s5350_s29 + $0x48] sm:$0xff] }
 0x1a7   : > { %5019 = vmatmul.msk.bf16.gmra.mxu0 %vm709_vm5, %v3952_v27  ;;  %v2505_v15 = vsel %vm5536_vm8, %v2503_v56, %v2504_v11  ;;  %v6221_v56 = vld [vmem:[%s5350_s29 + $0x64] sm:$0xf] }
 0x1a8   : > { %v1404_v14 = vpop.f32.mrf.mxu2  ;;  %4793 = vmatmul.msk.bf16.gmra.mxu1 %vm709_vm5, %v2614_v24  ;;  %v6199_v28 = vadd.f32 %v2343_v51, %v1736_v54  ;;  %v3837_v24 = vsel %vm5536_vm8, %v3835_v41, %v3836_v26  ;;  %v3260_v63 = vor.u32 %v3259_v17, %v3256_v34  ;;  %v2502_v51 = vsel %vm5536_vm8, %v4777_v20, %v2501_v18 }
 0x1a9   : > { %v1450_v27 = vadd.f32 %v1404_v14, %v1052_v32  ;;  %v3270_v54 = vor.u32 %v3269_v35, %v6196_v61  ;;  %v1055_v26 = vadd.f32 %v1054_v6, %v5661_v58  ;;  %v3925_v32 = vunpack.c.l.b16 %v3834_v36  ;;  %v4988_v35 = vld [vmem:[%s5350_s29 + $0x54] sm:$0xe] }
 0x1aa   : > { %v3926_v12 = vunpack.c.l.b16 %v3837_v24  ;;  %v2588_v41 = vunpack.c.l.b16 %v2502_v51  ;;  %v2589_v18 = vunpack.c.l.b16 %v2505_v15  ;;  %v3261_v34 = vrot.slane %v3260_v63, 4 }
 0x1ab   : > { %v3271_v11 = vrot.slane %v3270_v54, 4  ;;  %v3275_v17 = vrot.slane %v3273_v49, 5  ;;  %v3840_v20 = vrot.slane %v6175_v53, 5  ;;  %v2508_v36 = vrot.slane %v5238_v4, 5  ;;  %v4762_v53 = vld [vmem:[%s5350_s29 + $0x54] sm:$0xe] }
 0x1ac   : > { %v2345_v62 = vpop.f32.mrf.mxu0  ;;  %v2615_v19 = vpack.c.b16 %v2589_v18, %v2588_v41  ;;  %v5004_v15 = vrot.slane %v4988_v35, 9 }
 0x1ad   : > { %v1691_v33 = vpop.f32.mrf.mxu3  ;;  %4906 = vmatmul.msk.bf16.gmra.mxu2 %vm709_vm5, %v5071_v8  ;;  %v1056_v47 = vpop.f32.mrf.mxu1  ;;  %v4936_v8 = vld [vmem:[%s5350_s29 + $0x60] sm:$0xf]  ;;  %v3276_v51 = vsel %vm5362_vm4, %v3271_v11, %v3275_v17  ;;  %v5072_v17 = vld [vmem:[%s5350_s29 + $0x54] sm:$0xff] }
 0x1ae   : > { %v1737_v21 = vadd.f32 %v1691_v33, %v1450_v27  ;;  %v3953_v27 = vpack.c.b16 %v3926_v12, %v3925_v32  ;;  %v3266_v33 = vsel %vm5362_vm4, %v3261_v34, %v6196_v61  ;;  %v3278_v54 = vshrl.u32 %v4936_v8, 16  ;;  %v5239_v12 = vld [vmem:[%s5350_s29 + $0x5c] sm:$0x1] }
 0x1af   : > { %v3842_v32 = vrot.slane %v3840_v20, 4  ;;  %v3843_v61 = vrot.slane %v6202_v31, 5  ;;  %v3529_v18 = vunpack.c.l.b16 %v3266_v33  ;;  %v2510_v34 = vrot.slane %v2508_v36, 4 }
 0x1b0   : > { %v1407_v45 = vpop.f32.mrf.mxu2  ;;  %v6223_v58 = vadd.f32 %v2345_v62, %v1737_v21  ;;  %v3281_v62 = vshll.u32 %v4936_v8, 16  ;;  %v3287_v21 = vshll.u32 %v6221_v56, 16  ;;  %v3530_v35 = vunpack.c.l.b16 %v3276_v51 }
 0x1b1   : > { %v1451_v14 = vadd.f32 %v1407_v45, %v1055_v26  ;;  %v1057_v26 = vadd.f32 %v1056_v47, %v5680_v9  ;;  %v2511_v45 = vrot.slane %v5239_v12, 5  ;;  %v3841_v8 = vsel %vm5536_vm8, %v5004_v15, %v3840_v20 }
 0x1b2   : > { %4971 = vmatmul.msk.bf16.gmra.mxu3 %vm709_vm5, %v3555_v59  ;;  %v3291_v59 = vshrl.u32 %v6221_v56, 16  ;;  %v3280_v9 = vrot.slane %v3278_v54, 4  ;;  %v3283_v47 = vrot.slane %v3281_v62, 5  ;;  %v6244_v31 = vrot.slane %v3287_v21, 5 }
 0x1b3   : > { %v2512_v51 = vsel %vm5536_vm8, %v2510_v34, %v2511_v45  ;;  %v3927_v15 = vunpack.c.l.b16 %v3841_v8  ;;  %v4989_v8 = vld [vmem:[%s5350_s29 + $0x60] sm:$0xe] }
 0x1b4   : > { %v2348_v6 = vpop.f32.mrf.mxu0  ;;  %v3293_v4 = vrot.slane %v3291_v59, 4  ;;  %v3284_v21 = vor.u32 %v3283_v47, %v3280_v9 }
 0x1b5   : > { %v1694_v24 = vpop.f32.mrf.mxu3  ;;  %v1059_v63 = vpop.f32.mrf.mxu1 }
 0x1b6   : > { %v1738_v49 = vadd.f32 %v1694_v24, %v1451_v14  ;;  %v4778_v14 = vrot.slane %v4762_v53, 9  ;;  %v6253_v53 = vld [vmem:[%s5350_s29 + $0x68] sm:$0x1]  ;;  %v3294_v59 = vor.u32 %v3293_v4, %v6244_v31  ;;  %v3285_v34 = vrot.slane %v3284_v21, 4 }
 0x1b7   : > { %5020 = vmatmul.msk.bf16.gmra.mxu0 %vm709_vm5, %v3953_v27 }
 0x1b8   : > { %v1409_v41 = vpop.f32.mrf.mxu2  ;;  %4794 = vmatmul.msk.bf16.gmra.mxu1 %vm709_vm5, %v2615_v19  ;;  %v6242_v27 = vadd.f32 %v2348_v6, %v1738_v49  ;;  %v3844_v19 = vsel %vm5536_vm8, %v3842_v32, %v3843_v61  ;;  %v2509_v33 = vsel %vm5536_vm8, %v4778_v14, %v2508_v36  ;;  %v3556_v6 = vpack.c.b16 %v3530_v35, %v3529_v18  ;;  %v6261_v14 = vld [vmem:[%s5350_s29 + $0x70] sm:$0xf] }
 0x1b9   : > { %v1452_v11 = vadd.f32 %v1409_v41, %v1057_v26  ;;  %v3928_v62 = vunpack.c.l.b16 %v3844_v19  ;;  %v1060_v36 = vadd.f32 %v1059_v63, %v5701_v48  ;;  %v2590_v26 = vunpack.c.l.b16 %v2509_v33  ;;  %v4939_v41 = vld [vmem:[%s5350_s29 + $0x6c] sm:$0xf] }
 0x1ba   : > { %v2591_v32 = vunpack.c.l.b16 %v2512_v51  ;;  %v3297_v61 = vshll.u32 %v6253_v53, 16  ;;  %v3847_v48 = vrot.slane %v6221_v56, 5  ;;  %v3302_v47 = vshrl.u32 %v4939_v41, 16 }
 0x1bb   : > { %v3954_v18 = vpack.c.b16 %v3928_v62, %v3927_v15  ;;  %v3305_v4 = vshll.u32 %v4939_v41, 16  ;;  %v3311_v19 = vshll.u32 %v6261_v14, 16  ;;  %v3315_v33 = vshrl.u32 %v6261_v14, 16  ;;  %v5241_v62 = vld [vmem:[%s5350_s29 + $0x68] sm:$0x1] }
 0x1bc   : > { %v2350_v24 = vpop.f32.mrf.mxu0  ;;  %v3299_v35 = vrot.slane %v3297_v61, 5  ;;  %v2518_v21 = vrot.slane %v5241_v62, 5  ;;  %v3850_v56 = vrot.slane %v6253_v53, 5  ;;  %v3849_v61 = vrot.slane %v3847_v48, 4 }
 0x1bd   : > { %v1696_v20 = vpop.f32.mrf.mxu3  ;;  %4907 = vmatmul.msk.bf16.gmra.mxu2 %vm709_vm5, %v5072_v17  ;;  %v1061_v54 = vpop.f32.mrf.mxu1  ;;  %v2616_v17 = vpack.c.b16 %v2591_v32, %v2590_v26  ;;  %v3290_v26 = vsel %vm5362_vm4, %v3285_v34, %v6244_v31  ;;  %v3307_v41 = vrot.slane %v3305_v4, 5  ;;  %v3313_v53 = vrot.slane %v3311_v19, 5  ;;  %v6286_v34 = vld [vmem:[%s5350_s29 + $0x74] sm:$0x1] }
 0x1be   : > { %v1739_v49 = vadd.f32 %v1696_v20, %v1452_v11  ;;  %v3295_v11 = vrot.slane %v3294_v59, 4  ;;  %v3531_v62 = vunpack.c.l.b16 %v3290_v26 }
 0x1c0   : > { %v1412_v12 = vpop.f32.mrf.mxu2  ;;  %v6266_v63 = vadd.f32 %v2350_v24, %v1739_v49  ;;  %v4763_v24 = vld [vmem:[%s5350_s29 + $0x60] sm:$0xe]  ;;  %v1062_v49 = vadd.f32 %v1061_v54, %v5720_v16  ;;  %v3300_v32 = vsel %vm5362_vm4, %v3295_v11, %v3299_v35 }
 0x1c1   : > { %v1453_v45 = vadd.f32 %v1412_v12, %v1060_v36  ;;  %v5005_v36 = vrot.slane %v4989_v8, 9  ;;  %v3317_v8 = vrot.slane %v3315_v33, 4  ;;  %v3532_v31 = vunpack.c.l.b16 %v3300_v32 }
 0x1c2   : > { %4972 = vmatmul.msk.bf16.gmra.mxu3 %vm709_vm5, %v3556_v6  ;;  %6724 = vst [vmem:[#allocation4_spill] sm:$0xff] %v6266_v63  ;;  %v5240_v6 = vld [vmem:[%s5350_s29 + $0x64] sm:$0xf] }
 0x1c3   : > { %v2515_v15 = vrot.slane %v5240_v6, 5  ;;  %v4779_v6 = vrot.slane %v4763_v24, 9  ;;  %v3848_v11 = vsel %vm5536_vm8, %v5005_v36, %v3847_v48  ;;  %v3318_v33 = vor.u32 %v3317_v8, %v3313_v53 }
 0x1c4   : > { %v2353_v9 = vpop.f32.mrf.mxu0  ;;  %v3557_v36 = vpack.c.b16 %v3532_v31, %v3531_v62  ;;  %v3929_v24 = vunpack.c.l.b16 %v3848_v11 }
 0x1c5   : > { %v1699_v51 = vpop.f32.mrf.mxu3  ;;  %v1064_v20 = vpop.f32.mrf.mxu1  ;;  %v2517_v16 = vrot.slane %v2515_v15, 4 }
 0x1c6   : > { %v1740_v59 = vadd.f32 %v1699_v51, %v1453_v45  ;;  %v3304_v45 = vrot.slane %v3302_v47, 4 }
 0x1c7   : > { %5021 = vmatmul.msk.bf16.gmra.mxu0 %vm709_vm5, %v3954_v18  ;;  %v5073_v18 = vld [vmem:[%s5350_s29 + $0x60] sm:$0xff]  ;;  %v2519_v19 = vsel %vm5536_vm8, %v2517_v16, %v2518_v21  ;;  %v3854_v16 = vrot.slane %v6261_v14, 5 }
 0x1c8   : > { %v1414_v12 = vpop.f32.mrf.mxu2  ;;  %4795 = vmatmul.msk.bf16.gmra.mxu1 %vm709_vm5, %v2616_v17  ;;  %v6283_v54 = vadd.f32 %v2353_v9, %v1740_v59  ;;  %v3851_v17 = vsel %vm5536_vm8, %v3849_v61, %v3850_v56  ;;  %v3308_v35 = vor.u32 %v3307_v41, %v3304_v45  ;;  %v2516_v9 = vsel %vm5536_vm8, %v4779_v6, %v2515_v15  ;;  %v4942_v41 = vld [vmem:[%s5350_s29 + $0x78] sm:$0xf]  ;;  %v4990_v6 = vld [vmem:[%s5350_s29 + $0x6c] sm:$0xe] }
 0x1c9   : > { %v1454_v51 = vadd.f32 %v1414_v12, %v1062_v49  ;;  %v3321_v59 = vshll.u32 %v6286_v34, 16  ;;  %v1065_v56 = vadd.f32 %v1064_v20, %v5739_v55  ;;  %v3930_v49 = vunpack.c.l.b16 %v3851_v17 }
 0x1ca   : > { %v2592_v32 = vunpack.c.l.b16 %v2516_v9  ;;  %v2593_v61 = vunpack.c.l.b16 %v2519_v19  ;;  %v3309_v15 = vrot.slane %v3308_v35, 4  ;;  %v3319_v45 = vrot.slane %v3318_v33, 4  ;;  %v4764_v35 = vld [vmem:[%s5350_s29 + $0x6c] sm:$0xe] }
 0x1cb   : > { %v3323_v21 = vrot.slane %v3321_v59, 5  ;;  %v3955_v8 = vpack.c.b16 %v3930_v49, %v3929_v24  ;;  %v3326_v19 = vshrl.u32 %v4942_v41, 16  ;;  %v3329_v33 = vshll.u32 %v4942_v41, 16 }
 0x1cc   : > { %v2355_v63 = vpop.f32.mrf.mxu0  ;;  %v2617_v20 = vpack.c.b16 %v2593_v61, %v2592_v32  ;;  %v3314_v11 = vsel %vm5362_vm4, %v3309_v15, %v3313_v53  ;;  %v5006_v53 = vrot.slane %v4990_v6, 9  ;;  %v4780_v32 = vrot.slane %v4764_v35, 9  ;;  %v6327_v6 = vld [vmem:[%s5350_s29 + $0x80] sm:$0x1] }
 0x1cd   : > { %v1701_v47 = vpop.f32.mrf.mxu3  ;;  %4908 = vmatmul.msk.bf16.gmra.mxu2 %vm709_vm5, %v5073_v18  ;;  %v1066_v4 = vpop.f32.mrf.mxu1  ;;  %v3324_v17 = vsel %vm5362_vm4, %v3319_v45, %v3323_v21  ;;  %v3533_v24 = vunpack.c.l.b16 %v3314_v11  ;;  %v5243_v45 = vld [vmem:[%s5350_s29 + $0x74] sm:$0x1] }
 0x1ce   : > { %v1741_v48 = vadd.f32 %v1701_v47, %v1454_v51  ;;  %v6302_v51 = vld [vmem:[%s5350_s29 + $0x7c] sm:$0xf]  ;;  %v5242_v47 = vld [vmem:[%s5350_s29 + $0x70] sm:$0xf]  ;;  %v3534_v49 = vunpack.c.l.b16 %v3324_v17  ;;  %v2525_v21 = vrot.slane %v5243_v45, 5 }
 0x1cf   : > { %v2522_v9 = vrot.slane %v5242_v47, 5  ;;  %v3335_v59 = vshll.u32 %v6302_v51, 16  ;;  %v3339_v14 = vshrl.u32 %v6302_v51, 16  ;;  %v3861_v45 = vrot.slane %v6302_v51, 5 }
 0x1d0   : > { %v1417_v26 = vpop.f32.mrf.mxu2  ;;  %v6304_v18 = vadd.f32 %v2355_v63, %v1741_v48  ;;  %v1067_v48 = vadd.f32 %v1066_v4, %v5762_v3  ;;  %v3331_v3 = vrot.slane %v3329_v33, 5 }
 0x1d1   : > { %v1455_v12 = vadd.f32 %v1417_v26, %v1065_v56  ;;  %v3856_v26 = vrot.slane %v3854_v16, 4  ;;  %v2524_v15 = vrot.slane %v2522_v9, 4  ;;  %v6324_v4 = vrot.slane %v3335_v59, 5 }
 0x1d2   : > { %4973 = vmatmul.msk.bf16.gmra.mxu3 %vm709_vm5, %v3557_v36  ;;  %v3857_v36 = vrot.slane %v6286_v34, 5  ;;  %v3341_v34 = vrot.slane %v3339_v14, 4  ;;  %v2523_v47 = vsel %vm5536_vm8, %v4780_v32, %v2522_v9  ;;  %v3345_v59 = vshll.u32 %v6327_v6, 16  ;;  %v4945_v9 = vld [vmem:[%s5350_s29 + $0x84] sm:$0xf] }
 0x1d4   : > { %v2358_v55 = vpop.f32.mrf.mxu0  ;;  %v3858_v11 = vsel %vm5536_vm8, %v3856_v26, %v3857_v36 }
 0x1d5   : > { %v1704_v62 = vpop.f32.mrf.mxu3  ;;  %v1069_v31 = vpop.f32.mrf.mxu1 }
 0x1d6   : > { %v1742_v63 = vadd.f32 %v1704_v62, %v1455_v12  ;;  %v5074_v12 = vld [vmem:[%s5350_s29 + $0x6c] sm:$0xff]  ;;  %v1070_v14 = vadd.f32 %v1069_v31, %v5781_v7 }
 0x1d7   : > { %5022 = vmatmul.msk.bf16.gmra.mxu0 %vm709_vm5, %v3955_v8  ;;  %v3328_v8 = vrot.slane %v3326_v19, 4  ;;  %v2526_v19 = vsel %vm5536_vm8, %v2524_v15, %v2525_v21 }
 0x1d8   : > { %v1419_v56 = vpop.f32.mrf.mxu2  ;;  %4796 = vmatmul.msk.bf16.gmra.mxu1 %vm709_vm5, %v2617_v20  ;;  %v6322_v41 = vadd.f32 %v2358_v55, %v1742_v63  ;;  %v3855_v20 = vsel %vm5536_vm8, %v5006_v53, %v3854_v16  ;;  %v3558_v55 = vpack.c.b16 %v3534_v49, %v3533_v24  ;;  %v3342_v16 = vor.u32 %v3341_v34, %v6324_v4 }
 0x1d9   : > { %v1456_v61 = vadd.f32 %v1419_v56, %v1067_v48  ;;  %v3332_v33 = vor.u32 %v3331_v3, %v3328_v8  ;;  %v3931_v48 = vunpack.c.l.b16 %v3855_v20  ;;  %v3932_v53 = vunpack.c.l.b16 %v3858_v11  ;;  %v6348_v8 = vld [vmem:[%s5350_s29 + $0x88] sm:$0xf] }
 0x1da   : > { %v2594_v56 = vunpack.c.l.b16 %v2523_v47  ;;  %v2595_v24 = vunpack.c.l.b16 %v2526_v19  ;;  %v3343_v32 = vrot.slane %v3342_v16, 4  ;;  %v3350_v3 = vshrl.u32 %v4945_v9, 16  ;;  %v5244_v47 = vld [vmem:[%s5350_s29 + $0x7c] sm:$0xf] }
 0x1db   : > { %v3333_v26 = vrot.slane %v3332_v33, 4  ;;  %v3956_v15 = vpack.c.b16 %v3932_v53, %v3931_v48  ;;  %v3353_v34 = vshll.u32 %v4945_v9, 16  ;;  %v2529_v19 = vrot.slane %v5244_v47, 5 }
 0x1dc   : > { %v2360_v62 = vpop.f32.mrf.mxu0  ;;  %v2618_v21 = vpack.c.b16 %v2595_v24, %v2594_v56  ;;  %v3363_v48 = vshrl.u32 %v6348_v8, 16 }
 0x1dd   : > { %v1706_v17 = vpop.f32.mrf.mxu3  ;;  %4909 = vmatmul.msk.bf16.gmra.mxu2 %vm709_vm5, %v5074_v12  ;;  %v1071_v35 = vpop.f32.mrf.mxu1  ;;  %v4991_v12 = vld [vmem:[%s5350_s29 + $0x78] sm:$0xe]  ;;  %v3338_v51 = vsel %vm5362_vm4, %v3333_v26, %v6324_v4  ;;  %v3352_v4 = vrot.slane %v3350_v3, 4  ;;  %v3355_v56 = vrot.slane %v3353_v34, 5  ;;  %v2531_v9 = vrot.slane %v2529_v19, 4 }
 0x1de   : > { %v1743_v63 = vadd.f32 %v1706_v17, %v1456_v61  ;;  %v3347_v61 = vrot.slane %v3345_v59, 5  ;;  %v5007_v17 = vrot.slane %v4991_v12, 9  ;;  %v1072_v16 = vadd.f32 %v1071_v35, %v5798_v37  ;;  %v6372_v3 = vld [vmem:[%s5350_s29 + $0x8c] sm:$0x1] }
 0x1df   : > { %v3863_v59 = vrot.slane %v3861_v45, 4  ;;  %v3535_v37 = vunpack.c.l.b16 %v3338_v51  ;;  %v3356_v34 = vor.u32 %v3355_v56, %v3352_v4 }
 0x1e0   : > { %v1422_v36 = vpop.f32.mrf.mxu2  ;;  %v6345_v7 = vadd.f32 %v2360_v62, %v1743_v63  ;;  %v3348_v62 = vsel %vm5362_vm4, %v3343_v32, %v3347_v61  ;;  %v3864_v63 = vrot.slane %v6327_v6, 5  ;;  %v5245_v6 = vld [vmem:[%s5350_s29 + $0x80] sm:$0x1]  ;;  %v3862_v61 = vsel %vm5536_vm8, %v5007_v17, %v3861_v45 }
 0x1e1   : > { %v1457_v49 = vadd.f32 %v1422_v36, %v1070_v14  ;;  %v3359_v14 = vshll.u32 %v6348_v8, 16  ;;  %v2532_v26 = vrot.slane %v5245_v6, 5  ;;  %v3536_v35 = vunpack.c.l.b16 %v3348_v62 }
 0x1e2   : > { %4974 = vmatmul.msk.bf16.gmra.mxu3 %vm709_vm5, %v3558_v55  ;;  %v4765_v55 = vld [vmem:[%s5350_s29 + $0x78] sm:$0xe]  ;;  %v3865_v12 = vsel %vm5536_vm8, %v3863_v59, %v3864_v63  ;;  %v3933_v51 = vunpack.c.l.b16 %v3862_v61  ;;  %v3357_v4 = vrot.slane %v3356_v34, 4 }
 0x1e3   : > { %v4781_v36 = vrot.slane %v4765_v55, 9  ;;  %v2533_v45 = vsel %vm5536_vm8, %v2531_v9, %v2532_v26  ;;  %v3934_v62 = vunpack.c.l.b16 %v3865_v12  ;;  %v6386_v9 = vld [vmem:[%s5350_s29 + $0x94] sm:$0xf]  ;;  %v5246_v12 = vld [vmem:[%s5350_s29 + $0x88] sm:$0xf] }
 0x1e4   : > { %v2363_v31 = vpop.f32.mrf.mxu0 }
 0x1e5   : > { %v1709_v20 = vpop.f32.mrf.mxu3  ;;  %v2686_v11 = vpop.f32.mrf.mxu1  ;;  %v2530_v47 = vsel %vm5536_vm8, %v4781_v36, %v2529_v19  ;;  %v4992_v19 = vld [vmem:[%s5350_s29 + $0x84] sm:$0xe]  ;;  %v3957_v36 = vpack.c.b16 %v3934_v62, %v3933_v51  ;;  %v3387_v51 = vshrl.u32 %v6386_v9, 16  ;;  %v3871_v62 = vrot.slane %v6372_v3, 5 }
 0x1e6   : > { %v1744_v33 = vadd.f32 %v1709_v20, %v1457_v49  ;;  %v5075_v49 = vld [vmem:[%s5350_s29 + $0x78] sm:$0xff]  ;;  %v2766_v59 = vadd.f32 %v2686_v11, %v5815_v57 }
 0x1e7   : > { %5023 = vmatmul.msk.bf16.gmra.mxu0 %vm709_vm5, %v3956_v15  ;;  %v3361_v15 = vrot.slane %v3359_v14, 5 }
 0x1e8   : > { %v1424_v53 = vpop.f32.mrf.mxu2  ;;  %4797 = vmatmul.msk.bf16.gmra.mxu1 %vm709_vm5, %v2618_v21  ;;  %v6365_v32 = vadd.f32 %v2363_v31, %v1744_v33  ;;  %v3365_v21 = vrot.slane %v3363_v48, 4  ;;  %v3559_v33 = vpack.c.b16 %v3536_v35, %v3535_v37  ;;  %v2596_v48 = vunpack.c.l.b16 %v2530_v47  ;;  %v4766_v47 = vld [vmem:[%s5350_s29 + $0x84] sm:$0xe] }
 0x1e9   : > { %v1458_v24 = vadd.f32 %v1424_v53, %v1072_v16  ;;  %v3369_v16 = vshll.u32 %v6372_v3, 16  ;;  %v2597_v53 = vunpack.c.l.b16 %v2533_v45  ;;  %v5008_v37 = vrot.slane %v4992_v19, 9  ;;  %v5076_v3 = vld [vmem:[%s5350_s29 + $0x84] sm:$0xff] }
 0x1ea   : > { %v3366_v63 = vor.u32 %v3365_v21, %v3361_v15  ;;  %v3362_v61 = vsel %vm5362_vm4, %v3357_v4, %v3361_v15  ;;  %v2536_v21 = vrot.slane %v5246_v12, 5  ;;  %v5247_v4 = vld [vmem:[%s5350_s29 + $0x8c] sm:$0x1] }
 0x1eb   : > { %v3371_v26 = vrot.slane %v3369_v16, 5  ;;  %v2619_v35 = vpack.c.b16 %v2597_v53, %v2596_v48  ;;  %v4782_v48 = vrot.slane %v4766_v47, 9  ;;  %v2539_v19 = vrot.slane %v5247_v4, 5  ;;  %v4951_v4 = vld [vmem:[%s5350_s29 + $0x9c] sm:$0xf] }
 0x1ec   : > { %v2365_v20 = vpop.f32.mrf.mxu0  ;;  %v3367_v6 = vrot.slane %v3366_v63, 4  ;;  %v3537_v63 = vunpack.c.l.b16 %v3362_v61  ;;  %v2538_v53 = vrot.slane %v2536_v21, 4 }
 0x1ed   : > { %v1711_v55 = vpop.f32.mrf.mxu3  ;;  %4910 = vmatmul.msk.bf16.gmra.mxu2 %vm709_vm5, %v5075_v49  ;;  %v2688_v31 = vpop.f32.mrf.mxu1  ;;  %v4948_v49 = vld [vmem:[%s5350_s29 + $0x90] sm:$0xf] }
 0x1ee   : > { %v1745_v17 = vadd.f32 %v1711_v55, %v1458_v24  ;;  %v3868_v24 = vrot.slane %v6348_v8, 5  ;;  %v3374_v45 = vshrl.u32 %v4948_v49, 16  ;;  %v3377_v8 = vshll.u32 %v4948_v49, 16 }
 0x1ef   : > { %v3372_v15 = vsel %vm5362_vm4, %v3367_v6, %v3371_v26  ;;  %v3389_v6 = vrot.slane %v3387_v51, 4 }
 0x1f0   : > { %v2973_v14 = vpop.f32.mrf.mxu2  ;;  %v6388_v57 = vadd.f32 %v2365_v20, %v1745_v17  ;;  %v3870_v17 = vrot.slane %v3868_v24, 4  ;;  %v3869_v16 = vsel %vm5536_vm8, %v5008_v37, %v3868_v24  ;;  %v6411_v24 = vld [vmem:[%s6716_s2] ss:$0 sm:$0xff] }
 0x1f1   : > { %v3053_v56 = vadd.f32 %v2973_v14, %v2766_v59  ;;  %v2767_v59 = vadd.f32 %v2688_v31, %v5828_v50  ;;  %v3538_v31 = vunpack.c.l.b16 %v3372_v15  ;;  %v3935_v12 = vunpack.c.l.b16 %v3869_v16 }
 0x1f2   : > { %4975 = vmatmul.msk.bf16.gmra.mxu3 %vm709_vm5, %v3559_v33  ;;  %v3383_v33 = vshll.u32 %v6386_v9, 16  ;;  %v3872_v37 = vsel %vm5536_vm8, %v3870_v17, %v3871_v62 }
 0x1f3   : > { %v3560_v15 = vpack.c.b16 %v3538_v31, %v3537_v63 }
 0x1f4   : > { %v4025_v11 = vpop.f32.mrf.mxu0  ;;  %v6406_v49 = vrot.slane %v3383_v33, 5 }
 0x1f5   : > { %v3627_v34 = vpop.f32.mrf.mxu3  ;;  %v2691_v55 = vpop.f32.mrf.mxu1 }
 0x1f6   : > { %v3707_v20 = vadd.f32 %v3627_v34, %v3053_v56  ;;  %v3376_v56 = vrot.slane %v3374_v45, 4  ;;  %v2537_v34 = vsel %vm5536_vm8, %v4782_v48, %v2536_v21  ;;  %v3936_v45 = vunpack.c.l.b16 %v3872_v37 }
 0x1f7   : > { %5024 = vmatmul.msk.bf16.gmra.mxu0 %vm709_vm5, %v3957_v36  ;;  %v3379_v36 = vrot.slane %v3377_v8, 5  ;;  %v3390_v51 = vor.u32 %v3389_v6, %v6406_v49  ;;  %v2598_v21 = vunpack.c.l.b16 %v2537_v34  ;;  %v2768_v48 = vadd.f32 %v2691_v55, %v5841_v25  ;;  %v6430_v6 = vld [vmem:[%s5350_s29 + $0xa0] sm:$0xf] }
 0x1f8   : > { %v2975_v14 = vpop.f32.mrf.mxu2  ;;  %4798 = vmatmul.msk.bf16.gmra.mxu1 %vm709_vm5, %v2619_v35  ;;  %v4105_v26 = vadd.f32 %v4025_v11, %v3707_v20  ;;  %v6416_v35 = vld [vmem:[%s5350_s29 + $0x98] sm:$0x1]  ;;  %v2540_v11 = vsel %vm5536_vm8, %v2538_v53, %v2539_v19  ;;  %v3958_v19 = vpack.c.b16 %v3936_v45, %v3935_v12  ;;  %v3875_v25 = vrot.slane %v6386_v9, 5 }
 0x1f9   : > { %v3054_v50 = vadd.f32 %v2975_v14, %v2767_v59  ;;  %v3380_v33 = vor.u32 %v3379_v36, %v3376_v56  ;;  %v3393_v20 = vshll.u32 %v6416_v35, 16  ;;  %v2599_v16 = vunpack.c.l.b16 %v2540_v11  ;;  %v4993_v59 = vld [vmem:[%s5350_s29 + $0x90] sm:$0xe] }
 0x1fa   : > { %v4141_v17 = vadd.f32 %v6411_v24, %v4105_v26  ;;  %v3391_v56 = vrot.slane %v3390_v51, 4  ;;  %v3398_v55 = vshrl.u32 %v4951_v4, 16  ;;  %v3401_v34 = vshll.u32 %v4951_v4, 16  ;;  %v5248_v51 = vld [vmem:[%s5350_s29 + $0x94] sm:$0xf] }
 0x1fb   : > { %v3395_v36 = vrot.slane %v3393_v20, 5  ;;  %v2620_v31 = vpack.c.b16 %v2599_v16, %v2598_v21  ;;  %v3407_v11 = vshll.u32 %v6430_v6, 16  ;;  %v2543_v20 = vrot.slane %v5248_v51, 5 }
 0x1fc   : > { %v4027_v61 = vpop.f32.mrf.mxu0  ;;  %v4205_v37 = vmul.f32 0.1, %v4141_v17  ;;  %vm4173_vm9 = vcmp.gt.f32.partialorder %v4141_v17, 0.0 }
 0x1fd   : > { %v3629_v47 = vpop.f32.mrf.mxu3  ;;  %4911 = vmatmul.msk.bf16.gmra.mxu2 %vm709_vm5, %v5076_v3  ;;  %v2693_v8 = vpop.f32.mrf.mxu1  ;;  %v3381_v3 = vrot.slane %v3380_v33, 4  ;;  %v3878_v33 = vrot.slane %v6416_v35, 5  ;;  %v4767_v35 = vld [vmem:[%s5350_s29 + $0x90] sm:$0xe] }
 0x1fe   : > { %v3708_v62 = vadd.f32 %v3629_v47, %v3054_v50  ;;  %v5009_v50 = vrot.slane %v4993_v59, 9 }
 0x1ff   : > { %v3386_v16 = vsel %vm5362_vm4, %v3381_v3, %v6406_v49  ;;  %v3403_v49 = vrot.slane %v3401_v34, 5  ;;  %v6457_v3 = vrot.slane %v3407_v11, 5 }
 0x200   : > { %v4106_v14 = vadd.f32 %v4027_v61, %v3708_v62  ;;  %v2978_v53 = vpop.f32.mrf.mxu2  ;;  %v3411_v62 = vshrl.u32 %v6430_v6, 16 }
 0x201   : > { %v3055_v63 = vadd.f32 %v2978_v53, %v2768_v48  ;;  %v3877_v48 = vrot.slane %v3875_v25, 4  ;;  %v2769_v53 = vadd.f32 %v2693_v8, %v5854_v22  ;;  %v4953_v22 = vld [vmem:[%s5350_s29 + $0xa4] sm:$0x1] }
 0x202   : > { %v4142_v26 = vadd.f32 %v6411_v24, %v4106_v14  ;;  %4976 = vmatmul.msk.bf16.gmra.mxu3 %vm709_vm5, %v3560_v15  ;;  %v4237_v15 = vsel %vm4173_vm9, %v4141_v17, %v4205_v37  ;;  %v3396_v17 = vsel %vm5362_vm4, %v3391_v56, %v3395_v36  ;;  %v3876_v14 = vsel %vm5536_vm8, %v5009_v50, %v3875_v25 }
 0x203   : > { %v3400_v37 = vrot.slane %v3398_v55, 4  ;;  %v3413_v36 = vrot.slane %v3411_v62, 4  ;;  %v3539_v25 = vunpack.c.l.b16 %v3386_v16  ;;  %v3540_v51 = vunpack.c.l.b16 %v3396_v17 }
 0x204   : > { %vm4174_vm10 = vcmp.gt.f32.partialorder %v4142_v26, 0.0  ;;  %v4206_v61 = vmul.f32 0.1, %v4142_v26  ;;  %v4030_v12 = vpop.f32.mrf.mxu0  ;;  %v3879_v8 = vsel %vm5536_vm8, %v3877_v48, %v3878_v33  ;;  %v3937_v55 = vunpack.c.l.b16 %v3876_v14 }
 0x205   : > { %v3632_v47 = vpop.f32.mrf.mxu3  ;;  %v2696_v45 = vpop.f32.mrf.mxu1  ;;  %v3404_v34 = vor.u32 %v3403_v49, %v3400_v37  ;;  %v3414_v62 = vor.u32 %v3413_v36, %v6457_v3  ;;  %v3882_v17 = vrot.slane %v6430_v6, 5  ;;  %v4994_v37 = vld [vmem:[%s5350_s29 + $0x9c] sm:$0xe]  ;;  %v4954_v36 = vld [vmem:[%s5350_s29 + $0xa8] sm:$0xf] }
 0x206   : > { %v4238_v9 = vsel %vm4174_vm10, %v4142_v26, %v4206_v61  ;;  %v3709_v21 = vadd.f32 %v3632_v47, %v3055_v63  ;;  %v5077_v26 = vld [vmem:[%s5350_s29 + $0x90] sm:$0xff]  ;;  %v2545_v63 = vrot.slane %v2543_v20, 4  ;;  %v5249_v61 = vld [vmem:[%s5350_s29 + $0x98] sm:$0x1]  ;;  %v2770_v48 = vadd.f32 %v2696_v45, %v5867_v2 }
 0x207   : > { %v5086_v59 = vpack.c.bf16 %v4238_v9, %v4237_v15  ;;  %5025 = vmatmul.msk.bf16.gmra.mxu0 %vm709_vm5, %v3958_v19  ;;  %v4783_v19 = vrot.slane %v4767_v35, 9  ;;  %v2546_v56 = vrot.slane %v5249_v61, 5  ;;  %v3561_v35 = vpack.c.b16 %v3540_v51, %v3539_v25 }
 0x208   : > { %v2980_v4 = vpop.f32.mrf.mxu2  ;;  %4799 = vmatmul.msk.bf16.gmra.mxu1 %vm709_vm5, %v2620_v31  ;;  %v4107_v47 = vadd.f32 %v4030_v12, %v3709_v21  ;;  %v3417_v21 = vshll.u32 %v4953_v22, 16  ;;  %v3405_v49 = vrot.slane %v3404_v34, 4  ;;  %v5010_v2 = vrot.slane %v4994_v37, 9 }
 0x209   : > { %5087 = vst [vmem:[%s6444_s19] sm:$0xff] %v5086_v59   ;;  %v3056_v50 = vadd.f32 %v2980_v4, %v2769_v53  ;;  %v2544_v9 = vsel %vm5536_vm8, %v4783_v19, %v2543_v20  ;;  %v2547_v12 = vsel %vm5536_vm8, %v2545_v63, %v2546_v56  ;;  %v3938_v59 = vunpack.c.l.b16 %v3879_v8 }
 0x20a   : > { %v4143_v16 = vadd.f32 %v6411_v24, %v4107_v47  ;;  %v2600_v20 = vunpack.c.l.b16 %v2544_v9  ;;  %v2601_v4 = vunpack.c.l.b16 %v2547_v12  ;;  %v3419_v19 = vrot.slane %v3417_v21, 5  ;;  %v6479_v47 = vld [vmem:[%s5350_s29 + $0xac] sm:$0xf]  ;;  %v4768_v12 = vld [vmem:[%s5350_s29 + $0x9c] sm:$0xe] }
 0x20b   : > { %v3959_v56 = vpack.c.b16 %v3938_v59, %v3937_v55  ;;  %v3884_v45 = vrot.slane %v3882_v17, 4  ;;  %v3425_v55 = vshll.u32 %v4954_v36, 16  ;;  %v3431_v21 = vshll.u32 %v6479_v47, 16 }
 0x20c   : > { %v4032_v31 = vpop.f32.mrf.mxu0  ;;  %v4207_v63 = vmul.f32 0.1, %v4143_v16  ;;  %vm4175_vm11 = vcmp.gt.f32.partialorder %v4143_v16, 0.0  ;;  %v2621_v8 = vpack.c.b16 %v2601_v4, %v2600_v20  ;;  %v3883_v20 = vsel %vm5536_vm8, %v5010_v2, %v3882_v17 }
 0x20d   : > { %v3634_v11 = vpop.f32.mrf.mxu3  ;;  %4912 = vmatmul.msk.bf16.gmra.mxu2 %vm709_vm5, %v5077_v26  ;;  %v2698_v15 = vpop.f32.mrf.mxu1  ;;  %v3415_v26 = vrot.slane %v3414_v62, 4  ;;  %v3422_v62 = vshrl.u32 %v4954_v36, 16 }
 0x20e   : > { %v3710_v33 = vadd.f32 %v3634_v11, %v3056_v50  ;;  %v3885_v50 = vrot.slane %v4953_v22, 5  ;;  %v2771_v4 = vadd.f32 %v2698_v15, %v5880_v0  ;;  %v4956_v0 = vld [vmem:[%s5350_s29 + $0xb0] sm:$0x1] }
 0x210   : > { %v4108_v14 = vadd.f32 %v4032_v31, %v3710_v33  ;;  %v2983_v53 = vpop.f32.mrf.mxu2  ;;  %v5250_v31 = vld [vmem:[%s5350_s29 + $0xa0] sm:$0xf]  ;;  %v3435_v33 = vshrl.u32 %v6479_v47, 16 }
 0x211   : > { %v3057_v6 = vadd.f32 %v2983_v53, %v2770_v48  ;;  %v2550_v34 = vrot.slane %v5250_v31, 5  ;;  %v3420_v53 = vsel %vm5362_vm4, %v3415_v26, %v3419_v19  ;;  %v3427_v26 = vrot.slane %v3425_v55, 5 }
 0x212   : > { %v4144_v61 = vadd.f32 %v6411_v24, %v4108_v14  ;;  %4977 = vmatmul.msk.bf16.gmra.mxu3 %vm709_vm5, %v3561_v35  ;;  %v4239_v35 = vsel %vm4175_vm11, %v4143_v16, %v4207_v63  ;;  %v3410_v14 = vsel %vm5362_vm4, %v3405_v49, %v6457_v3  ;;  %v3886_v16 = vsel %vm5536_vm8, %v3884_v45, %v3885_v50  ;;  %v5251_v49 = vld [vmem:[%s5350_s29 + $0xa4] sm:$0x1] }
 0x213   : > { %v4784_v63 = vrot.slane %v4768_v12, 9  ;;  %v2552_v3 = vrot.slane %v2550_v34, 4  ;;  %v6501_v19 = vrot.slane %v3431_v21, 5  ;;  %v3437_v17 = vrot.slane %v3435_v33, 4 }
 0x214   : > { %vm4176_vm12 = vcmp.gt.f32.partialorder %v4144_v61, 0.0  ;;  %v4208_v25 = vmul.f32 0.1, %v4144_v61  ;;  %v4035_v51 = vpop.f32.mrf.mxu0  ;;  %v3541_v45 = vunpack.c.l.b16 %v3410_v14  ;;  %v3542_v50 = vunpack.c.l.b16 %v3420_v53 }
 0x215   : > { %v3637_v11 = vpop.f32.mrf.mxu3  ;;  %v2701_v9 = vpop.f32.mrf.mxu1  ;;  %v2551_v31 = vsel %vm5536_vm8, %v4784_v63, %v2550_v34  ;;  %v3438_v55 = vor.u32 %v3437_v17, %v6501_v19  ;;  %v3441_v21 = vshll.u32 %v4956_v0, 16 }
 0x216   : > { %v4240_v22 = vsel %vm4176_vm12, %v4144_v61, %v4208_v25  ;;  %v3711_v59 = vadd.f32 %v3637_v11, %v3057_v6  ;;  %v2553_v61 = vrot.slane %v5251_v49, 5  ;;  %v3424_v6 = vrot.slane %v3422_v62, 4 }
 0x217   : > { %v5091_v48 = vpack.c.bf16 %v4240_v22, %v4239_v35  ;;  %5026 = vmatmul.msk.bf16.gmra.mxu0 %vm709_vm5, %v3959_v56  ;;  %v5078_v56 = vld [vmem:[%s5350_s29 + $0x9c] sm:$0xff]  ;;  %v3939_v25 = vunpack.c.l.b16 %v3883_v20  ;;  %v3562_v22 = vpack.c.b16 %v3542_v50, %v3541_v45  ;;  %v2602_v14 = vunpack.c.l.b16 %v2551_v31  ;;  %v5252_v31 = vld [vmem:[%s5350_s29 + $0xac] sm:$0xf] }
 0x218   : > { %v2985_v37 = vpop.f32.mrf.mxu2  ;;  %4800 = vmatmul.msk.bf16.gmra.mxu1 %vm709_vm5, %v2621_v8  ;;  %v4109_v36 = vadd.f32 %v4035_v51, %v3711_v59  ;;  %v3940_v8 = vunpack.c.l.b16 %v3886_v16  ;;  %v2554_v11 = vsel %vm5536_vm8, %v2552_v3, %v2553_v61  ;;  %v3428_v51 = vor.u32 %v3427_v26, %v3424_v6  ;;  %v4995_v59 = vld [vmem:[%s5350_s29 + $0xa8] sm:$0xe] }
 0x219   : > { %5163 = vst [vmem:[%s6444_s19 + $0x8] sm:$0xff] %v5091_v48   ;;  %v3058_v2 = vadd.f32 %v2985_v37, %v2771_v4  ;;  %v2603_v34 = vunpack.c.l.b16 %v2554_v11  ;;  %v3889_v48 = vrot.slane %v6479_v47, 5  ;;  %v2772_v20 = vadd.f32 %v2701_v9, %v5893_v43  ;;  %v4957_v37 = vld [vmem:[%s5350_s29 + $0xb4] sm:$0xf] }
 0x21a   : > { %v4145_v33 = vadd.f32 %v6411_v24, %v4109_v36  ;;  %v3960_v16 = vpack.c.b16 %v3940_v8, %v3939_v25  ;;  %v3429_v63 = vrot.slane %v3428_v51, 4  ;;  %v3439_v3 = vrot.slane %v3438_v55, 4 }
 0x21b   : > { %v3443_v49 = vrot.slane %v3441_v21, 5  ;;  %v5011_v61 = vrot.slane %v4995_v59, 9  ;;  %v3892_v47 = vrot.slane %v4956_v0, 5  ;;  %v2622_v36 = vpack.c.b16 %v2603_v34, %v2602_v14 }
 0x21c   : > { %v4037_v15 = vpop.f32.mrf.mxu0  ;;  %v4209_v6 = vmul.f32 0.1, %v4145_v33  ;;  %vm4177_vm13 = vcmp.gt.f32.partialorder %v4145_v33, 0.0  ;;  %v3891_v43 = vrot.slane %v3889_v48, 4  ;;  %v3446_v9 = vshrl.u32 %v4957_v37, 16 }
 0x21d   : > { %v3639_v12 = vpop.f32.mrf.mxu3  ;;  %4913 = vmatmul.msk.bf16.gmra.mxu2 %vm709_vm5, %v5078_v56  ;;  %v2703_v62 = vpop.f32.mrf.mxu1  ;;  %v6516_v56 = vld [vmem:[%s5350_s29 + $0xb8] sm:$0xf]  ;;  %v3449_v50 = vshll.u32 %v4957_v37, 16  ;;  %v2557_v11 = vrot.slane %v5252_v31, 5  ;;  %v3434_v21 = vsel %vm5362_vm4, %v3429_v63, %v6501_v19  ;;  %v3444_v59 = vsel %vm5362_vm4, %v3439_v3, %v3443_v49  ;;  %v5253_v3 = vld [vmem:[%s5350_s29 + $0xb0] sm:$0x1] }
 0x21e   : > { %v3712_v35 = vadd.f32 %v3639_v12, %v3058_v2  ;;  %v3459_v12 = vshrl.u32 %v6516_v56, 16  ;;  %v4241_v51 = vsel %vm4177_vm13, %v4145_v33, %v4209_v6  ;;  %v3890_v14 = vsel %vm5536_vm8, %v5011_v61, %v3889_v48 }
 0x21f   : > { %v3893_v33 = vsel %vm5536_vm8, %v3891_v43, %v3892_v47  ;;  %v2773_v34 = vadd.f32 %v2703_v62, %v5906_v42  ;;  %v3448_v19 = vrot.slane %v3446_v9, 4  ;;  %v2559_v63 = vrot.slane %v2557_v11, 4  ;;  %v6542_v42 = vld [vmem:[%s5350_s29 + $0xbc] sm:$0x1] }
 0x220   : > { %v4110_v53 = vadd.f32 %v4037_v15, %v3712_v35  ;;  %v2988_v4 = vpop.f32.mrf.mxu2  ;;  %v3455_v15 = vshll.u32 %v6516_v56, 16  ;;  %v4769_v35 = vld [vmem:[%s5350_s29 + $0xa8] sm:$0xe]  ;;  %v2560_v49 = vrot.slane %v5253_v3, 5  ;;  %v3461_v48 = vrot.slane %v3459_v12, 4 }
 0x221   : > { %v3059_v17 = vadd.f32 %v2988_v4, %v2772_v20  ;;  %v3451_v20 = vrot.slane %v3449_v50, 5  ;;  %v4785_v37 = vrot.slane %v4769_v35, 9  ;;  %v3941_v47 = vunpack.c.l.b16 %v3890_v14 }
 0x222   : > { %v4146_v26 = vadd.f32 %v6411_v24, %v4110_v53  ;;  %4978 = vmatmul.msk.bf16.gmra.mxu3 %vm709_vm5, %v3562_v22  ;;  %v6536_v4 = vrot.slane %v3455_v15, 5  ;;  %v2561_v50 = vsel %vm5536_vm8, %v2559_v63, %v2560_v49 }
 0x224   : > { %vm4178_vm14 = vcmp.gt.f32.partialorder %v4146_v26, 0.0  ;;  %v4210_v2 = vmul.f32 0.1, %v4146_v26  ;;  %v4040_v45 = vpop.f32.mrf.mxu0  ;;  %v3462_v15 = vor.u32 %v3461_v48, %v6536_v4 }
 0x225   : > { %v3642_v25 = vpop.f32.mrf.mxu3  ;;  %v2706_v8 = vpop.f32.mrf.mxu1 }
 0x226   : > { %v4242_v0 = vsel %vm4178_vm14, %v4146_v26, %v4210_v2  ;;  %v3713_v55 = vadd.f32 %v3642_v25, %v3059_v17  ;;  %v3543_v26 = vunpack.c.l.b16 %v3434_v21  ;;  %v3544_v17 = vunpack.c.l.b16 %v3444_v59 }
 0x227   : > { %v5096_v22 = vpack.c.bf16 %v4242_v0, %v4241_v51  ;;  %5027 = vmatmul.msk.bf16.gmra.mxu0 %vm709_vm5, %v3960_v16  ;;  %v5079_v16 = vld [vmem:[%s5350_s29 + $0xa8] sm:$0xff]  ;;  %v2558_v2 = vsel %vm5536_vm8, %v4785_v37, %v2557_v11  ;;  %v3465_v51 = vshll.u32 %v6542_v42, 16  ;;  %v2605_v11 = vunpack.c.l.b16 %v2561_v50  ;;  %v4996_v37 = vld [vmem:[%s5350_s29 + $0xb4] sm:$0xe] }
 0x228   : > { %v2990_v53 = vpop.f32.mrf.mxu2  ;;  %4801 = vmatmul.msk.bf16.gmra.mxu1 %vm709_vm5, %v2622_v36  ;;  %v4111_v61 = vadd.f32 %v4040_v45, %v3713_v55  ;;  %v3942_v36 = vunpack.c.l.b16 %v3893_v33  ;;  %v3452_v45 = vor.u32 %v3451_v20, %v3448_v19  ;;  %v3563_v12 = vpack.c.b16 %v3544_v17, %v3543_v26 }
 0x229   : > { %5164 = vst [vmem:[%s6444_s19 + $0x10] sm:$0xff] %v5096_v22   ;;  %v3060_v6 = vadd.f32 %v2990_v53, %v2773_v34  ;;  %v2774_v55 = vadd.f32 %v2706_v8, %v5919_v5  ;;  %v2604_v35 = vunpack.c.l.b16 %v2558_v2  ;;  %v4960_v22 = vld [vmem:[%s5350_s29 + $0xc0] sm:$0xf]  ;;  %v3463_v33 = vrot.slane %v3462_v15, 4  ;;  %v6555_v34 = vld [vmem:[%s5350_s29 + $0xc4] sm:$0xf] }
 0x22a   : > { %v4147_v25 = vadd.f32 %v6411_v24, %v4111_v61  ;;  %v3961_v59 = vpack.c.b16 %v3942_v36, %v3941_v47  ;;  %v3453_v14 = vrot.slane %v3452_v45, 4  ;;  %v3896_v5 = vrot.slane %v6516_v56, 5  ;;  %v4770_v45 = vld [vmem:[%s5350_s29 + $0xb4] sm:$0xe] }
 0x22b   : > { %v3470_v8 = vshrl.u32 %v4960_v22, 16  ;;  %v3473_v63 = vshll.u32 %v4960_v22, 16  ;;  %v2623_v48 = vpack.c.b16 %v2605_v11, %v2604_v35  ;;  %v3479_v61 = vshll.u32 %v6555_v34, 16  ;;  %v5080_v35 = vld [vmem:[%s5350_s29 + $0xb4] sm:$0xff] }
 0x22c   : > { %v4042_v62 = vpop.f32.mrf.mxu0  ;;  %v4211_v53 = vmul.f32 0.1, %v4147_v25  ;;  %vm4179_vm15 = vcmp.gt.f32.partialorder %v4147_v25, 0.0  ;;  %v5012_v17 = vrot.slane %v4996_v37, 9  ;;  %v3483_v36 = vshrl.u32 %v6555_v34, 16 }
 0x22d   : > { %v3644_v43 = vpop.f32.mrf.mxu3  ;;  %4914 = vmatmul.msk.bf16.gmra.mxu2 %vm709_vm5, %v5079_v16  ;;  %v2708_v9 = vpop.f32.mrf.mxu1  ;;  %v3467_v16 = vrot.slane %v3465_v51, 5  ;;  %v3458_v50 = vsel %vm5362_vm4, %v3453_v14, %v6536_v4  ;;  %v3475_v51 = vrot.slane %v3473_v63, 5  ;;  %v6574_v4 = vrot.slane %v3479_v61, 5 }
 0x22e   : > { %v3714_v31 = vadd.f32 %v3644_v43, %v3060_v6  ;;  %v4243_v43 = vsel %vm4179_vm15, %v4147_v25, %v4211_v53  ;;  %v2775_v25 = vadd.f32 %v2708_v9, %v5933_v29  ;;  %v4786_v11 = vrot.slane %v4770_v45, 9  ;;  %v6580_v9 = vld [vmem:[%s5350_s29 + $0xc8] sm:$0x1] }
 0x230   : > { %v4112_v0 = vadd.f32 %v4042_v62, %v3714_v31  ;;  %v2993_v21 = vpop.f32.mrf.mxu2  ;;  %v5254_v62 = vld [vmem:[%s5350_s29 + $0xb8] sm:$0xf]  ;;  %v3468_v31 = vsel %vm5362_vm4, %v3463_v33, %v3467_v16  ;;  %v3485_v33 = vrot.slane %v3483_v36, 4 }
 0x231   : > { %v3061_v20 = vadd.f32 %v2993_v21, %v2774_v55  ;;  %v2564_v47 = vrot.slane %v5254_v62, 5  ;;  %v3898_v55 = vrot.slane %v3896_v5, 4  ;;  %v3899_v21 = vrot.slane %v6542_v42, 5 }
 0x232   : > { %v4148_v19 = vadd.f32 %v6411_v24, %v4112_v0  ;;  %4979 = vmatmul.msk.bf16.gmra.mxu3 %vm709_vm5, %v3563_v12  ;;  %v3472_v12 = vrot.slane %v3470_v8, 4  ;;  %v3546_v29 = vunpack.c.l.b16 %v3468_v31  ;;  %v3897_v42 = vsel %vm5536_vm8, %v5012_v17, %v3896_v5 }
 0x233   : > { %v2566_v22 = vrot.slane %v2564_v47, 4  ;;  %v3900_v8 = vsel %vm5536_vm8, %v3898_v55, %v3899_v21  ;;  %v3486_v61 = vor.u32 %v3485_v33, %v6574_v4  ;;  %v3943_v36 = vunpack.c.l.b16 %v3897_v42  ;;  %v5256_v42 = vld [vmem:[%s5350_s29 + $0xc4] sm:$0xf] }
 0x234   : > { %vm4180_vm0 = vcmp.gt.f32.partialorder %v4148_v19, 0.0  ;;  %v4212_v3 = vmul.f32 0.1, %v4148_v19  ;;  %v4045_v49 = vpop.f32.mrf.mxu0  ;;  %v3476_v16 = vor.u32 %v3475_v51, %v3472_v12  ;;  %v4997_v12 = vld [vmem:[%s5350_s29 + $0xc0] sm:$0xe] }
 0x235   : > { %v3647_v6 = vpop.f32.mrf.mxu3  ;;  %v2711_v26 = vpop.f32.mrf.mxu1  ;;  %v3487_v51 = vrot.slane %v3486_v61, 4  ;;  %v4771_v61 = vld [vmem:[%s5350_s29 + $0xc0] sm:$0xe] }
 0x236   : > { %v4244_v2 = vsel %vm4180_vm0, %v4148_v19, %v4212_v3  ;;  %v3715_v56 = vadd.f32 %v3647_v6, %v3061_v20  ;;  %v3545_v20 = vunpack.c.l.b16 %v3458_v50  ;;  %v3489_v6 = vshll.u32 %v6580_v9, 16  ;;  %v6725_v50 = vld [vmem:[#allocation2_spill] sm:$0xff] }
 0x237   : > { %v5101_v15 = vpack.c.bf16 %v4244_v2, %v4243_v43  ;;  %5028 = vmatmul.msk.bf16.gmra.mxu0 %vm709_vm5, %v3961_v59  ;;  %v5255_v59 = vld [vmem:[%s5350_s29 + $0xbc] sm:$0x1]  ;;  %v3944_v43 = vunpack.c.l.b16 %v3900_v8  ;;  %v3477_v2 = vrot.slane %v3476_v16, 4  ;;  %v2776_v45 = vadd.f32 %v2711_v26, %v6725_v50  ;;  %v4963_v26 = vld [vmem:[%s5350_s29 + $0xcc] sm:$0xf] }
 0x238   : > { %v2995_v0 = vpop.f32.mrf.mxu2  ;;  %4802 = vmatmul.msk.bf16.gmra.mxu1 %vm709_vm5, %v2623_v48  ;;  %v2567_v14 = vrot.slane %v5255_v59, 5  ;;  %v4113_v53 = vadd.f32 %v4045_v49, %v3715_v56  ;;  %v2565_v49 = vsel %vm5536_vm8, %v4786_v11, %v2564_v47  ;;  %v3564_v62 = vpack.c.b16 %v3546_v29, %v3545_v20 }
 0x239   : > { %5165 = vst [vmem:[%s6444_s19 + $0x18] sm:$0xff] %v5101_v15   ;;  %v3062_v19 = vadd.f32 %v2995_v0, %v2775_v25  ;;  %v2606_v47 = vunpack.c.l.b16 %v2565_v49  ;;  %v3491_v25 = vrot.slane %v3489_v6, 5  ;;  %v3903_v0 = vrot.slane %v6555_v34, 5 }
 0x23a   : > { %v2568_v48 = vsel %vm5536_vm8, %v2566_v22, %v2567_v14  ;;  %v4149_v5 = vadd.f32 %v6411_v24, %v4113_v53  ;;  %v3962_v11 = vpack.c.b16 %v3944_v43, %v3943_v36  ;;  %v5013_v22 = vrot.slane %v4997_v12, 9  ;;  %v6604_v53 = vld [vmem:[%s5350_s29 + $0xd0] sm:$0xf] }
 0x23b   : > { %v2607_v31 = vunpack.c.l.b16 %v2568_v48  ;;  %v3482_v34 = vsel %vm5362_vm4, %v3477_v2, %v6574_v4  ;;  %v3492_v29 = vsel %vm5362_vm4, %v3487_v51, %v3491_v25  ;;  %v3905_v16 = vrot.slane %v3903_v0, 4 }
 0x23c   : > { %v4047_v37 = vpop.f32.mrf.mxu0  ;;  %v4213_v55 = vmul.f32 0.1, %v4149_v5  ;;  %vm4181_vm1 = vcmp.gt.f32.partialorder %v4149_v5, 0.0  ;;  %v2571_v8 = vrot.slane %v5256_v42, 5  ;;  %v3494_v4 = vshrl.u32 %v4963_v26, 16 }
 0x23d   : > { %v3649_v63 = vpop.f32.mrf.mxu3  ;;  %4915 = vmatmul.msk.bf16.gmra.mxu2 %vm709_vm5, %v5080_v35  ;;  %v2713_v3 = vpop.f32.mrf.mxu1  ;;  %v2624_v33 = vpack.c.b16 %v2607_v31, %v2606_v47  ;;  %v3507_v36 = vshrl.u32 %v6604_v53, 16  ;;  %v3547_v2 = vunpack.c.l.b16 %v3482_v34  ;;  %v4787_v50 = vrot.slane %v4771_v61, 9 }
 0x23e   : > { %v3716_v17 = vadd.f32 %v3649_v63, %v3062_v19  ;;  %v4245_v63 = vsel %vm4181_vm1, %v4149_v5, %v4213_v55  ;;  %v5081_v5 = vld [vmem:[%s5350_s29 + $0xc0] sm:$0xff]  ;;  %v3904_v51 = vsel %vm5536_vm8, %v5013_v22, %v3903_v0 }
 0x240   : > { %v4114_v56 = vadd.f32 %v4047_v37, %v3716_v17  ;;  %v2998_v15 = vpop.f32.mrf.mxu2  ;;  %v3906_v37 = vrot.slane %v6580_v9, 5  ;;  %v3497_v17 = vshll.u32 %v4963_v26, 16  ;;  %v2777_v9 = vadd.f32 %v2713_v3, %v5980_v52 }
 0x241   : > { %v3063_v35 = vadd.f32 %v2998_v15, %v2776_v45  ;;  %v2573_v45 = vrot.slane %v2571_v8, 4  ;;  %v5257_v15 = vld [vmem:[%s5350_s29 + $0xc8] sm:$0x1]  ;;  %v3496_v3 = vrot.slane %v3494_v4, 4 }
 0x242   : > { %v4150_v21 = vadd.f32 %v6411_v24, %v4114_v56  ;;  %4980 = vmatmul.msk.bf16.gmra.mxu3 %vm709_vm5, %v3564_v62  ;;  %v3503_v62 = vshll.u32 %v6604_v53, 16  ;;  %v3548_v56 = vunpack.c.l.b16 %v3492_v29  ;;  %v2574_v47 = vrot.slane %v5257_v15, 5 }
 0x243   : > { %v3907_v52 = vsel %vm5536_vm8, %v3905_v16, %v3906_v37  ;;  %v3499_v25 = vrot.slane %v3497_v17, 5 }
 0x244   : > { %vm4182_vm2 = vcmp.gt.f32.partialorder %v4150_v21, 0.0  ;;  %v4214_v59 = vmul.f32 0.1, %v4150_v21  ;;  %v4050_v14 = vpop.f32.mrf.mxu0  ;;  %v3505_v55 = vrot.slane %v3503_v62, 5  ;;  %v2575_v0 = vsel %vm5536_vm8, %v2573_v45, %v2574_v47  ;;  %v4998_v45 = vld [vmem:[%s5350_s29 + $0xcc] sm:$0xe] }
 0x245   : > { %v3652_v19 = vpop.f32.mrf.mxu3  ;;  %v2716_v20 = vpop.f32.mrf.mxu1  ;;  %v3946_v29 = vunpack.c.l.b16 %v3907_v52  ;;  %v3500_v16 = vor.u32 %v3499_v25, %v3496_v3  ;;  %v2609_v4 = vunpack.c.l.b16 %v2575_v0  ;;  %v6726_v3 = vld [vmem:[#allocation3_spill] sm:$0xff] }
 0x246   : > { %v4246_v49 = vsel %vm4182_vm2, %v4150_v21, %v4214_v59  ;;  %v3717_v48 = vadd.f32 %v3652_v19, %v3063_v35  ;;  %v3509_v21 = vrot.slane %v3507_v36, 4  ;;  %v3565_v59 = vpack.c.b16 %v3548_v56, %v3547_v2 }
 0x247   : > { %v5106_v6 = vpack.c.bf16 %v4246_v49, %v4245_v63  ;;  %5029 = vmatmul.msk.bf16.gmra.mxu0 %vm709_vm5, %v3962_v11  ;;  %v4965_v11 = vld [vmem:[%s5350_s29 + $0xd4] sm:$0x1]  ;;  %v3945_v19 = vunpack.c.l.b16 %v3904_v51  ;;  %v2778_v49 = vadd.f32 %v2716_v20, %v5991_v60  ;;  %v3501_v36 = vrot.slane %v3500_v16, 4 }
 0x248   : > { %v3000_v43 = vpop.f32.mrf.mxu2  ;;  %4803 = vmatmul.msk.bf16.gmra.mxu1 %vm709_vm5, %v2624_v33  ;;  %v4115_v31 = vadd.f32 %v4050_v14, %v3717_v48  ;;  %v2572_v14 = vsel %vm5536_vm8, %v4787_v50, %v2571_v8  ;;  %v3510_v37 = vor.u32 %v3509_v21, %v3505_v55  ;;  %v3513_v42 = vshll.u32 %v4965_v11, 16 }
 0x249   : > { %5166 = vst [vmem:[%s6444_s19 + $0x20] sm:$0xff] %v5106_v6   ;;  %v3064_v12 = vadd.f32 %v3000_v43, %v2777_v9  ;;  %v2608_v61 = vunpack.c.l.b16 %v2572_v14  ;;  %v3963_v17 = vpack.c.b16 %v3946_v29, %v3945_v19  ;;  %v3910_v60 = vrot.slane %v6604_v53, 5 }
 0x24a   : > { %v4151_v22 = vadd.f32 %v6411_v24, %v4115_v31  ;;  %v3511_v9 = vrot.slane %v3510_v37, 4  ;;  %v3515_v43 = vrot.slane %v3513_v42, 5  ;;  %v3506_v51 = vsel %vm5362_vm4, %v3501_v36, %v3505_v55 }
 0x24b   : > { %v2625_v56 = vpack.c.b16 %v2609_v4, %v2608_v61  ;;  %v5014_v21 = vrot.slane %v4998_v45, 9 }
 0x24c   : > { %v4052_v35 = vpop.f32.mrf.mxu0  ;;  %v4215_v6 = vmul.f32 0.1, %v4151_v22  ;;  %vm4183_vm3 = vcmp.gt.f32.partialorder %v4151_v22, 0.0  ;;  %v3516_v52 = vsel %vm5362_vm4, %v3511_v9, %v3515_v43 }
 0x24d   : > { %v3654_v26 = vpop.f32.mrf.mxu3  ;;  %4916 = vmatmul.msk.bf16.gmra.mxu2 %vm709_vm5, %v5081_v5  ;;  %v2718_v33 = vpop.f32.mrf.mxu1  ;;  %v3911_v55 = vsel %vm5536_vm8, %v5014_v21, %v3910_v60 }
 0x24e   : > { %v3718_v34 = vadd.f32 %v3654_v26, %v3064_v12  ;;  %v4247_v15 = vsel %vm4183_vm3, %v4151_v22, %v4215_v6  ;;  %v2779_v25 = vadd.f32 %v2718_v33, %v6726_v3  ;;  %v3913_v26 = vrot.slane %v4965_v11, 5 }
 0x24f   : > { %v3549_v22 = vunpack.c.l.b16 %v3506_v51  ;;  %v3947_v42 = vunpack.c.l.b16 %v3911_v55 }
 0x250   : > { %v4116_v63 = vadd.f32 %v4052_v35, %v3718_v34  ;;  %v3003_v48 = vpop.f32.mrf.mxu2  ;;  %v3912_v35 = vrot.slane %v3910_v60, 4  ;;  %v3550_v34 = vunpack.c.l.b16 %v3516_v52 }
 0x251   : > { %v3065_v62 = vadd.f32 %v3003_v48, %v2778_v49 }
 0x252   : > { %v4152_v8 = vadd.f32 %v6411_v24, %v4116_v63  ;;  %4981 = vmatmul.msk.bf16.gmra.mxu3 %vm709_vm5, %v3565_v59  ;;  %v5082_v59 = vld [vmem:[%s5350_s29 + $0xcc] sm:$0xff]  ;;  %v3914_v39 = vsel %vm5536_vm8, %v3912_v35, %v3913_v26  ;;  %v3566_v37 = vpack.c.b16 %v3550_v34, %v3549_v22 }
 0x253   : > { %v3948_v63 = vunpack.c.l.b16 %v3914_v39 }
 0x254   : > { %vm4184_vm6 = vcmp.gt.f32.partialorder %v4152_v8, 0.0  ;;  %v4216_v2 = vmul.f32 0.1, %v4152_v8  ;;  %v4055_v5 = vpop.f32.mrf.mxu0 }
 0x255   : > { %v3657_v20 = vpop.f32.mrf.mxu3  ;;  %v2721_v50 = vpop.f32.mrf.mxu1 }
 0x256   : > { %v4248_v47 = vsel %vm4184_vm6, %v4152_v8, %v4216_v2  ;;  %v3719_v31 = vadd.f32 %v3657_v20, %v3065_v62  ;;  %v2780_v48 = vadd.f32 %v2721_v50, %v6027_v40  ;;  %v3964_v8 = vpack.c.b16 %v3948_v63, %v3947_v42 }
 0x257   : > { %v5111_v12 = vpack.c.bf16 %v4248_v47, %v4247_v15  ;;  %5030 = vmatmul.msk.bf16.gmra.mxu0 %vm709_vm5, %v3963_v17 }
 0x258   : > { %v3005_v53 = vpop.f32.mrf.mxu2  ;;  %4804 = vmatmul.msk.bf16.gmra.mxu1 %vm709_vm5, %v2625_v56  ;;  %v4117_v14 = vadd.f32 %v4055_v5, %v3719_v31 }
 0x259   : > { %5167 = vst [vmem:[%s6444_s19 + $0x28] sm:$0xff] %v5111_v12   ;;  %v3066_v0 = vadd.f32 %v3005_v53, %v2779_v25 }
 0x25a   : > { %v4153_v16 = vadd.f32 %v6411_v24, %v4117_v14 }
 0x25c   : > { %v4057_v19 = vpop.f32.mrf.mxu0  ;;  %v4217_v4 = vmul.f32 0.1, %v4153_v16  ;;  %vm4185_vm4 = vcmp.gt.f32.partialorder %v4153_v16, 0.0 }
 0x25d   : > { %v3659_v33 = vpop.f32.mrf.mxu3  ;;  %4917 = vmatmul.msk.bf16.gmra.mxu2 %vm709_vm5, %v5082_v59  ;;  %v2723_v29 = vpop.f32.mrf.mxu1 }
 0x25e   : > { %v3720_v11 = vadd.f32 %v3659_v33, %v3066_v0  ;;  %v4249_v43 = vsel %vm4185_vm4, %v4153_v16, %v4217_v4  ;;  %v2781_v40 = vadd.f32 %v2723_v29, %v6051_v46 }
 0x260   : > { %v4118_v49 = vadd.f32 %v4057_v19, %v3720_v11  ;;  %v3008_v61 = vpop.f32.mrf.mxu2 }
 0x261   : > { %v3067_v30 = vadd.f32 %v3008_v61, %v2780_v48 }
 0x262   : > { %v4154_v6 = vadd.f32 %v6411_v24, %v4118_v49  ;;  %4982 = vmatmul.msk.bf16.gmra.mxu3 %vm709_vm5, %v3566_v37 }
 0x264   : > { %vm4186_vm7 = vcmp.gt.f32.partialorder %v4154_v6, 0.0  ;;  %v4218_v17 = vmul.f32 0.1, %v4154_v6  ;;  %v4060_v62 = vpop.f32.mrf.mxu0 }
 0x265   : > { %v3662_v36 = vpop.f32.mrf.mxu3  ;;  %v2726_v9 = vpop.f32.mrf.mxu1 }
 0x266   : > { %v4250_v2 = vsel %vm4186_vm7, %v4154_v6, %v4218_v17  ;;  %v3721_v5 = vadd.f32 %v3662_v36, %v3067_v30  ;;  %v2782_v52 = vadd.f32 %v2726_v9, %v6070_v44 }
 0x267   : > { %v5116_v56 = vpack.c.bf16 %v4250_v2, %v4249_v43  ;;  %5031 = vmatmul.msk.bf16.gmra.mxu0 %vm709_vm5, %v3964_v8 }
 0x268   : > { %v3010_v60 = vpop.f32.mrf.mxu2  ;;  %v4119_v20 = vadd.f32 %v4060_v62, %v3721_v5 }
 0x269   : > { %5168 = vst [vmem:[%s6444_s19 + $0x30] sm:$0xff] %v5116_v56   ;;  %v3068_v50 = vadd.f32 %v3010_v60, %v2781_v40  ;;  %v6670_v60 = vld [vmem:[%s6716_s2] ss:$0 sm:$0xff] }
 0x26a   : > { %v4155_v31 = vadd.f32 %v6411_v24, %v4119_v20 }
 0x26c   : > { %v4062_v45 = vpop.f32.mrf.mxu0  ;;  %v4219_v25 = vmul.f32 0.1, %v4155_v31  ;;  %vm4187_vm5 = vcmp.gt.f32.partialorder %v4155_v31, 0.0 }
 0x26d   : > { %v3664_v15 = vpop.f32.mrf.mxu3  ;;  %v2728_v47 = vpop.f32.mrf.mxu1 }
 0x26e   : > { %v3722_v12 = vadd.f32 %v3664_v15, %v3068_v50  ;;  %v4251_v14 = vsel %vm4187_vm5, %v4155_v31, %v4219_v25  ;;  %v2783_v19 = vadd.f32 %v2728_v47, %v6094_v13 }
 0x270   : > { %v4120_v51 = vadd.f32 %v4062_v45, %v3722_v12  ;;  %v3013_v3 = vpop.f32.mrf.mxu2 }
 0x271   : > { %v3069_v21 = vadd.f32 %v3013_v3, %v2782_v52 }
 0x272   : > { %v4156_v53 = vadd.f32 %v6411_v24, %v4120_v51 }
 0x274   : > { %vm4188_vm8 = vcmp.gt.f32.partialorder %v4156_v53, 0.0  ;;  %v4220_v46 = vmul.f32 0.1, %v4156_v53  ;;  %v4065_v35 = vpop.f32.mrf.mxu0 }
 0x275   : > { %v3667_v26 = vpop.f32.mrf.mxu3  ;;  %v2731_v59 = vpop.f32.mrf.mxu1 }
 0x276   : > { %v4252_v0 = vsel %vm4188_vm8, %v4156_v53, %v4220_v46  ;;  %v3723_v22 = vadd.f32 %v3667_v26, %v3069_v21  ;;  %v2784_v63 = vadd.f32 %v2731_v59, %v6113_v1 }
 0x277   : > { %v5121_v34 = vpack.c.bf16 %v4252_v0, %v4251_v14 }
 0x278   : > { %v3015_v55 = vpop.f32.mrf.mxu2  ;;  %v4121_v44 = vadd.f32 %v4065_v35, %v3723_v22 }
 0x279   : > { %5169 = vst [vmem:[%s6444_s19 + $0x38] sm:$0xff] %v5121_v34   ;;  %v3070_v39 = vadd.f32 %v3015_v55, %v2783_v19 }
 0x27a   : > { %v4157_v11 = vadd.f32 %v6411_v24, %v4121_v44 }
 0x27c   : > { %v4067_v33 = vpop.f32.mrf.mxu0  ;;  %v4221_v48 = vmul.f32 0.1, %v4157_v11  ;;  %vm4189_vm9 = vcmp.gt.f32.partialorder %v4157_v11, 0.0 }
 0x27d   : > { %v3669_v29 = vpop.f32.mrf.mxu3  ;;  %v2733_v16 = vpop.f32.mrf.mxu1 }
 0x27e   : > { %v3724_v37 = vadd.f32 %v3669_v29, %v3070_v39  ;;  %v4253_v17 = vsel %vm4189_vm9, %v4157_v11, %v4221_v48  ;;  %v2785_v43 = vadd.f32 %v2733_v16, %v6137_v38 }
 0x280   : > { %v4122_v42 = vadd.f32 %v4067_v33, %v3724_v37  ;;  %v3018_v49 = vpop.f32.mrf.mxu2 }
 0x281   : > { %v3071_v4 = vadd.f32 %v3018_v49, %v2784_v63 }
 0x282   : > { %v4158_v61 = vadd.f32 %v6411_v24, %v4122_v42 }
 0x284   : > { %vm4190_vm10 = vcmp.gt.f32.partialorder %v4158_v61, 0.0  ;;  %v4222_v13 = vmul.f32 0.1, %v4158_v61  ;;  %v4070_v6 = vpop.f32.mrf.mxu0 }
 0x285   : > { %v3672_v30 = vpop.f32.mrf.mxu3  ;;  %v2736_v8 = vpop.f32.mrf.mxu1 }
 0x286   : > { %v4254_v62 = vsel %vm4190_vm10, %v4158_v61, %v4222_v13  ;;  %v3725_v36 = vadd.f32 %v3672_v30, %v3071_v4  ;;  %v2786_v15 = vadd.f32 %v2736_v8, %v6156_v10 }
 0x287   : > { %v5126_v9 = vpack.c.bf16 %v4254_v62, %v4253_v17 }
 0x288   : > { %v3020_v2 = vpop.f32.mrf.mxu2  ;;  %v4123_v1 = vadd.f32 %v4070_v6, %v3725_v36 }
 0x289   : > { %5170 = vst [vmem:[%s6444_s19 + $0x40] sm:$0xff] %v5126_v9   ;;  %v3072_v5 = vadd.f32 %v3020_v2, %v2785_v43 }
 0x28a   : > { %v4159_v20 = vadd.f32 %v6670_v60, %v4123_v1 }
 0x28c   : > { %v4072_v56 = vpop.f32.mrf.mxu0  ;;  %v4223_v38 = vmul.f32 0.1, %v4159_v20  ;;  %vm4191_vm11 = vcmp.gt.f32.partialorder %v4159_v20, 0.0 }
 0x28d   : > { %v3674_v40 = vpop.f32.mrf.mxu3  ;;  %v2738_v24 = vpop.f32.mrf.mxu1 }
 0x28e   : > { %v3726_v50 = vadd.f32 %v3674_v40, %v3072_v5  ;;  %v4255_v53 = vsel %vm4191_vm11, %v4159_v20, %v4223_v38  ;;  %v2787_v26 = vadd.f32 %v2738_v24, %v6180_v23 }
 0x290   : > { %v4124_v45 = vadd.f32 %v4072_v56, %v3726_v50  ;;  %v3023_v47 = vpop.f32.mrf.mxu2 }
 0x291   : > { %v3073_v12 = vadd.f32 %v3023_v47, %v2786_v15 }
 0x292   : > { %v4160_v31 = vadd.f32 %v6670_v60, %v4124_v45 }
 0x294   : > { %vm4192_vm12 = vcmp.gt.f32.partialorder %v4160_v31, 0.0  ;;  %v4224_v51 = vmul.f32 0.1, %v4160_v31  ;;  %v4075_v52 = vpop.f32.mrf.mxu0 }
 0x295   : > { %v3677_v3 = vpop.f32.mrf.mxu3  ;;  %v2741_v25 = vpop.f32.mrf.mxu1 }
 0x296   : > { %v4256_v21 = vsel %vm4192_vm12, %v4160_v31, %v4224_v51  ;;  %v3727_v46 = vadd.f32 %v3677_v3, %v3073_v12  ;;  %v2788_v39 = vadd.f32 %v2741_v25, %v6199_v28  ;;  %v6727_v31 = vld [vmem:[#allocation4_spill] sm:$0xff] }
 0x297   : > { %v5131_v35 = vpack.c.bf16 %v4256_v21, %v4255_v53 }
 0x298   : > { %v3025_v59 = vpop.f32.mrf.mxu2  ;;  %v4125_v10 = vadd.f32 %v4075_v52, %v3727_v46 }
 0x299   : > { %5171 = vst [vmem:[%s6444_s19 + $0x48] sm:$0xff] %v5131_v35   ;;  %v3074_v14 = vadd.f32 %v3025_v59, %v2787_v26 }
 0x29a   : > { %v4161_v19 = vadd.f32 %v6670_v60, %v4125_v10 }
 0x29c   : > { %v4077_v0 = vpop.f32.mrf.mxu0  ;;  %v4225_v29 = vmul.f32 0.1, %v4161_v19  ;;  %vm4193_vm13 = vcmp.gt.f32.partialorder %v4161_v19, 0.0 }
 0x29d   : > { %v3679_v22 = vpop.f32.mrf.mxu3  ;;  %v2743_v34 = vpop.f32.mrf.mxu1 }
 0x29e   : > { %v3728_v55 = vadd.f32 %v3679_v22, %v3074_v14  ;;  %v4257_v49 = vsel %vm4193_vm13, %v4161_v19, %v4225_v29  ;;  %v2789_v13 = vadd.f32 %v2743_v34, %v6223_v58 }
 0x2a0   : > { %v4126_v44 = vadd.f32 %v4077_v0, %v3728_v55  ;;  %v3028_v33 = vpop.f32.mrf.mxu2 }
 0x2a1   : > { %v3075_v11 = vadd.f32 %v3028_v33, %v2788_v39 }
 0x2a2   : > { %v4162_v16 = vadd.f32 %v6670_v60, %v4126_v44 }
 0x2a4   : > { %vm4194_vm14 = vcmp.gt.f32.partialorder %v4162_v16, 0.0  ;;  %v4226_v23 = vmul.f32 0.1, %v4162_v16  ;;  %v4080_v37 = vpop.f32.mrf.mxu0 }
 0x2a5   : > { %v3682_v42 = vpop.f32.mrf.mxu3  ;;  %v2746_v63 = vpop.f32.mrf.mxu1 }
 0x2a6   : > { %v4258_v48 = vsel %vm4194_vm14, %v4162_v16, %v4226_v23  ;;  %v3729_v61 = vadd.f32 %v3682_v42, %v3075_v11  ;;  %v2790_v2 = vadd.f32 %v2746_v63, %v6242_v27 }
 0x2a7   : > { %v5136_v4 = vpack.c.bf16 %v4258_v48, %v4257_v49 }
 0x2a8   : > { %v3030_v6 = vpop.f32.mrf.mxu2  ;;  %v4127_v28 = vadd.f32 %v4080_v37, %v3729_v61 }
 0x2a9   : > { %5172 = vst [vmem:[%s6444_s19 + $0x50] sm:$0xff] %v5136_v4   ;;  %v3076_v30 = vadd.f32 %v3030_v6, %v2789_v13 }
 0x2aa   : > { %v4163_v36 = vadd.f32 %v6670_v60, %v4127_v28 }
 0x2ac   : > { %v4082_v8 = vpop.f32.mrf.mxu0  ;;  %v4227_v5 = vmul.f32 0.1, %v4163_v36  ;;  %vm4195_vm15 = vcmp.gt.f32.partialorder %v4163_v36, 0.0 }
 0x2ad   : > { %v3684_v17 = vpop.f32.mrf.mxu3  ;;  %v2748_v62 = vpop.f32.mrf.mxu1 }
 0x2ae   : > { %v3730_v9 = vadd.f32 %v3684_v17, %v3076_v30  ;;  %v4259_v45 = vsel %vm4195_vm15, %v4163_v36, %v4227_v5  ;;  %v2791_v12 = vadd.f32 %v2748_v62, %v6727_v31 }
 0x2b0   : > { %v4128_v43 = vadd.f32 %v4082_v8, %v3730_v9  ;;  %v3033_v1 = vpop.f32.mrf.mxu2 }
 0x2b1   : > { %v3077_v40 = vadd.f32 %v3033_v1, %v2790_v2 }
 0x2b2   : > { %v4164_v56 = vadd.f32 %v6670_v60, %v4128_v43 }
 0x2b4   : > { %vm4196_vm0 = vcmp.gt.f32.partialorder %v4164_v56, 0.0  ;;  %v4228_v58 = vmul.f32 0.1, %v4164_v56  ;;  %v4085_v24 = vpop.f32.mrf.mxu0 }
 0x2b5   : > { %v3687_v20 = vpop.f32.mrf.mxu3  ;;  %v2751_v50 = vpop.f32.mrf.mxu1 }
 0x2b6   : > { %v4260_v15 = vsel %vm4196_vm0, %v4164_v56, %v4228_v58  ;;  %v3731_v47 = vadd.f32 %v3687_v20, %v3077_v40  ;;  %v2792_v26 = vadd.f32 %v2751_v50, %v6283_v54 }
 0x2b7   : > { %v5141_v38 = vpack.c.bf16 %v4260_v15, %v4259_v45 }
 0x2b8   : > { %v3035_v51 = vpop.f32.mrf.mxu2  ;;  %v4129_v27 = vadd.f32 %v4085_v24, %v3731_v47 }
 0x2b9   : > { %5173 = vst [vmem:[%s6444_s19 + $0x58] sm:$0xff] %v5141_v38   ;;  %v3078_v52 = vadd.f32 %v3035_v51, %v2791_v12 }
 0x2ba   : > { %v4165_v21 = vadd.f32 %v6670_v60, %v4129_v27 }
 0x2bc   : > { %v4087_v3 = vpop.f32.mrf.mxu0  ;;  %v4229_v10 = vmul.f32 0.1, %v4165_v21  ;;  %vm4197_vm1 = vcmp.gt.f32.partialorder %v4165_v21, 0.0 }
 0x2bd   : > { %v3689_v25 = vpop.f32.mrf.mxu3  ;;  %v2753_v53 = vpop.f32.mrf.mxu1 }
 0x2be   : > { %v3732_v46 = vadd.f32 %v3689_v25, %v3078_v52  ;;  %v4261_v55 = vsel %vm4197_vm1, %v4165_v21, %v4229_v10  ;;  %v2793_v16 = vadd.f32 %v2753_v53, %v6304_v18 }
 0x2c0   : > { %v4130_v35 = vadd.f32 %v4087_v3, %v3732_v46  ;;  %v3038_v59 = vpop.f32.mrf.mxu2 }
 0x2c1   : > { %v3079_v0 = vadd.f32 %v3038_v59, %v2792_v26 }
 0x2c2   : > { %v4166_v14 = vadd.f32 %v6670_v60, %v4130_v35 }
 0x2c4   : > { %vm4198_vm2 = vcmp.gt.f32.partialorder %v4166_v14, 0.0  ;;  %v4230_v22 = vmul.f32 0.1, %v4166_v14  ;;  %v4090_v34 = vpop.f32.mrf.mxu0 }
 0x2c5   : > { %v3692_v19 = vpop.f32.mrf.mxu3  ;;  %v2756_v33 = vpop.f32.mrf.mxu1 }
 0x2c6   : > { %v4262_v44 = vsel %vm4198_vm2, %v4166_v14, %v4230_v22  ;;  %v3733_v39 = vadd.f32 %v3692_v19, %v3079_v0  ;;  %v2794_v61 = vadd.f32 %v2756_v33, %v6322_v41 }
 0x2c7   : > { %v5146_v29 = vpack.c.bf16 %v4262_v44, %v4261_v55 }
 0x2c8   : > { %v3040_v11 = vpop.f32.mrf.mxu2  ;;  %v4131_v54 = vadd.f32 %v4090_v34, %v3733_v39 }
 0x2c9   : > { %5174 = vst [vmem:[%s6444_s19 + $0x60] sm:$0xff] %v5146_v29   ;;  %v3080_v23 = vadd.f32 %v3040_v11, %v2793_v16 }
 0x2ca   : > { %v4167_v63 = vadd.f32 %v6670_v60, %v4131_v54 }
 0x2cc   : > { %v4092_v37 = vpop.f32.mrf.mxu0  ;;  %v4231_v6 = vmul.f32 0.1, %v4167_v63  ;;  %vm4199_vm3 = vcmp.gt.f32.partialorder %v4167_v63, 0.0 }
 0x2cd   : > { %v3694_v42 = vpop.f32.mrf.mxu3  ;;  %v2758_v13 = vpop.f32.mrf.mxu1 }
 0x2ce   : > { %v3734_v49 = vadd.f32 %v3694_v42, %v3080_v23  ;;  %v4263_v62 = vsel %vm4199_vm3, %v4167_v63, %v4231_v6  ;;  %v2795_v2 = vadd.f32 %v2758_v13, %v6345_v7 }
 0x2d0   : > { %v4132_v48 = vadd.f32 %v4092_v37, %v3734_v49  ;;  %v3043_v4 = vpop.f32.mrf.mxu2 }
 0x2d1   : > { %v3081_v30 = vadd.f32 %v3043_v4, %v2794_v61 }
 0x2d2   : > { %v4168_v28 = vadd.f32 %v6670_v60, %v4132_v48 }
 0x2d4   : > { %vm4200_vm6 = vcmp.gt.f32.partialorder %v4168_v28, 0.0  ;;  %v4232_v18 = vmul.f32 0.1, %v4168_v28  ;;  %v4095_v8 = vpop.f32.mrf.mxu0 }
 0x2d5   : > { %v3697_v17 = vpop.f32.mrf.mxu3  ;;  %v2761_v56 = vpop.f32.mrf.mxu1 }
 0x2d6   : > { %v4264_v36 = vsel %vm4200_vm6, %v4168_v28, %v4232_v18  ;;  %v3735_v9 = vadd.f32 %v3697_v17, %v3081_v30  ;;  %v2796_v45 = vadd.f32 %v2761_v56, %v6365_v32 }
 0x2d7   : > { %v5151_v43 = vpack.c.bf16 %v4264_v36, %v4263_v62 }
 0x2d8   : > { %v3045_v1 = vpop.f32.mrf.mxu2  ;;  %v4133_v41 = vadd.f32 %v4095_v8, %v3735_v9 }
 0x2d9   : > { %5175 = vst [vmem:[%s6444_s19 + $0x68] sm:$0xff] %v5151_v43   ;;  %v3082_v5 = vadd.f32 %v3045_v1, %v2795_v2 }
 0x2da   : > { %v4169_v24 = vadd.f32 %v6670_v60, %v4133_v41 }
 0x2dc   : > { %v4097_v40 = vpop.f32.mrf.mxu0  ;;  %v4233_v47 = vmul.f32 0.1, %v4169_v24  ;;  %vm4201_vm4 = vcmp.gt.f32.partialorder %v4169_v24, 0.0 }
 0x2dd   : > { %v3699_v58 = vpop.f32.mrf.mxu3  ;;  %v2763_v12 = vpop.f32.mrf.mxu1 }
 0x2de   : > { %v3736_v20 = vadd.f32 %v3699_v58, %v3082_v5  ;;  %v4265_v52 = vsel %vm4201_vm4, %v4169_v24, %v4233_v47  ;;  %v2797_v21 = vadd.f32 %v2763_v12, %v6388_v57 }
 0x2e0   : > { %v4134_v50 = vadd.f32 %v4097_v40, %v3736_v20  ;;  %v3048_v15 = vpop.f32.mrf.mxu2 }
 0x2e1   : > { %v3083_v31 = vadd.f32 %v3048_v15, %v2796_v45 }
 0x2e2   : > { %v4170_v38 = vadd.f32 %v6670_v60, %v4134_v50 }
 0x2e4   : > { %vm4202_vm7 = vcmp.gt.f32.partialorder %v4170_v38, 0.0  ;;  %v4234_v7 = vmul.f32 0.1, %v4170_v38  ;;  %v4100_v51 = vpop.f32.mrf.mxu0 }
 0x2e5   : > { %v3702_v27 = vpop.f32.mrf.mxu3 }
 0x2e6   : > { %v4266_v3 = vsel %vm4202_vm7, %v4170_v38, %v4234_v7  ;;  %v3737_v25 = vadd.f32 %v3702_v27, %v3083_v31 }
 0x2e7   : > { %v5156_v53 = vpack.c.bf16 %v4266_v3, %v4265_v52 }
 0x2e8   : > { %v3050_v46 = vpop.f32.mrf.mxu2  ;;  %v4135_v32 = vadd.f32 %v4100_v51, %v3737_v25 }
 0x2e9   : > { %5176 = vst [vmem:[%s6444_s19 + $0x70] sm:$0xff] %v5156_v53   ;;  %v3084_v35 = vadd.f32 %v3050_v46, %v2797_v21 }
 0x2ea   : > { %v4171_v59 = vadd.f32 %v6670_v60, %v4135_v32 }
 0x2ec   : > { %v4102_v14 = vpop.f32.mrf.mxu0  ;;  %v4235_v22 = vmul.f32 0.1, %v4171_v59  ;;  %vm4203_vm5 = vcmp.gt.f32.partialorder %v4171_v59, 0.0 }
 0x2ed   : > { %v3704_v26 = vpop.f32.mrf.mxu3 }
 0x2ee   : > { %v3738_v10 = vadd.f32 %v3704_v26, %v3084_v35  ;;  %v4267_v55 = vsel %vm4203_vm5, %v4171_v59, %v4235_v22 }
 0x2f0   : > { %v4136_v0 = vadd.f32 %v4102_v14, %v3738_v10 }
 0x2f2   : > { %v4172_v34 = vadd.f32 %v6670_v60, %v4136_v0 }
 0x2f4   : > { %vm4204_vm8 = vcmp.gt.f32.partialorder %v4172_v34, 0.0  ;;  %v4236_v19 = vmul.f32 0.1, %v4172_v34 }
 0x2f6   : > { %v4268_v44 = vsel %vm4204_vm8, %v4172_v34, %v4236_v19 }
 0x2f7   : > { %v5161_v57 = vpack.c.bf16 %v4268_v44, %v4267_v55 }
 0x2f9   : > { %5177 = vst [vmem:[%s6444_s19 + $0x78] sm:$0xff] %v5161_v57  }
 0x2fa PF: > { %s13_s14 = sadd.s32 1, %s5281_s14   ;;  %s6728_s12 = smov %s5277_s13 }
 0x2fb   : > { %p10_p5 = scmp.ge.s32.totalorder %s13_s14, 4   ;;  %s6729_s13 = smov %s6731_s15 }
 0x2fd   :  { %12 = sbr.rel (!%p10_p5) target bundleno = 2 (0x2), region = 78 }

// kernel: _lambda_.10
= control target key start
LH: loop header
LB: loop body
LE: loop exit
PB: predicated region body
PF: predicated region fallthrough
CT: control target
= control target key end

     0   :  { %s2670_s12 = smov 0   ;;  %s2672_s13 = smov 0   ;;  %s3125_s0 = inlined_call_operand.vmem [shape: bf16[2,9,9,512], index: 0, kind: input, shape index: {}]   ;;  %s3126_s1 = inlined_call_operand.vmem [shape: bf16[3,3,128,128], index: 1, kind: input, shape index: {}]   ;;  %s3127_s2 = inlined_call_operand.vmem [shape: f32[1,128], index: 2, kind: input, shape index: {}]   ;;  %s3128_s3 = inlined_call_operand.vmem [shape: bf16[2,64,128], index: 3, kind: output, shape index: {}]  }
   0x1   :  { %s2674_s14 = smov 0  }
   0x2 LB: > { %s25_s15 = sadd.s32 1, %s2644_s13  ;;  %p1914_p0 = scmp.ge.s32.totalorder %s2648_s14, 1  ;;  %s2648_s14 = sphi %s2674_s14, %s13_s14   ;;  %s2644_s13 = sphi %s2672_s13, %s3132_s13   ;;  %s2640_s12 = sphi %s2670_s12, %s3131_s12  }
   0x3   : > { %p27_p1 = scmp.ge.s32.totalorder %s25_s15, 2  ;;  %p168_p2 = scmp.lt.s32.totalorder %s2648_s14, 3 }
   0x5   : > { %s3134_s15 = smov (%p27_p1, %s25_s15), 0  ;;  %p169_p3 = pnand %p1914_p0, %p168_p2 }
   0x6   : > { %p202_p4 = scmp.lt.s32.totalorder (!%p169_p3), %s2640_s12, 1 }
   0x7   : > { %172 = sbr.rel (%p169_p3) target bundleno = 338 (0x152), region = 32 }
   0xc   : > { %v2488_v0 = vld [vmem:[%s3126_s1 + $0x78] sm:$0xff]  ;;  %v2487_v2 = vld [vmem:[%s3126_s1 + $0x70] sm:$0xff]  ;;  %s3136_s12 = smov (!%p202_p4, %s2640_s12), 1  ;;  %v2486_v6 = vld [vmem:[%s3126_s1 + $0x68] sm:$0xff]  ;;  %vm489_vm0 = vsmask.f32 3328 }
   0xd   : > { %v2496_v1 = vld [vmem:[%s3126_s1 + $0xb8] sm:$0xff]  ;;  %2584 = vmatpush.bf16.msra.mxu1 %v2488_v0  ;;  %343 = vmatpush.bf16.msra.mxu0 %v2488_v0  ;;  %v2495_v3 = vld [vmem:[%s3126_s1 + $0xb0] sm:$0xff]  ;;  %s2600_s26 = smul.u32 288, %s3136_s12  ;;  %v2494_v7 = vld [vmem:[%s3126_s1 + $0xa8] sm:$0xff]  ;;  %vm490_vm1 = vsmask.f32 7440 }
   0xe   : > { %685 = vmatpush.bf16.msra.mxu2 %v2496_v1  ;;  %v2508_v4 = vld [vmem:[%s3126_s1 + $0xf8] sm:$0xff]  ;;  %v2507_v5 = vld [vmem:[%s3126_s1 + $0xf0] sm:$0xff]  ;;  %v2506_v8 = vld [vmem:[%s3126_s1 + $0xe8] sm:$0xff]  ;;  %s2464_s5 = sshll.u32 %s3136_s12, 5 }
   0xf   : > { %819 = vmatpush.bf16.msra.mxu3 %v2508_v4  ;;  %s2715_s6 = scalar_lea.vmem %s3125_s0, %s2600_s26  ;;  %v2485_v10 = vld [vmem:[%s3126_s1 + $0x60] sm:$0xff]  ;;  %v2484_v23 = vld [vmem:[%s3126_s1 + $0x58] sm:$0xff]  ;;  %v2483_v31 = vld [vmem:[%s3126_s1 + $0x50] sm:$0xff]  ;;  %s3095_s9 = scalar_lea.vmem %s3128_s3, %s2464_s5 }
  0x10   : > { %v473_v9 = vld [vmem:[%s2715_s6] sm:$0xf]  ;;  %v474_v16 = vld [vmem:[%s2715_s6 + $0x10] sm:$0x1]  ;;  %v2492_v25 = vld [vmem:[%s3126_s1 + $0x98] sm:$0xff] }
  0x11   : > { %2585 = vmatpush.bf16.msra.mxu1 %v2487_v2  ;;  %344 = vmatpush.bf16.msra.mxu0 %v2487_v2  ;;  %v475_v11 = vld [vmem:[%s2715_s6 + $0x20] sm:$0xf]  ;;  %v493_v13 = vshrl.u32 %v473_v9, 16  ;;  %v496_v14 = vshll.u32 %v473_v9, 16  ;;  %v476_v17 = vld [vmem:[%s2715_s6 + $0x30] sm:$0x1]  ;;  %vm2752_vm2 = vmor %vm489_vm0, %vm490_vm1 }
  0x12   : > { %686 = vmatpush.bf16.msra.mxu2 %v2495_v3  ;;  %v2493_v12 = vld [vmem:[%s3126_s1 + $0xa0] sm:$0xff]  ;;  %v507_v15 = vshrl.u32 %v475_v11, 16  ;;  %v510_v18 = vshll.u32 %v475_v11, 16  ;;  %v502_v27 = vshll.u32 %v474_v16, 16  ;;  %v516_v28 = vshll.u32 %v476_v17, 16  ;;  %v2504_v30 = vld [vmem:[%s3126_s1 + $0xd8] sm:$0xff] }
  0x13   : > { %820 = vmatpush.bf16.msra.mxu3 %v2507_v5  ;;  %v2505_v19 = vld [vmem:[%s3126_s1 + $0xe0] sm:$0xff]  ;;  %v495_v20 = vrot.slane %v493_v13, 4  ;;  %v498_v21 = vrot.slane %v496_v14, 5  ;;  %v2491_v32 = vld [vmem:[%s3126_s1 + $0x90] sm:$0xff]  ;;  %v2482_v41 = vld [vmem:[%s3126_s1 + $0x48] sm:$0xff] }
  0x14   : > { %v509_v22 = vrot.slane %v507_v15, 4  ;;  %v512_v24 = vrot.slane %v510_v18, 5  ;;  %v504_v34 = vrot.slane %v502_v27, 5  ;;  %v518_v36 = vrot.slane %v516_v28, 5  ;;  %v477_v37 = vld [vmem:[%s2715_s6 + $0x40] sm:$0xf] }
  0x15   : > { %2586 = vmatpush.bf16.msra.mxu1 %v2486_v6  ;;  %345 = vmatpush.bf16.msra.mxu0 %v2486_v6  ;;  %v499_v26 = vor.u32 %v498_v21, %v495_v20  ;;  %v479_v39 = vld [vmem:[%s2715_s6 + $0x60] sm:$0xf]  ;;  %v2503_v40 = vld [vmem:[%s3126_s1 + $0xd0] sm:$0xff]  ;;  %v521_v42 = vshrl.u32 %v477_v37, 16  ;;  %v524_v43 = vshll.u32 %v477_v37, 16  ;;  %v2490_v44 = vld [vmem:[%s3126_s1 + $0x88] sm:$0xff] }
  0x16   : > { %687 = vmatpush.bf16.msra.mxu2 %v2494_v7  ;;  %v513_v29 = vor.u32 %v512_v24, %v509_v22  ;;  %v535_v47 = vshrl.u32 %v479_v39, 16  ;;  %v538_v48 = vshll.u32 %v479_v39, 16  ;;  %v2481_v49 = vld [vmem:[%s3126_s1 + $0x40] sm:$0xff]  ;;  %v2476_v52 = vld [vmem:[%s3126_s1 + $0x38] sm:$0xff]  ;;  %v2502_v53 = vld [vmem:[%s3126_s1 + $0xc8] sm:$0xff] }
  0x17   : > { %821 = vmatpush.bf16.msra.mxu3 %v2506_v8  ;;  %v500_v33 = vrot.slane %v499_v26, 4  ;;  %v1944_v50 = vld [vmem:[%s2715_s6 + $0x84] sm:$0xf]  ;;  %v478_v59 = vld [vmem:[%s2715_s6 + $0x50] sm:$0x1]  ;;  %v523_v60 = vrot.slane %v521_v42, 4 }
  0x18   : > { %v514_v35 = vrot.slane %v513_v29, 4  ;;  %v2479_v51 = vld [vmem:[%s2715_s6 + $0xa0] sm:$0xf0]  ;;  %v526_v61 = vrot.slane %v524_v43, 5  ;;  %v537_v62 = vrot.slane %v535_v47, 4  ;;  %v540_v63 = vrot.slane %v538_v48, 5 }
  0x19   : > { %2587 = vmatpush.bf16.msra.mxu1 %v2485_v10  ;;  %346 = vmatpush.bf16.msra.mxu0 %v2485_v10  ;;  %v505_v45 = vsel %vm2752_vm2, %v500_v33, %v504_v34  ;;  %v2489_v54 = vld [vmem:[%s3126_s1 + $0x80] sm:$0xff]  ;;  %v2520_v0 = vld [vmem:[%s3126_s1 + $0x138] sm:$0xff]  ;;  %v480_v2 = vld [vmem:[%s2715_s6 + $0x70] sm:$0x1]  ;;  %v1945_v3 = vor.u32 %v2479_v51, %v1944_v50  ;;  %v530_v9 = vshll.u32 %v478_v59, 16 }
  0x1a   : > { %688 = vmatpush.bf16.msra.mxu2 %v2493_v12  ;;  %v519_v46 = vsel %vm2752_vm2, %v514_v35, %v518_v36  ;;  %v1936_v55 = vld [vmem:[%s2715_s6 + $0x4] sm:$0xf]  ;;  %v621_v57 = vunpack.c.l.b16 %v505_v45  ;;  %v2540_v1 = vld [vmem:[%s3126_s1 + $0x1b8] sm:$0xff]  ;;  %v2096_v7 = vld [vmem:[%s2715_s6 + $0x8] sm:$0xf]  ;;  %v527_v11 = vor.u32 %v526_v61, %v523_v60  ;;  %v541_v12 = vor.u32 %v540_v63, %v537_v62 }
  0x1b   : > { %822 = vmatpush.bf16.msra.mxu3 %v2505_v19  ;;  %v2477_v56 = vld [vmem:[%s2715_s6 + $0x20] sm:$0xf0]  ;;  %v622_v58 = vunpack.c.l.b16 %v519_v46  ;;  %v2497_v8 = vld [vmem:[%s2715_s6 + $0x24] sm:$0xf0]  ;;  %v2475_v10 = vld [vmem:[%s3126_s1 + $0x30] sm:$0xff]  ;;  %v544_v13 = vshll.u32 %v480_v2, 16 }
  0x1c   : > { %v1937_v4 = vor.u32 %v2477_v56, %v1936_v55  ;;  %v2501_v6 = vld [vmem:[%s3126_s1 + $0xc0] sm:$0xff]  ;;  %v2552_v14 = vld [vmem:[%s3126_s1 + $0x1f8] sm:$0xff]  ;;  %v2519_v15 = vld [vmem:[%s3126_s1 + $0x130] sm:$0xff]  ;;  %v2097_v17 = vor.u32 %v2497_v8, %v2096_v7  ;;  %v532_v19 = vrot.slane %v530_v9, 5  ;;  %v528_v20 = vrot.slane %v527_v11, 4 }
  0x1d   : > { %2588 = vmatpush.bf16.msra.mxu1 %v2484_v23  ;;  %347 = vmatpush.bf16.msra.mxu0 %v2484_v23  ;;  %v629_v5 = vpack.c.b16 %v622_v58, %v621_v57  ;;  %v2539_v16 = vld [vmem:[%s3126_s1 + $0x1b0] sm:$0xff]  ;;  %v2474_v18 = vld [vmem:[%s3126_s1 + $0x28] sm:$0xff]  ;;  %v542_v21 = vrot.slane %v541_v12, 4  ;;  %v546_v22 = vrot.slane %v544_v13, 5  ;;  %v481_v24 = vld [vmem:[%s2715_s6 + $0x80] sm:$0xf] }
  0x1e   : > { %689 = vmatpush.bf16.msra.mxu2 %v2492_v25  ;;  %v2551_v23 = vld [vmem:[%s3126_s1 + $0x1f0] sm:$0xff]  ;;  %v2518_v25 = vld [vmem:[%s3126_s1 + $0x128] sm:$0xff]  ;;  %v483_v27 = vld [vmem:[%s2715_s6 + $0xa0] sm:$0xf]  ;;  %v549_v28 = vshrl.u32 %v481_v24, 16  ;;  %v552_v29 = vshll.u32 %v481_v24, 16 }
  0x1f   : > { %823 = vmatpush.bf16.msra.mxu3 %v2504_v30  ;;  %v2538_v26 = vld [vmem:[%s3126_s1 + $0x1a8] sm:$0xff]  ;;  %v2473_v30 = vld [vmem:[%s3126_s1 + $0x20] sm:$0xff]  ;;  %v563_v33 = vshrl.u32 %v483_v27, 16  ;;  %v566_v34 = vshll.u32 %v483_v27, 16  ;;  %v2472_v47 = vld [vmem:[%s3126_s1 + $0x18] sm:$0xff] }
  0x20   : > { %v2550_v35 = vld [vmem:[%s3126_s1 + $0x1e8] sm:$0xff]  ;;  %v2517_v36 = vld [vmem:[%s3126_s1 + $0x120] sm:$0xff]  ;;  %v551_v45 = vrot.slane %v549_v28, 4  ;;  %v554_v46 = vrot.slane %v552_v29, 5  ;;  %v2516_v50 = vld [vmem:[%s3126_s1 + $0x118] sm:$0xff] }
  0x21   : > { %2589 = vmatpush.bf16.msra.mxu1 %v2483_v31  ;;  %348 = vmatpush.bf16.msra.mxu0 %v2483_v31  ;;  %v533_v31 = vsel %vm2752_vm2, %v528_v20, %v532_v19  ;;  %v2537_v37 = vld [vmem:[%s3126_s1 + $0x1a0] sm:$0xff]  ;;  %v565_v48 = vrot.slane %v563_v33, 4  ;;  %v482_v51 = vld [vmem:[%s2715_s6 + $0x90] sm:$0x1]  ;;  %v2100_v56 = vld [vmem:[%s2715_s6 + $0x48] sm:$0xf] }
  0x22   : > { %690 = vmatpush.bf16.msra.mxu2 %v2491_v32  ;;  %v547_v32 = vsel %vm2752_vm2, %v542_v21, %v546_v22  ;;  %v1948_v39 = vld [vmem:[%s2715_s6 + $0xc4] sm:$0xf]  ;;  %v623_v43 = vunpack.c.l.b16 %v533_v31  ;;  %v2498_v57 = vld [vmem:[%s2715_s6 + $0x64] sm:$0xf0]  ;;  %v555_v58 = vor.u32 %v554_v46, %v551_v45  ;;  %v2471_v59 = vld [vmem:[%s3126_s1 + $0x10] sm:$0xff]  ;;  %v558_v60 = vshll.u32 %v482_v51, 16 }
  0x23   : > { %824 = vmatpush.bf16.msra.mxu3 %v2503_v40  ;;  %v2480_v40 = vld [vmem:[%s2715_s6 + $0xe0] sm:$0xf0]  ;;  %v2515_v63 = vld [vmem:[%s3126_s1 + $0x110] sm:$0xff]  ;;  %v2470_v2 = vld [vmem:[%s3126_s1 + $0x8] sm:$0xff] }
  0x24   : > { %v2478_v42 = vld [vmem:[%s2715_s6 + $0x60] sm:$0xf0]  ;;  %v485_v8 = vld [vmem:[%s2715_s6 + $0xc0] sm:$0xf]  ;;  %v2514_v9 = vld [vmem:[%s3126_s1 + $0x108] sm:$0xff] }
  0x25   : > { %2590 = vmatpush.bf16.msra.mxu1 %v2482_v41  ;;  %349 = vmatpush.bf16.msra.mxu0 %v2482_v41  ;;  %v1940_v41 = vld [vmem:[%s2715_s6 + $0x44] sm:$0xf]  ;;  %v2535_v11 = vld [vmem:[%s3126_s1 + $0x190] sm:$0xff]  ;;  %v577_v12 = vshrl.u32 %v485_v8, 16  ;;  %v580_v13 = vshll.u32 %v485_v8, 16  ;;  %v2528_v20 = vld [vmem:[%s3126_s1 + $0x178] sm:$0xff] }
  0x26   : > { %691 = vmatpush.bf16.msra.mxu2 %v2490_v44  ;;  %v624_v44 = vunpack.c.l.b16 %v547_v32  ;;  %v2549_v7 = vld [vmem:[%s3126_s1 + $0x1e0] sm:$0xff]  ;;  %v2560_v24 = vld [vmem:[%s3126_s1 + $0x238] sm:$0xff]  ;;  %v2527_v33 = vld [vmem:[%s3126_s1 + $0x170] sm:$0xff] }
  0x27   : > { %825 = vmatpush.bf16.msra.mxu3 %v2502_v53  ;;  %v1949_v53 = vor.u32 %v2480_v40, %v1948_v39  ;;  %v2513_v21 = vld [vmem:[%s3126_s1 + $0x100] sm:$0xff]  ;;  %v579_v29 = vrot.slane %v577_v12, 4  ;;  %v2104_v40 = vld [vmem:[%s2715_s6 + $0x88] sm:$0xf] }
  0x28   : > { %v630_v55 = vpack.c.b16 %v624_v44, %v623_v43  ;;  %v1984_v22 = vld [vmem:[%s2715_s6] sm:$0xf]  ;;  %v2559_v43 = vld [vmem:[%s3126_s1 + $0x230] sm:$0xff]  ;;  %v2522_v12 = vld [vmem:[%s3126_s1 + $0x148] sm:$0xff] }
  0x29   : > { %2591 = vmatpush.bf16.msra.mxu1 %v2481_v49  ;;  %350 = vmatpush.bf16.msra.mxu0 %v2481_v49  ;;  %v568_v49 = vrot.slane %v566_v34, 5  ;;  %v486_v34 = vld [vmem:[%s2715_s6 + $0xd0] sm:$0x1] }
  0x2a   : > { %692 = vmatpush.bf16.msra.mxu2 %v2489_v54  ;;  %v1941_v54 = vor.u32 %v2478_v42, %v1940_v41  ;;  %v2499_v41 = vld [vmem:[%s2715_s6 + $0xa4] sm:$0xf0]  ;;  %v586_v44 = vshll.u32 %v486_v34, 16  ;;  %v2400_v34 = vld [vmem:[%s2715_s6 + $0x40] sm:$0xf] }
  0x2b   : > { %826 = vmatpush.bf16.msra.mxu3 %v2501_v6  ;;  %v569_v61 = vor.u32 %v568_v49, %v565_v48  ;;  %v2534_v48 = vld [vmem:[%s3126_s1 + $0x188] sm:$0xff]  ;;  %v2105_v49 = vor.u32 %v2499_v41, %v2104_v40 }
  0x2c   : > { %361 = vmatmul.bf16.vlgmr.msra.gmra.mxu1 %v1945_v3  ;;  %351 = vmatmul.bf16.vlgmr.msra.gmra.mxu0 %v1937_v4  ;;  %v556_v3 = vrot.slane %v555_v58, 4  ;;  %v560_v4 = vrot.slane %v558_v60, 5  ;;  %v588_v51 = vrot.slane %v586_v44, 5  ;;  %v2546_v58 = vld [vmem:[%s3126_s1 + $0x1c8] sm:$0xff]  ;;  %v1996_v44 = vld [vmem:[%s2715_s6 + $0xc0] sm:$0xf] }
  0x2d   : > { %444 = vmatpush.bf16.msrb.mxu1 %v2476_v52  ;;  %953 = vmatpush.bf16.msrb.mxu0 %v2520_v0  ;;  %v484_v52 = vld [vmem:[%s2715_s6 + $0xb0] sm:$0x1]  ;;  %v2101_v0 = vor.u32 %v2498_v57, %v2100_v56  ;;  %v2558_v56 = vld [vmem:[%s3126_s1 + $0x228] sm:$0xff]  ;;  %v2525_v57 = vld [vmem:[%s3126_s1 + $0x160] sm:$0xff] }
  0x2e   : > { %1334 = vmatpush.bf16.msrb.mxu2 %v2540_v1  ;;  %827 = vmatmul.bf16.vlgmr.msra.gmra.mxu3 %v2097_v17  ;;  %v572_v62 = vshll.u32 %v484_v52, 16  ;;  %v2536_v1 = vld [vmem:[%s3126_s1 + $0x198] sm:$0xff] }
  0x2f   : > { %693 = vmatmul.bf16.vlgmr.msra.gmra.mxu2 %v629_v5  ;;  %1468 = vmatpush.bf16.msrb.mxu3 %v2552_v14  ;;  %v570_v5 = vrot.slane %v569_v61, 4  ;;  %v2548_v14 = vld [vmem:[%s3126_s1 + $0x1d8] sm:$0xff] }
  0x30   : > { %v574_v6 = vrot.slane %v572_v62, 5  ;;  %v2524_v62 = vld [vmem:[%s3126_s1 + $0x158] sm:$0xff] }
  0x31   : > { %445 = vmatpush.bf16.msrb.mxu1 %v2475_v10  ;;  %954 = vmatpush.bf16.msrb.mxu0 %v2519_v15  ;;  %v487_v10 = vld [vmem:[%s2715_s6 + $0xe0] sm:$0xf] }
  0x32   : > { %1335 = vmatpush.bf16.msrb.mxu2 %v2539_v16  ;;  %v2469_v15 = vld [vmem:[%s3126_s1] sm:$0xff]  ;;  %v561_v16 = vsel %vm2752_vm2, %v556_v3, %v560_v4  ;;  %v575_v17 = vsel %vm2752_vm2, %v570_v5, %v574_v6  ;;  %v594_v19 = vshll.u32 %v487_v10, 16  ;;  %v2523_v5 = vld [vmem:[%s3126_s1 + $0x150] sm:$0xff] }
  0x33   : > { %1469 = vmatpush.bf16.msrb.mxu3 %v2551_v23  ;;  %v2465_v23 = vld [vmem:[%s2715_s6 + $0x1c] sm:$0xf0]  ;;  %v625_v27 = vunpack.c.l.b16 %v561_v16  ;;  %v626_v28 = vunpack.c.l.b16 %v575_v17  ;;  %v2555_v16 = vld [vmem:[%s3126_s1 + $0x210] sm:$0xff] }
  0x34   : > { %v596_v32 = vrot.slane %v594_v19, 5  ;;  %v1992_v17 = vld [vmem:[%s2715_s6 + $0x80] sm:$0xf] }
  0x35   : > { %446 = vmatpush.bf16.msrb.mxu1 %v2474_v18  ;;  %955 = vmatpush.bf16.msrb.mxu0 %v2518_v25  ;;  %v591_v18 = vshrl.u32 %v487_v10, 16  ;;  %v2160_v25 = vld [vmem:[%s2715_s6 + $0xc] sm:$0xf]  ;;  %v631_v39 = vpack.c.b16 %v626_v28, %v625_v27  ;;  %v2500_v10 = vld [vmem:[%s2715_s6 + $0xe4] sm:$0xf0] }
  0x36   : > { %1336 = vmatpush.bf16.msrb.mxu2 %v2538_v26  ;;  %v2509_v26 = vld [vmem:[%s2715_s6 + $0x28] sm:$0xf0]  ;;  %v2467_v19 = vld [vmem:[%s2715_s6 + $0x9c] sm:$0xf0]  ;;  %v2352_v27 = vld [vmem:[%s2715_s6 + $0x24] sm:$0xf] }
  0x37   : > { %1470 = vmatpush.bf16.msrb.mxu3 %v2550_v35  ;;  %v593_v31 = vrot.slane %v591_v18, 4  ;;  %v488_v35 = vld [vmem:[%s2715_s6 + $0xf0] sm:$0x1]  ;;  %v2554_v18 = vld [vmem:[%s3126_s1 + $0x208] sm:$0xff]  ;;  %v2541_v28 = vld [vmem:[%s2715_s6 + $0x40] sm:$0xf0] }
  0x38   : > { %v600_v46 = vshll.u32 %v488_v35, 16 }
  0x39   : > { %447 = vmatpush.bf16.msrb.mxu1 %v2473_v30  ;;  %956 = vmatpush.bf16.msrb.mxu0 %v2517_v36  ;;  %v582_v30 = vrot.slane %v580_v13, 5  ;;  %v1985_v36 = vor.u32 %v2465_v23, %v1984_v22  ;;  %v597_v45 = vor.u32 %v596_v32, %v593_v31  ;;  %v2545_v13 = vld [vmem:[%s3126_s1 + $0x1c0] sm:$0xff]  ;;  %v990_v31 = vld [vmem:[%s2715_s6 + $0x8] sm:$0xf] }
  0x3a   : > { %1337 = vmatpush.bf16.msrb.mxu2 %v2537_v37  ;;  %v2161_v37 = vor.u32 %v2509_v26, %v2160_v25  ;;  %v2280_v22 = vld [vmem:[%s2715_s6 + $0x20] sm:$0xf]  ;;  %v992_v32 = vld [vmem:[%s2715_s6 + $0x28] sm:$0xf]  ;;  %v1007_v35 = vshrl.u32 %v990_v31, 16 }
  0x3b   : > { %1471 = vmatpush.bf16.msrb.mxu3 %v2549_v7  ;;  %v583_v42 = vor.u32 %v582_v30, %v579_v29  ;;  %v598_v52 = vrot.slane %v597_v45, 4  ;;  %v2529_v23 = vld [vmem:[%s2715_s6 + $0x3c] sm:$0xf0]  ;;  %v2353_v29 = vor.u32 %v2541_v28, %v2352_v27 }
  0x3c   : > { %366 = vmatmul.bf16.gmra.mxu1 %v1949_v53  ;;  %356 = vmatmul.bf16.gmra.mxu0 %v1941_v54  ;;  %v602_v53 = vrot.slane %v600_v46, 5  ;;  %v2533_v54 = vld [vmem:[%s3126_s1 + $0x180] sm:$0xff]  ;;  %v2281_v26 = vor.u32 %v2529_v23, %v2280_v22  ;;  %v2172_v46 = vld [vmem:[%s2715_s6 + $0xcc] sm:$0xf] }
  0x3d   : > { %448 = vmatpush.bf16.msrb.mxu1 %v2472_v47  ;;  %957 = vmatpush.bf16.msrb.mxu0 %v2516_v50  ;;  %v2526_v47 = vld [vmem:[%s3126_s1 + $0x168] sm:$0xff]  ;;  %v584_v50 = vrot.slane %v583_v42, 4  ;;  %v2553_v30 = vld [vmem:[%s3126_s1 + $0x200] sm:$0xff]  ;;  %v1536_v42 = vshrl.u32 %v2400_v34, 16 }
  0x3e   : > { %1338 = vmatpush.bf16.msrb.mxu2 %v2536_v1  ;;  %832 = vmatmul.bf16.gmra.mxu3 %v2101_v0  ;;  %v603_v61 = vsel %vm2752_vm2, %v598_v52, %v602_v53  ;;  %v2466_v0 = vld [vmem:[%s2715_s6 + $0x5c] sm:$0xf0]  ;;  %v2164_v1 = vld [vmem:[%s2715_s6 + $0x4c] sm:$0xf] }
  0x3f   : > { %698 = vmatmul.bf16.gmra.mxu2 %v630_v55  ;;  %1472 = vmatpush.bf16.msrb.mxu3 %v2548_v14  ;;  %v2547_v55 = vld [vmem:[%s3126_s1 + $0x1d0] sm:$0xff]  ;;  %v589_v60 = vsel %vm2752_vm2, %v584_v50, %v588_v51  ;;  %v628_v4 = vunpack.c.l.b16 %v603_v61  ;;  %v2556_v14 = vld [vmem:[%s3126_s1 + $0x218] sm:$0xff]  ;;  %v2468_v45 = vld [vmem:[%s2715_s6 + $0xdc] sm:$0xf0]  ;;  %v1009_v51 = vrot.slane %v1007_v35, 4 }
  0x40   : > { %v627_v3 = vunpack.c.l.b16 %v589_v60  ;;  %v993_v50 = vld [vmem:[%s2715_s6 + $0x38] sm:$0x1]  ;;  %v2399_v60 = vld [vmem:[%s2715_s6 + $0x30] sm:$0x1] }
  0x41   : > { %449 = vmatpush.bf16.msrb.mxu1 %v2471_v59  ;;  %958 = vmatpush.bf16.msrb.mxu0 %v2515_v63  ;;  %v2557_v59 = vld [vmem:[%s3126_s1 + $0x220] sm:$0xff]  ;;  %v2401_v61 = vld [vmem:[%s2715_s6 + $0x50] sm:$0x1] }
  0x42   : > { %1339 = vmatpush.bf16.msrb.mxu2 %v2535_v11  ;;  %v1988_v63 = vld [vmem:[%s2715_s6 + $0x40] sm:$0xf]  ;;  %v632_v8 = vpack.c.b16 %v628_v4, %v627_v3 }
  0x43   : > { %1473 = vmatpush.bf16.msrb.mxu3 %v2547_v55  ;;  %v1989_v6 = vor.u32 %v2466_v0, %v1988_v63  ;;  %v2530_v55 = vld [vmem:[%s2715_s6 + $0x7c] sm:$0xf0]  ;;  %v1030_v0 = vshll.u32 %v993_v50, 16 }
  0x45   : > { %450 = vmatpush.bf16.msrb.mxu1 %v2470_v2  ;;  %959 = vmatpush.bf16.msrb.mxu0 %v2514_v9  ;;  %v2510_v2 = vld [vmem:[%s2715_s6 + $0x68] sm:$0xf0]  ;;  %v2108_v9 = vld [vmem:[%s2715_s6 + $0xc8] sm:$0xf] }
  0x46   : > { %1340 = vmatpush.bf16.msrb.mxu2 %v2534_v48  ;;  %v2165_v7 = vor.u32 %v2510_v2, %v2164_v1  ;;  %v2109_v11 = vor.u32 %v2500_v10, %v2108_v9  ;;  %v2284_v48 = vld [vmem:[%s2715_s6 + $0x60] sm:$0xf]  ;;  %v1545_v10 = vshll.u32 %v2401_v61, 16 }
  0x47   : > { %1474 = vmatpush.bf16.msrb.mxu3 %v2546_v58  ;;  %v1538_v58 = vrot.slane %v1536_v42, 4  ;;  %v2285_v2 = vor.u32 %v2530_v55, %v2284_v48  ;;  %v997_v42 = vld [vmem:[%s2715_s6 + $0x78] sm:$0x1] }
  0x48   : > { %v1547_v23 = vrot.slane %v1545_v10, 5 }
  0x49   : > { %451 = vmatpush.bf16.msrb.mxu1 %v2469_v15  ;;  %960 = vmatpush.bf16.msrb.mxu0 %v2513_v21  ;;  %v2521_v15 = vld [vmem:[%s3126_s1 + $0x140] sm:$0xff]  ;;  %v2511_v21 = vld [vmem:[%s2715_s6 + $0xa8] sm:$0xf0] }
  0x4a   : > { %1341 = vmatpush.bf16.msrb.mxu2 %v2533_v54 }
  0x4b   : > { %1475 = vmatpush.bf16.msrb.mxu3 %v2545_v13  ;;  %v994_v13 = vld [vmem:[%s2715_s6 + $0x48] sm:$0xf] }
  0x4c   : > { %452 = vmatmul.bf16.vlgmr.msrb.gmra.mxu1 %v1985_v36  ;;  %961 = vmatmul.bf16.vlgmr.msrb.gmra.mxu0 %v2161_v37  ;;  %v1010_v36 = vshll.u32 %v990_v31, 16  ;;  %v1021_v37 = vshrl.u32 %v992_v32, 16 }
  0x4d   : > { %1199 = vmatpush.bf16.msra.mxu1 %v2528_v20  ;;  %1714 = vmatpush.bf16.msra.mxu0 %v2560_v24  ;;  %v2168_v20 = vld [vmem:[%s2715_s6 + $0x8c] sm:$0xf] }
  0x4e   : > { %837 = vmatmul.bf16.gmra.mxu3 %v2105_v49  ;;  %2592 = vmatpush.bf16.msra.mxu2 %v2560_v24  ;;  %v1993_v24 = vor.u32 %v2467_v19, %v1992_v17  ;;  %v2169_v25 = vor.u32 %v2511_v21, %v2168_v20  ;;  %v991_v49 = vld [vmem:[%s2715_s6 + $0x18] sm:$0x1]  ;;  %v1012_v52 = vrot.slane %v1010_v36, 5  ;;  %v1023_v53 = vrot.slane %v1021_v37, 4  ;;  %v2404_v19 = vld [vmem:[%s2715_s6 + $0x80] sm:$0xf] }
  0x4f   : > { %703 = vmatmul.bf16.gmra.mxu2 %v631_v39  ;;  %v1024_v39 = vshll.u32 %v992_v32, 16  ;;  %v1016_v63 = vshll.u32 %v991_v49, 16  ;;  %v1567_v31 = vshll.u32 %v2404_v19, 16  ;;  %v995_v36 = vld [vmem:[%s2715_s6 + $0x58] sm:$0x1] }
  0x50   : > { %v1013_v3 = vor.u32 %v1012_v52, %v1009_v51  ;;  %v2403_v51 = vld [vmem:[%s2715_s6 + $0x70] sm:$0x1] }
  0x51   : > { %1200 = vmatpush.bf16.msra.mxu1 %v2527_v33  ;;  %1715 = vmatpush.bf16.msra.mxu0 %v2559_v43  ;;  %v2398_v33 = vld [vmem:[%s2715_s6 + $0x20] sm:$0xf]  ;;  %v1026_v54 = vrot.slane %v1024_v39, 5  ;;  %v2405_v52 = vld [vmem:[%s2715_s6 + $0x90] sm:$0x1] }
  0x52   : > { %2593 = vmatpush.bf16.msra.mxu2 %v2559_v43  ;;  %v1522_v40 = vshrl.u32 %v2398_v33, 16  ;;  %v1525_v41 = vshll.u32 %v2398_v33, 16  ;;  %v1539_v43 = vshll.u32 %v2400_v34, 16 }
  0x53   : > { %v1027_v4 = vor.u32 %v1026_v54, %v1023_v53  ;;  %v2288_v53 = vld [vmem:[%s2715_s6 + $0xa0] sm:$0xf] }
  0x54   : > { %v2531_v54 = vld [vmem:[%s2715_s6 + $0xbc] sm:$0xf0] }
  0x55   : > { %1201 = vmatpush.bf16.msra.mxu1 %v2526_v47  ;;  %1716 = vmatpush.bf16.msra.mxu0 %v2558_v56  ;;  %v2512_v47 = vld [vmem:[%s2715_s6 + $0xe8] sm:$0xf0] }
  0x56   : > { %2594 = vmatpush.bf16.msra.mxu2 %v2558_v56  ;;  %v1524_v56 = vrot.slane %v1522_v40, 4  ;;  %v2173_v1 = vor.u32 %v2512_v47, %v2172_v46  ;;  %v1569_v46 = vrot.slane %v1567_v31, 5 }
  0x59   : > { %1202 = vmatpush.bf16.msra.mxu1 %v2525_v57  ;;  %1717 = vmatpush.bf16.msra.mxu0 %v2557_v59  ;;  %v1527_v57 = vrot.slane %v1525_v41, 5 }
  0x5a   : > { %2595 = vmatpush.bf16.msra.mxu2 %v2557_v59  ;;  %v1541_v59 = vrot.slane %v1539_v43, 5 }
  0x5c   : > { %457 = vmatmul.bf16.gmra.mxu1 %v1989_v6  ;;  %966 = vmatmul.bf16.gmra.mxu0 %v2165_v7  ;;  %v2542_v6 = vld [vmem:[%s2715_s6 + $0x80] sm:$0xf0]  ;;  %v1528_v7 = vor.u32 %v1527_v57, %v1524_v56  ;;  %v1542_v9 = vor.u32 %v1541_v59, %v1538_v58  ;;  %v1044_v56 = vshll.u32 %v995_v36, 16  ;;  %v1058_v58 = vshll.u32 %v997_v42, 16  ;;  %v999_v42 = vld [vmem:[%s2715_s6 + $0x98] sm:$0x1] }
  0x5d   : > { %1203 = vmatpush.bf16.msra.mxu1 %v2524_v62  ;;  %1718 = vmatpush.bf16.msra.mxu0 %v2556_v14  ;;  %v1997_v62 = vor.u32 %v2468_v45, %v1996_v44 }
  0x5e   : > { %842 = vmatmul.bf16.gmra.mxu3 %v2109_v11  ;;  %2596 = vmatpush.bf16.msra.mxu2 %v2556_v14  ;;  %v1018_v11 = vrot.slane %v1016_v63, 5  ;;  %v996_v14 = vld [vmem:[%s2715_s6 + $0x68] sm:$0xf]  ;;  %v1529_v20 = vrot.slane %v1528_v7, 4  ;;  %v1543_v22 = vrot.slane %v1542_v9, 4  ;;  %v1060_v7 = vrot.slane %v1058_v58, 5 }
  0x5f   : > { %708 = vmatmul.bf16.gmra.mxu2 %v632_v8  ;;  %v1531_v8 = vshll.u32 %v2399_v60, 16  ;;  %v1052_v27 = vshll.u32 %v996_v14, 16  ;;  %v1559_v60 = vshll.u32 %v2403_v51, 16  ;;  %v2292_v51 = vld [vmem:[%s2715_s6 + $0xe0] sm:$0xf] }
  0x60   : > { %v1548_v35 = vsel %vm2752_vm2, %v1543_v22, %v1547_v23  ;;  %v2411_v58 = vld [vmem:[%s2715_s6 + $0xf0] sm:$0x1] }
  0x61   : > { %1204 = vmatpush.bf16.msra.mxu1 %v2523_v5  ;;  %1719 = vmatpush.bf16.msra.mxu0 %v2555_v16  ;;  %v2356_v5 = vld [vmem:[%s2715_s6 + $0x64] sm:$0xf]  ;;  %v1533_v21 = vrot.slane %v1531_v8, 5  ;;  %v1054_v41 = vrot.slane %v1052_v27, 5  ;;  %v1651_v50 = vunpack.c.l.b16 %v1548_v35  ;;  %v1561_v9 = vrot.slane %v1559_v60, 5 }
  0x62   : > { %2597 = vmatpush.bf16.msra.mxu2 %v2555_v16  ;;  %v1028_v16 = vrot.slane %v1027_v4, 4  ;;  %v2357_v17 = vor.u32 %v2542_v6, %v2356_v5  ;;  %v1046_v5 = vrot.slane %v1044_v56, 5  ;;  %v2532_v56 = vld [vmem:[%s2715_s6 + $0xfc] sm:$0xf0] }
  0x63   : > { %v1534_v34 = vsel %vm2752_vm2, %v1529_v20, %v1533_v21  ;;  %v2410_v21 = vld [vmem:[%s2715_s6 + $0xe0] sm:$0xf] }
  0x64   : > { %v1650_v49 = vunpack.c.l.b16 %v1534_v34  ;;  %v1609_v34 = vshll.u32 %v2410_v21, 16 }
  0x65   : > { %1205 = vmatpush.bf16.msra.mxu1 %v2522_v12  ;;  %1720 = vmatpush.bf16.msra.mxu0 %v2554_v18  ;;  %v1032_v12 = vrot.slane %v1030_v0, 5 }
  0x66   : > { %2598 = vmatpush.bf16.msra.mxu2 %v2554_v18  ;;  %v2402_v18 = vld [vmem:[%s2715_s6 + $0x60] sm:$0xf]  ;;  %v1658_v0 = vpack.c.b16 %v1651_v50, %v1650_v49 }
  0x67   : > { %v1550_v28 = vshrl.u32 %v2402_v18, 16  ;;  %v1033_v33 = vsel %vm2752_vm2, %v1028_v16, %v1032_v12  ;;  %v998_v12 = vld [vmem:[%s2715_s6 + $0x88] sm:$0xf]  ;;  %v2408_v16 = vld [vmem:[%s2715_s6 + $0xc0] sm:$0xf] }
  0x68   : > { %v1136_v48 = vunpack.c.l.b16 %v1033_v33  ;;  %v1066_v20 = vshll.u32 %v998_v12, 16  ;;  %v1606_v33 = vshrl.u32 %v2410_v21, 16 }
  0x69   : > { %1206 = vmatpush.bf16.msra.mxu1 %v2521_v15  ;;  %1721 = vmatpush.bf16.msra.mxu0 %v2553_v30  ;;  %v1014_v15 = vrot.slane %v1013_v3, 4  ;;  %v1552_v43 = vrot.slane %v1550_v28, 4  ;;  %v2543_v3 = vld [vmem:[%s2715_s6 + $0xc0] sm:$0xf0] }
  0x6a   : > { %2599 = vmatpush.bf16.msra.mxu2 %v2553_v30  ;;  %v1564_v30 = vshrl.u32 %v2404_v19, 16  ;;  %v1063_v19 = vshrl.u32 %v998_v12, 16  ;;  %v1068_v36 = vrot.slane %v1066_v20, 5 }
  0x6b   : > { %v1019_v32 = vsel %vm2752_vm2, %v1014_v15, %v1018_v11  ;;  %v2406_v15 = vld [vmem:[%s2715_s6 + $0xa0] sm:$0xf] }
  0x6c   : > { %462 = vmatmul.bf16.gmra.mxu1 %v1993_v24  ;;  %971 = vmatmul.bf16.gmra.mxu0 %v2169_v25  ;;  %v1035_v24 = vshrl.u32 %v994_v13, 16  ;;  %v1038_v25 = vshll.u32 %v994_v13, 16  ;;  %v1566_v45 = vrot.slane %v1564_v30, 4  ;;  %v1135_v47 = vunpack.c.l.b16 %v1019_v32 }
  0x6d   : > { %v1578_v27 = vshrl.u32 %v2406_v15, 16  ;;  %v1581_v28 = vshll.u32 %v2406_v15, 16  ;;  %v1595_v30 = vshll.u32 %v2408_v16, 16  ;;  %v1065_v35 = vrot.slane %v1063_v19, 4 }
  0x6e   : > { %1476 = vmatmul.bf16.vlgmr.msrb.gmra.mxu3 %v2353_v29  ;;  %v1553_v29 = vshll.u32 %v2402_v18, 16  ;;  %v1037_v37 = vrot.slane %v1035_v24, 4  ;;  %v1040_v39 = vrot.slane %v1038_v25, 5  ;;  %v1570_v61 = vor.u32 %v1569_v46, %v1566_v45  ;;  %v2407_v46 = vld [vmem:[%s2715_s6 + $0xb0] sm:$0x1] }
  0x6f   : > { %1342 = vmatmul.bf16.vlgmr.msrb.gmra.mxu2 %v2281_v26  ;;  %v1049_v26 = vshrl.u32 %v996_v14, 16  ;;  %v1143_v63 = vpack.c.b16 %v1136_v48, %v1135_v47  ;;  %v1000_v14 = vld [vmem:[%s2715_s6 + $0xa8] sm:$0xf]  ;;  %v1580_v47 = vrot.slane %v1578_v27, 4  ;;  %v1583_v48 = vrot.slane %v1581_v28, 5 }
  0x70   : > { %v1555_v44 = vrot.slane %v1553_v29, 5  ;;  %v1041_v55 = vor.u32 %v1040_v39, %v1037_v37  ;;  %v1571_v10 = vrot.slane %v1570_v61, 4  ;;  %v1077_v24 = vshrl.u32 %v1000_v14, 16  ;;  %v1004_v27 = vld [vmem:[%s2715_s6 + $0xe8] sm:$0xf] }
  0x71   : > { %v1051_v40 = vrot.slane %v1049_v26, 4  ;;  %v1080_v25 = vshll.u32 %v1000_v14, 16  ;;  %v2412_v26 = vld [vmem:[%s2715_s6 + $0x100] sm:$0xf]  ;;  %v1592_v29 = vshrl.u32 %v2408_v16, 16  ;;  %v1597_v50 = vrot.slane %v1595_v30, 5 }
  0x72   : > { %v1556_v59 = vor.u32 %v1555_v44, %v1552_v43  ;;  %v1042_v4 = vrot.slane %v1041_v55, 4  ;;  %v1620_v37 = vshrl.u32 %v2412_v26, 16  ;;  %v1623_v39 = vshll.u32 %v2412_v26, 16  ;;  %v1001_v43 = vld [vmem:[%s2715_s6 + $0xb8] sm:$0x1] }
  0x73   : > { %v1055_v57 = vor.u32 %v1054_v41, %v1051_v40  ;;  %v1079_v44 = vrot.slane %v1077_v24, 4  ;;  %v1082_v45 = vrot.slane %v1080_v25, 5  ;;  %v1594_v49 = vrot.slane %v1592_v29, 4  ;;  %v1002_v24 = vld [vmem:[%s2715_s6 + $0xc8] sm:$0xf] }
  0x74   : > { %v1557_v8 = vrot.slane %v1556_v59, 4  ;;  %v1622_v59 = vrot.slane %v1620_v37, 4  ;;  %v1625_v60 = vrot.slane %v1623_v39, 5  ;;  %v1072_v61 = vshll.u32 %v999_v42, 16 }
  0x75   : > { %v1056_v6 = vrot.slane %v1055_v57, 4  ;;  %v1069_v57 = vor.u32 %v1068_v36, %v1065_v35  ;;  %v1105_v35 = vshrl.u32 %v1004_v27, 16  ;;  %v1108_v36 = vshll.u32 %v1004_v27, 16 }
  0x76   : > { %v1562_v22 = vsel %vm2752_vm2, %v1557_v8, %v1561_v9  ;;  %v2544_v8 = vld [vmem:[%s2715_s6 + $0x100] sm:$0xf0]  ;;  %v1626_v12 = vor.u32 %v1625_v60, %v1622_v59  ;;  %v1074_v14 = vrot.slane %v1072_v61, 5 }
  0x77   : > { %v1061_v18 = vsel %vm2752_vm2, %v1056_v6, %v1060_v7  ;;  %v1652_v40 = vunpack.c.l.b16 %v1562_v22  ;;  %v2293_v6 = vor.u32 %v2532_v56, %v2292_v51  ;;  %v2364_v7 = vld [vmem:[%s2715_s6 + $0xe4] sm:$0xf] }
  0x78   : > { %v1138_v32 = vunpack.c.l.b16 %v1061_v18  ;;  %v2365_v18 = vor.u32 %v2544_v8, %v2364_v7  ;;  %v1627_v25 = vrot.slane %v1626_v12, 4 }
  0x7c   : > { %467 = vmatmul.bf16.gmra.mxu1 %v1997_v62  ;;  %976 = vmatmul.bf16.gmra.mxu0 %v2173_v1  ;;  %v1573_v62 = vshll.u32 %v2405_v52, 16  ;;  %v2289_v1 = vor.u32 %v2531_v54, %v2288_v53  ;;  %v2409_v52 = vld [vmem:[%s2715_s6 + $0xd0] sm:$0x1]  ;;  %v1608_v53 = vrot.slane %v1606_v33, 4  ;;  %v1611_v54 = vrot.slane %v1609_v34, 5 }
  0x7d   : > { %v1094_v34 = vshll.u32 %v1002_v24, 16 }
  0x7e   : > { %1481 = vmatmul.bf16.gmra.mxu3 %v2357_v17  ;;  %v1575_v11 = vrot.slane %v1573_v62, 5  ;;  %v1047_v17 = vsel %vm2752_vm2, %v1042_v4, %v1046_v5  ;;  %v1083_v62 = vor.u32 %v1082_v45, %v1079_v44  ;;  %v1598_v4 = vor.u32 %v1597_v50, %v1594_v49  ;;  %v1005_v50 = vld [vmem:[%s2715_s6 + $0xf8] sm:$0x1] }
  0x7f   : > { %1347 = vmatmul.bf16.gmra.mxu2 %v2285_v2  ;;  %v2360_v2 = vld [vmem:[%s2715_s6 + $0xa4] sm:$0xf]  ;;  %v1137_v31 = vunpack.c.l.b16 %v1047_v17  ;;  %v1601_v5 = vshll.u32 %v2409_v52, 16  ;;  %v1612_v9 = vor.u32 %v1611_v54, %v1608_v53  ;;  %v1110_v49 = vrot.slane %v1108_v36, 5 }
  0x80   : > { %v2361_v13 = vor.u32 %v2543_v3, %v2360_v2  ;;  %v1576_v23 = vsel %vm2752_vm2, %v1571_v10, %v1575_v11  ;;  %v1584_v3 = vor.u32 %v1583_v48, %v1580_v47  ;;  %v1615_v10 = vshll.u32 %v2411_v58, 16 }
  0x81   : > { %v1653_v41 = vunpack.c.l.b16 %v1576_v23  ;;  %v1144_v55 = vpack.c.b16 %v1138_v32, %v1137_v31  ;;  %v1070_v11 = vrot.slane %v1069_v57, 4  ;;  %v1084_v15 = vrot.slane %v1083_v62, 4 }
  0x82   : > { %v1585_v19 = vrot.slane %v1584_v3, 4  ;;  %v1599_v20 = vrot.slane %v1598_v4, 4  ;;  %v1603_v21 = vrot.slane %v1601_v5, 5  ;;  %v1613_v22 = vrot.slane %v1612_v9, 4 }
  0x83   : > { %v1659_v2 = vpack.c.b16 %v1653_v41, %v1652_v40  ;;  %v1617_v23 = vrot.slane %v1615_v10, 5  ;;  %v1075_v28 = vsel %vm2752_vm2, %v1070_v11, %v1074_v14  ;;  %v1091_v32 = vshrl.u32 %v1002_v24, 16 }
  0x84   : > { %v1604_v31 = vsel %vm2752_vm2, %v1599_v20, %v1603_v21  ;;  %v1139_v39 = vunpack.c.l.b16 %v1075_v28  ;;  %v1096_v47 = vrot.slane %v1094_v34, 5  ;;  %v1107_v48 = vrot.slane %v1105_v35, 4 }
  0x85   : > { %v1618_v33 = vsel %vm2752_vm2, %v1613_v22, %v1617_v23  ;;  %v1655_v42 = vunpack.c.l.b16 %v1604_v31  ;;  %v1093_v44 = vrot.slane %v1091_v32, 4  ;;  %v1114_v59 = vshll.u32 %v1005_v50, 16 }
  0x86   : > { %v1111_v58 = vor.u32 %v1110_v49, %v1107_v48 }
  0x87   : > { %v1097_v57 = vor.u32 %v1096_v47, %v1093_v44 }
  0x88   : > { %v1112_v62 = vrot.slane %v1111_v58, 4 }
  0x89   : > { %v1098_v60 = vrot.slane %v1097_v57, 4 }
  0x8c   : > { %1207 = vmatmul.bf16.vlgmr.msra.gmra.mxu1 %v1143_v63  ;;  %1722 = vmatmul.bf16.vlgmr.msra.gmra.mxu0 %v1658_v0  ;;  %v1086_v63 = vshll.u32 %v1001_v43, 16  ;;  %v1587_v0 = vshll.u32 %v2407_v46, 16  ;;  %v1656_v43 = vunpack.c.l.b16 %v1618_v33  ;;  %v1003_v46 = vld [vmem:[%s2715_s6 + $0xd8] sm:$0x1] }
  0x8d   : > { %v1100_v53 = vshll.u32 %v1003_v46, 16 }
  0x8e   : > { %1486 = vmatmul.bf16.gmra.mxu3 %v2361_v13  ;;  %v1088_v16 = vrot.slane %v1086_v63, 5  ;;  %v1589_v17 = vrot.slane %v1587_v0, 5  ;;  %v1116_v63 = vrot.slane %v1114_v59, 5 }
  0x8f   : > { %1352 = vmatmul.bf16.gmra.mxu2 %v2289_v1  ;;  %v2413_v1 = vld [vmem:[%s2715_s6 + $0x110] sm:$0x1]  ;;  %v1102_v61 = vrot.slane %v1100_v53, 5 }
  0x90   : > { %v1629_v13 = vshll.u32 %v2413_v1, 16  ;;  %v1089_v29 = vsel %vm2752_vm2, %v1084_v15, %v1088_v16  ;;  %v1590_v30 = vsel %vm2752_vm2, %v1585_v19, %v1589_v17  ;;  %v1117_v4 = vsel %vm2752_vm2, %v1112_v62, %v1116_v63 }
  0x91   : > { %v1140_v40 = vunpack.c.l.b16 %v1089_v29  ;;  %v1654_v41 = vunpack.c.l.b16 %v1590_v30  ;;  %v1103_v3 = vsel %vm2752_vm2, %v1098_v60, %v1102_v61  ;;  %v1142_v7 = vunpack.c.l.b16 %v1117_v4 }
  0x92   : > { %v1631_v26 = vrot.slane %v1629_v13, 5 }
  0x93   : > { %v1145_v51 = vpack.c.b16 %v1140_v40, %v1139_v39  ;;  %v1660_v52 = vpack.c.b16 %v1655_v42, %v1654_v41 }
  0x94   : > { %v1632_v37 = vsel %vm2752_vm2, %v1627_v25, %v1631_v26 }
  0x95   : > { %v1657_v45 = vunpack.c.l.b16 %v1632_v37 }
  0x97   : > { %v1661_v56 = vpack.c.b16 %v1657_v45, %v1656_v43 }
  0x9c   : > { %1212 = vmatmul.bf16.gmra.mxu1 %v1144_v55  ;;  %1727 = vmatmul.bf16.gmra.mxu0 %v1659_v2 }
  0x9e   : > { %1491 = vmatmul.bf16.gmra.mxu3 %v2365_v18 }
  0x9f   : > { %1357 = vmatmul.bf16.gmra.mxu2 %v2293_v6  ;;  %v1141_v6 = vunpack.c.l.b16 %v1103_v3 }
  0xa1   : > { %v1146_v8 = vpack.c.b16 %v1142_v7, %v1141_v6 }
  0xa9   : > { %v362_v54 = vpop.f32.mrf.mxu1  ;;  %v352_v55 = vpop.f32.mrf.mxu0 }
  0xac   : > { %1217 = vmatmul.bf16.gmra.mxu1 %v1145_v51  ;;  %1732 = vmatmul.bf16.gmra.mxu0 %v1660_v52 }
  0xaf   : > { %1737 = vmatmul.bf16.vlgmr.msra.gmra.mxu2 %v1661_v56 }
  0xb1   : > { %v364_v1 = vpop.f32.mrf.mxu1  ;;  %v354_v2 = vpop.f32.mrf.mxu0 }
  0xb2   : > { %v694_v0 = vpop.f32.mrf.mxu2  ;;  %v828_v5 = vpop.f32.mrf.mxu3 }
  0xb9   : > { %v367_v10 = vpop.f32.mrf.mxu1  ;;  %v357_v11 = vpop.f32.mrf.mxu0 }
  0xba   : > { %v696_v9 = vpop.f32.mrf.mxu2  ;;  %v3060_v12 = vpop.f32.mrf.mxu3 }
  0xbc   : > { %1222 = vmatmul.bf16.gmra.mxu1 %v1146_v8 }
  0xc1   : > { %v369_v14 = vpop.f32.mrf.mxu1  ;;  %v359_v15 = vpop.f32.mrf.mxu0 }
  0xc2   : > { %v699_v13 = vpop.f32.mrf.mxu2  ;;  %v833_v16 = vpop.f32.mrf.mxu3 }
  0xc9   : > { %v453_v18 = vpop.f32.mrf.mxu1  ;;  %v962_v19 = vpop.f32.mrf.mxu0 }
  0xca   : > { %v701_v17 = vpop.f32.mrf.mxu2  ;;  %v454_v20 = vadd.f32 %v453_v18, %v352_v55  ;;  %v3062_v21 = vpop.f32.mrf.mxu3 }
  0xcc   : > { %v714_v38 = vadd.f32 %v694_v0, %v454_v20 }
  0xce   : > { %v848_v22 = vadd.f32 %v828_v5, %v714_v38 }
  0xd0   : > { %v982_v23 = vadd.f32 %v962_v19, %v848_v22 }
  0xd1   : > { %v455_v25 = vpop.f32.mrf.mxu1  ;;  %v964_v26 = vpop.f32.mrf.mxu0 }
  0xd2   : > { %v704_v24 = vpop.f32.mrf.mxu2  ;;  %v456_v27 = vadd.f32 %v455_v25, %v354_v2  ;;  %v838_v29 = vpop.f32.mrf.mxu3 }
  0xd4   : > { %v715_v28 = vadd.f32 %v696_v9, %v456_v27 }
  0xd9   : > { %v458_v31 = vpop.f32.mrf.mxu1  ;;  %v967_v32 = vpop.f32.mrf.mxu0 }
  0xda   : > { %v706_v30 = vpop.f32.mrf.mxu2  ;;  %v459_v33 = vadd.f32 %v458_v31, %v357_v11  ;;  %v3064_v39 = vpop.f32.mrf.mxu3 }
  0xdc   : > { %v716_v34 = vadd.f32 %v699_v13, %v459_v33 }
  0xde   : > { %v850_v35 = vadd.f32 %v833_v16, %v716_v34 }
  0xe0   : > { %v984_v36 = vadd.f32 %v967_v32, %v850_v35 }
  0xe1   : > { %v460_v40 = vpop.f32.mrf.mxu1  ;;  %v3066_v41 = vpop.f32.mrf.mxu0 }
  0xe2   : > { %v709_v37 = vpop.f32.mrf.mxu2  ;;  %v461_v42 = vadd.f32 %v460_v40, %v359_v15  ;;  %v843_v48 = vpop.f32.mrf.mxu3  ;;  %v849_v15 = vadd.f32 %v3060_v12, %v715_v28 }
  0xe4   : > { %v717_v43 = vadd.f32 %v701_v17, %v461_v42  ;;  %v983_v17 = vadd.f32 %v964_v26, %v849_v15 }
  0xe6   : > { %v851_v32 = vadd.f32 %v3062_v21, %v717_v43 }
  0xe9   : > { %v463_v45 = vpop.f32.mrf.mxu1  ;;  %v972_v46 = vpop.f32.mrf.mxu0 }
  0xea   : > { %v711_v44 = vpop.f32.mrf.mxu2  ;;  %v464_v47 = vadd.f32 %v463_v45, %v362_v54  ;;  %v3074_v58 = vpop.f32.mrf.mxu3 }
  0xec   : > { %v718_v49 = vadd.f32 %v704_v24, %v464_v47 }
  0xee   : > { %v852_v50 = vadd.f32 %v838_v29, %v718_v49 }
  0xf0   : > { %v3068_v51 = vadd.f32 %v972_v46, %v852_v50 }
  0xf1   : > { %v465_v53 = vpop.f32.mrf.mxu1  ;;  %v3070_v55 = vpop.f32.mrf.mxu0 }
  0xf2   : > { %v1343_v52 = vpop.f32.mrf.mxu2  ;;  %v466_v56 = vadd.f32 %v465_v53, %v364_v1  ;;  %v1477_v0 = vpop.f32.mrf.mxu3 }
  0xf4   : > { %v3072_v57 = vadd.f32 %v706_v30, %v466_v56 }
  0xf9   : > { %v468_v60 = vpop.f32.mrf.mxu1  ;;  %v977_v61 = vpop.f32.mrf.mxu0 }
  0xfa   : > { %v1345_v59 = vpop.f32.mrf.mxu2  ;;  %v469_v62 = vadd.f32 %v468_v60, %v367_v10  ;;  %v1479_v1 = vpop.f32.mrf.mxu3 }
  0xfc   : > { %v720_v63 = vadd.f32 %v709_v37, %v469_v62 }
  0xfe   : > { %v854_v54 = vadd.f32 %v843_v48, %v720_v63  ;;  %v853_v63 = vadd.f32 %v3064_v39, %v3072_v57 }
 0x100   : > { %v3076_v2 = vadd.f32 %v977_v61, %v854_v54 }
 0x101   : > { %v470_v4 = vpop.f32.mrf.mxu1  ;;  %v3078_v5 = vpop.f32.mrf.mxu0 }
 0x102   : > { %v1348_v3 = vpop.f32.mrf.mxu2  ;;  %v471_v6 = vadd.f32 %v470_v4, %v369_v14  ;;  %v3086_v14 = vld [vmem:[%s3127_s2] ss:$0 sm:$0xff]  ;;  %v1482_v22 = vpop.f32.mrf.mxu3 }
 0x104   : > { %v3080_v7 = vadd.f32 %v711_v44, %v471_v6 }
 0x109   : > { %v1208_v8 = vpop.f32.mrf.mxu1  ;;  %v1723_v9 = vpop.f32.mrf.mxu0 }
 0x10a   : > { %v1228_v11 = vadd.f32 %v1208_v8, %v982_v23  ;;  %v1350_v13 = vpop.f32.mrf.mxu2  ;;  %v1484_v35 = vpop.f32.mrf.mxu3  ;;  %v987_v8 = vadd.f32 %v3070_v55, %v853_v63 }
 0x10c   : > { %v1363_v10 = vadd.f32 %v1343_v52, %v1228_v11 }
 0x10e   : > { %v1497_v16 = vadd.f32 %v1477_v0, %v1363_v10 }
 0x110   : > { %v1743_v20 = vadd.f32 %v1723_v9, %v1497_v16 }
 0x111   : > { %v1210_v18 = vpop.f32.mrf.mxu1  ;;  %v1725_v19 = vpop.f32.mrf.mxu0 }
 0x112   : > { %v1229_v38 = vadd.f32 %v1210_v18, %v983_v17  ;;  %v1353_v25 = vpop.f32.mrf.mxu2  ;;  %v1755_v23 = vadd.f32 %v3086_v14, %v1743_v20  ;;  %v1487_v52 = vpop.f32.mrf.mxu3 }
 0x114   : > { %v1364_v24 = vadd.f32 %v1345_v59, %v1229_v38  ;;  %v1771_v26 = vmul.f32 0.1, %v1755_v23  ;;  %vm1763_vm3 = vcmp.gt.f32.partialorder %v1755_v23, 0.0 }
 0x116   : > { %v1498_v27 = vadd.f32 %v1479_v1, %v1364_v24  ;;  %v1779_v37 = vsel %vm1763_vm3, %v1755_v23, %v1771_v26 }
 0x118   : > { %v1744_v12 = vadd.f32 %v1725_v19, %v1498_v27 }
 0x119   : > { %v1213_v28 = vpop.f32.mrf.mxu1  ;;  %v1728_v29 = vpop.f32.mrf.mxu0 }
 0x11a   : > { %v1756_v30 = vadd.f32 %v3086_v14, %v1744_v12  ;;  %v1230_v31 = vadd.f32 %v1213_v28, %v984_v36  ;;  %v1355_v45 = vpop.f32.mrf.mxu2  ;;  %v985_v36 = vadd.f32 %v3066_v41, %v851_v32  ;;  %v1489_v9 = vpop.f32.mrf.mxu3 }
 0x11c   : > { %vm1764_vm4 = vcmp.gt.f32.partialorder %v1756_v30, 0.0  ;;  %v1772_v33 = vmul.f32 0.1, %v1756_v30  ;;  %v1365_v34 = vadd.f32 %v1348_v3, %v1230_v31 }
 0x11e   : > { %v1780_v40 = vsel %vm1764_vm4, %v1756_v30, %v1772_v33  ;;  %v1499_v42 = vadd.f32 %v1482_v22, %v1365_v34  ;;  %v855_v22 = vadd.f32 %v3074_v58, %v3080_v7 }
 0x11f   : > { %v2564_v44 = vpack.c.bf16 %v1780_v40, %v1779_v37 }
 0x120   : > { %v1745_v43 = vadd.f32 %v1728_v29, %v1499_v42  ;;  %v989_v26 = vadd.f32 %v3078_v5, %v855_v22 }
 0x121   : > { %2565 = vst [vmem:[%s3095_s9] sm:$0xff] %v2564_v44   ;;  %v1215_v46 = vpop.f32.mrf.mxu1  ;;  %v1730_v21 = vpop.f32.mrf.mxu0 }
 0x122   : > { %v1231_v47 = vadd.f32 %v1215_v46, %v985_v36  ;;  %v1757_v49 = vadd.f32 %v3086_v14, %v1745_v43  ;;  %v1358_v56 = vpop.f32.mrf.mxu2  ;;  %v1492_v55 = vpop.f32.mrf.mxu3 }
 0x124   : > { %v1366_v48 = vadd.f32 %v1350_v13, %v1231_v47  ;;  %v1773_v60 = vmul.f32 0.1, %v1757_v49  ;;  %vm1765_vm5 = vcmp.gt.f32.partialorder %v1757_v49, 0.0 }
 0x126   : > { %v1500_v50 = vadd.f32 %v1484_v35, %v1366_v48  ;;  %v1781_v3 = vsel %vm1765_vm5, %v1757_v49, %v1773_v60 }
 0x128   : > { %v1746_v53 = vadd.f32 %v1730_v21, %v1500_v50 }
 0x129   : > { %v1218_v59 = vpop.f32.mrf.mxu1  ;;  %v1733_v41 = vpop.f32.mrf.mxu0 }
 0x12a   : > { %v1758_v61 = vadd.f32 %v3086_v14, %v1746_v53  ;;  %v1232_v62 = vadd.f32 %v1218_v59, %v3068_v51  ;;  %v1360_v51 = vpop.f32.mrf.mxu2  ;;  %v1494_v33 = vpop.f32.mrf.mxu3 }
 0x12c   : > { %vm1766_vm6 = vcmp.gt.f32.partialorder %v1758_v61, 0.0  ;;  %v1774_v54 = vmul.f32 0.1, %v1758_v61  ;;  %v1367_v0 = vadd.f32 %v1353_v25, %v1232_v62 }
 0x12e   : > { %v1782_v4 = vsel %vm1766_vm6, %v1758_v61, %v1774_v54  ;;  %v1501_v6 = vadd.f32 %v1487_v52, %v1367_v0 }
 0x12f   : > { %v2569_v1 = vpack.c.bf16 %v1782_v4, %v1781_v3 }
 0x130   : > { %v1747_v13 = vadd.f32 %v1733_v41, %v1501_v6 }
 0x131   : > { %2581 = vst [vmem:[%s3095_s9 + $0x8] sm:$0xff] %v2569_v1   ;;  %v1220_v11 = vpop.f32.mrf.mxu1  ;;  %v1735_v16 = vpop.f32.mrf.mxu0 }
 0x132   : > { %v1233_v15 = vadd.f32 %v1220_v11, %v987_v8  ;;  %v1759_v17 = vadd.f32 %v3086_v14, %v1747_v13  ;;  %v1738_v23 = vpop.f32.mrf.mxu2 }
 0x134   : > { %v1368_v10 = vadd.f32 %v1355_v45, %v1233_v15  ;;  %v1775_v19 = vmul.f32 0.1, %v1759_v17  ;;  %vm1767_vm7 = vcmp.gt.f32.partialorder %v1759_v17, 0.0 }
 0x136   : > { %v1502_v39 = vadd.f32 %v1489_v9, %v1368_v10  ;;  %v1783_v27 = vsel %vm1767_vm7, %v1759_v17, %v1775_v19 }
 0x138   : > { %v1748_v57 = vadd.f32 %v1735_v16, %v1502_v39 }
 0x139   : > { %v1223_v18 = vpop.f32.mrf.mxu1 }
 0x13a   : > { %v1760_v20 = vadd.f32 %v3086_v14, %v1748_v57  ;;  %v1234_v38 = vadd.f32 %v1223_v18, %v3076_v2  ;;  %v1740_v7 = vpop.f32.mrf.mxu2 }
 0x13c   : > { %vm1768_vm8 = vcmp.gt.f32.partialorder %v1760_v20, 0.0  ;;  %v1776_v24 = vmul.f32 0.1, %v1760_v20  ;;  %v1369_v25 = vadd.f32 %v1358_v56, %v1234_v38 }
 0x13e   : > { %v1784_v12 = vsel %vm1768_vm8, %v1760_v20, %v1776_v24  ;;  %v1503_v28 = vadd.f32 %v1492_v55, %v1369_v25 }
 0x13f   : > { %v2574_v29 = vpack.c.bf16 %v1784_v12, %v1783_v27 }
 0x140   : > { %v1749_v31 = vadd.f32 %v1738_v23, %v1503_v28 }
 0x141   : > { %2582 = vst [vmem:[%s3095_s9 + $0x10] sm:$0xff] %v2574_v29   ;;  %v1225_v30 = vpop.f32.mrf.mxu1 }
 0x142   : > { %v1235_v2 = vadd.f32 %v1225_v30, %v989_v26  ;;  %v1761_v34 = vadd.f32 %v3086_v14, %v1749_v31 }
 0x144   : > { %v1370_v32 = vadd.f32 %v1360_v51, %v1235_v2  ;;  %v1777_v37 = vmul.f32 0.1, %v1761_v34  ;;  %vm1769_vm9 = vcmp.gt.f32.partialorder %v1761_v34, 0.0 }
 0x146   : > { %v1504_v58 = vadd.f32 %v1494_v33, %v1370_v32  ;;  %v1785_v44 = vsel %vm1769_vm9, %v1761_v34, %v1777_v37 }
 0x148   : > { %v1750_v35 = vadd.f32 %v1740_v7, %v1504_v58 }
 0x14a   : > { %v1762_v40 = vadd.f32 %v3086_v14, %v1750_v35 }
 0x14c   : > { %vm1770_vm10 = vcmp.gt.f32.partialorder %v1762_v40, 0.0  ;;  %v1778_v42 = vmul.f32 0.1, %v1762_v40 }
 0x14e   : > { %v1786_v5 = vsel %vm1770_vm10, %v1762_v40, %v1778_v42 }
 0x14f   : > { %v2579_v45 = vpack.c.bf16 %v1786_v5, %v1785_v44 }
 0x151   : > { %2583 = vst [vmem:[%s3095_s9 + $0x18] sm:$0xff] %v2579_v45  }
 0x152 PF: > { %s13_s14 = sadd.s32 1, %s2648_s14   ;;  %s3131_s12 = smov %s2644_s13 }
 0x153   : > { %p10_p5 = scmp.ge.s32.totalorder %s13_s14, 4   ;;  %s3132_s13 = smov %s3134_s15 }
 0x155   :  { %12 = sbr.rel (!%p10_p5) target bundleno = 2 (0x2), region = 77 }

// kernel: _lambda_.13
= control target key start
LH: loop header
LB: loop body
LE: loop exit
PB: predicated region body
PF: predicated region fallthrough
CT: control target
= control target key end

     0   :  { %s663_s12 = smov 0   ;;  %s665_s13 = smov 0   ;;  %s734_s0 = inlined_call_operand.vmem [shape: bf16[2,8,8,128], index: 0, kind: input, shape index: {}]   ;;  %s735_s1 = inlined_call_operand.vmem [shape: bf16[1,1,128,128], index: 1, kind: input, shape index: {}]   ;;  %s736_s2 = inlined_call_operand.vmem [shape: f32[1,128], index: 2, kind: input, shape index: {}]   ;;  %s737_s3 = inlined_call_operand.vmem [shape: bf16[2,64,128], index: 3, kind: output, shape index: {}]  }
   0x1   :  { %s667_s14 = smov 0  }
   0x2 LB: > { %s25_s15 = sadd.s32 1, %s637_s13  ;;  %p478_p0 = scmp.ge.s32.totalorder %s641_s14, 1  ;;  %s641_s14 = sphi %s667_s14, %s13_s14   ;;  %s637_s13 = sphi %s665_s13, %s739_s13   ;;  %s633_s12 = sphi %s663_s12, %s738_s12  }
   0x3   : > { %p27_p1 = scmp.ge.s32.totalorder %s25_s15, 2  ;;  %p168_p2 = scmp.lt.s32.totalorder %s641_s14, 3 }
   0x5   : > { %s741_s15 = smov (%p27_p1, %s25_s15), 0  ;;  %p169_p3 = pnand %p478_p0, %p168_p2 }
   0x6   : > { %p202_p4 = scmp.lt.s32.totalorder (!%p169_p3), %s633_s12, 1 }
   0x7   : > { %172 = sbr.rel (%p169_p3) target bundleno = 191 (0xbf), region = 32 }
   0xc   : > { %v546_v0 = vld [vmem:[%s735_s1 + $0x38] sm:$0xff]  ;;  %v545_v1 = vld [vmem:[%s735_s1 + $0x30] sm:$0xff]  ;;  %v544_v2 = vld [vmem:[%s735_s1 + $0x28] sm:$0xff]  ;;  %s743_s12 = smov (!%p202_p4, %s633_s12), 1 }
   0xd   : > { %322 = vmatpush.bf16.msra.mxu0 %v546_v0  ;;  %570 = vmatpush.bf16.msra.mxu1 %v546_v0  ;;  %v543_v3 = vld [vmem:[%s735_s1 + $0x20] sm:$0xff]  ;;  %v542_v4 = vld [vmem:[%s735_s1 + $0x18] sm:$0xff]  ;;  %v541_v5 = vld [vmem:[%s735_s1 + $0x10] sm:$0xff]  ;;  %s533_s30 = sshll.u32 %s743_s12, 5 }
   0xe   : > { %571 = vmatpush.bf16.msra.mxu2 %v546_v0  ;;  %572 = vmatpush.bf16.msra.mxu3 %v546_v0  ;;  %v540_v6 = vld [vmem:[%s735_s1 + $0x8] sm:$0xff]  ;;  %v539_v7 = vld [vmem:[%s735_s1] sm:$0xff]  ;;  %s206_s8 = scalar_lea.vmem %s734_s0, %s533_s30  ;;  %s221_s17 = scalar_lea.vmem %s737_s3, %s533_s30 }
   0xf   : > { %v535_v8 = vld [vmem:[%s206_s8] sm:$0xff]  ;;  %v536_v9 = vld [vmem:[%s206_s8 + $0x8] sm:$0xff]  ;;  %v537_v10 = vld [vmem:[%s206_s8 + $0x10] sm:$0xff] }
  0x10   : > { %v538_v11 = vld [vmem:[%s206_s8 + $0x18] sm:$0xff]  ;;  %v618_v14 = vld [vmem:[%s736_s2] ss:$0 sm:$0xff] }
  0x11   : > { %323 = vmatpush.bf16.msra.mxu0 %v545_v1  ;;  %573 = vmatpush.bf16.msra.mxu1 %v545_v1 }
  0x12   : > { %574 = vmatpush.bf16.msra.mxu2 %v545_v1  ;;  %575 = vmatpush.bf16.msra.mxu3 %v545_v1 }
  0x15   : > { %324 = vmatpush.bf16.msra.mxu0 %v544_v2  ;;  %576 = vmatpush.bf16.msra.mxu1 %v544_v2 }
  0x16   : > { %577 = vmatpush.bf16.msra.mxu2 %v544_v2  ;;  %578 = vmatpush.bf16.msra.mxu3 %v544_v2 }
  0x19   : > { %325 = vmatpush.bf16.msra.mxu0 %v543_v3  ;;  %579 = vmatpush.bf16.msra.mxu1 %v543_v3 }
  0x1a   : > { %580 = vmatpush.bf16.msra.mxu2 %v543_v3  ;;  %581 = vmatpush.bf16.msra.mxu3 %v543_v3 }
  0x1d   : > { %326 = vmatpush.bf16.msra.mxu0 %v542_v4  ;;  %582 = vmatpush.bf16.msra.mxu1 %v542_v4 }
  0x1e   : > { %583 = vmatpush.bf16.msra.mxu2 %v542_v4  ;;  %584 = vmatpush.bf16.msra.mxu3 %v542_v4 }
  0x21   : > { %327 = vmatpush.bf16.msra.mxu0 %v541_v5  ;;  %585 = vmatpush.bf16.msra.mxu1 %v541_v5 }
  0x22   : > { %586 = vmatpush.bf16.msra.mxu2 %v541_v5  ;;  %587 = vmatpush.bf16.msra.mxu3 %v541_v5 }
  0x25   : > { %328 = vmatpush.bf16.msra.mxu0 %v540_v6  ;;  %588 = vmatpush.bf16.msra.mxu1 %v540_v6 }
  0x26   : > { %589 = vmatpush.bf16.msra.mxu2 %v540_v6  ;;  %590 = vmatpush.bf16.msra.mxu3 %v540_v6 }
  0x29   : > { %329 = vmatpush.bf16.msra.mxu0 %v539_v7  ;;  %591 = vmatpush.bf16.msra.mxu1 %v539_v7 }
  0x2a   : > { %592 = vmatpush.bf16.msra.mxu2 %v539_v7  ;;  %593 = vmatpush.bf16.msra.mxu3 %v539_v7 }
  0x2c   : > { %330 = vmatmul.bf16.vlgmr.msra.gmra.mxu0 %v535_v8  ;;  %335 = vmatmul.bf16.vlgmr.msra.gmra.mxu1 %v536_v9 }
  0x2d   : > { %340 = vmatmul.bf16.vlgmr.msra.gmra.mxu2 %v537_v10  ;;  %345 = vmatmul.bf16.vlgmr.msra.gmra.mxu3 %v538_v11 }
  0xa9   : > { %v331_v12 = vpop.f32.mrf.mxu0  ;;  %v336_v13 = vpop.f32.mrf.mxu1 }
  0xaa   : > { %v332_v19 = vadd.f32 %v618_v14, %v331_v12  ;;  %v337_v20 = vadd.f32 %v618_v14, %v336_v13 }
  0xb0   : > { %v341_v15 = vpop.f32.mrf.mxu2  ;;  %v346_v16 = vpop.f32.mrf.mxu3 }
  0xb1   : > { %v333_v17 = vpop.f32.mrf.mxu0  ;;  %v338_v18 = vpop.f32.mrf.mxu1  ;;  %v342_v27 = vadd.f32 %v618_v14, %v341_v15  ;;  %v347_v28 = vadd.f32 %v618_v14, %v346_v16 }
  0xb2   : > { %v334_v21 = vadd.f32 %v618_v14, %v333_v17  ;;  %v339_v22 = vadd.f32 %v618_v14, %v338_v18 }
  0xb4   : > { %v550_v23 = vpack.c.bf16 %v334_v21, %v332_v19  ;;  %v555_v24 = vpack.c.bf16 %v339_v22, %v337_v20 }
  0xb6   : > { %551 = vst [vmem:[%s221_s17] sm:$0xff] %v550_v23  }
  0xb7   : > { %567 = vst [vmem:[%s221_s17 + $0x8] sm:$0xff] %v555_v24  }
  0xb8   : > { %v343_v25 = vpop.f32.mrf.mxu2  ;;  %v348_v26 = vpop.f32.mrf.mxu3 }
  0xb9   : > { %v344_v29 = vadd.f32 %v618_v14, %v343_v25  ;;  %v349_v30 = vadd.f32 %v618_v14, %v348_v26 }
  0xbb   : > { %v560_v31 = vpack.c.bf16 %v344_v29, %v342_v27  ;;  %v565_v32 = vpack.c.bf16 %v349_v30, %v347_v28 }
  0xbd   : > { %568 = vst [vmem:[%s221_s17 + $0x10] sm:$0xff] %v560_v31  }
  0xbe   : > { %569 = vst [vmem:[%s221_s17 + $0x18] sm:$0xff] %v565_v32  }
  0xbf PF: > { %s13_s14 = sadd.s32 1, %s641_s14   ;;  %s738_s12 = smov %s637_s13 }
  0xc0   : > { %p10_p5 = scmp.ge.s32.totalorder %s13_s14, 4   ;;  %s739_s13 = smov %s741_s15 }
  0xc2   :  { %12 = sbr.rel (!%p10_p5) target bundleno = 2 (0x2), region = 68 }

// kernel: _lambda_.15
= control target key start
LH: loop header
LB: loop body
LE: loop exit
PB: predicated region body
PF: predicated region fallthrough
CT: control target
= control target key end

     0   :  { %s1406_s15 = smov 0   ;;  %s1408_s16 = smov 0   ;;  %s1994_s0 = inlined_call_operand.vmem [shape: bf16[2,10,10,128], index: 0, kind: input, shape index: {}]   ;;  %s1995_s1 = inlined_call_operand.vmem [shape: bf16[2,8,8,128], index: 1, kind: output, shape index: {0}]   ;;  %s1996_s2 = inlined_call_operand.vmem [shape: bf16[2,8,8,128], index: 2, kind: output, shape index: {1}]   ;;  %s1997_s3 = inlined_call_operand.vmem [shape: bf16[2,8,8,128], index: 3, kind: output, shape index: {2}]   ;;  %s1998_s4 = inlined_call_operand.vmem [shape: bf16[2,8,8,128], index: 4, kind: output, shape index: {3}]  }
   0x1   :  { %s1410_s17 = smov 0  }
   0x2 LB: > { %s27_s18 = sadd.s32 1, %s1375_s16  ;;  %p1270_p0 = scmp.ge.s32.totalorder %s1379_s17, 1  ;;  %s1379_s17 = sphi %s1410_s17, %s15_s17   ;;  %s1375_s16 = sphi %s1408_s16, %s2056_s16   ;;  %s1371_s15 = sphi %s1406_s15, %s2055_s15  }
   0x3   : > { %p29_p1 = scmp.ge.s32.totalorder %s27_s18, 2  ;;  %p194_p2 = scmp.lt.s32.totalorder %s1379_s17, 3 }
   0x5   : > { %s2058_s18 = smov (%p29_p1, %s27_s18), 0  ;;  %p195_p3 = pnand %p1270_p0, %p194_p2 }
   0x7   : > { %198 = sbr.rel (%p195_p3) target bundleno = 148 (0x94), region = 24 }
   0xc   : > { %p250_p4 = scmp.lt.s32.totalorder %s1371_s15, 1  ;;  %vm438_vm0 = vcmask 1046528   ;;  %vm591_vm1 = vsmask.f32 3328  ;;  %vm592_vm2 = vsmask.f32 7440 }
   0xd   : > { %vm1691_vm3 = vmor %vm591_vm1, %vm592_vm2 }
   0xe   : > { %s2060_s15 = smov (!%p250_p4, %s1371_s15), 1 }
   0xf   : > { %s1332_s19 = smul.u32 80, %s2060_s15  ;;  %s1473_s23 = sshll.u32 %s2060_s15, 5 }
  0x10   : > { %s1515_s26 = scalar_lea.vmem %s1995_s1, %s1473_s23  ;;  %s1702_s29 = scalar_lea.vmem %s1996_s2, %s1473_s23 }
  0x11   : > { %s1430_s22 = scalar_lea.vmem %s1994_s0, %s1332_s19  ;;  %s1808_s6 = scalar_lea.vmem %s1997_s3, %s1473_s23 }
  0x12   : > { %v290_v0 = vld [vmem:[%s1430_s22] sm:$0xf]  ;;  %v291_v1 = vld [vmem:[%s1430_s22 + $0x4] sm:$0x1]  ;;  %v292_v2 = vld [vmem:[%s1430_s22 + $0x8] sm:$0xf]  ;;  %s1935_s9 = scalar_lea.vmem %s1998_s4, %s1473_s23 }
  0x13   : > { %v293_v3 = vld [vmem:[%s1430_s22 + $0xc] sm:$0x1]  ;;  %v294_v4 = vld [vmem:[%s1430_s22 + $0x10] sm:$0xf]  ;;  %v295_v5 = vld [vmem:[%s1430_s22 + $0x14] sm:$0x1]  ;;  %v310_v6 = vunpack.c.l.bf16 %v290_v0  ;;  %v311_v7 = vunpack.c.l.bf16 %v291_v1  ;;  %v312_v8 = vunpack.c.l.bf16 %v292_v2 }
  0x14   : > { %v313_v9 = vunpack.c.l.bf16 %v293_v3  ;;  %v314_v10 = vunpack.c.l.bf16 %v294_v4  ;;  %v315_v11 = vunpack.c.l.bf16 %v295_v5  ;;  %v296_v12 = vld [vmem:[%s1430_s22 + $0x18] sm:$0xf]  ;;  %v297_v13 = vld [vmem:[%s1430_s22 + $0x1c] sm:$0x1]  ;;  %v298_v18 = vld [vmem:[%s1430_s22 + $0x20] sm:$0xf] }
  0x15   : > { %v330_v14 = vmul.f32 0.25, %v310_v6  ;;  %v331_v15 = vmul.f32 0.25, %v311_v7  ;;  %v332_v16 = vmul.f32 0.25, %v312_v8  ;;  %v1440_v17 = vmul.f32 0.75, %v312_v8  ;;  %v299_v23 = vld [vmem:[%s1430_s22 + $0x24] sm:$0x1] }
  0x16   : > { %v333_v19 = vmul.f32 0.25, %v313_v9  ;;  %v1443_v20 = vmul.f32 0.75, %v313_v9  ;;  %v1445_v21 = vmul.f32 0.75, %v314_v10  ;;  %v1447_v22 = vmul.f32 0.75, %v315_v11  ;;  %v300_v46 = vld [vmem:[%s1430_s22 + $0x28] sm:$0xf] }
  0x17   : > { %v362_v24 = vadd.f32 %v1440_v17, %v330_v14  ;;  %v316_v25 = vunpack.c.l.bf16 %v296_v12  ;;  %v317_v29 = vunpack.c.l.bf16 %v297_v13  ;;  %v318_v32 = vunpack.c.l.bf16 %v298_v18  ;;  %v301_v51 = vld [vmem:[%s1430_s22 + $0x2c] sm:$0x1]  ;;  %v302_v56 = vld [vmem:[%s1430_s22 + $0x30] sm:$0xf]  ;;  %v303_v61 = vld [vmem:[%s1430_s22 + $0x34] sm:$0x1] }
  0x18   : > { %v1452_v26 = vadd.f32 %v1443_v20, %v331_v15  ;;  %v364_v27 = vadd.f32 %v1445_v21, %v332_v16  ;;  %v1456_v28 = vadd.f32 %v1447_v22, %v333_v19  ;;  %v319_v33 = vunpack.c.l.bf16 %v299_v23 }
  0x19   : > { %v1458_v30 = vmul.f32 0.25, %v362_v24  ;;  %v1460_v31 = vmul.f32 0.75, %v362_v24  ;;  %v1476_v39 = vmul.f32 0.25, %v314_v10  ;;  %v1478_v40 = vmul.f32 0.25, %v315_v11 }
  0x1a   : > { %v1462_v34 = vmul.f32 0.25, %v364_v27  ;;  %v1465_v35 = vmul.f32 0.75, %v1452_v26  ;;  %v1467_v36 = vmul.f32 0.75, %v364_v27  ;;  %v1470_v37 = vmul.f32 0.75, %v1456_v28  ;;  %v304_v27 = vld [vmem:[%s1430_s22 + $0x38] sm:$0xf] }
  0x1b   : > { %v439_v38 = vrot.slane %v1460_v31, 1  ;;  %v1480_v41 = vmul.f32 0.25, %v316_v25  ;;  %v1485_v45 = vmul.f32 0.25, %v317_v29  ;;  %v1488_v47 = vmul.f32 0.75, %v316_v25 }
  0x1c   : > { %v440_v42 = vrot.slane %v1465_v35, 1  ;;  %v442_v43 = vrot.slane %v1467_v36, 1  ;;  %v443_v44 = vrot.slane %v1470_v37, 1  ;;  %v1490_v48 = vmul.f32 0.75, %v317_v29 }
  0x1d   : > { %v1492_v49 = vmul.f32 0.75, %v318_v32  ;;  %v1494_v50 = vmul.f32 0.75, %v319_v33  ;;  %v366_v59 = vadd.f32 %v1488_v47, %v1476_v39  ;;  %v320_v0 = vunpack.c.l.bf16 %v300_v46 }
  0x1e   : > { %v441_v52 = vsel %vm438_vm0, %v439_v38, %v440_v42  ;;  %v444_v53 = vsel %vm438_vm0, %v442_v43, %v443_v44  ;;  %v1508_v60 = vadd.f32 %v1490_v48, %v1478_v40  ;;  %v321_v1 = vunpack.c.l.bf16 %v301_v51  ;;  %v305_v42 = vld [vmem:[%s1430_s22 + $0x3c] sm:$0x1] }
  0x1f   : > { %v471_v57 = vadd.f32 %v441_v52, %v1458_v30  ;;  %v472_v58 = vadd.f32 %v444_v53, %v1462_v34  ;;  %v368_v62 = vadd.f32 %v1492_v49, %v1480_v41  ;;  %v1521_v63 = vadd.f32 %v1494_v50, %v1485_v45  ;;  %v1572_v52 = vld [vmem:[%s1430_s22 + $0x40] sm:$0xf] }
  0x20   : > { %v1523_v3 = vmul.f32 0.75, %v366_v59  ;;  %v1526_v4 = vmul.f32 0.75, %v1508_v60  ;;  %v322_v5 = vunpack.c.l.bf16 %v302_v56  ;;  %v1528_v6 = vmul.f32 0.25, %v366_v59  ;;  %2018 = vst [vmem:[#allocation6_spill] sm:$0xff] %v1572_v52 }
  0x21   : > { %v1289_v2 = vpack.c.bf16 %v472_v58, %v471_v57  ;;  %v1530_v7 = vmul.f32 0.75, %v368_v62  ;;  %v1533_v8 = vmul.f32 0.75, %v1521_v63  ;;  %v323_v9 = vunpack.c.l.bf16 %v303_v61  ;;  %v1582_v58 = vld [vmem:[%s1430_s22 + $0x44] sm:$0x1] }
  0x22   : > { %v445_v10 = vrot.slane %v1523_v3, 1  ;;  %v446_v11 = vrot.slane %v1526_v4, 1  ;;  %v1538_v12 = vmul.f32 0.25, %v318_v32  ;;  %v1540_v13 = vmul.f32 0.25, %v319_v33  ;;  %2019 = vst [vmem:[#allocation7_spill] sm:$0xff] %v1582_v58 }
  0x23   : > { %1290 = vst [vmem:[%s1515_s26] sm:$0xff] %v1289_v2   ;;  %v1542_v14 = vmul.f32 0.25, %v368_v62  ;;  %v448_v15 = vrot.slane %v1530_v7, 1  ;;  %v449_v16 = vrot.slane %v1533_v8, 1  ;;  %v1546_v18 = vmul.f32 0.25, %v320_v0 }
  0x24   : > { %v447_v19 = vsel %vm438_vm0, %v445_v10, %v446_v11  ;;  %v1549_v23 = vmul.f32 0.25, %v321_v1  ;;  %v1551_v24 = vmul.f32 0.75, %v320_v0  ;;  %v1553_v25 = vmul.f32 0.75, %v321_v1 }
  0x25   : > { %v450_v29 = vsel %vm438_vm0, %v448_v15, %v449_v16  ;;  %v473_v32 = vadd.f32 %v447_v19, %v1528_v6  ;;  %v1558_v33 = vmul.f32 0.75, %v322_v5  ;;  %v1560_v38 = vmul.f32 0.75, %v323_v9 }
  0x26   : > { %2014 = vst [vmem:[#allocation2_spill] sm:$0xff] %v1551_v24  ;;  %v474_v43 = vadd.f32 %v450_v29, %v1542_v14  ;;  %v370_v46 = vadd.f32 %v1551_v24, %v1538_v12  ;;  %v1569_v51 = vadd.f32 %v1553_v25, %v1540_v13  ;;  %v324_v59 = vunpack.c.l.bf16 %v304_v27 }
  0x27   : > { %2015 = vst [vmem:[#allocation3_spill] sm:$0xff] %v1553_v25  ;;  %v372_v56 = vadd.f32 %v1558_v33, %v1546_v18  ;;  %v1579_v57 = vadd.f32 %v1560_v38, %v1549_v23  ;;  %v325_v1 = vunpack.c.l.bf16 %v305_v42  ;;  %v1999_v15 = vunpack.c.l.bf16 %v1572_v52 }
  0x28   : > { %2016 = vst [vmem:[#allocation4_spill] sm:$0xff] %v1558_v33  ;;  %v1294_v61 = vpack.c.bf16 %v474_v43, %v473_v32  ;;  %v1584_v62 = vmul.f32 0.75, %v370_v46  ;;  %v1587_v0 = vmul.f32 0.75, %v1569_v51  ;;  %v1589_v2 = vmul.f32 0.25, %v370_v46 }
  0x29   : > { %2017 = vst [vmem:[#allocation5_spill] sm:$0xff] %v1560_v38  ;;  %v1591_v10 = vmul.f32 0.75, %v372_v56  ;;  %v1594_v11 = vmul.f32 0.75, %v1579_v57  ;;  %v1601_v29 = vmul.f32 0.25, %v322_v5  ;;  %v1603_v32 = vmul.f32 0.25, %v372_v56 }
  0x2a   : > { %1326 = vst [vmem:[%s1515_s26 + $0x8] sm:$0xff] %v1294_v61   ;;  %v451_v16 = vrot.slane %v1584_v62, 1  ;;  %v452_v19 = vrot.slane %v1587_v0, 1  ;;  %v1607_v46 = vmul.f32 0.25, %v323_v9  ;;  %v1610_v44 = vmul.f32 0.25, %v324_v59 }
  0x2b   : > { %2020 = vst [vmem:[#allocation8_spill] sm:$0xff] %v1601_v29  ;;  %v454_v42 = vrot.slane %v1591_v10, 1  ;;  %v455_v43 = vrot.slane %v1594_v11, 1  ;;  %v1612_v61 = vmul.f32 0.25, %v325_v1  ;;  %v1614_v55 = vmul.f32 0.75, %v324_v59 }
  0x2c   : > { %2021 = vst [vmem:[#allocation9_spill] sm:$0xff] %v1607_v46  ;;  %v453_v53 = vsel %vm438_vm0, %v451_v16, %v452_v19  ;;  %v1618_v56 = vmul.f32 0.75, %v325_v1  ;;  %v1622_v27 = vmul.f32 0.75, %v1999_v15  ;;  %v2027_v16 = vunpack.c.l.bf16 %v1582_v58 }
  0x2d   : > { %2022 = vst [vmem:[#allocation10_spill] sm:$0xff] %v1610_v44  ;;  %v456_v54 = vsel %vm438_vm0, %v454_v42, %v455_v43  ;;  %v475_v5 = vadd.f32 %v453_v53, %v1589_v2  ;;  %v374_v59 = vadd.f32 %v1614_v55, %v1601_v29  ;;  %v495_v42 = vmul.f32 0.25, %v1452_v26 }
  0x2e   : > { %2023 = vst [vmem:[#allocation11_spill] sm:$0xff] %v1612_v61  ;;  %v476_v9 = vadd.f32 %v456_v54, %v1603_v32  ;;  %v1627_v19 = vmul.f32 0.75, %v2027_v16  ;;  %v1636_v43 = vadd.f32 %v1618_v56, %v1607_v46  ;;  %v376_v54 = vadd.f32 %v1622_v27, %v1610_v44 }
  0x2f   : > { %2024 = vst [vmem:[#allocation12_spill] sm:$0xff] %v1614_v55  ;;  %v1644_v58 = vmul.f32 0.25, %v374_v59  ;;  %v1646_v55 = vmul.f32 0.75, %v374_v59  ;;  %v496_v59 = vmul.f32 0.25, %v1456_v28  ;;  %v497_v28 = vmul.f32 0.25, %v1508_v60 }
  0x30   : > { %2025 = vst [vmem:[#allocation13_spill] sm:$0xff] %v1618_v56  ;;  %v1299_v15 = vpack.c.bf16 %v476_v9, %v475_v5  ;;  %v1642_v16 = vadd.f32 %v1627_v19, %v1612_v61  ;;  %v1648_v26 = vmul.f32 0.25, %v376_v54  ;;  %v1651_v1 = vmul.f32 0.75, %v1636_v43 }
  0x31   : > { %2026 = vst [vmem:[#allocation14_spill] sm:$0xff] %v1622_v27  ;;  %v1653_v53 = vmul.f32 0.75, %v376_v54  ;;  %v520_v56 = vrot.slane %v495_v42, 1  ;;  %v457_v5 = vrot.slane %v1646_v55, 1  ;;  %v2029_v42 = vrot.slane %v1458_v30, 1 }
  0x32   : > { %2028 = vst [vmem:[#allocation15_spill] sm:$0xff] %v1627_v19  ;;  %v1657_v27 = vmul.f32 0.75, %v1642_v16  ;;  %v458_v19 = vrot.slane %v1651_v1, 1  ;;  %v523_v33 = vrot.slane %v496_v59, 1  ;;  %v498_v25 = vmul.f32 0.25, %v1521_v63 }
  0x33   : > { %1327 = vst [vmem:[%s1515_s26 + $0x10] sm:$0xff] %v1299_v15   ;;  %v460_v52 = vrot.slane %v1653_v53, 1  ;;  %v521_v15 = vsel %vm438_vm0, %v2029_v42, %v520_v56  ;;  %v560_v9 = vadd.f32 %v520_v56, %v1465_v35  ;;  %v499_v46 = vmul.f32 0.25, %v1569_v51 }
  0x34   : > { %v461_v38 = vrot.slane %v1657_v27, 1  ;;  %v559_v61 = vadd.f32 %v521_v15, %v1460_v31  ;;  %v459_v44 = vsel %vm438_vm0, %v457_v5, %v458_v19  ;;  %v2030_v31 = vrot.slane %v1462_v34, 1 }
  0x35   : > { %v477_v30 = vadd.f32 %v459_v44, %v1644_v58  ;;  %v576_v24 = vpack.c.bf16 %v560_v9, %v560_v9  ;;  %v562_v56 = vadd.f32 %v523_v33, %v1470_v37  ;;  %v526_v60 = vrot.slane %v497_v28, 1 }
  0x36   : > { %v462_v54 = vsel %vm438_vm0, %v460_v52, %v461_v38  ;;  %v575_v42 = vpack.c.bf16 %v559_v61, %v559_v61  ;;  %v524_v35 = vsel %vm438_vm0, %v2030_v31, %v523_v33  ;;  %v2031_v44 = vrot.slane %v1528_v6, 1 }
  0x37   : > { %v478_v29 = vadd.f32 %v462_v54, %v1648_v26  ;;  %v604_v5 = vshll.u32 %v576_v24, 16  ;;  %v561_v51 = vadd.f32 %v524_v35, %v1467_v36  ;;  %v578_v52 = vpack.c.bf16 %v562_v56, %v562_v56 }
  0x38   : > { %v595_v19 = vshrl.u32 %v575_v42, 16  ;;  %v598_v63 = vshll.u32 %v575_v42, 16  ;;  %v527_v61 = vsel %vm438_vm0, %v2031_v44, %v526_v60  ;;  %v564_v9 = vadd.f32 %v526_v60, %v1526_v4 }
  0x39   : > { %v1304_v38 = vpack.c.bf16 %v478_v29, %v477_v30  ;;  %v606_v54 = vrot.slane %v604_v5, 5  ;;  %v577_v15 = vpack.c.bf16 %v561_v51, %v561_v51  ;;  %v618_v37 = vshll.u32 %v578_v52, 16 }
  0x3a   : > { %v597_v34 = vrot.slane %v595_v19, 4  ;;  %v600_v59 = vrot.slane %v598_v63, 5  ;;  %v563_v33 = vadd.f32 %v527_v61, %v1523_v3  ;;  %v580_v24 = vpack.c.bf16 %v564_v9, %v564_v9 }
  0x3b   : > { %1328 = vst [vmem:[%s1515_s26 + $0x18] sm:$0xff] %v1304_v38   ;;  %v529_v28 = vrot.slane %v498_v25, 1  ;;  %v609_v29 = vshrl.u32 %v577_v15, 16  ;;  %v612_v30 = vshll.u32 %v577_v15, 16  ;;  %v532_v42 = vrot.slane %v499_v46, 1 }
  0x3c   : > { %v601_v36 = vor.u32 %v600_v59, %v597_v34  ;;  %v620_v4 = vrot.slane %v618_v37, 5  ;;  %v579_v31 = vpack.c.bf16 %v563_v33, %v563_v33  ;;  %v632_v35 = vshll.u32 %v580_v24, 16 }
  0x3d   : > { %v2034_v56 = vrot.slane %v1542_v14, 1  ;;  %v611_v25 = vrot.slane %v609_v29, 4  ;;  %v614_v46 = vrot.slane %v612_v30, 5  ;;  %v566_v38 = vadd.f32 %v529_v28, %v1533_v8 }
  0x3e   : > { %v602_v3 = vrot.slane %v601_v36, 4  ;;  %v623_v63 = vshrl.u32 %v579_v31, 16  ;;  %v626_v5 = vshll.u32 %v579_v31, 16  ;;  %v634_v51 = vrot.slane %v632_v35, 5 }
  0x3f   : > { %v530_v60 = vsel %vm438_vm0, %v2034_v56, %v529_v28  ;;  %v615_v52 = vor.u32 %v614_v46, %v611_v25  ;;  %v2035_v61 = vrot.slane %v1589_v2, 1  ;;  %v582_v15 = vpack.c.bf16 %v566_v38, %v566_v38 }
  0x40   : > { %v565_v19 = vadd.f32 %v530_v60, %v1530_v7  ;;  %v607_v14 = vsel %vm1691_vm3, %v602_v3, %v606_v54  ;;  %v625_v34 = vrot.slane %v623_v63, 4  ;;  %v628_v59 = vrot.slane %v626_v5, 5 }
  0x41   : > { %v533_v9 = vsel %vm438_vm0, %v2035_v61, %v532_v42  ;;  %714 = vst [vmem:[%s1702_s29] sm:$0xf] %v607_v14  ;;  %v616_v37 = vrot.slane %v615_v52, 4  ;;  %v568_v8 = vadd.f32 %v532_v42, %v1587_v0  ;;  %v646_v54 = vshll.u32 %v582_v15, 16 }
  0x42   : > { %v581_v44 = vpack.c.bf16 %v565_v19, %v565_v19  ;;  %v567_v7 = vadd.f32 %v533_v9, %v1584_v62  ;;  %v629_v28 = vor.u32 %v628_v59, %v625_v34  ;;  %v500_v29 = vmul.f32 0.25, %v1579_v57 }
  0x43   : > { %v621_v2 = vsel %vm1691_vm3, %v616_v37, %v620_v4  ;;  %v584_v35 = vpack.c.bf16 %v568_v8, %v568_v8  ;;  %v648_v62 = vrot.slane %v646_v54, 5  ;;  %v501_v42 = vmul.f32 0.25, %v1636_v43 }
  0x44   : > { %v637_v33 = vshrl.u32 %v581_v44, 16  ;;  %v640_v24 = vshll.u32 %v581_v44, 16  ;;  %v583_v36 = vpack.c.bf16 %v567_v7, %v567_v7  ;;  %715 = vst [vmem:[%s1702_s29 + $0x4] sm:$0xf] %v621_v2  ;;  %v630_v56 = vrot.slane %v629_v28, 4 }
  0x45   : > { %v660_v46 = vshll.u32 %v584_v35, 16  ;;  %v535_v0 = vrot.slane %v500_v29, 1  ;;  %v502_v63 = vmul.f32 0.25, %v1642_v16  ;;  %v2036_v14 = vrot.slane %v1603_v32, 1 }
  0x46   : > { %v639_v30 = vrot.slane %v637_v33, 4  ;;  %v642_v31 = vrot.slane %v640_v24, 5  ;;  %v651_v60 = vshrl.u32 %v583_v36, 16  ;;  %v654_v3 = vshll.u32 %v583_v36, 16 }
  0x47   : > { %v635_v57 = vsel %vm1691_vm3, %v630_v56, %v634_v51  ;;  %v662_v38 = vrot.slane %v660_v46, 5  ;;  %v536_v52 = vsel %vm438_vm0, %v2036_v14, %v535_v0  ;;  %v570_v44 = vadd.f32 %v535_v0, %v1594_v11 }
  0x48   : > { %v643_v25 = vor.u32 %v642_v31, %v639_v30  ;;  %v653_v19 = vrot.slane %v651_v60, 4  ;;  %v656_v4 = vrot.slane %v654_v3, 5  ;;  %716 = vst [vmem:[%s1702_s29 + $0x8] sm:$0xf] %v635_v57  ;;  %v569_v43 = vadd.f32 %v536_v52, %v1591_v10 }
  0x49   : > { %v538_v9 = vrot.slane %v501_v42, 1  ;;  %v541_v34 = vrot.slane %v502_v63, 1  ;;  %v586_v59 = vpack.c.bf16 %v570_v44, %v570_v44  ;;  %v382_v16 = vadd.f32 %v1440_v17, %v1476_v39 }
  0x4a   : > { %v644_v5 = vrot.slane %v643_v25, 4  ;;  %v657_v61 = vor.u32 %v656_v4, %v653_v19  ;;  %v585_v32 = vpack.c.bf16 %v569_v43, %v569_v43  ;;  %v2037_v7 = vrot.slane %v1644_v58, 1 }
  0x4b   : > { %v572_v37 = vadd.f32 %v538_v9, %v1651_v1  ;;  %v674_v10 = vshll.u32 %v586_v59, 16  ;;  %v2038_v24 = vrot.slane %v1648_v26, 1  ;;  %v574_v28 = vadd.f32 %v541_v34, %v1657_v27 }
  0x4c   : > { %v649_v51 = vsel %vm1691_vm3, %v644_v5, %v648_v62  ;;  %v658_v15 = vrot.slane %v657_v61, 4  ;;  %v539_v11 = vsel %vm438_vm0, %v2037_v7, %v538_v9  ;;  %v665_v39 = vshrl.u32 %v585_v32, 16 }
  0x4d   : > { %717 = vst [vmem:[%s1702_s29 + $0xc] sm:$0xf] %v649_v51  ;;  %v571_v33 = vadd.f32 %v539_v11, %v1646_v55  ;;  %v542_v8 = vsel %vm438_vm0, %v2038_v24, %v541_v34  ;;  %v668_v54 = vshll.u32 %v585_v32, 16  ;;  %v588_v36 = vpack.c.bf16 %v572_v37, %v572_v37 }
  0x4e   : > { %v663_v17 = vsel %vm1691_vm3, %v658_v15, %v662_v38  ;;  %v573_v29 = vadd.f32 %v542_v8, %v1653_v53  ;;  %v590_v1 = vpack.c.bf16 %v574_v28, %v574_v28  ;;  %v1748_v55 = vadd.f32 %v1443_v20, %v1478_v40 }
  0x4f   : > { %718 = vst [vmem:[%s1702_s29 + $0x10] sm:$0xf] %v663_v17  ;;  %v587_v58 = vpack.c.bf16 %v571_v33, %v571_v33  ;;  %v667_v26 = vrot.slane %v665_v39, 4  ;;  %v670_v2 = vrot.slane %v668_v54, 5  ;;  %v676_v30 = vrot.slane %v674_v10, 5  ;;  %v2039_v17 = vld [vmem:[#allocation8_spill] sm:$0xff] }
  0x50   : > { %v688_v31 = vshll.u32 %v588_v36, 16  ;;  %v589_v56 = vpack.c.bf16 %v573_v29, %v573_v29  ;;  %v702_v62 = vshll.u32 %v590_v1, 16  ;;  %v384_v25 = vadd.f32 %v1445_v21, %v1480_v41  ;;  %v2040_v39 = vld [vmem:[#allocation2_spill] sm:$0xff] }
  0x51   : > { %v679_v27 = vshrl.u32 %v587_v58, 16  ;;  %v682_v35 = vshll.u32 %v587_v58, 16  ;;  %v671_v60 = vor.u32 %v670_v2, %v667_v26  ;;  %v1754_v53 = vadd.f32 %v1447_v22, %v1485_v45  ;;  %v308_v26 = vld [vmem:[%s1430_s22 + $0x48] sm:$0xf] }
  0x52   : > { %v690_v3 = vrot.slane %v688_v31, 5  ;;  %v693_v40 = vshrl.u32 %v589_v56, 16  ;;  %v696_v0 = vshll.u32 %v589_v56, 16  ;;  %v704_v57 = vrot.slane %v702_v62, 5  ;;  %v2042_v31 = vld [vmem:[#allocation3_spill] sm:$0xff]  ;;  %v2044_v56 = vld [vmem:[#allocation4_spill] sm:$0xff] }
  0x53   : > { %v681_v46 = vrot.slane %v679_v27, 4  ;;  %v684_v20 = vrot.slane %v682_v35, 5  ;;  %v672_v42 = vrot.slane %v671_v60, 4  ;;  %v1756_v19 = vmul.f32 0.25, %v382_v16  ;;  %v2043_v35 = vld [vmem:[#allocation10_spill] sm:$0xff] }
  0x54   : > { %v1758_v4 = vmul.f32 0.75, %v382_v16  ;;  %v695_v5 = vrot.slane %v693_v40, 4  ;;  %v698_v38 = vrot.slane %v696_v0, 5  ;;  %v1761_v21 = vmul.f32 0.75, %v1748_v55 }
  0x55   : > { %v685_v63 = vor.u32 %v684_v20, %v681_v46  ;;  %v677_v22 = vsel %vm1691_vm3, %v672_v42, %v676_v30  ;;  %v1765_v41 = vmul.f32 0.75, %v384_v25  ;;  %v1768_v45 = vmul.f32 0.75, %v1754_v53  ;;  %v2041_v30 = vld [vmem:[#allocation9_spill] sm:$0xff]  ;;  %v2045_v46 = vld [vmem:[#allocation11_spill] sm:$0xff] }
  0x56   : > { %v762_v14 = vrot.slane %v1758_v4, 1  ;;  %719 = vst [vmem:[%s1702_s29 + $0x14] sm:$0xf] %v677_v22  ;;  %v699_v44 = vor.u32 %v698_v38, %v695_v5  ;;  %v1772_v61 = vmul.f32 0.25, %v384_v25  ;;  %v763_v43 = vrot.slane %v1761_v21, 1  ;;  %v2046_v20 = vld [vmem:[#allocation5_spill] sm:$0xff] }
  0x57   : > { %v686_v52 = vrot.slane %v685_v63, 4  ;;  %v765_v9 = vrot.slane %v1765_v41, 1  ;;  %v766_v34 = vrot.slane %v1768_v45, 1  ;;  %v842_v51 = vrot.slane %v1756_v19, 1  ;;  %v309_v42 = vld [vmem:[%s1430_s22 + $0x4c] sm:$0x1] }
  0x58   : > { %v386_v59 = vadd.f32 %v1488_v47, %v1538_v12  ;;  %v700_v15 = vrot.slane %v699_v44, 4  ;;  %v764_v32 = vsel %vm438_vm0, %v762_v14, %v763_v43  ;;  %v1785_v7 = vadd.f32 %v1490_v48, %v1540_v13 }
  0x59   : > { %v691_v16 = vsel %vm1691_vm3, %v686_v52, %v690_v3  ;;  %v767_v11 = vsel %vm438_vm0, %v765_v9, %v766_v34  ;;  %v794_v37 = vadd.f32 %v764_v32, %v1756_v19  ;;  %v388_v10 = vadd.f32 %v1492_v49, %v1546_v18  ;;  %v2047_v32 = vld [vmem:[#allocation6_spill] sm:$0xff] }
  0x5a   : > { %720 = vst [vmem:[%s1702_s29 + $0x18] sm:$0xf] %v691_v16  ;;  %v1794_v47 = vadd.f32 %v1494_v50, %v1549_v23  ;;  %v705_v12 = vsel %vm1691_vm3, %v700_v15, %v704_v57  ;;  %v795_v33 = vadd.f32 %v767_v11, %v1772_v61  ;;  %v1799_v24 = vmul.f32 0.25, %v386_v59 }
  0x5b   : > { %v1801_v48 = vmul.f32 0.75, %v386_v59  ;;  %721 = vst [vmem:[%s1702_s29 + $0x1c] sm:$0xf] %v705_v12  ;;  %v1810_v49 = vmul.f32 0.25, %v388_v10  ;;  %v1813_v50 = vmul.f32 0.75, %v1785_v7  ;;  %v1815_v13 = vmul.f32 0.75, %v388_v10 }
  0x5c   : > { %v1818_v18 = vmul.f32 0.75, %v1794_v47  ;;  %v1309_v23 = vpack.c.bf16 %v795_v33, %v794_v37  ;;  %v845_v8 = vrot.slane %v1772_v61, 1  ;;  %v390_v54 = vadd.f32 %v2040_v39, %v2039_v17  ;;  %v2049_v10 = vld [vmem:[#allocation7_spill] sm:$0xff] }
  0x5d   : > { %v768_v28 = vrot.slane %v1801_v48, 1  ;;  %v769_v36 = vrot.slane %v1813_v50, 1  ;;  %v771_v58 = vrot.slane %v1815_v13, 1  ;;  %v848_v1 = vrot.slane %v1799_v24, 1 }
  0x5e   : > { %v772_v29 = vrot.slane %v1818_v18, 1  ;;  %1310 = vst [vmem:[%s1808_s6] sm:$0xff] %v1309_v23   ;;  %v851_v2 = vrot.slane %v1810_v49, 1  ;;  %v1833_v27 = vadd.f32 %v2042_v31, %v2041_v30  ;;  %v392_v62 = vadd.f32 %v2044_v56, %v2043_v35  ;;  %v2053_v35 = vld [vmem:[#allocation14_spill] sm:$0xff] }
  0x5f   : > { %v1837_v60 = vmul.f32 0.25, %v390_v54  ;;  %v770_v3 = vsel %vm438_vm0, %v768_v28, %v769_v36  ;;  %v1843_v40 = vadd.f32 %v2046_v20, %v2045_v46  ;;  %v1845_v0 = vmul.f32 0.75, %v390_v54 }
  0x60   : > { %v773_v25 = vsel %vm438_vm0, %v771_v58, %v772_v29  ;;  %v796_v57 = vadd.f32 %v770_v3, %v1799_v24  ;;  %v1851_v5 = vmul.f32 0.75, %v1833_v27  ;;  %v328_v38 = vunpack.c.l.bf16 %v308_v26  ;;  %v2051_v58 = vld [vmem:[#allocation12_spill] sm:$0xff]  ;;  %v2052_v26 = vld [vmem:[#allocation13_spill] sm:$0xff] }
  0x61   : > { %v797_v63 = vadd.f32 %v773_v25, %v1810_v49  ;;  %v1853_v22 = vmul.f32 0.25, %v392_v62  ;;  %v1855_v14 = vmul.f32 0.75, %v392_v62  ;;  %v1858_v52 = vmul.f32 0.75, %v1843_v40  ;;  %v2054_v62 = vld [vmem:[#allocation15_spill] sm:$0xff] }
  0x62   : > { %v774_v44 = vrot.slane %v1845_v0, 1  ;;  %v775_v9 = vrot.slane %v1851_v5, 1  ;;  %v854_v34 = vrot.slane %v1837_v60, 1  ;;  %v329_v59 = vunpack.c.l.bf16 %v309_v42 }
  0x63   : > { %v1314_v43 = vpack.c.bf16 %v797_v63, %v796_v57  ;;  %v777_v16 = vrot.slane %v1855_v14, 1  ;;  %v778_v15 = vrot.slane %v1858_v52, 1  ;;  %v2048_v11 = vunpack.c.l.bf16 %v2047_v32 }
  0x64   : > { %v2050_v12 = vunpack.c.l.bf16 %v2049_v10  ;;  %v776_v23 = vsel %vm438_vm0, %v774_v44, %v775_v9  ;;  %v380_v28 = vmul.f32 0.25, %v328_v38  ;;  %v381_v17 = vmul.f32 0.25, %v329_v59 }
  0x65   : > { %v378_v37 = vmul.f32 0.25, %v2048_v11  ;;  %1329 = vst [vmem:[%s1808_s6 + $0x8] sm:$0xff] %v1314_v43   ;;  %v818_v39 = vmul.f32 0.25, %v1748_v55  ;;  %v779_v54 = vsel %vm438_vm0, %v777_v16, %v778_v15  ;;  %v798_v36 = vadd.f32 %v776_v23, %v1837_v60 }
  0x66   : > { %v379_v33 = vmul.f32 0.25, %v2050_v12  ;;  %v799_v31 = vadd.f32 %v779_v54, %v1853_v22  ;;  %v396_v56 = vadd.f32 %v380_v28, %v2053_v35  ;;  %v1881_v3 = vadd.f32 %v381_v17, %v2054_v62 }
  0x67   : > { %v394_v29 = vadd.f32 %v378_v37, %v2051_v58  ;;  %v843_v25 = vrot.slane %v818_v39, 1  ;;  %v819_v42 = vmul.f32 0.25, %v1754_v53  ;;  %v857_v63 = vrot.slane %v1853_v22, 1 }
  0x68   : > { %v1876_v30 = vadd.f32 %v379_v33, %v2052_v26  ;;  %v1319_v57 = vpack.c.bf16 %v799_v31, %v798_v36  ;;  %v1892_v38 = vmul.f32 0.75, %v396_v56  ;;  %v1895_v44 = vmul.f32 0.75, %v1881_v3 }
  0x69   : > { %v1883_v46 = vmul.f32 0.25, %v394_v29  ;;  %v1885_v55 = vmul.f32 0.75, %v394_v29  ;;  %v1897_v43 = vmul.f32 0.25, %v396_v56  ;;  %v844_v16 = vsel %vm438_vm0, %v842_v51, %v843_v25 }
  0x6a   : > { %v1888_v20 = vmul.f32 0.75, %v1876_v30  ;;  %1330 = vst [vmem:[%s1808_s6 + $0x10] sm:$0xff] %v1319_v57   ;;  %v783_v53 = vrot.slane %v1892_v38, 1  ;;  %v784_v15 = vrot.slane %v1895_v44, 1  ;;  %v882_v11 = vadd.f32 %v844_v16, %v1758_v4 }
  0x6b   : > { %v780_v9 = vrot.slane %v1885_v55, 1  ;;  %v860_v32 = vrot.slane %v1883_v46, 1  ;;  %v883_v10 = vadd.f32 %v843_v25, %v1761_v21  ;;  %v846_v12 = vrot.slane %v819_v42, 1 }
  0x6c   : > { %v781_v59 = vrot.slane %v1888_v20, 1  ;;  %v820_v33 = vmul.f32 0.25, %v1785_v7  ;;  %v785_v19 = vsel %vm438_vm0, %v783_v53, %v784_v15  ;;  %v898_v23 = vpack.c.bf16 %v882_v11, %v882_v11 }
  0x6d   : > { %v821_v28 = vmul.f32 0.25, %v1794_v47  ;;  %v801_v17 = vadd.f32 %v785_v19, %v1897_v43  ;;  %v899_v39 = vpack.c.bf16 %v883_v10, %v883_v10  ;;  %v847_v4 = vsel %vm438_vm0, %v845_v8, %v846_v12 }
  0x6e   : > { %v782_v37 = vsel %vm438_vm0, %v780_v9, %v781_v59  ;;  %v885_v21 = vadd.f32 %v846_v12, %v1768_v45  ;;  %v915_v54 = vshrl.u32 %v898_v23, 16  ;;  %v918_v36 = vshll.u32 %v898_v23, 16 }
  0x6f   : > { %v800_v51 = vadd.f32 %v782_v37, %v1883_v46  ;;  %v884_v7 = vadd.f32 %v847_v4, %v1765_v41  ;;  %v849_v58 = vrot.slane %v820_v33, 1  ;;  %v924_v26 = vshll.u32 %v899_v39, 16 }
  0x70   : > { %v901_v31 = vpack.c.bf16 %v885_v21, %v885_v21  ;;  %v852_v35 = vrot.slane %v821_v28, 1  ;;  %v917_v47 = vrot.slane %v915_v54, 4  ;;  %v920_v56 = vrot.slane %v918_v36, 5 }
  0x71   : > { %v1324_v29 = vpack.c.bf16 %v801_v17, %v800_v51  ;;  %v900_v62 = vpack.c.bf16 %v884_v7, %v884_v7  ;;  %v850_v61 = vsel %vm438_vm0, %v848_v1, %v849_v58  ;;  %v926_v8 = vrot.slane %v924_v26, 5 }
  0x72   : > { %v938_v45 = vshll.u32 %v901_v31, 16  ;;  %v886_v25 = vadd.f32 %v850_v61, %v1801_v48  ;;  %v887_v41 = vadd.f32 %v849_v58, %v1813_v50  ;;  %v921_v42 = vor.u32 %v920_v56, %v917_v47 }
  0x73   : > { %1331 = vst [vmem:[%s1808_s6 + $0x18] sm:$0xff] %v1324_v29   ;;  %v929_v57 = vshrl.u32 %v900_v62, 16  ;;  %v932_v9 = vshll.u32 %v900_v62, 16  ;;  %v853_v59 = vsel %vm438_vm0, %v851_v2, %v852_v35  ;;  %v889_v11 = vadd.f32 %v852_v35, %v1818_v18 }
  0x74   : > { %v940_v16 = vrot.slane %v938_v45, 5  ;;  %v902_v53 = vpack.c.bf16 %v886_v25, %v886_v25  ;;  %v903_v15 = vpack.c.bf16 %v887_v41, %v887_v41  ;;  %v888_v24 = vadd.f32 %v853_v59, %v1815_v13 }
  0x75   : > { %v922_v48 = vrot.slane %v921_v42, 4  ;;  %v931_v50 = vrot.slane %v929_v57, 4  ;;  %v934_v1 = vrot.slane %v932_v9, 5  ;;  %v905_v13 = vpack.c.bf16 %v889_v11, %v889_v11 }
  0x76   : > { %v943_v37 = vshrl.u32 %v902_v53, 16  ;;  %v946_v49 = vshll.u32 %v902_v53, 16  ;;  %v952_v10 = vshll.u32 %v903_v15, 16  ;;  %v904_v2 = vpack.c.bf16 %v888_v24, %v888_v24 }
  0x77   : > { %v927_v12 = vsel %vm1691_vm3, %v922_v48, %v926_v8  ;;  %v935_v33 = vor.u32 %v934_v1, %v931_v50  ;;  %v822_v19 = vmul.f32 0.25, %v1833_v27  ;;  %v966_v18 = vshll.u32 %v905_v13, 16 }
  0x78   : > { %1034 = vst [vmem:[%s1935_s9] sm:$0xf] %v927_v12  ;;  %v945_v51 = vrot.slane %v943_v37, 4  ;;  %v948_v23 = vrot.slane %v946_v49, 5  ;;  %v954_v28 = vrot.slane %v952_v10, 5  ;;  %v957_v17 = vshrl.u32 %v904_v2, 16 }
  0x79   : > { %v936_v39 = vrot.slane %v935_v33, 4  ;;  %v960_v4 = vshll.u32 %v904_v2, 16  ;;  %v855_v21 = vrot.slane %v822_v19, 1  ;;  %v823_v7 = vmul.f32 0.25, %v1843_v40 }
  0x7a   : > { %v949_v54 = vor.u32 %v948_v23, %v945_v51  ;;  %v959_v36 = vrot.slane %v957_v17, 4  ;;  %v824_v58 = vmul.f32 0.25, %v1876_v30  ;;  %v863_v29 = vrot.slane %v1897_v43, 1 }
  0x7b   : > { %v941_v27 = vsel %vm1691_vm3, %v936_v39, %v940_v16  ;;  %v962_v26 = vrot.slane %v960_v4, 5  ;;  %v856_v31 = vsel %vm438_vm0, %v854_v34, %v855_v21  ;;  %v891_v56 = vadd.f32 %v855_v21, %v1851_v5 }
  0x7c   : > { %1035 = vst [vmem:[%s1935_s9 + $0x4] sm:$0xf] %v941_v27  ;;  %v950_v35 = vrot.slane %v949_v54, 4  ;;  %v890_v47 = vadd.f32 %v856_v31, %v1845_v0  ;;  %v858_v40 = vrot.slane %v823_v7, 1  ;;  %v968_v30 = vrot.slane %v966_v18, 5 }
  0x7d   : > { %v963_v62 = vor.u32 %v962_v26, %v959_v36  ;;  %v861_v61 = vrot.slane %v824_v58, 1  ;;  %v825_v43 = vmul.f32 0.25, %v1881_v3  ;;  %v907_v60 = vpack.c.bf16 %v891_v56, %v891_v56 }
  0x7e   : > { %v955_v8 = vsel %vm1691_vm3, %v950_v35, %v954_v28  ;;  %v906_v45 = vpack.c.bf16 %v890_v47, %v890_v47  ;;  %v859_v34 = vsel %vm438_vm0, %v857_v63, %v858_v40  ;;  %v893_v25 = vadd.f32 %v858_v40, %v1858_v52 }
  0x7f   : > { %1036 = vst [vmem:[%s1935_s9 + $0x8] sm:$0xf] %v955_v8  ;;  %v964_v0 = vrot.slane %v963_v62, 4  ;;  %v892_v5 = vadd.f32 %v859_v34, %v1855_v14  ;;  %v862_v3 = vsel %vm438_vm0, %v860_v32, %v861_v61  ;;  %v980_v57 = vshll.u32 %v907_v60, 16 }
  0x80   : > { %v971_v41 = vshrl.u32 %v906_v45, 16  ;;  %v974_v42 = vshll.u32 %v906_v45, 16  ;;  %v894_v9 = vadd.f32 %v862_v3, %v1885_v55  ;;  %v909_v63 = vpack.c.bf16 %v893_v25, %v893_v25 }
  0x81   : > { %v969_v22 = vsel %vm1691_vm3, %v964_v0, %v968_v30  ;;  %v908_v59 = vpack.c.bf16 %v892_v5, %v892_v5  ;;  %v895_v16 = vadd.f32 %v861_v61, %v1888_v20  ;;  %v982_v52 = vrot.slane %v980_v57, 5 }
  0x82   : > { %1037 = vst [vmem:[%s1935_s9 + $0xc] sm:$0xf] %v969_v22  ;;  %v973_v14 = vrot.slane %v971_v41, 4  ;;  %v976_v53 = vrot.slane %v974_v42, 5  ;;  %v910_v15 = vpack.c.bf16 %v894_v9, %v894_v9  ;;  %v994_v32 = vshll.u32 %v909_v63, 16 }
  0x83   : > { %v985_v46 = vshrl.u32 %v908_v59, 16  ;;  %v988_v24 = vshll.u32 %v908_v59, 16  ;;  %v911_v48 = vpack.c.bf16 %v895_v16, %v895_v16  ;;  %v864_v55 = vrot.slane %v825_v43, 1 }
  0x84   : > { %v977_v50 = vor.u32 %v976_v53, %v973_v14  ;;  %v999_v1 = vshrl.u32 %v910_v15, 16  ;;  %v1002_v11 = vshll.u32 %v910_v15, 16  ;;  %v996_v19 = vrot.slane %v994_v32, 5 }
  0x85   : > { %v987_v37 = vrot.slane %v985_v46, 4  ;;  %v990_v49 = vrot.slane %v988_v24, 5  ;;  %v1008_v10 = vshll.u32 %v911_v48, 16  ;;  %v865_v33 = vsel %vm438_vm0, %v863_v29, %v864_v55 }
  0x86   : > { %v978_v2 = vrot.slane %v977_v50, 4  ;;  %v1001_v12 = vrot.slane %v999_v1, 4  ;;  %v1004_v20 = vrot.slane %v1002_v11, 5  ;;  %v896_v51 = vadd.f32 %v865_v33, %v1892_v38 }
  0x87   : > { %v991_v13 = vor.u32 %v990_v49, %v987_v37  ;;  %v897_v23 = vadd.f32 %v864_v55, %v1895_v44  ;;  %v1010_v39 = vrot.slane %v1008_v10, 5 }
  0x88   : > { %v983_v28 = vsel %vm1691_vm3, %v978_v2, %v982_v52  ;;  %v1005_v17 = vor.u32 %v1004_v20, %v1001_v12  ;;  %v912_v18 = vpack.c.bf16 %v896_v51, %v896_v51 }
  0x89   : > { %1038 = vst [vmem:[%s1935_s9 + $0x10] sm:$0xf] %v983_v28  ;;  %v992_v4 = vrot.slane %v991_v13, 4  ;;  %v913_v21 = vpack.c.bf16 %v897_v23, %v897_v23 }
  0x8a   : > { %v1006_v54 = vrot.slane %v1005_v17, 4  ;;  %v1013_v7 = vshrl.u32 %v912_v18, 16  ;;  %v1016_v58 = vshll.u32 %v912_v18, 16 }
  0x8b   : > { %v997_v36 = vsel %vm1691_vm3, %v992_v4, %v996_v19  ;;  %v1022_v38 = vshll.u32 %v913_v21, 16 }
  0x8c   : > { %1039 = vst [vmem:[%s1935_s9 + $0x14] sm:$0xf] %v997_v36  ;;  %v1011_v44 = vsel %vm1691_vm3, %v1006_v54, %v1010_v39  ;;  %v1015_v29 = vrot.slane %v1013_v7, 4  ;;  %v1018_v27 = vrot.slane %v1016_v58, 5 }
  0x8d   : > { %1040 = vst [vmem:[%s1935_s9 + $0x18] sm:$0xf] %v1011_v44  ;;  %v1024_v31 = vrot.slane %v1022_v38, 5 }
  0x8e   : > { %v1019_v26 = vor.u32 %v1018_v27, %v1015_v29 }
  0x90   : > { %v1020_v35 = vrot.slane %v1019_v26, 4 }
  0x92   : > { %v1025_v47 = vsel %vm1691_vm3, %v1020_v35, %v1024_v31 }
  0x93   : > { %1041 = vst [vmem:[%s1935_s9 + $0x1c] sm:$0xf] %v1025_v47 }
  0x94 PF: > { %s15_s17 = sadd.s32 1, %s1379_s17   ;;  %s2055_s15 = smov %s1375_s16 }
  0x95   : > { %p12_p5 = scmp.ge.s32.totalorder %s15_s17, 4   ;;  %s2056_s16 = smov %s2058_s18 }
  0x97   :  { %14 = sbr.rel (!%p12_p5) target bundleno = 2 (0x2), region = 90 }

// kernel: _lambda_.16
= control target key start
LH: loop header
LB: loop body
LE: loop exit
PB: predicated region body
PF: predicated region fallthrough
CT: control target
= control target key end

     0   :  { %s1328_s12 = smov 0   ;;  %s1330_s13 = smov 0   ;;  %s1538_s0 = inlined_call_operand.vmem [shape: bf16[2,16,16,256], index: 0, kind: input, shape index: {}]   ;;  %s1539_s1 = inlined_call_operand.vmem [shape: bf16[1,1,256,128], index: 1, kind: input, shape index: {}]   ;;  %s1540_s2 = inlined_call_operand.vmem [shape: f32[1,128], index: 2, kind: input, shape index: {}]   ;;  %s1541_s3 = inlined_call_operand.vmem [shape: bf16[2,256,128], index: 3, kind: output, shape index: {}]  }
   0x1   :  { %s1332_s14 = smov 0  }
   0x2 LB: > { %s25_s15 = sadd.s32 1, %s1302_s13  ;;  %p899_p0 = scmp.ge.s32.totalorder %s1306_s14, 1  ;;  %s1306_s14 = sphi %s1332_s14, %s13_s14   ;;  %s1302_s13 = sphi %s1330_s13, %s1543_s13   ;;  %s1298_s12 = sphi %s1328_s12, %s1542_s12  }
   0x3   : > { %p27_p1 = scmp.ge.s32.totalorder %s25_s15, 2  ;;  %p168_p2 = scmp.lt.s32.totalorder %s1306_s14, 3 }
   0x5   : > { %s1545_s15 = smov (%p27_p1, %s25_s15), 0  ;;  %p169_p3 = pnand %p899_p0, %p168_p2 }
   0x6   : > { %p202_p4 = scmp.lt.s32.totalorder (!%p169_p3), %s1298_s12, 1 }
   0x7   : > { %172 = sbr.rel (%p169_p3) target bundleno = 303 (0x12f), region = 32 }
   0xc   : > { %v1139_v0 = vld [vmem:[%s1539_s1 + $0x38] sm:$0xff]  ;;  %v1138_v2 = vld [vmem:[%s1539_s1 + $0x30] sm:$0xff]  ;;  %v1137_v4 = vld [vmem:[%s1539_s1 + $0x28] sm:$0xff]  ;;  %s1547_s12 = smov (!%p202_p4, %s1298_s12), 1 }
   0xd   : > { %v1147_v1 = vld [vmem:[%s1539_s1 + $0x78] sm:$0xff]  ;;  %546 = vmatpush.bf16.msra.mxu0 %v1139_v0  ;;  %1243 = vmatpush.bf16.msra.mxu2 %v1139_v0  ;;  %v1146_v3 = vld [vmem:[%s1539_s1 + $0x70] sm:$0xff]  ;;  %v1145_v5 = vld [vmem:[%s1539_s1 + $0x68] sm:$0xff]  ;;  %s1098_s17 = sshll.u32 %s1547_s12, 8  ;;  %s1099_s4 = sshll.u32 %s1547_s12, 7 }
   0xe   : > { %635 = vmatpush.bf16.msra.mxu1 %v1147_v1  ;;  %1251 = vmatpush.bf16.msra.mxu3 %v1147_v1  ;;  %v1136_v6 = vld [vmem:[%s1539_s1 + $0x20] sm:$0xff]  ;;  %v1135_v8 = vld [vmem:[%s1539_s1 + $0x18] sm:$0xff]  ;;  %v1134_v10 = vld [vmem:[%s1539_s1 + $0x10] sm:$0xff]  ;;  %s1395_s22 = scalar_lea.vmem %s1538_s0, %s1098_s17  ;;  %s1481_s7 = scalar_lea.vmem %s1541_s3, %s1099_s4 }
   0xf   : > { %v1144_v7 = vld [vmem:[%s1539_s1 + $0x60] sm:$0xff]  ;;  %v1143_v9 = vld [vmem:[%s1539_s1 + $0x58] sm:$0xff]  ;;  %v1142_v11 = vld [vmem:[%s1539_s1 + $0x50] sm:$0xff] }
  0x10   : > { %v1133_v12 = vld [vmem:[%s1539_s1 + $0x8] sm:$0xff]  ;;  %v1132_v14 = vld [vmem:[%s1539_s1] sm:$0xff]  ;;  %v914_v28 = vld [vmem:[%s1395_s22 + $0x10] sm:$0xf] }
  0x11   : > { %547 = vmatpush.bf16.msra.mxu0 %v1138_v2  ;;  %1244 = vmatpush.bf16.msra.mxu2 %v1138_v2  ;;  %v1141_v13 = vld [vmem:[%s1539_s1 + $0x48] sm:$0xff]  ;;  %v1140_v15 = vld [vmem:[%s1539_s1 + $0x40] sm:$0xff]  ;;  %v1103_v29 = vld [vmem:[%s1395_s22 + $0x14] sm:$0xf0] }
  0x12   : > { %636 = vmatpush.bf16.msra.mxu1 %v1146_v3  ;;  %1252 = vmatpush.bf16.msra.mxu3 %v1146_v3  ;;  %v906_v16 = vld [vmem:[%s1395_s22] sm:$0xf]  ;;  %v1101_v17 = vld [vmem:[%s1395_s22 + $0x4] sm:$0xf0]  ;;  %v1100_v20 = vld [vmem:[%s1395_s22 + $0x4] sm:$0xf]  ;;  %v915_v36 = vor.u32 %v1103_v29, %v914_v28 }
  0x13   : > { %v970_v18 = vld [vmem:[%s1395_s22 + $0x80] sm:$0xf]  ;;  %v1117_v19 = vld [vmem:[%s1395_s22 + $0x84] sm:$0xf0]  ;;  %v908_v21 = vld [vmem:[%s1395_s22 + $0x8] sm:$0xf0]  ;;  %v907_v24 = vor.u32 %v1101_v17, %v906_v16 }
  0x14   : > { %v1116_v22 = vld [vmem:[%s1395_s22 + $0x84] sm:$0xf]  ;;  %v972_v23 = vld [vmem:[%s1395_s22 + $0x88] sm:$0xf0]  ;;  %v971_v25 = vor.u32 %v1117_v19, %v970_v18  ;;  %v911_v26 = vor.u32 %v1100_v20, %v908_v21  ;;  %v978_v30 = vld [vmem:[%s1395_s22 + $0x90] sm:$0xf] }
  0x15   : > { %548 = vmatpush.bf16.msra.mxu0 %v1137_v4  ;;  %1245 = vmatpush.bf16.msra.mxu2 %v1137_v4  ;;  %v975_v27 = vor.u32 %v1116_v22, %v972_v23  ;;  %v1119_v31 = vld [vmem:[%s1395_s22 + $0x94] sm:$0xf0]  ;;  %v1102_v32 = vld [vmem:[%s1395_s22 + $0x14] sm:$0xf]  ;;  %v916_v33 = vld [vmem:[%s1395_s22 + $0x18] sm:$0xf0] }
  0x16   : > { %637 = vmatpush.bf16.msra.mxu1 %v1145_v5  ;;  %1253 = vmatpush.bf16.msra.mxu3 %v1145_v5  ;;  %v1118_v34 = vld [vmem:[%s1395_s22 + $0x94] sm:$0xf]  ;;  %v980_v35 = vld [vmem:[%s1395_s22 + $0x98] sm:$0xf0]  ;;  %v979_v37 = vor.u32 %v1119_v31, %v978_v30  ;;  %v919_v38 = vor.u32 %v1102_v32, %v916_v33  ;;  %v922_v40 = vld [vmem:[%s1395_s22 + $0x20] sm:$0xf] }
  0x17   : > { %v983_v39 = vor.u32 %v1118_v34, %v980_v35  ;;  %v1105_v41 = vld [vmem:[%s1395_s22 + $0x24] sm:$0xf0]  ;;  %v986_v42 = vld [vmem:[%s1395_s22 + $0xa0] sm:$0xf]  ;;  %v1104_v44 = vld [vmem:[%s1395_s22 + $0x24] sm:$0xf] }
  0x18   : > { %v1121_v43 = vld [vmem:[%s1395_s22 + $0xa4] sm:$0xf0]  ;;  %v924_v45 = vld [vmem:[%s1395_s22 + $0x28] sm:$0xf0]  ;;  %v1120_v46 = vld [vmem:[%s1395_s22 + $0xa4] sm:$0xf]  ;;  %v923_v48 = vor.u32 %v1105_v41, %v922_v40 }
  0x19   : > { %549 = vmatpush.bf16.msra.mxu0 %v1136_v6  ;;  %1246 = vmatpush.bf16.msra.mxu2 %v1136_v6  ;;  %v988_v47 = vld [vmem:[%s1395_s22 + $0xa8] sm:$0xf0]  ;;  %v987_v49 = vor.u32 %v1121_v43, %v986_v42  ;;  %v927_v50 = vor.u32 %v1104_v44, %v924_v45  ;;  %v930_v52 = vld [vmem:[%s1395_s22 + $0x30] sm:$0xf]  ;;  %v1107_v53 = vld [vmem:[%s1395_s22 + $0x34] sm:$0xf0] }
  0x1a   : > { %638 = vmatpush.bf16.msra.mxu1 %v1144_v7  ;;  %1254 = vmatpush.bf16.msra.mxu3 %v1144_v7  ;;  %v991_v51 = vor.u32 %v1120_v46, %v988_v47  ;;  %v994_v54 = vld [vmem:[%s1395_s22 + $0xb0] sm:$0xf]  ;;  %v1123_v55 = vld [vmem:[%s1395_s22 + $0xb4] sm:$0xf0]  ;;  %v1106_v56 = vld [vmem:[%s1395_s22 + $0x34] sm:$0xf]  ;;  %v931_v60 = vor.u32 %v1107_v53, %v930_v52 }
  0x1b   : > { %v932_v57 = vld [vmem:[%s1395_s22 + $0x38] sm:$0xf0]  ;;  %v1122_v58 = vld [vmem:[%s1395_s22 + $0xb4] sm:$0xf]  ;;  %v995_v61 = vor.u32 %v1123_v55, %v994_v54  ;;  %v938_v0 = vld [vmem:[%s1395_s22 + $0x40] sm:$0xf] }
  0x1c   : > { %v996_v59 = vld [vmem:[%s1395_s22 + $0xb8] sm:$0xf0]  ;;  %v935_v62 = vor.u32 %v1106_v56, %v932_v57  ;;  %v1109_v1 = vld [vmem:[%s1395_s22 + $0x44] sm:$0xf0]  ;;  %v1002_v2 = vld [vmem:[%s1395_s22 + $0xc0] sm:$0xf] }
  0x1d   : > { %550 = vmatpush.bf16.msra.mxu0 %v1135_v8  ;;  %1247 = vmatpush.bf16.msra.mxu2 %v1135_v8  ;;  %v999_v63 = vor.u32 %v1122_v58, %v996_v59  ;;  %v1125_v3 = vld [vmem:[%s1395_s22 + $0xc4] sm:$0xf0]  ;;  %v1108_v4 = vld [vmem:[%s1395_s22 + $0x44] sm:$0xf]  ;;  %v940_v5 = vld [vmem:[%s1395_s22 + $0x48] sm:$0xf0]  ;;  %v939_v8 = vor.u32 %v1109_v1, %v938_v0 }
  0x1e   : > { %639 = vmatpush.bf16.msra.mxu1 %v1143_v9  ;;  %1255 = vmatpush.bf16.msra.mxu3 %v1143_v9  ;;  %v1124_v6 = vld [vmem:[%s1395_s22 + $0xc4] sm:$0xf]  ;;  %v1004_v7 = vld [vmem:[%s1395_s22 + $0xc8] sm:$0xf0]  ;;  %v1003_v9 = vor.u32 %v1125_v3, %v1002_v2  ;;  %v1110_v16 = vld [vmem:[%s1395_s22 + $0x54] sm:$0xf] }
  0x1f   : > { %v948_v17 = vld [vmem:[%s1395_s22 + $0x58] sm:$0xf0]  ;;  %v1126_v18 = vld [vmem:[%s1395_s22 + $0xd4] sm:$0xf]  ;;  %v1112_v28 = vld [vmem:[%s1395_s22 + $0x64] sm:$0xf] }
  0x20   : > { %v1012_v19 = vld [vmem:[%s1395_s22 + $0xd8] sm:$0xf0]  ;;  %v951_v22 = vor.u32 %v1110_v16, %v948_v17  ;;  %v956_v29 = vld [vmem:[%s1395_s22 + $0x68] sm:$0xf0]  ;;  %v1128_v30 = vld [vmem:[%s1395_s22 + $0xe4] sm:$0xf] }
  0x21   : > { %551 = vmatpush.bf16.msra.mxu0 %v1134_v10  ;;  %1248 = vmatpush.bf16.msra.mxu2 %v1134_v10  ;;  %v943_v10 = vor.u32 %v1108_v4, %v940_v5  ;;  %v1015_v23 = vor.u32 %v1126_v18, %v1012_v19  ;;  %v1020_v31 = vld [vmem:[%s1395_s22 + $0xe8] sm:$0xf0]  ;;  %v959_v34 = vor.u32 %v1112_v28, %v956_v29  ;;  %v1114_v40 = vld [vmem:[%s1395_s22 + $0x74] sm:$0xf]  ;;  %v964_v41 = vld [vmem:[%s1395_s22 + $0x78] sm:$0xf0] }
  0x22   : > { %640 = vmatpush.bf16.msra.mxu1 %v1142_v11  ;;  %1256 = vmatpush.bf16.msra.mxu3 %v1142_v11  ;;  %v1007_v11 = vor.u32 %v1124_v6, %v1004_v7  ;;  %v1023_v35 = vor.u32 %v1128_v30, %v1020_v31  ;;  %v1130_v42 = vld [vmem:[%s1395_s22 + $0xf4] sm:$0xf]  ;;  %v1028_v43 = vld [vmem:[%s1395_s22 + $0xf8] sm:$0xf0]  ;;  %v967_v46 = vor.u32 %v1114_v40, %v964_v41 }
  0x23   : > { %v1031_v47 = vor.u32 %v1130_v42, %v1028_v43 }
  0x25   : > { %552 = vmatpush.bf16.msra.mxu0 %v1133_v12  ;;  %1249 = vmatpush.bf16.msra.mxu2 %v1133_v12  ;;  %v946_v12 = vld [vmem:[%s1395_s22 + $0x50] sm:$0xf] }
  0x26   : > { %641 = vmatpush.bf16.msra.mxu1 %v1141_v13  ;;  %1257 = vmatpush.bf16.msra.mxu3 %v1141_v13  ;;  %v1111_v13 = vld [vmem:[%s1395_s22 + $0x54] sm:$0xf0] }
  0x27   : > { %v947_v20 = vor.u32 %v1111_v13, %v946_v12 }
  0x29   : > { %553 = vmatpush.bf16.msra.mxu0 %v1132_v14  ;;  %1250 = vmatpush.bf16.msra.mxu2 %v1132_v14  ;;  %v1010_v14 = vld [vmem:[%s1395_s22 + $0xd0] sm:$0xf] }
  0x2a   : > { %642 = vmatpush.bf16.msra.mxu1 %v1140_v15  ;;  %1258 = vmatpush.bf16.msra.mxu3 %v1140_v15  ;;  %v1127_v15 = vld [vmem:[%s1395_s22 + $0xd4] sm:$0xf0] }
  0x2b   : > { %v1011_v21 = vor.u32 %v1127_v15, %v1010_v14 }
  0x2c   : > { %554 = vmatmul.bf16.vlgmr.msra.gmra.mxu0 %v907_v24  ;;  %594 = vmatmul.bf16.vlgmr.msra.gmra.mxu2 %v971_v25  ;;  %v954_v24 = vld [vmem:[%s1395_s22 + $0x60] sm:$0xf]  ;;  %v1113_v25 = vld [vmem:[%s1395_s22 + $0x64] sm:$0xf0] }
  0x2d   : > { %643 = vmatmul.bf16.vlgmr.msra.gmra.mxu1 %v911_v26  ;;  %683 = vmatmul.bf16.vlgmr.msra.gmra.mxu3 %v975_v27  ;;  %v1018_v26 = vld [vmem:[%s1395_s22 + $0xe0] sm:$0xf]  ;;  %v1129_v27 = vld [vmem:[%s1395_s22 + $0xe4] sm:$0xf0]  ;;  %v955_v32 = vor.u32 %v1113_v25, %v954_v24 }
  0x2e   : > { %v1019_v33 = vor.u32 %v1129_v27, %v1018_v26 }
  0x3c   : > { %559 = vmatmul.bf16.gmra.mxu0 %v915_v36  ;;  %599 = vmatmul.bf16.gmra.mxu2 %v979_v37  ;;  %v962_v36 = vld [vmem:[%s1395_s22 + $0x70] sm:$0xf]  ;;  %v1115_v37 = vld [vmem:[%s1395_s22 + $0x74] sm:$0xf0] }
  0x3d   : > { %648 = vmatmul.bf16.gmra.mxu1 %v919_v38  ;;  %688 = vmatmul.bf16.gmra.mxu3 %v983_v39  ;;  %v1026_v38 = vld [vmem:[%s1395_s22 + $0xf0] sm:$0xf]  ;;  %v1131_v39 = vld [vmem:[%s1395_s22 + $0xf4] sm:$0xf0]  ;;  %v963_v44 = vor.u32 %v1115_v37, %v962_v36 }
  0x3e   : > { %v1027_v45 = vor.u32 %v1131_v39, %v1026_v38 }
  0x4c   : > { %564 = vmatmul.bf16.gmra.mxu0 %v923_v48  ;;  %604 = vmatmul.bf16.gmra.mxu2 %v987_v49 }
  0x4d   : > { %653 = vmatmul.bf16.gmra.mxu1 %v927_v50  ;;  %693 = vmatmul.bf16.gmra.mxu3 %v991_v51  ;;  %v1473_v50 = vld [vmem:[%s1540_s2] ss:$0 sm:$0xff] }
  0x5c   : > { %569 = vmatmul.bf16.gmra.mxu0 %v931_v60  ;;  %609 = vmatmul.bf16.gmra.mxu2 %v995_v61 }
  0x5d   : > { %658 = vmatmul.bf16.gmra.mxu1 %v935_v62  ;;  %698 = vmatmul.bf16.gmra.mxu3 %v999_v63 }
  0x6c   : > { %574 = vmatmul.bf16.gmra.mxu0 %v939_v8  ;;  %614 = vmatmul.bf16.gmra.mxu2 %v1003_v9 }
  0x6d   : > { %663 = vmatmul.bf16.gmra.mxu1 %v943_v10  ;;  %703 = vmatmul.bf16.gmra.mxu3 %v1007_v11 }
  0x7c   : > { %579 = vmatmul.bf16.gmra.mxu0 %v947_v20  ;;  %619 = vmatmul.bf16.gmra.mxu2 %v1011_v21 }
  0x7d   : > { %668 = vmatmul.bf16.gmra.mxu1 %v951_v22  ;;  %708 = vmatmul.bf16.gmra.mxu3 %v1015_v23 }
  0x8c   : > { %584 = vmatmul.bf16.gmra.mxu0 %v955_v32  ;;  %624 = vmatmul.bf16.gmra.mxu2 %v1019_v33 }
  0x8d   : > { %673 = vmatmul.bf16.gmra.mxu1 %v959_v34  ;;  %713 = vmatmul.bf16.gmra.mxu3 %v1023_v35 }
  0x9c   : > { %589 = vmatmul.bf16.gmra.mxu0 %v963_v44  ;;  %629 = vmatmul.bf16.gmra.mxu2 %v1027_v45 }
  0x9d   : > { %678 = vmatmul.bf16.gmra.mxu1 %v967_v46  ;;  %718 = vmatmul.bf16.gmra.mxu3 %v1031_v47 }
  0xa9   : > { %v555_v48 = vpop.f32.mrf.mxu0 }
  0xaa   : > { %v644_v49 = vpop.f32.mrf.mxu1  ;;  %v556_v52 = vadd.f32 %v1473_v50, %v555_v48 }
  0xac   : > { %v645_v57 = vadd.f32 %v644_v49, %v556_v52 }
  0xaf   : > { %v595_v51 = vpop.f32.mrf.mxu2 }
  0xb0   : > { %v684_v53 = vpop.f32.mrf.mxu3  ;;  %v596_v59 = vadd.f32 %v1473_v50, %v595_v51 }
  0xb1   : > { %v557_v54 = vpop.f32.mrf.mxu0 }
  0xb2   : > { %v558_v55 = vadd.f32 %v1473_v50, %v557_v54  ;;  %v646_v56 = vpop.f32.mrf.mxu1  ;;  %v685_v1 = vadd.f32 %v684_v53, %v596_v59 }
  0xb4   : > { %v647_v58 = vadd.f32 %v646_v56, %v558_v55 }
  0xb6   : > { %v1151_v60 = vpack.c.bf16 %v647_v58, %v645_v57 }
  0xb7   : > { %v597_v61 = vpop.f32.mrf.mxu2 }
  0xb8   : > { %1152 = vst [vmem:[%s1481_s7] sm:$0xff] %v1151_v60   ;;  %v598_v62 = vadd.f32 %v1473_v50, %v597_v61  ;;  %v686_v63 = vpop.f32.mrf.mxu3 }
  0xb9   : > { %v560_v0 = vpop.f32.mrf.mxu0 }
  0xba   : > { %v687_v2 = vadd.f32 %v686_v63, %v598_v62  ;;  %v649_v3 = vpop.f32.mrf.mxu1  ;;  %v561_v6 = vadd.f32 %v1473_v50, %v560_v0 }
  0xbc   : > { %v1191_v4 = vpack.c.bf16 %v687_v2, %v685_v1  ;;  %v650_v11 = vadd.f32 %v649_v3, %v561_v6 }
  0xbe   : > { %1235 = vst [vmem:[%s1481_s7 + $0x40] sm:$0xff] %v1191_v4  }
  0xbf   : > { %v600_v5 = vpop.f32.mrf.mxu2 }
  0xc0   : > { %v689_v7 = vpop.f32.mrf.mxu3  ;;  %v601_v13 = vadd.f32 %v1473_v50, %v600_v5 }
  0xc1   : > { %v562_v8 = vpop.f32.mrf.mxu0 }
  0xc2   : > { %v563_v9 = vadd.f32 %v1473_v50, %v562_v8  ;;  %v651_v10 = vpop.f32.mrf.mxu1  ;;  %v690_v19 = vadd.f32 %v689_v7, %v601_v13 }
  0xc4   : > { %v652_v12 = vadd.f32 %v651_v10, %v563_v9 }
  0xc6   : > { %v1156_v14 = vpack.c.bf16 %v652_v12, %v650_v11 }
  0xc7   : > { %v602_v15 = vpop.f32.mrf.mxu2 }
  0xc8   : > { %1228 = vst [vmem:[%s1481_s7 + $0x8] sm:$0xff] %v1156_v14   ;;  %v603_v16 = vadd.f32 %v1473_v50, %v602_v15  ;;  %v691_v17 = vpop.f32.mrf.mxu3 }
  0xc9   : > { %v565_v18 = vpop.f32.mrf.mxu0 }
  0xca   : > { %v692_v20 = vadd.f32 %v691_v17, %v603_v16  ;;  %v654_v21 = vpop.f32.mrf.mxu1  ;;  %v566_v24 = vadd.f32 %v1473_v50, %v565_v18 }
  0xcc   : > { %v1196_v22 = vpack.c.bf16 %v692_v20, %v690_v19  ;;  %v655_v29 = vadd.f32 %v654_v21, %v566_v24 }
  0xce   : > { %1236 = vst [vmem:[%s1481_s7 + $0x48] sm:$0xff] %v1196_v22  }
  0xcf   : > { %v605_v23 = vpop.f32.mrf.mxu2 }
  0xd0   : > { %v694_v25 = vpop.f32.mrf.mxu3  ;;  %v606_v31 = vadd.f32 %v1473_v50, %v605_v23 }
  0xd1   : > { %v567_v26 = vpop.f32.mrf.mxu0 }
  0xd2   : > { %v568_v27 = vadd.f32 %v1473_v50, %v567_v26  ;;  %v656_v28 = vpop.f32.mrf.mxu1  ;;  %v695_v37 = vadd.f32 %v694_v25, %v606_v31 }
  0xd4   : > { %v657_v30 = vadd.f32 %v656_v28, %v568_v27 }
  0xd6   : > { %v1161_v32 = vpack.c.bf16 %v657_v30, %v655_v29 }
  0xd7   : > { %v607_v33 = vpop.f32.mrf.mxu2 }
  0xd8   : > { %1229 = vst [vmem:[%s1481_s7 + $0x10] sm:$0xff] %v1161_v32   ;;  %v608_v34 = vadd.f32 %v1473_v50, %v607_v33  ;;  %v696_v35 = vpop.f32.mrf.mxu3 }
  0xd9   : > { %v570_v36 = vpop.f32.mrf.mxu0 }
  0xda   : > { %v697_v38 = vadd.f32 %v696_v35, %v608_v34  ;;  %v659_v39 = vpop.f32.mrf.mxu1  ;;  %v571_v42 = vadd.f32 %v1473_v50, %v570_v36 }
  0xdc   : > { %v1201_v40 = vpack.c.bf16 %v697_v38, %v695_v37  ;;  %v660_v47 = vadd.f32 %v659_v39, %v571_v42 }
  0xde   : > { %1237 = vst [vmem:[%s1481_s7 + $0x50] sm:$0xff] %v1201_v40  }
  0xdf   : > { %v610_v41 = vpop.f32.mrf.mxu2 }
  0xe0   : > { %v699_v43 = vpop.f32.mrf.mxu3  ;;  %v611_v49 = vadd.f32 %v1473_v50, %v610_v41 }
  0xe1   : > { %v572_v44 = vpop.f32.mrf.mxu0 }
  0xe2   : > { %v573_v45 = vadd.f32 %v1473_v50, %v572_v44  ;;  %v661_v46 = vpop.f32.mrf.mxu1  ;;  %v700_v56 = vadd.f32 %v699_v43, %v611_v49 }
  0xe4   : > { %v662_v48 = vadd.f32 %v661_v46, %v573_v45 }
  0xe6   : > { %v1166_v51 = vpack.c.bf16 %v662_v48, %v660_v47 }
  0xe7   : > { %v612_v52 = vpop.f32.mrf.mxu2 }
  0xe8   : > { %1230 = vst [vmem:[%s1481_s7 + $0x18] sm:$0xff] %v1166_v51   ;;  %v613_v53 = vadd.f32 %v1473_v50, %v612_v52  ;;  %v701_v54 = vpop.f32.mrf.mxu3 }
  0xe9   : > { %v575_v55 = vpop.f32.mrf.mxu0 }
  0xea   : > { %v702_v57 = vadd.f32 %v701_v54, %v613_v53  ;;  %v664_v58 = vpop.f32.mrf.mxu1  ;;  %v576_v61 = vadd.f32 %v1473_v50, %v575_v55 }
  0xec   : > { %v1206_v59 = vpack.c.bf16 %v702_v57, %v700_v56  ;;  %v665_v2 = vadd.f32 %v664_v58, %v576_v61 }
  0xee   : > { %1238 = vst [vmem:[%s1481_s7 + $0x58] sm:$0xff] %v1206_v59  }
  0xef   : > { %v615_v60 = vpop.f32.mrf.mxu2 }
  0xf0   : > { %v704_v62 = vpop.f32.mrf.mxu3  ;;  %v616_v4 = vadd.f32 %v1473_v50, %v615_v60 }
  0xf1   : > { %v577_v63 = vpop.f32.mrf.mxu0 }
  0xf2   : > { %v578_v0 = vadd.f32 %v1473_v50, %v577_v63  ;;  %v666_v1 = vpop.f32.mrf.mxu1  ;;  %v705_v10 = vadd.f32 %v704_v62, %v616_v4 }
  0xf4   : > { %v667_v3 = vadd.f32 %v666_v1, %v578_v0 }
  0xf6   : > { %v1171_v5 = vpack.c.bf16 %v667_v3, %v665_v2 }
  0xf7   : > { %v617_v6 = vpop.f32.mrf.mxu2 }
  0xf8   : > { %1231 = vst [vmem:[%s1481_s7 + $0x20] sm:$0xff] %v1171_v5   ;;  %v618_v7 = vadd.f32 %v1473_v50, %v617_v6  ;;  %v706_v8 = vpop.f32.mrf.mxu3 }
  0xf9   : > { %v580_v9 = vpop.f32.mrf.mxu0 }
  0xfa   : > { %v707_v11 = vadd.f32 %v706_v8, %v618_v7  ;;  %v669_v12 = vpop.f32.mrf.mxu1  ;;  %v581_v15 = vadd.f32 %v1473_v50, %v580_v9 }
  0xfc   : > { %v1211_v13 = vpack.c.bf16 %v707_v11, %v705_v10  ;;  %v670_v20 = vadd.f32 %v669_v12, %v581_v15 }
  0xfe   : > { %1239 = vst [vmem:[%s1481_s7 + $0x60] sm:$0xff] %v1211_v13  }
  0xff   : > { %v620_v14 = vpop.f32.mrf.mxu2 }
 0x100   : > { %v709_v16 = vpop.f32.mrf.mxu3  ;;  %v621_v22 = vadd.f32 %v1473_v50, %v620_v14 }
 0x101   : > { %v582_v17 = vpop.f32.mrf.mxu0 }
 0x102   : > { %v583_v18 = vadd.f32 %v1473_v50, %v582_v17  ;;  %v671_v19 = vpop.f32.mrf.mxu1  ;;  %v710_v28 = vadd.f32 %v709_v16, %v621_v22 }
 0x104   : > { %v672_v21 = vadd.f32 %v671_v19, %v583_v18 }
 0x106   : > { %v1176_v23 = vpack.c.bf16 %v672_v21, %v670_v20 }
 0x107   : > { %v622_v24 = vpop.f32.mrf.mxu2 }
 0x108   : > { %1232 = vst [vmem:[%s1481_s7 + $0x28] sm:$0xff] %v1176_v23   ;;  %v623_v25 = vadd.f32 %v1473_v50, %v622_v24  ;;  %v711_v26 = vpop.f32.mrf.mxu3 }
 0x109   : > { %v585_v27 = vpop.f32.mrf.mxu0 }
 0x10a   : > { %v712_v29 = vadd.f32 %v711_v26, %v623_v25  ;;  %v674_v30 = vpop.f32.mrf.mxu1  ;;  %v586_v33 = vadd.f32 %v1473_v50, %v585_v27 }
 0x10c   : > { %v1216_v31 = vpack.c.bf16 %v712_v29, %v710_v28  ;;  %v675_v38 = vadd.f32 %v674_v30, %v586_v33 }
 0x10e   : > { %1240 = vst [vmem:[%s1481_s7 + $0x68] sm:$0xff] %v1216_v31  }
 0x10f   : > { %v625_v32 = vpop.f32.mrf.mxu2 }
 0x110   : > { %v714_v34 = vpop.f32.mrf.mxu3  ;;  %v626_v40 = vadd.f32 %v1473_v50, %v625_v32 }
 0x111   : > { %v587_v35 = vpop.f32.mrf.mxu0 }
 0x112   : > { %v588_v36 = vadd.f32 %v1473_v50, %v587_v35  ;;  %v676_v37 = vpop.f32.mrf.mxu1  ;;  %v715_v46 = vadd.f32 %v714_v34, %v626_v40 }
 0x114   : > { %v677_v39 = vadd.f32 %v676_v37, %v588_v36 }
 0x116   : > { %v1181_v41 = vpack.c.bf16 %v677_v39, %v675_v38 }
 0x117   : > { %v627_v42 = vpop.f32.mrf.mxu2 }
 0x118   : > { %1233 = vst [vmem:[%s1481_s7 + $0x30] sm:$0xff] %v1181_v41   ;;  %v628_v43 = vadd.f32 %v1473_v50, %v627_v42  ;;  %v716_v44 = vpop.f32.mrf.mxu3 }
 0x119   : > { %v590_v45 = vpop.f32.mrf.mxu0 }
 0x11a   : > { %v717_v47 = vadd.f32 %v716_v44, %v628_v43  ;;  %v679_v48 = vpop.f32.mrf.mxu1  ;;  %v591_v52 = vadd.f32 %v1473_v50, %v590_v45 }
 0x11c   : > { %v1221_v49 = vpack.c.bf16 %v717_v47, %v715_v46  ;;  %v680_v57 = vadd.f32 %v679_v48, %v591_v52 }
 0x11e   : > { %1241 = vst [vmem:[%s1481_s7 + $0x70] sm:$0xff] %v1221_v49  }
 0x11f   : > { %v630_v51 = vpop.f32.mrf.mxu2 }
 0x120   : > { %v719_v53 = vpop.f32.mrf.mxu3  ;;  %v631_v59 = vadd.f32 %v1473_v50, %v630_v51 }
 0x121   : > { %v592_v54 = vpop.f32.mrf.mxu0 }
 0x122   : > { %v593_v55 = vadd.f32 %v1473_v50, %v592_v54  ;;  %v681_v56 = vpop.f32.mrf.mxu1  ;;  %v720_v0 = vadd.f32 %v719_v53, %v631_v59 }
 0x124   : > { %v682_v58 = vadd.f32 %v681_v56, %v593_v55 }
 0x126   : > { %v1186_v60 = vpack.c.bf16 %v682_v58, %v680_v57 }
 0x127   : > { %v632_v61 = vpop.f32.mrf.mxu2 }
 0x128   : > { %1234 = vst [vmem:[%s1481_s7 + $0x38] sm:$0xff] %v1186_v60   ;;  %v633_v62 = vadd.f32 %v1473_v50, %v632_v61  ;;  %v721_v63 = vpop.f32.mrf.mxu3 }
 0x12a   : > { %v722_v1 = vadd.f32 %v721_v63, %v633_v62 }
 0x12c   : > { %v1226_v2 = vpack.c.bf16 %v722_v1, %v720_v0 }
 0x12e   : > { %1242 = vst [vmem:[%s1481_s7 + $0x78] sm:$0xff] %v1226_v2  }
 0x12f PF: > { %s13_s14 = sadd.s32 1, %s1306_s14   ;;  %s1542_s12 = smov %s1302_s13 }
 0x130   : > { %p10_p5 = scmp.ge.s32.totalorder %s13_s14, 4   ;;  %s1543_s13 = smov %s1545_s15 }
 0x132   :  { %12 = sbr.rel (!%p10_p5) target bundleno = 2 (0x2), region = 68 }

// kernel: tile.26
= control target key start
LH: loop header
LB: loop body
LE: loop exit
PB: predicated region body
PF: predicated region fallthrough
CT: control target
= control target key end

     0   :  { %s208_s0 = inlined_call_operand.vmem [shape: f32[3], index: 0, kind: input, shape index: {}]   ;;  %s209_s1 = inlined_call_operand.vmem [shape: f32[256,3], index: 1, kind: output, shape index: {}]  }
   0x1   :  { %v4_v0 = vld [vmem:[%s208_s0] ss:$0 sm:$0xff] }
   0x2   :  { %5 = vst [vmem:[%s209_s1] sm:$0xff] %v4_v0 }
   0x3   :  { %68 = vst [vmem:[%s209_s1 + $0x8] sm:$0xff] %v4_v0 }
   0x4   :  { %69 = vst [vmem:[%s209_s1 + $0x10] sm:$0xff] %v4_v0 }
   0x5   :  { %70 = vst [vmem:[%s209_s1 + $0x18] sm:$0xff] %v4_v0 }
   0x6   :  { %71 = vst [vmem:[%s209_s1 + $0x20] sm:$0xff] %v4_v0 }
   0x7   :  { %72 = vst [vmem:[%s209_s1 + $0x28] sm:$0xff] %v4_v0 }
   0x8   :  { %73 = vst [vmem:[%s209_s1 + $0x30] sm:$0xff] %v4_v0 }
   0x9   :  { %74 = vst [vmem:[%s209_s1 + $0x38] sm:$0xff] %v4_v0 }
   0xa   :  { %75 = vst [vmem:[%s209_s1 + $0x40] sm:$0xff] %v4_v0 }
   0xb   :  { %76 = vst [vmem:[%s209_s1 + $0x48] sm:$0xff] %v4_v0 }
   0xc   :  { %77 = vst [vmem:[%s209_s1 + $0x50] sm:$0xff] %v4_v0 }
   0xd   :  { %78 = vst [vmem:[%s209_s1 + $0x58] sm:$0xff] %v4_v0 }
   0xe   :  { %79 = vst [vmem:[%s209_s1 + $0x60] sm:$0xff] %v4_v0 }
   0xf   :  { %80 = vst [vmem:[%s209_s1 + $0x68] sm:$0xff] %v4_v0 }
  0x10   :  { %81 = vst [vmem:[%s209_s1 + $0x70] sm:$0xff] %v4_v0 }
  0x11   :  { %82 = vst [vmem:[%s209_s1 + $0x78] sm:$0xff] %v4_v0 }
  0x12   :  { %83 = vst [vmem:[%s209_s1 + $0x80] sm:$0xff] %v4_v0 }
  0x13   :  { %84 = vst [vmem:[%s209_s1 + $0x88] sm:$0xff] %v4_v0 }
  0x14   :  { %85 = vst [vmem:[%s209_s1 + $0x90] sm:$0xff] %v4_v0 }
  0x15   :  { %86 = vst [vmem:[%s209_s1 + $0x98] sm:$0xff] %v4_v0 }
  0x16   :  { %87 = vst [vmem:[%s209_s1 + $0xa0] sm:$0xff] %v4_v0 }
  0x17   :  { %88 = vst [vmem:[%s209_s1 + $0xa8] sm:$0xff] %v4_v0 }
  0x18   :  { %89 = vst [vmem:[%s209_s1 + $0xb0] sm:$0xff] %v4_v0 }
  0x19   :  { %90 = vst [vmem:[%s209_s1 + $0xb8] sm:$0xff] %v4_v0 }
  0x1a   :  { %91 = vst [vmem:[%s209_s1 + $0xc0] sm:$0xff] %v4_v0 }
  0x1b   :  { %92 = vst [vmem:[%s209_s1 + $0xc8] sm:$0xff] %v4_v0 }
  0x1c   :  { %93 = vst [vmem:[%s209_s1 + $0xd0] sm:$0xff] %v4_v0 }
  0x1d   :  { %94 = vst [vmem:[%s209_s1 + $0xd8] sm:$0xff] %v4_v0 }
  0x1e   :  { %95 = vst [vmem:[%s209_s1 + $0xe0] sm:$0xff] %v4_v0 }
  0x1f   :  { %96 = vst [vmem:[%s209_s1 + $0xe8] sm:$0xff] %v4_v0 }
  0x20   :  { %97 = vst [vmem:[%s209_s1 + $0xf0] sm:$0xff] %v4_v0 }
  0x21   :  { %98 = vst [vmem:[%s209_s1 + $0xf8] sm:$0xff] %v4_v0 }

// kernel: _lambda_.14
= control target key start
LH: loop header
LB: loop body
LE: loop exit
PB: predicated region body
PF: predicated region fallthrough
CT: control target
= control target key end

     0   :  { %s332_s9 = smov 0   ;;  %s366_s0 = inlined_call_operand.vmem [shape: f32[2,7,192], index: 0, kind: input, shape index: {}]   ;;  %s367_s1 = inlined_call_operand.vmem [shape: f32[4,192], index: 1, kind: input, shape index: {}]   ;;  %s368_s2 = inlined_call_operand.vmem [shape: f32[2,7,192], index: 2, kind: output, shape index: {}]  }
   0x1 LB: > { %s274_s10 = sadd.s32 4294967295, %s315_s9   ;;  %p278_p0 = scmp.ge.s32.totalorder %s315_s9, 1  ;;  %s315_s9 = sphi %s332_s9, %s12_s9  }
   0x2   : > { %p112_p1 = scmp.lt.s32.totalorder %s315_s9, 3 }
   0x4   : > { %p113_p2 = pnand %p278_p0, %p112_p1 }
   0x5   : > { %p134_p3 = scmp.lt.s32.totalorder (!%p113_p2), %s274_s10, 1 }
   0x6   : > { %116 = sbr.rel (%p113_p2) target bundleno = 49 (0x31), region = 28 }
   0xb   : > { %v146_v0 = vld [vmem:[%s367_s1] sm:$0x33]  ;;  %s370_s10 = smov (!%p134_p3, %s274_s10), 1  ;;  %v147_v1 = vld [vmem:[%s367_s1] sm:$0xcc]  ;;  %vm214_vm0 = vcmask 519170  }
   0xc   : > { %187 = vst [vmem:[#allocation1] ss:$2 sm:$0xff] %v146_v0  ;;  %s287_s13 = sshll.u32 %s370_s10, 4  ;;  %vm217_vm9 = vcmask 522244   ;;  %vm197_vm10 = vcmask 517120  }
   0xd   : > { %s138_s16 = scalar_lea.vmem %s366_s0, %s287_s13  ;;  %s355_s21 = scalar_lea.vmem %s368_s2, %s287_s13 }
   0xe   : > { %v144_v2 = vld [vmem:[%s138_s16] sm:$0x7f]  ;;  %v145_v3 = vld [vmem:[%s138_s16 + $0x8] sm:$0x7f] }
   0xf   : > { %v283_v4 = vmul.f32 -1.442695, %v144_v2  ;;  %v284_v5 = vmul.f32 -1.442695, %v145_v3  ;;  %v199_v8 = vmul.f32 1.442695, %v144_v2 }
  0x10   : > { %v201_v9 = vmul.f32 1.442695, %v145_v3 }
  0x11   : > { %297 = vpow2.f32 %v283_v4 }
  0x12   : > { %299 = vpow2.f32 %v284_v5 }
  0x13   : > { %v188_v6 = vld.sshfl [vmem:[#allocation1] sm:$0xff pattern:$0x75316420]  ;;  %v189_v7 = vld.sshfl [vmem:[#allocation1 + $0x8] sm:$0xff pattern:$0x75316420]  ;;  %301 = vpow2.f32 %v199_v8 }
  0x14   : > { %204 = vst [vmem:[#allocation1] ss:$2 sm:$0xff] %v147_v1  ;;  %303 = vpow2.f32 %v201_v9 }
  0x17   : > { %v298_v10 = vpop.eup %297 }
  0x18   : > { %v300_v11 = vpop.eup %299  ;;  %v154_v12 = vadd.f32 1.0, %v298_v10 }
  0x19   : > { %v302_v14 = vpop.eup %301  ;;  %v155_v15 = vadd.f32 1.0, %v300_v11 }
  0x1a   : > { %v304_v17 = vpop.eup %303  ;;  %305 = vrcp.f32 %v154_v12  ;;  %vm161_vm1 = vweird.f32 %v154_v12  ;;  %v167_v25 = vand.u32 2147483648, %v154_v12  ;;  %v165_v28 = vand.u32 2147483647, %v154_v12 }
  0x1b   : > { %v205_v13 = vld.sshfl [vmem:[#allocation1] sm:$0xff pattern:$0x75316420]  ;;  %v206_v16 = vld.sshfl [vmem:[#allocation1 + $0x8] sm:$0xff pattern:$0x75316420]  ;;  %307 = vrcp.f32 %v155_v15  ;;  %vm176_vm3 = vweird.f32 %v155_v15 }
  0x1c   : > { %v209_v18 = vmul.f32 %v302_v14, %v205_v13  ;;  %v210_v19 = vmul.f32 %v304_v17, %v206_v16  ;;  %v182_v29 = vand.u32 2147483648, %v155_v15  ;;  %v180_v31 = vand.u32 2147483647, %v155_v15 }
  0x1d   : > { %v168_v33 = vor.u32 1.1754944e-38, %v167_v25  ;;  %vm166_vm6 = vcmp.eq.f32.partialorder %v165_v28, 8.507059e+37 }
  0x1e   : > { %v211_v20 = vmul.f32 2.0, %v209_v18  ;;  %v212_v21 = vmul.f32 2.0, %v210_v19  ;;  %v183_v36 = vor.u32 1.1754944e-38, %v182_v29  ;;  %vm181_vm8 = vcmp.eq.f32.partialorder %v180_v31, 8.507059e+37 }
  0x20   : > { %v306_v22 = vpop.eup %305  ;;  %213 = vst [vmem:[%s355_s21] sm:$0xc] %v211_v20 }
  0x21   : > { %v308_v23 = vpop.eup %307  ;;  %v157_v24 = vmul.f32 %v306_v22, %v154_v12  ;;  %215 = vst.msk [vmem:[%s355_s21 + $0x8] sm:$0xc] %vm214_vm0, %v212_v21  ;;  %vm162_vm2 = vweird.f32 %v306_v22 }
  0x22   : > { %v172_v26 = vmul.f32 %v308_v23, %v155_v15  ;;  %vm177_vm4 = vweird.f32 %v308_v23  ;;  %vm163_vm5 = vmor %vm161_vm1, %vm162_vm2 }
  0x23   : > { %v158_v27 = vsub.f32 1.0, %v157_v24  ;;  %vm178_vm7 = vmor %vm176_vm3, %vm177_vm4 }
  0x24   : > { %v173_v30 = vsub.f32 1.0, %v172_v26 }
  0x25   : > { %v159_v32 = vmul.f32 %v306_v22, %v158_v27 }
  0x26   : > { %v174_v34 = vmul.f32 %v308_v23, %v173_v30 }
  0x27   : > { %v160_v35 = vadd.f32 %v306_v22, %v159_v32 }
  0x28   : > { %v175_v37 = vadd.f32 %v308_v23, %v174_v34 }
  0x29   : > { %v164_v38 = vsel %vm163_vm5, %v306_v22, %v160_v35 }
  0x2a   : > { %v169_v39 = vsel %vm166_vm6, %v168_v33, %v164_v38  ;;  %v179_v40 = vsel %vm178_vm7, %v308_v23, %v175_v37 }
  0x2b   : > { %v192_v41 = vadd.f32 %v188_v6, %v169_v39  ;;  %216 = vst [vmem:[%s355_s21] sm:$0x70] %v169_v39  ;;  %v184_v42 = vsel %vm181_vm8, %v183_v36, %v179_v40 }
  0x2c   : > { %v193_v43 = vadd.f32 %v189_v7, %v184_v42  ;;  %218 = vst.msk [vmem:[%s355_s21 + $0x8] sm:$0x70] %vm217_vm9, %v184_v42 }
  0x2d   : > { %v194_v44 = vmul.f32 2.0, %v192_v41 }
  0x2e   : > { %v195_v45 = vmul.f32 2.0, %v193_v43 }
  0x2f   : > { %196 = vst [vmem:[%s355_s21] sm:$0x3] %v194_v44 }
  0x30   : > { %198 = vst.msk [vmem:[%s355_s21 + $0x8] sm:$0x3] %vm197_vm10, %v195_v45 }
  0x31 PF: > { %s12_s9 = sadd.s32 1, %s315_s9  }
  0x32   : > { %p9_p4 = scmp.ge.s32.totalorder %s12_s9, 4  }
  0x34   :  { %11 = sbr.rel (!%p9_p4) target bundleno = 1 (0x1), region = 58 }

// kernel: _lambda_.17
= control target key start
LH: loop header
LB: loop body
LE: loop exit
PB: predicated region body
PF: predicated region fallthrough
CT: control target
= control target key end

     0   :  { %s490_s9 = smov 0   ;;  %s713_s0 = inlined_call_operand.vmem [shape: f32[2,7,768], index: 0, kind: input, shape index: {}]   ;;  %s714_s1 = inlined_call_operand.vmem [shape: f32[4,768], index: 1, kind: input, shape index: {}]   ;;  %s715_s2 = inlined_call_operand.vmem [shape: f32[2,7,768], index: 2, kind: output, shape index: {}]  }
   0x1 LB: > { %s407_s10 = sadd.s32 4294967295, %s473_s9   ;;  %p411_p0 = scmp.ge.s32.totalorder %s473_s9, 1  ;;  %s473_s9 = sphi %s490_s9, %s12_s9  }
   0x2   : > { %p112_p1 = scmp.lt.s32.totalorder %s473_s9, 3 }
   0x4   : > { %p113_p2 = pnand %p411_p0, %p112_p1 }
   0x5   : > { %p134_p3 = scmp.lt.s32.totalorder (!%p113_p2), %s407_s10, 1 }
   0x6   : > { %116 = sbr.rel (%p113_p2) target bundleno = 63 (0x3f), region = 28 }
   0xb   : > { %v150_v0 = vld [vmem:[%s714_s1] sm:$0x33]  ;;  %v151_v1 = vld [vmem:[%s714_s1 + $0x8] sm:$0x33]  ;;  %v152_v2 = vld [vmem:[%s714_s1 + $0x10] sm:$0x33] }
   0xc   : > { %273 = vst [vmem:[#allocation1] ss:$2 sm:$0xff] %v150_v0  ;;  %s739_s10 = smov (!%p134_p3, %s407_s10), 1  ;;  %v153_v3 = vld [vmem:[%s714_s1] sm:$0xcc] }
   0xd   : > { %275 = vst [vmem:[#allocation1 + $0x10] ss:$2 sm:$0xff] %v151_v1  ;;  %s422_s19 = smul.u32 48, %s739_s10  ;;  %v154_v4 = vld [vmem:[%s714_s1 + $0x8] sm:$0xcc] }
   0xe   : > { %277 = vst [vmem:[#allocation1 + $0x20] ss:$2 sm:$0xff] %v152_v2  ;;  %v155_v5 = vld [vmem:[%s714_s1 + $0x10] sm:$0xcc] }
   0xf   : > { %s138_s26 = scalar_lea.vmem %s713_s0, %s422_s19  ;;  %s620_s29 = scalar_lea.vmem %s715_s2, %s422_s19 }
  0x10   : > { %v144_v12 = vld [vmem:[%s138_s26] sm:$0x7f]  ;;  %v145_v13 = vld [vmem:[%s138_s26 + $0x8] sm:$0x7f]  ;;  %v146_v16 = vld [vmem:[%s138_s26 + $0x10] sm:$0x7f] }
  0x11   : > { %v414_v14 = vmul.f32 -1.442695, %v144_v12  ;;  %v415_v15 = vmul.f32 -1.442695, %v145_v13  ;;  %v416_v17 = vmul.f32 -1.442695, %v146_v16 }
  0x12   : > { %v147_v18 = vld [vmem:[%s138_s26 + $0x18] sm:$0x7f]  ;;  %v148_v19 = vld [vmem:[%s138_s26 + $0x20] sm:$0x7f]  ;;  %v149_v22 = vld [vmem:[%s138_s26 + $0x28] sm:$0x7f] }
  0x13   : > { %v519_v6 = vld.sshfl [vmem:[#allocation1] sm:$0xff pattern:$0x75316420]  ;;  %v521_v7 = vld.sshfl [vmem:[#allocation1 + $0x8] sm:$0xff pattern:$0x75316420]  ;;  %431 = vpow2.f32 %v414_v14 }
  0x14   : > { %317 = vst [vmem:[#allocation1] ss:$2 sm:$0xff] %v153_v3  ;;  %v523_v8 = vld.sshfl [vmem:[#allocation1 + $0x10] sm:$0xff pattern:$0x75316420]  ;;  %433 = vpow2.f32 %v415_v15 }
  0x15   : > { %v530_v9 = vld.sshfl [vmem:[#allocation1 + $0x18] sm:$0xff pattern:$0x75316420]  ;;  %v532_v10 = vld.sshfl [vmem:[#allocation1 + $0x20] sm:$0xff pattern:$0x75316420]  ;;  %435 = vpow2.f32 %v416_v17 }
  0x16   : > { %319 = vst [vmem:[#allocation1 + $0x10] ss:$2 sm:$0xff] %v154_v4  ;;  %v534_v11 = vld.sshfl [vmem:[#allocation1 + $0x28] sm:$0xff pattern:$0x75316420] }
  0x17   : > { %321 = vst [vmem:[#allocation1 + $0x20] ss:$2 sm:$0xff] %v155_v5  ;;  %v417_v20 = vmul.f32 -1.442695, %v147_v18  ;;  %v418_v21 = vmul.f32 -1.442695, %v148_v19 }
  0x18   : > { %v419_v23 = vmul.f32 -1.442695, %v149_v22  ;;  %v302_v24 = vmul.f32 1.442695, %v144_v12  ;;  %v304_v28 = vmul.f32 1.442695, %v145_v13 }
  0x19   : > { %437 = vpow2.f32 %v417_v20  ;;  %v432_v25 = vpop.eup %431  ;;  %v306_v31 = vmul.f32 1.442695, %v146_v16  ;;  %v541_v33 = vmul.f32 1.442695, %v147_v18  ;;  %v546_v37 = vmul.f32 1.442695, %v148_v19 }
  0x1a   : > { %439 = vpow2.f32 %v418_v21  ;;  %v434_v26 = vpop.eup %433  ;;  %v536_v27 = vadd.f32 1.0, %v432_v25  ;;  %v556_v44 = vmul.f32 1.442695, %v149_v22 }
  0x1b   : > { %441 = vpow2.f32 %v419_v23  ;;  %v436_v29 = vpop.eup %435  ;;  %v538_v30 = vadd.f32 1.0, %v434_v26  ;;  %v322_v17 = vld.sshfl [vmem:[#allocation1] sm:$0xff pattern:$0x75316420] }
  0x1c   : > { %443 = vpow2.f32 %v302_v24  ;;  %v189_v35 = vand.u32 2147483647, %v536_v27  ;;  %v191_v36 = vand.u32 2147483648, %v536_v27  ;;  %v549_v40 = vadd.f32 1.0, %v436_v29 }
  0x1d   : > { %445 = vrcp.f32 %v536_v27  ;;  %v204_v39 = vand.u32 2147483647, %v538_v30  ;;  %v206_v42 = vand.u32 2147483648, %v538_v30  ;;  %vm185_vm0 = vweird.f32 %v536_v27  ;;  %v325_v1 = vld.sshfl [vmem:[#allocation1 + $0x18] sm:$0xff pattern:$0x75316420] }
  0x1e   : > { %447 = vrcp.f32 %v538_v30  ;;  %vm200_vm1 = vweird.f32 %v538_v30  ;;  %v221_v45 = vand.u32 2147483648, %v549_v40  ;;  %vm562_vm2 = vcmp.eq.f32.partialorder %v189_v35, 8.507059e+37  ;;  %v326_v4 = vld.sshfl [vmem:[#allocation1 + $0x20] sm:$0xff pattern:$0x75316420] }
  0x1f   : > { %v438_v32 = vpop.eup %437  ;;  %449 = vpow2.f32 %v304_v28  ;;  %v192_v48 = vor.u32 1.1754944e-38, %v191_v36  ;;  %v219_v49 = vand.u32 2147483647, %v549_v40  ;;  %vm570_vm3 = vcmp.eq.f32.partialorder %v204_v39, 8.507059e+37 }
  0x20   : > { %v440_v34 = vpop.eup %439  ;;  %v551_v41 = vadd.f32 1.0, %v438_v32  ;;  %451 = vpow2.f32 %v306_v31  ;;  %v207_v57 = vor.u32 1.1754944e-38, %v206_v42  ;;  %vm215_vm4 = vweird.f32 %v549_v40 }
  0x21   : > { %v442_v38 = vpop.eup %441  ;;  %v554_v43 = vadd.f32 1.0, %v440_v34  ;;  %453 = vrcp.f32 %v549_v40  ;;  %v583_v60 = vor.u32 1.1754944e-38, %v221_v45  ;;  %vm589_vm7 = vcmp.eq.f32.partialorder %v219_v49, 8.507059e+37 }
  0x22   : > { %v444_v46 = vpop.eup %443  ;;  %455 = vrcp.f32 %v551_v41  ;;  %v568_v50 = vadd.f32 1.0, %v442_v38  ;;  %v234_v53 = vand.u32 2147483647, %v551_v41  ;;  %v236_v54 = vand.u32 2147483648, %v551_v41 }
  0x23   : > { %v446_v51 = vpop.eup %445  ;;  %457 = vrcp.f32 %v554_v43  ;;  %vm230_vm5 = vweird.f32 %v551_v41  ;;  %v249_v61 = vand.u32 2147483647, %v554_v43  ;;  %v251_v62 = vand.u32 2147483648, %v554_v43 }
  0x24   : > { %v448_v55 = vpop.eup %447  ;;  %v181_v56 = vmul.f32 %v446_v51, %v536_v27  ;;  %vm186_vm6 = vweird.f32 %v446_v51  ;;  %vm245_vm8 = vweird.f32 %v554_v43  ;;  %459 = vrcp.f32 %v568_v50 }
  0x25   : > { %v580_v58 = vpop.eup %449  ;;  %v196_v59 = vmul.f32 %v448_v55, %v538_v30  ;;  %vm201_vm9 = vweird.f32 %v448_v55  ;;  %vm595_vm10 = vcmp.eq.f32.partialorder %v234_v53, 8.507059e+37  ;;  %v237_v5 = vor.u32 1.1754944e-38, %v236_v54  ;;  %vm609_vm13 = vmor %vm185_vm0, %vm186_vm6 }
  0x26   : > { %v587_v63 = vpop.eup %451  ;;  %v182_v0 = vsub.f32 1.0, %v181_v56  ;;  %vm260_vm11 = vweird.f32 %v568_v50  ;;  %vm601_vm12 = vcmp.eq.f32.partialorder %v249_v61, 8.507059e+37  ;;  %v264_v16 = vand.u32 2147483647, %v568_v50  ;;  %vm625_vm14 = vmor %vm200_vm1, %vm201_vm9 }
  0x27   : > { %v454_v2 = vpop.eup %453  ;;  %v197_v3 = vsub.f32 1.0, %v196_v59  ;;  %v252_v22 = vor.u32 1.1754944e-38, %v251_v62  ;;  %v266_v23 = vand.u32 2147483648, %v568_v50  ;;  %v334_v31 = vmul.f32 %v444_v46, %v322_v17  ;;  %v323_v62 = vld.sshfl [vmem:[#allocation1 + $0x8] sm:$0xff pattern:$0x75316420] }
  0x28   : > { %v456_v12 = vpop.eup %455  ;;  %v183_v13 = vmul.f32 %v446_v51, %v182_v0  ;;  %v211_v14 = vmul.f32 %v454_v2, %v549_v40  ;;  %vm216_vm15 = vweird.f32 %v454_v2  ;;  %461 = vpow2.f32 %v541_v33  ;;  %v324_v0 = vld.sshfl [vmem:[#allocation1 + $0x10] sm:$0xff pattern:$0x75316420] }
  0x29   : > { %v458_v18 = vpop.eup %457  ;;  %v198_v20 = vmul.f32 %v448_v55, %v197_v3  ;;  %v226_v21 = vmul.f32 %v456_v12, %v551_v41  ;;  %vm231_vm0 = vweird.f32 %v456_v12  ;;  %vm638_vm6 = vmor %vm215_vm4, %vm216_vm15  ;;  %340 = vst [vmem:[%s620_s29] sm:$0xc] %v334_v31  ;;  %463 = vpow2.f32 %v546_v37 }
  0x2a   : > { %v184_v24 = vadd.f32 %v446_v51, %v183_v13  ;;  %v212_v26 = vsub.f32 1.0, %v211_v14  ;;  %v241_v27 = vmul.f32 %v458_v18, %v554_v43  ;;  %v460_v32 = vpop.eup %459  ;;  %vm246_vm1 = vweird.f32 %v458_v18  ;;  %v327_v13 = vld.sshfl [vmem:[#allocation1 + $0x28] sm:$0xff pattern:$0x75316420] }
  0x2b   : > { %v199_v28 = vadd.f32 %v448_v55, %v198_v20  ;;  %v227_v29 = vsub.f32 1.0, %v226_v21  ;;  %v256_v45 = vmul.f32 %v460_v32, %v568_v50  ;;  %vm660_vm4 = vmor %vm245_vm8, %vm246_vm1  ;;  %465 = vpow2.f32 %v556_v44 }
  0x2c   : > { %v188_v34 = vsel %vm609_vm13, %v446_v51, %v184_v24  ;;  %v213_v35 = vmul.f32 %v454_v2, %v212_v26  ;;  %v242_v30 = vsub.f32 1.0, %v241_v27  ;;  %v335_v3 = vmul.f32 %v580_v58, %v323_v62 }
  0x2d   : > { %v193_v36 = vsel %vm562_vm2, %v192_v48, %v188_v34  ;;  %v203_v38 = vsel %vm625_vm14, %v448_v55, %v199_v28  ;;  %v228_v42 = vmul.f32 %v456_v12, %v227_v29  ;;  %vm651_vm2 = vmor %vm230_vm5, %vm231_vm0  ;;  %v257_v52 = vsub.f32 1.0, %v256_v45 }
  0x2e   : > { %v290_v46 = vadd.f32 %v519_v6, %v193_v36  ;;  %346 = vst [vmem:[%s620_s29] sm:$0x70] %v193_v36  ;;  %v208_v47 = vsel %vm570_vm3, %v207_v57, %v203_v38  ;;  %v214_v48 = vadd.f32 %v454_v2, %v213_v35  ;;  %v243_v49 = vmul.f32 %v458_v18, %v242_v30 }
  0x2f   : > { %v291_v51 = vadd.f32 %v521_v7, %v208_v47  ;;  %347 = vst [vmem:[%s620_s29 + $0x8] sm:$0x70] %v208_v47  ;;  %v229_v53 = vadd.f32 %v456_v12, %v228_v42  ;;  %vm261_vm3 = vweird.f32 %v460_v32  ;;  %v267_v55 = vor.u32 1.1754944e-38, %v266_v23 }
  0x30   : > { %296 = vst [vmem:[%s620_s29] sm:$0x3] %v290_v46  ;;  %v218_v41 = vsel %vm638_vm6, %v454_v2, %v214_v48  ;;  %v244_v54 = vadd.f32 %v458_v18, %v243_v49  ;;  %v258_v56 = vmul.f32 %v460_v32, %v257_v52  ;;  %vm684_vm5 = vmor %vm260_vm11, %vm261_vm3 }
  0x31   : > { %297 = vst [vmem:[%s620_s29 + $0x8] sm:$0x3] %v291_v51  ;;  %v223_v7 = vsel %vm589_vm7, %v583_v60, %v218_v41  ;;  %v233_v43 = vsel %vm651_vm2, %v456_v12, %v229_v53  ;;  %vm265_vm7 = vcmp.eq.f32.partialorder %v264_v16, 8.507059e+37  ;;  %v336_v12 = vmul.f32 %v587_v63, %v324_v0 }
  0x32   : > { %v292_v57 = vadd.f32 %v523_v8, %v223_v7  ;;  %348 = vst [vmem:[%s620_s29 + $0x10] sm:$0x70] %v223_v7  ;;  %v238_v59 = vsel %vm595_vm10, %v237_v5, %v233_v43  ;;  %v248_v33 = vsel %vm660_vm4, %v458_v18, %v244_v54  ;;  %v259_v61 = vadd.f32 %v460_v32, %v258_v56 }
  0x33   : > { %v293_v37 = vadd.f32 %v530_v9, %v238_v59  ;;  %349 = vst [vmem:[%s620_s29 + $0x18] sm:$0x70] %v238_v59  ;;  %v253_v8 = vsel %vm601_vm12, %v252_v22, %v248_v33  ;;  %v462_v9 = vpop.eup %461 }
  0x34   : > { %298 = vst [vmem:[%s620_s29 + $0x10] sm:$0x3] %v292_v57  ;;  %v294_v50 = vadd.f32 %v532_v10, %v253_v8  ;;  %v263_v44 = vsel %vm684_vm5, %v460_v32, %v259_v61  ;;  %v464_v10 = vpop.eup %463  ;;  %v337_v15 = vmul.f32 %v462_v9, %v325_v1 }
  0x35   : > { %299 = vst [vmem:[%s620_s29 + $0x18] sm:$0x3] %v293_v37  ;;  %v268_v2 = vsel %vm265_vm7, %v267_v55, %v263_v44  ;;  %v466_v14 = vpop.eup %465  ;;  %v338_v16 = vmul.f32 %v464_v10, %v326_v4 }
  0x36   : > { %300 = vst [vmem:[%s620_s29 + $0x20] sm:$0x3] %v294_v50  ;;  %v295_v5 = vadd.f32 %v534_v11, %v268_v2  ;;  %v339_v17 = vmul.f32 %v466_v14, %v327_v13 }
  0x37   : > { %350 = vst [vmem:[%s620_s29 + $0x20] sm:$0x70] %v253_v8 }
  0x38   : > { %351 = vst [vmem:[%s620_s29 + $0x28] sm:$0x70] %v268_v2 }
  0x39   : > { %301 = vst [vmem:[%s620_s29 + $0x28] sm:$0x3] %v295_v5 }
  0x3a   : > { %341 = vst [vmem:[%s620_s29 + $0x8] sm:$0xc] %v335_v3 }
  0x3b   : > { %342 = vst [vmem:[%s620_s29 + $0x10] sm:$0xc] %v336_v12 }
  0x3c   : > { %343 = vst [vmem:[%s620_s29 + $0x18] sm:$0xc] %v337_v15 }
  0x3d   : > { %344 = vst [vmem:[%s620_s29 + $0x20] sm:$0xc] %v338_v16 }
  0x3e   : > { %345 = vst [vmem:[%s620_s29 + $0x28] sm:$0xc] %v339_v17 }
  0x3f PF: > { %s12_s9 = sadd.s32 1, %s473_s9  }
  0x40   : > { %p9_p4 = scmp.ge.s32.totalorder %s12_s9, 4  }
  0x42   :  { %11 = sbr.rel (!%p9_p4) target bundleno = 1 (0x1), region = 62 }

</bundles_post_ra>
